<compile_context>
chip_gen: v7x
topology: tpu7x:2x2x1
jax: 0.10.0
libtpu: 0.0.40
codegen_flags: <defaults>
</compile_context>

<pallas_src>
import jax
import jax.numpy as jnp
from jax.experimental import pallas as pl
from jax.experimental.pallas import tpu as pltpu

_H1 = 2046
_H1_PAD = 2048   # 2046 padded up to a lane-aligned 2048
_H2 = 512
_H3 = 256

# Single-buffer operands whose block index never changes; fall back cleanly if
# this Pallas build does not support pipeline_mode on BlockSpec.
try:
    pl.BlockSpec((8, 128), lambda i: (0, 0), pipeline_mode=pl.Buffered(1))
    _SINGLE_BUF = dict(pipeline_mode=pl.Buffered(1))
except Exception:                                      # pragma: no cover
    _SINGLE_BUF = {}


def _resident(block_shape):
    nd = len(block_shape)
    return pl.BlockSpec(block_shape, lambda k, _nd=nd: (0,) * _nd, **_SINGLE_BUF)


def _pick_block_n1(in_channel):
    """Largest w1 column-block width whose double-buffered bf16 stream <= ~24 MiB."""
    budget = 24 << 20
    for bn in (2048, 1024, 512, 256, 128):
        if 2 * in_channel * bn * 2 <= budget:
            return bn
    return 128


def _dae_encoder_kernel(x_ref, noise_ref,
                        w1_ref,                 # streamed: (in_ch, bn1) bf16, contiguous slab
                        b1_ref,                 # resident: (n_steps, 1, bn1) f32
                        w2_ref,                 # resident: (n_steps, bn1, 512) bf16
                        b2_ref, w3_ref, b3_ref, w4_ref, b4_ref,   # resident
                        out_ref,
                        xn_ref, h2_ref):        # scratch: noisy input bf16, layer-2 acc f32
    k = pl.program_id(0)

    @pl.when(k == 0)
    def _init():
        x = x_ref[...]
        # noise = U[0,1) * mean(x) / 10 ; x = x + noise   (Dropout = identity, eval)
        xn = x + noise_ref[...] * (jnp.mean(x) * 0.1)
        xn_ref[...] = xn.astype(jnp.bfloat16)
        h2_ref[...] = jnp.zeros_like(h2_ref)

    # Layer 1, output-column block k (BN folded into w1/b1), then that block's
    # contribution to layer 2.  w1 is the only streamed operand; its DMA for
    # step k+1 overlaps these matmuls.
    h1 = jnp.dot(xn_ref[...], w1_ref[...], preferred_element_type=jnp.float32)
    h1 = jnp.maximum(h1 + b1_ref[k], 0.0)
    h2_ref[...] += jnp.dot(h1.astype(jnp.bfloat16), w2_ref[k],
                           preferred_element_type=jnp.float32)

    @pl.when(k == pl.num_programs(0) - 1)
    def _tail():
        h2 = jnp.maximum(h2_ref[...] + b2_ref[...], 0.0)
        h3 = jnp.dot(h2.astype(jnp.bfloat16), w3_ref[...],
                     preferred_element_type=jnp.float32)
        h3 = jnp.maximum(h3 + b3_ref[...], 0.0)
        out = jnp.dot(h3.astype(jnp.bfloat16), w4_ref[...],
                      preferred_element_type=jnp.float32) + b4_ref[...]
        out_ref[...] = out.astype(out_ref.dtype)


def init_params(key, in_channel=1024, feature_size=32, block_n1=None):
    """nn.Linear-style init (U[-1/sqrt(fan_in), +1/sqrt(fan_in)]) with eval-mode
    BatchNorm folded in, 2046 zero-padded to 2048, weights cast to bf16, and
    w1/b1/w2 pre-blocked for contiguous streaming.  Returns (kernel_params,
    ref_params); ref_params keep the flat f32 layout for the reference."""
    dims = [in_channel, _H1, _H2, _H3, feature_size]
    keys = jax.random.split(key, 8)
    raw = {}
    for i in range(4):
        fan_in = dims[i]
        bound = 1.0 / float(fan_in) ** 0.5
        raw[f"w{i + 1}"] = jax.random.uniform(
            keys[2 * i], (dims[i], dims[i + 1]), jnp.float32, -bound, bound)
        raw[f"b{i + 1}"] = jax.random.uniform(
            keys[2 * i + 1], (1, dims[i + 1]), jnp.float32, -bound, bound)

    # Fold BatchNorm1d (eval): gamma=1, beta=0, running_mean=0, running_var=1, eps=1e-5
    eps = 1e-5
    folded = {}
    for i, n in enumerate([_H1, _H2, _H3], start=1):
        gamma = jnp.ones((1, n), jnp.float32)
        beta = jnp.zeros((1, n), jnp.float32)
        rmean = jnp.zeros((1, n), jnp.float32)
        rvar = jnp.ones((1, n), jnp.float32)
        scale = gamma / jnp.sqrt(rvar + eps)
        shift = beta - rmean * scale
        folded[f"w{i}"] = raw[f"w{i}"] * scale          # per-output-column scale
        folded[f"b{i}"] = raw[f"b{i}"] * scale + shift
    folded["w4"] = raw["w4"]
    folded["b4"] = raw["b4"]

    # Zero-pad hidden-1 2046 -> 2048 (padded cols/rows are zero: relu(0+0)=0 and
    # the extra w2 rows contribute nothing).
    pad = _H1_PAD - _H1
    folded["w1"] = jnp.pad(folded["w1"], ((0, 0), (0, pad)))
    folded["b1"] = jnp.pad(folded["b1"], ((0, 0), (0, pad)))
    folded["w2"] = jnp.pad(folded["w2"], ((0, pad), (0, 0)))
    ref_params = dict(folded)                           # flat f32 reference copy

    # Kernel layout: adaptive block width, contiguous pre-blocked w1/b1/w2.
    if block_n1 is None:
        block_n1 = _pick_block_n1(in_channel)
    assert _H1_PAD % block_n1 == 0 and block_n1 % 128 == 0
    n_steps = _H1_PAD // block_n1

    kp = {}
    kp["w1"] = (folded["w1"].reshape(in_channel, n_steps, block_n1)
                .transpose(1, 0, 2).astype(jnp.bfloat16))        # (n_steps, in_ch, bn1)
    kp["b1"] = folded["b1"].reshape(n_steps, 1, block_n1)        # (n_steps, 1, bn1) f32
    kp["w2"] = folded["w2"].reshape(n_steps, block_n1, _H2).astype(jnp.bfloat16)
    kp["b2"] = folded["b2"]
    kp["w3"] = folded["w3"].astype(jnp.bfloat16)
    kp["b3"] = folded["b3"]
    kp["w4"] = folded["w4"].astype(jnp.bfloat16)
    kp["b4"] = folded["b4"]
    return kp, ref_params


def dae_encoder(x, noise, params):
    """x, noise: (B, C, H, W) or (B, in_channel).  params: from init_params()."""
    b = x.shape[0]
    x_flat = x.reshape(b, -1).astype(jnp.float32)
    noise_flat = noise.reshape(b, -1).astype(jnp.float32)
    in_ch = x_flat.shape[1]

    n_steps, w1_in, block_n1 = params["w1"].shape
    assert w1_in == in_ch, (w1_in, in_ch)
    assert params["w2"].shape == (n_steps, block_n1, _H2)
    feature_size = params["w4"].shape[1]

    grid_spec = pltpu.PrefetchScalarGridSpec(
        num_scalar_prefetch=0,
        grid=(n_steps,),
        in_specs=[
            _resident((b, in_ch)),                                # x (resident, 1-buf)
            _resident((b, in_ch)),                                # noise (resident, 1-buf)
            pl.BlockSpec((None, in_ch, block_n1),                 # w1 contiguous slab (streamed)
                         lambda k: (k, 0, 0),
                         **(_SINGLE_BUF if n_steps == 1 else {})),
            _resident((n_steps, 1, block_n1)),                    # b1 (resident, indexed by k)
            _resident((n_steps, block_n1, _H2)),                  # w2 (resident, indexed by k)
            _resident((1, _H2)),                                  # b2
            _resident((_H2, _H3)),                                # w3
            _resident((1, _H3)),                                  # b3
            _resident((_H3, feature_size)),                       # w4
            _resident((1, feature_size)),                         # b4
        ],
        out_specs=pl.BlockSpec((b, feature_size), lambda k: (0, 0)),
        scratch_shapes=[
            pltpu.VMEM((b, in_ch), jnp.bfloat16),                 # noisy input (bf16 for MXU)
            pltpu.VMEM((b, _H2), jnp.float32),                    # layer-2 accumulator
        ],
    )

    # VMEM budget: streamed w1 buffers + residents + scratch, with margin,
    # clamped so it always fits v7x's 64 MiB and overrides v5e's 16 MiB default.
    streamed_bytes = (1 if n_steps == 1 else 2) * in_ch * block_n1 * 2
    resident_bytes = (2 * b * in_ch * 4
                      + n_steps * 8 * block_n1 * 4
                      + _H1_PAD * _H2 * 2 + _H2 * 4
                      + _H2 * _H3 * 2 + _H3 * 4
                      + _H3 * feature_size * 2 + feature_size * 4
                      + b * feature_size * 4)
    scratch_bytes = b * in_ch * 2 + b * _H2 * 4
    vmem_limit = int(1.5 * (streamed_bytes + resident_bytes + scratch_bytes))
    vmem_limit = min(max(vmem_limit, 32 << 20), 56 << 20)

    return pl.pallas_call(
        _dae_encoder_kernel,
        out_shape=jax.ShapeDtypeStruct((b, feature_size), jnp.float32),
        grid_spec=grid_spec,
        compiler_params=pltpu.CompilerParams(
            dimension_semantics=("arbitrary",),
            vmem_limit_bytes=vmem_limit,
        ),
    )(x_flat, noise_flat,
      params["w1"], params["b1"],
      params["w2"], params["b2"],
      params["w3"], params["b3"],
      params["w4"], params["b4"])


def dae_encoder_ref(x, noise, ref_params):
    """Plain-JAX f32 reference (BN folded, padded) for correctness checking."""
    b = x.shape[0]
    h = x.reshape(b, -1).astype(jnp.float32)
    h = h + noise.reshape(b, -1) * (jnp.mean(h) * 0.1)
    for i in (1, 2, 3):
        h = jnp.maximum(h @ ref_params[f"w{i}"] + ref_params[f"b{i}"], 0.0)
    return h @ ref_params["w4"] + ref_params["b4"]


if __name__ == "__main__":
    key = jax.random.PRNGKey(0)
    k_param, k_x, k_noise = jax.random.split(key, 3)

    # Small shapes: batch=8, x of shape (8, 4, 16, 16) -> in_channel = 1024
    B, C, H, W = 8, 4, 16, 16
    in_channel = C * H * W
    feature_size = 32

    kernel_params, ref_params = init_params(
        k_param, in_channel=in_channel, feature_size=feature_size)
    x = jax.random.normal(k_x, (B, C, H, W), jnp.float32)
    noise = jax.random.uniform(k_noise, (B, C, H, W), jnp.float32)

    out = jax.block_until_ready(dae_encoder(x, noise, kernel_params))
    ref = jax.block_until_ready(dae_encoder_ref(x, noise, ref_params))

    assert out.shape == (B, feature_size), out.shape
    # bf16 weights / bf16 MXU operands vs f32 reference -> loose-but-tight tolerance
    assert jnp.allclose(out, ref, atol=3e-2, rtol=3e-2), "mismatch vs reference"

    print("KERNEL_OK")
</pallas_src>

<mosaic_0001>
module attributes {stable_mosaic.version = 11 : i64} {
  func.func @_dae_encoder_kernel(%arg0: i32, %arg1: memref<8x1024xf32, #tpu.memory_space<vmem>>, %arg2: memref<8x1024xf32, #tpu.memory_space<vmem>>, %arg3: memref<1x1024x2048xbf16, #tpu.memory_space<vmem>>, %arg4: memref<1x1x2048xf32, #tpu.memory_space<vmem>>, %arg5: memref<1x2048x512xbf16, #tpu.memory_space<vmem>>, %arg6: memref<1x512xf32, #tpu.memory_space<vmem>>, %arg7: memref<512x256xbf16, #tpu.memory_space<vmem>>, %arg8: memref<1x256xf32, #tpu.memory_space<vmem>>, %arg9: memref<256x32xbf16, #tpu.memory_space<vmem>>, %arg10: memref<1x32xf32, #tpu.memory_space<vmem>>, %arg11: memref<8x32xf32, #tpu.memory_space<vmem>>, %arg12: memref<8x1024xbf16, #tpu.memory_space<vmem>>, %arg13: memref<8x512xf32, #tpu.memory_space<vmem>>) attributes {dimension_semantics = [#tpu.dimension_semantics<arbitrary>], iteration_bounds = array<i64: 1>, scalar_prefetch = 0 : i64, scratch_operands = 2 : i64, tpu.core_type = #tpu.core_type<tc>, window_params = [{pipeline_mode = #tpu.pipeline_mode<synchronous>, transform_indices = @transform_0, window_bounds = array<i64: 8, 1024>}, {pipeline_mode = #tpu.pipeline_mode<synchronous>, transform_indices = @transform_1, window_bounds = array<i64: 8, 1024>}, {pipeline_mode = #tpu.pipeline_mode<synchronous>, transform_indices = @transform_2, window_bounds = array<i64: 1, 1024, 2048>}, {pipeline_mode = #tpu.pipeline_mode<synchronous>, transform_indices = @transform_3, window_bounds = array<i64: 1, 1, 2048>}, {pipeline_mode = #tpu.pipeline_mode<synchronous>, transform_indices = @transform_4, window_bounds = array<i64: 1, 2048, 512>}, {pipeline_mode = #tpu.pipeline_mode<synchronous>, transform_indices = @transform_5, window_bounds = array<i64: 1, 512>}, {pipeline_mode = #tpu.pipeline_mode<synchronous>, transform_indices = @transform_6, window_bounds = array<i64: 512, 256>}, {pipeline_mode = #tpu.pipeline_mode<synchronous>, transform_indices = @transform_7, window_bounds = array<i64: 1, 256>}, {pipeline_mode = #tpu.pipeline_mode<synchronous>, transform_indices = @transform_8, window_bounds = array<i64: 256, 32>}, {pipeline_mode = #tpu.pipeline_mode<synchronous>, transform_indices = @transform_9, window_bounds = array<i64: 1, 32>}, {pipeline_mode = #tpu.pipeline_mode<synchronous>, transform_indices = @transform_10, window_bounds = array<i64: 8, 32>}]} {
    %c0_i32 = arith.constant 0 : i32
    %0 = arith.cmpi eq, %arg0, %c0_i32 : i32
    %1 = arith.extui %0 : i1 to i32
    %c0_i32_0 = arith.constant 0 : i32
    %2 = arith.cmpi ne, %1, %c0_i32_0 : i32
    scf.if %2 {
      %c0_17 = arith.constant 0 : index
      %c0_18 = arith.constant 0 : index
      %25 = vector.load %arg1[%c0_17, %c0_18] : memref<8x1024xf32, #tpu.memory_space<vmem>>, vector<8x1024xf32>
      %c0_19 = arith.constant 0 : index
      %c0_20 = arith.constant 0 : index
      %26 = vector.load %arg2[%c0_19, %c0_20] : memref<8x1024xf32, #tpu.memory_space<vmem>>, vector<8x1024xf32>
      %27 = vector.shape_cast %25 : vector<8x1024xf32> to vector<1x8x1024xf32>
      %cst_21 = arith.constant dense<0.000000e+00> : vector<1xf32>
      %28 = vector.multi_reduction <add>, %27, %cst_21 [1, 2] : vector<1x8x1024xf32> to vector<1xf32>
      %29 = vector.shape_cast %28 : vector<1xf32> to vector<1x1x1xf32>
      %30 = vector.extract %29[0, 0, 0] : f32 from vector<1x1x1xf32>
      %cst_22 = arith.constant 8.192000e+03 : f32
      %31 = arith.divf %30, %cst_22 : f32
      %cst_23 = arith.constant 1.000000e-01 : f32
      %32 = arith.mulf %31, %cst_23 : f32
      %33 = vector.broadcast %32 : f32 to vector<8x1024xf32>
      %34 = arith.mulf %26, %33 : vector<8x1024xf32>
      %35 = arith.addf %25, %34 : vector<8x1024xf32>
      %36 = arith.truncf %35 : vector<8x1024xf32> to vector<8x1024xbf16>
      %c0_24 = arith.constant 0 : index
      %c0_25 = arith.constant 0 : index
      %37 = vector.load %arg12[%c0_24, %c0_25] : memref<8x1024xbf16, #tpu.memory_space<vmem>>, vector<8x1024xbf16>
      tpu.vector_store %arg12[%c0_24, %c0_25], %36 {strides = array<i32>} : memref<8x1024xbf16, #tpu.memory_space<vmem>>, vector<8x1024xbf16>,
      %cst_26 = arith.constant 0.000000e+00 : f32
      %38 = vector.broadcast %cst_26 : f32 to vector<8x512xf32>
      %c0_27 = arith.constant 0 : index
      %c0_28 = arith.constant 0 : index
      %39 = vector.load %arg13[%c0_27, %c0_28] : memref<8x512xf32, #tpu.memory_space<vmem>>, vector<8x512xf32>
      tpu.vector_store %arg13[%c0_27, %c0_28], %38 {strides = array<i32>} : memref<8x512xf32, #tpu.memory_space<vmem>>, vector<8x512xf32>,
    } else {
    }
    %c0 = arith.constant 0 : index
    %c0_1 = arith.constant 0 : index
    %3 = vector.load %arg12[%c0, %c0_1] : memref<8x1024xbf16, #tpu.memory_space<vmem>>, vector<8x1024xbf16>
    %c0_2 = arith.constant 0 : index
    %c0_3 = arith.constant 0 : index
    %c0_4 = arith.constant 0 : index
    %4 = vector.load %arg3[%c0_2, %c0_3, %c0_4] : memref<1x1024x2048xbf16, #tpu.memory_space<vmem>>, vector<1x1024x2048xbf16>
    %5 = vector.shape_cast %4 : vector<1x1024x2048xbf16> to vector<1024x2048xbf16>
    %cst = arith.constant dense<0.000000e+00> : vector<8x2048xf32>
    %6 = tpu.matmul %3, %5, %cst {dimension_numbers = #tpu.dot_dimension_numbers<[1], [0], [0], [1], [0, 0, 1, 1], [], []>} : vector<8x1024xbf16>, vector<1024x2048xbf16>, vector<8x2048xf32> -> vector<8x2048xf32>
    %7 = arith.index_cast %arg0 : i32 to index
    %c0_5 = arith.constant 0 : index
    %c0_6 = arith.constant 0 : index
    %8 = vector.load %arg4[%7, %c0_5, %c0_6] : memref<1x1x2048xf32, #tpu.memory_space<vmem>>, vector<1x1x2048xf32>
    %9 = vector.shape_cast %8 : vector<1x1x2048xf32> to vector<1x2048xf32>
    %10 = vector.broadcast %9 : vector<1x2048xf32> to vector<8x2048xf32>
    %11 = arith.addf %6, %10 : vector<8x2048xf32>
    %cst_7 = arith.constant 0.000000e+00 : f32
    %12 = vector.broadcast %cst_7 : f32 to vector<8x2048xf32>
    %13 = arith.maximumf %11, %12 : vector<8x2048xf32>
    %c0_8 = arith.constant 0 : index
    %c0_9 = arith.constant 0 : index
    %14 = vector.load %arg13[%c0_8, %c0_9] : memref<8x512xf32, #tpu.memory_space<vmem>>, vector<8x512xf32>
    %15 = arith.truncf %13 : vector<8x2048xf32> to vector<8x2048xbf16>
    %16 = arith.index_cast %arg0 : i32 to index
    %c0_10 = arith.constant 0 : index
    %c0_11 = arith.constant 0 : index
    %17 = vector.load %arg5[%16, %c0_10, %c0_11] : memref<1x2048x512xbf16, #tpu.memory_space<vmem>>, vector<1x2048x512xbf16>
    %18 = vector.shape_cast %17 : vector<1x2048x512xbf16> to vector<2048x512xbf16>
    %cst_12 = arith.constant dense<0.000000e+00> : vector<8x512xf32>
    %19 = tpu.matmul %15, %18, %cst_12 {dimension_numbers = #tpu.dot_dimension_numbers<[1], [0], [0], [1], [0, 0, 1, 1], [], []>} : vector<8x2048xbf16>, vector<2048x512xbf16>, vector<8x512xf32> -> vector<8x512xf32>
    %20 = arith.addf %14, %19 : vector<8x512xf32>
    %c0_13 = arith.constant 0 : index
    %c0_14 = arith.constant 0 : index
    %21 = vector.load %arg13[%c0_13, %c0_14] : memref<8x512xf32, #tpu.memory_space<vmem>>, vector<8x512xf32>
    tpu.vector_store %arg13[%c0_13, %c0_14], %20 {strides = array<i32>} : memref<8x512xf32, #tpu.memory_space<vmem>>, vector<8x512xf32>,
    %c0_i32_15 = arith.constant 0 : i32
    %22 = arith.cmpi eq, %arg0, %c0_i32_15 : i32
    %23 = arith.extui %22 : i1 to i32
    %c0_i32_16 = arith.constant 0 : i32
    %24 = arith.cmpi ne, %23, %c0_i32_16 : i32
    scf.if %24 {
      %c0_17 = arith.constant 0 : index
      %c0_18 = arith.constant 0 : index
      %25 = vector.load %arg13[%c0_17, %c0_18] : memref<8x512xf32, #tpu.memory_space<vmem>>, vector<8x512xf32>
      %c0_19 = arith.constant 0 : index
      %c0_20 = arith.constant 0 : index
      %26 = vector.load %arg6[%c0_19, %c0_20] : memref<1x512xf32, #tpu.memory_space<vmem>>, vector<1x512xf32>
      %27 = vector.broadcast %26 : vector<1x512xf32> to vector<8x512xf32>
      %28 = arith.addf %25, %27 : vector<8x512xf32>
      %cst_21 = arith.constant 0.000000e+00 : f32
      %29 = vector.broadcast %cst_21 : f32 to vector<8x512xf32>
      %30 = arith.maximumf %28, %29 : vector<8x512xf32>
      %31 = arith.truncf %30 : vector<8x512xf32> to vector<8x512xbf16>
      %c0_22 = arith.constant 0 : index
      %c0_23 = arith.constant 0 : index
      %32 = vector.load %arg7[%c0_22, %c0_23] : memref<512x256xbf16, #tpu.memory_space<vmem>>, vector<512x256xbf16>
      %cst_24 = arith.constant dense<0.000000e+00> : vector<8x256xf32>
      %33 = tpu.matmul %31, %32, %cst_24 {dimension_numbers = #tpu.dot_dimension_numbers<[1], [0], [0], [1], [0, 0, 1, 1], [], []>} : vector<8x512xbf16>, vector<512x256xbf16>, vector<8x256xf32> -> vector<8x256xf32>
      %c0_25 = arith.constant 0 : index
      %c0_26 = arith.constant 0 : index
      %34 = vector.load %arg8[%c0_25, %c0_26] : memref<1x256xf32, #tpu.memory_space<vmem>>, vector<1x256xf32>
      %35 = vector.broadcast %34 : vector<1x256xf32> to vector<8x256xf32>
      %36 = arith.addf %33, %35 : vector<8x256xf32>
      %cst_27 = arith.constant 0.000000e+00 : f32
      %37 = vector.broadcast %cst_27 : f32 to vector<8x256xf32>
      %38 = arith.maximumf %36, %37 : vector<8x256xf32>
      %39 = arith.truncf %38 : vector<8x256xf32> to vector<8x256xbf16>
      %c0_28 = arith.constant 0 : index
      %c0_29 = arith.constant 0 : index
      %40 = vector.load %arg9[%c0_28, %c0_29] : memref<256x32xbf16, #tpu.memory_space<vmem>>, vector<256x32xbf16>
      %cst_30 = arith.constant dense<0.000000e+00> : vector<8x32xf32>
      %41 = tpu.matmul %39, %40, %cst_30 {dimension_numbers = #tpu.dot_dimension_numbers<[1], [0], [0], [1], [0, 0, 1, 1], [], []>} : vector<8x256xbf16>, vector<256x32xbf16>, vector<8x32xf32> -> vector<8x32xf32>
      %c0_31 = arith.constant 0 : index
      %c0_32 = arith.constant 0 : index
      %42 = vector.load %arg10[%c0_31, %c0_32] : memref<1x32xf32, #tpu.memory_space<vmem>>, vector<1x32xf32>
      %43 = vector.broadcast %42 : vector<1x32xf32> to vector<8x32xf32>
      %44 = arith.addf %41, %43 : vector<8x32xf32>
      %c0_33 = arith.constant 0 : index
      %c0_34 = arith.constant 0 : index
      %45 = vector.load %arg11[%c0_33, %c0_34] : memref<8x32xf32, #tpu.memory_space<vmem>>, vector<8x32xf32>
      tpu.vector_store %arg11[%c0_33, %c0_34], %44 {strides = array<i32>} : memref<8x32xf32, #tpu.memory_space<vmem>>, vector<8x32xf32>,
    } else {
    }
    return
  }
  func.func @transform_0(%arg0: i32) -> (i32, i32) {
    %c0_i32 = arith.constant 0 : i32
    %c0_i32_0 = arith.constant 0 : i32
    %c0_i32_1 = arith.constant 0 : i32
    return %c0_i32, %c0_i32_0 : i32, i32
  }
  func.func @transform_1(%arg0: i32) -> (i32, i32) {
    %c0_i32 = arith.constant 0 : i32
    %c0_i32_0 = arith.constant 0 : i32
    %c0_i32_1 = arith.constant 0 : i32
    return %c0_i32, %c0_i32_0 : i32, i32
  }
  func.func @transform_2(%arg0: i32) -> (i32, i32, i32) {
    %c0_i32 = arith.constant 0 : i32
    %c0_i32_0 = arith.constant 0 : i32
    %c0_i32_1 = arith.constant 0 : i32
    return %arg0, %c0_i32, %c0_i32_0 : i32, i32, i32
  }
  func.func @transform_3(%arg0: i32) -> (i32, i32, i32) {
    %c0_i32 = arith.constant 0 : i32
    %c0_i32_0 = arith.constant 0 : i32
    %c0_i32_1 = arith.constant 0 : i32
    %c0_i32_2 = arith.constant 0 : i32
    return %c0_i32, %c0_i32_0, %c0_i32_1 : i32, i32, i32
  }
  func.func @transform_4(%arg0: i32) -> (i32, i32, i32) {
    %c0_i32 = arith.constant 0 : i32
    %c0_i32_0 = arith.constant 0 : i32
    %c0_i32_1 = arith.constant 0 : i32
    %c0_i32_2 = arith.constant 0 : i32
    return %c0_i32, %c0_i32_0, %c0_i32_1 : i32, i32, i32
  }
  func.func @transform_5(%arg0: i32) -> (i32, i32) {
    %c0_i32 = arith.constant 0 : i32
    %c0_i32_0 = arith.constant 0 : i32
    %c0_i32_1 = arith.constant 0 : i32
    return %c0_i32, %c0_i32_0 : i32, i32
  }
  func.func @transform_6(%arg0: i32) -> (i32, i32) {
    %c0_i32 = arith.constant 0 : i32
    %c0_i32_0 = arith.constant 0 : i32
    %c0_i32_1 = arith.constant 0 : i32
    return %c0_i32, %c0_i32_0 : i32, i32
  }
  func.func @transform_7(%arg0: i32) -> (i32, i32) {
    %c0_i32 = arith.constant 0 : i32
    %c0_i32_0 = arith.constant 0 : i32
    %c0_i32_1 = arith.constant 0 : i32
    return %c0_i32, %c0_i32_0 : i32, i32
  }
  func.func @transform_8(%arg0: i32) -> (i32, i32) {
    %c0_i32 = arith.constant 0 : i32
    %c0_i32_0 = arith.constant 0 : i32
    %c0_i32_1 = arith.constant 0 : i32
    return %c0_i32, %c0_i32_0 : i32, i32
  }
  func.func @transform_9(%arg0: i32) -> (i32, i32) {
    %c0_i32 = arith.constant 0 : i32
    %c0_i32_0 = arith.constant 0 : i32
    %c0_i32_1 = arith.constant 0 : i32
    return %c0_i32, %c0_i32_0 : i32, i32
  }
  func.func @transform_10(%arg0: i32) -> (i32, i32) {
    %c0_i32 = arith.constant 0 : i32
    %c0_i32_0 = arith.constant 0 : i32
    %c0_i32_1 = arith.constant 0 : i32
    return %c0_i32, %c0_i32_0 : i32, i32
  }
}

</mosaic_0001>

<bundles_post_ra>
// kernel: tpu_custom_call.1
= control target key start
LH: loop header
LB: loop body
LE: loop exit
PB: predicated region body
PF: predicated region fallthrough
CT: control target
= control target key end

     0   :  { %15 = vsyncpa [#allocation5], 0  ;;  %s15813_s0 = inlined_call_operand.hbm [shape: f32[8,1024], index: 0, kind: input, shape index: {}]   ;;  %s15814_s1 = inlined_call_operand.hbm [shape: f32[8,1024], index: 1, kind: input, shape index: {}]   ;;  %s15815_s2 = inlined_call_operand.hbm [shape: bf16[1,1024,2048], index: 2, kind: input, shape index: {}]   ;;  %s15816_s3 = inlined_call_operand.hbm [shape: f32[1,1,2048], index: 3, kind: input, shape index: {}]   ;;  %s15817_s4 = inlined_call_operand.hbm [shape: bf16[1,2048,512], index: 4, kind: input, shape index: {}]   ;;  %s15818_s5 = inlined_call_operand.hbm [shape: f32[1,512], index: 5, kind: input, shape index: {}]   ;;  %s15819_s6 = inlined_call_operand.hbm [shape: bf16[512,256], index: 6, kind: input, shape index: {}]   ;;  %s15820_s7 = inlined_call_operand.hbm [shape: f32[1,256], index: 7, kind: input, shape index: {}]   ;;  %s15821_s8 = inlined_call_operand.vmem [shape: bf16[256,32], index: 8, kind: input, shape index: {}]   ;;  %s15822_s9 = inlined_call_operand.hbm [shape: f32[1,32], index: 9, kind: input, shape index: {}]   ;;  %s15823_s10 = inlined_call_operand.hbm [shape: f32[8,32], index: 10, kind: output, shape index: {}]  }
   0x1   :  { %16 = vsyncpa [#allocation8], 0 }
   0x2   :  { %17 = vsyncpa [#allocation11], 0 }
   0x3   :  { %18 = vsyncpa [#allocation14], 0 }
   0x4   :  { %19 = vsyncpa [#allocation17], 0 }
   0x5   :  { %20 = vsyncpa [#allocation6], 0  ;;  %s15231_s13 = smov [#allocation7]   ;;  %s15232_s15 = smov [#allocation10]  }
   0x6   :  { %s37_s14 = sshll.u32 %s15231_s13, 4  ;;  %s59_s16 = sshll.u32 %s15232_s15, 4  ;;  %s38_s14 = int_to_ptr.vmem [resolvable:$true] %s37_s14  ;;  %s60_s16 = int_to_ptr.vmem [resolvable:$true] %s59_s16 }
   0x7   :  { %s14999_s19 = scalar_lea.hbm %s15814_s1, 1024 }
   0x8   :  { %p15000_p0 = scmp.ne.s32.totalorder %s15814_s1, %s14999_s19  ;;  %p15003_p1 = scmp.lt.u32.totalorder %s14999_s19, %s15814_s1 }
   0xa   :  { %p15005_p2 = pnand %p15003_p1, %p15000_p0 }
   0xc   :  { %15008 = shalt.err (!%p15005_p2)
}
   0xd   :  { %s15009_s24 = scalar_lea.vmem %s38_s14, 1024  ;;  %p15014_p4 = scmp.lt.s32.totalorder %s38_s14, %s38_s14 }
   0xe   :  { %p15010_p3 = scmp.ne.s32.totalorder %s38_s14, %s15009_s24  ;;  %p15015_p5 = scmp.lt.s32.totalorder %s15009_s24, %s15009_s24 }
  0x10   :  { %p15016_p6 = por %p15015_p5, %p15014_p4 }
  0x12   :  { %p15017_p7 = pnand %p15016_p6, %p15010_p3 }
  0x14   :  { %15020 = shalt.err (!%p15017_p7)
}
  0x15   :  { %40 = dma.hbm_to_vmem [thread:$0]  %s15814_s1, 1024, %s38_s14, [#allocation8]  }
  0x16   :  { %s15021_s29 = scalar_lea.hbm %s15816_s3, 256 }
  0x17   :  { %p15022_p8 = scmp.ne.s32.totalorder %s15816_s3, %s15021_s29  ;;  %p15025_p9 = scmp.lt.u32.totalorder %s15021_s29, %s15816_s3 }
  0x19   :  { %p15027_p10 = pnand %p15025_p9, %p15022_p8 }
  0x1b   :  { %15030 = shalt.err (!%p15027_p10)
}
  0x1c   :  { %s15031_s15 = scalar_lea.vmem %s60_s16, 256  ;;  %p15036_p12 = scmp.lt.s32.totalorder %s60_s16, %s60_s16 }
  0x1d   :  { %p15032_p11 = scmp.ne.s32.totalorder %s60_s16, %s15031_s15  ;;  %p15037_p13 = scmp.lt.s32.totalorder %s15031_s15, %s15031_s15 }
  0x1f   :  { %p15038_p0 = por %p15037_p13, %p15036_p12 }
  0x21   :  { %p15039_p1 = pnand %p15038_p0, %p15032_p11 }
  0x23   :  { %15042 = shalt.err (!%p15039_p1)
}
  0x24   :  { %62 = dma.hbm_to_vmem [thread:$0]  %s15816_s3, 256, %s60_s16, [#allocation11]  }
  0x25   :  { %s15233_s17 = smov [#allocation13]   ;;  %s15234_s19 = smov [#allocation16]  }
  0x26   :  { %s81_s18 = sshll.u32 %s15233_s17, 4  ;;  %s103_s20 = sshll.u32 %s15234_s19, 4  ;;  %s82_s18 = int_to_ptr.vmem [resolvable:$true] %s81_s18  ;;  %s104_s20 = int_to_ptr.vmem [resolvable:$true] %s103_s20 }
  0x27   :  { %s15043_s23 = scalar_lea.hbm %s15818_s5, 64 }
  0x28   :  { %p15044_p2 = scmp.ne.s32.totalorder %s15818_s5, %s15043_s23  ;;  %p15047_p3 = scmp.lt.u32.totalorder %s15043_s23, %s15818_s5 }
  0x2a   :  { %p15049_p4 = pnand %p15047_p3, %p15044_p2 }
  0x2c   :  { %15052 = shalt.err (!%p15049_p4)
}
  0x2d   :  { %s15053_s3 = scalar_lea.vmem %s82_s18, 64  ;;  %p15058_p6 = scmp.lt.s32.totalorder %s82_s18, %s82_s18 }
  0x2e   :  { %p15054_p5 = scmp.ne.s32.totalorder %s82_s18, %s15053_s3  ;;  %p15059_p7 = scmp.lt.s32.totalorder %s15053_s3, %s15053_s3 }
  0x30   :  { %p15060_p8 = por %p15059_p7, %p15058_p6 }
  0x32   :  { %p15061_p9 = pnand %p15060_p8, %p15054_p5 }
  0x34   :  { %15064 = shalt.err (!%p15061_p9)
}
  0x35   :  { %84 = dma.hbm_to_vmem [thread:$0]  %s15818_s5, 64, %s82_s18, [#allocation14]  }
  0x36   :  { %s15065_s11 = scalar_lea.hbm %s15820_s7, 32 }
  0x37   :  { %p15066_p10 = scmp.ne.s32.totalorder %s15820_s7, %s15065_s11  ;;  %p15069_p11 = scmp.lt.u32.totalorder %s15065_s11, %s15820_s7 }
  0x39   :  { %p15071_p12 = pnand %p15069_p11, %p15066_p10 }
  0x3b   :  { %15074 = shalt.err (!%p15071_p12)
}
  0x3c   :  { %s15075_s14 = scalar_lea.vmem %s104_s20, 32  ;;  %p15080_p0 = scmp.lt.s32.totalorder %s104_s20, %s104_s20 }
  0x3d   :  { %p15076_p13 = scmp.ne.s32.totalorder %s104_s20, %s15075_s14  ;;  %p15081_p1 = scmp.lt.s32.totalorder %s15075_s14, %s15075_s14 }
  0x3f   :  { %p15082_p2 = por %p15081_p1, %p15080_p0 }
  0x41   :  { %p15083_p3 = pnand %p15082_p2, %p15076_p13 }
  0x43   :  { %15086 = shalt.err (!%p15083_p3)
}
  0x44   :  { %106 = dma.hbm_to_vmem [thread:$0]  %s15820_s7, 32, %s104_s20, [#allocation17]  }
  0x45   :  { %s15235_s18 = smov [#allocation4]   ;;  %s15236_s21 = smov [#allocation9]  }
  0x46   :  { %s27_s19 = sshll.u32 %s15235_s18, 4  ;;  %s46_s22 = sshll.u32 %s15236_s21, 4  ;;  %s28_s19 = int_to_ptr.vmem [resolvable:$true] %s27_s19  ;;  %s15350_s22 = int_to_ptr.vmem [resolvable:$true] %s46_s22 }
  0x47   :  { %s15087_s25 = scalar_lea.hbm %s15813_s0, 1024 }
  0x48   :  { %p15088_p4 = scmp.ne.s32.totalorder %s15813_s0, %s15087_s25  ;;  %p15091_p5 = scmp.lt.u32.totalorder %s15087_s25, %s15813_s0 }
  0x4a   :  { %p15093_p6 = pnand %p15091_p5, %p15088_p4 }
  0x4c   :  { %15096 = shalt.err (!%p15093_p6)
}
  0x4d   :  { %s15097_s7 = scalar_lea.vmem %s28_s19, 1024  ;;  %p15102_p8 = scmp.lt.s32.totalorder %s28_s19, %s28_s19 }
  0x4e   :  { %p15098_p7 = scmp.ne.s32.totalorder %s28_s19, %s15097_s7  ;;  %p15103_p9 = scmp.lt.s32.totalorder %s15097_s7, %s15097_s7 }
  0x50   :  { %p15104_p10 = por %p15103_p9, %p15102_p8 }
  0x52   :  { %p15105_p11 = pnand %p15104_p10, %p15098_p7 }
  0x54   :  { %15108 = shalt.err (!%p15105_p11)
}
  0x55   :  { %30 = dma.hbm_to_vmem [thread:$0]  %s15813_s0, 1024, %s28_s19, [#allocation5]  }
  0x56   :  { %s15109_s11 = scalar_lea.hbm %s15815_s2, 131072 }
  0x57   :  { %p15110_p12 = scmp.ne.s32.totalorder %s15815_s2, %s15109_s11  ;;  %p15113_p13 = scmp.lt.u32.totalorder %s15109_s11, %s15815_s2 }
  0x59   :  { %p15115_p0 = pnand %p15113_p13, %p15110_p12 }
  0x5b   :  { %15118 = shalt.err (!%p15115_p0)
}
  0x5c   :  { %s15119_s14 = scalar_lea.vmem %s15350_s22, 131072  ;;  %p15124_p2 = scmp.lt.s32.totalorder %s15350_s22, %s15350_s22 }
  0x5d   :  { %p15120_p1 = scmp.ne.s32.totalorder %s15350_s22, %s15119_s14  ;;  %p15125_p3 = scmp.lt.s32.totalorder %s15119_s14, %s15119_s14 }
  0x5f   :  { %p15126_p4 = por %p15125_p3, %p15124_p2 }
  0x61   :  { %p15127_p5 = pnand %p15126_p4, %p15120_p1 }
  0x63   :  { %15130 = shalt.err (!%p15127_p5)
}
  0x64   :  { %s15237_s0 = smov 1024   ;;  %s15238_s5 = smov 64  }
  0x65   :  { %52 = dma.hbm_to_vmem [thread:$0]  %s15815_s2, 131072, %s15350_s22, [#allocation8], %s15237_s0, %s15237_s0, %s15238_s5  }
  0x66   :  { %s15239_s19 = smov [#allocation12]   ;;  %s15131_s25 = scalar_lea.hbm %s15817_s4, 65536 }
  0x67   :  { %s68_s21 = sshll.u32 %s15239_s19, 4  ;;  %p15132_p6 = scmp.ne.s32.totalorder %s15817_s4, %s15131_s25  ;;  %s69_s21 = int_to_ptr.vmem [resolvable:$true] %s68_s21 }
  0x68   :  { %p15135_p7 = scmp.lt.u32.totalorder %s15131_s25, %s15817_s4 }
  0x6a   :  { %p15137_p8 = pnand %p15135_p7, %p15132_p6 }
  0x6c   :  { %15140 = shalt.err (!%p15137_p8)
}
  0x6d   :  { %s15141_s7 = scalar_lea.vmem %s69_s21, 65536  ;;  %p15146_p10 = scmp.lt.s32.totalorder %s69_s21, %s69_s21 }
  0x6e   :  { %p15142_p9 = scmp.ne.s32.totalorder %s69_s21, %s15141_s7  ;;  %p15147_p11 = scmp.lt.s32.totalorder %s15141_s7, %s15141_s7 }
  0x70   :  { %p15148_p12 = por %p15147_p11, %p15146_p10 }
  0x72   :  { %p15149_p13 = pnand %p15148_p12, %p15142_p9 }
  0x74   :  { %15152 = shalt.err (!%p15149_p13)
}
  0x75   :  { %s15240_s2 = smov 256   ;;  %s15241_s22 = smov 16  }
  0x76   :  { %74 = dma.hbm_to_vmem [thread:$0]  %s15817_s4, 65536, %s69_s21, [#allocation11], %s15240_s2, %s15240_s2, %s15241_s22  }
  0x77   :  { %s15242_s29 = smov [#allocation15]   ;;  %s15153_s13 = scalar_lea.hbm %s15819_s6, 8192 }
  0x78   :  { %s90_s30 = sshll.u32 %s15242_s29, 4  ;;  %p15154_p0 = scmp.ne.s32.totalorder %s15819_s6, %s15153_s13  ;;  %s91_s30 = int_to_ptr.vmem [resolvable:$true] %s90_s30 }
  0x79   :  { %p15157_p1 = scmp.lt.u32.totalorder %s15153_s13, %s15819_s6 }
  0x7b   :  { %p15159_p2 = pnand %p15157_p1, %p15154_p0 }
  0x7d   :  { %15162 = shalt.err (!%p15159_p2)
}
  0x7e   :  { %s15163_s5 = scalar_lea.vmem %s91_s30, 8192  ;;  %p15168_p4 = scmp.lt.s32.totalorder %s91_s30, %s91_s30 }
  0x7f   :  { %p15164_p3 = scmp.ne.s32.totalorder %s91_s30, %s15163_s5  ;;  %p15169_p5 = scmp.lt.s32.totalorder %s15163_s5, %s15163_s5 }
  0x81   :  { %p15170_p6 = por %p15169_p5, %p15168_p4 }
  0x83   :  { %p15171_p7 = pnand %p15170_p6, %p15164_p3 }
  0x85   :  { %15174 = shalt.err (!%p15171_p7)
}
  0x86   :  { %s15243_s4 = smov 128   ;;  %s15244_s17 = smov 8  }
  0x87   :  { %96 = dma.hbm_to_vmem [thread:$0]  %s15819_s6, 8192, %s91_s30, [#allocation14], %s15243_s4, %s15243_s4, %s15244_s17  }
  0x88   :  { %s15245_s21 = smov [#allocation18]   ;;  %s15175_s26 = scalar_lea.hbm %s15822_s9, 16 }
  0x89   :  { %s115_s23 = sshll.u32 %s15245_s21, 4  ;;  %p15176_p8 = scmp.ne.s32.totalorder %s15822_s9, %s15175_s26  ;;  %s116_s23 = int_to_ptr.vmem [resolvable:$true] %s115_s23 }
  0x8a   :  { %p15179_p9 = scmp.lt.u32.totalorder %s15175_s26, %s15822_s9 }
  0x8c   :  { %p15181_p10 = pnand %p15179_p9, %p15176_p8 }
  0x8e   :  { %15184 = shalt.err (!%p15181_p10)
}
  0x8f   :  { %s15185_s2 = scalar_lea.vmem %s116_s23, 16  ;;  %s15189_s6 = scalar_lea.vmem %s116_s23, 32 }
  0x90   :  { %p15186_p11 = scmp.ne.s32.totalorder %s116_s23, %s15185_s2  ;;  %p15190_p12 = scmp.lt.s32.totalorder %s116_s23, %s116_s23 }
  0x91   :  { %p15191_p13 = scmp.lt.s32.totalorder %s15189_s6, %s15185_s2 }
  0x93   :  { %p15192_p0 = por %p15191_p13, %p15190_p12 }
  0x95   :  { %p15193_p1 = pnand %p15192_p0, %p15186_p11 }
  0x97   :  { %15196 = shalt.err (!%p15193_p1)
}
  0x98   :  { %118 = dma.hbm_to_vmem [thread:$0]  %s15822_s9, 16, %s116_s23, [#allocation17]  }
  0x99   :  { %15219 = dma.done.wait [#allocation5], 1024  }
  0x9a   :  { %15220 = vsyncadd [#allocation5], 4294966272 }
  0x9b   :  { %15221 = dma.done.wait [#allocation8], 132096  }
  0x9c   :  { %15222 = vsyncadd [#allocation8], 4294835200 }
  0x9d   :  { %15223 = dma.done.wait [#allocation11], 65792  }
  0x9e   :  { %15224 = vsyncadd [#allocation11], 4294901504 }
  0x9f   :  { %15225 = dma.done.wait [#allocation14], 8256  }
  0xa0   :  { %15226 = vsyncadd [#allocation14], 4294959040 }
  0xa1   :  { %15227 = dma.done.wait [#allocation17], 48  }
  0xa2   :  { %15228 = vsyncadd [#allocation17], 4294967248  ;;  %v151_v0 = vld [vmem:[#allocation4] sm:$0xff]  ;;  %v152_v1 = vld [vmem:[#allocation4 + $0x8] sm:$0xff]  ;;  %vm12291_vm0 = vcmask 261120  }
  0xa3   :  { %v153_v2 = vld [vmem:[#allocation4 + $0x10] sm:$0xff]  ;;  %v167_v3 = vadd.f32 %v152_v1, %v151_v0  ;;  %v154_v4 = vld [vmem:[#allocation4 + $0x18] sm:$0xff]  ;;  %v155_v5 = vld [vmem:[#allocation4 + $0x20] sm:$0xff] }
  0xa4   :  { %v156_v7 = vld [vmem:[#allocation4 + $0x28] sm:$0xff]  ;;  %v157_v9 = vld [vmem:[#allocation4 + $0x30] sm:$0xff]  ;;  %v158_v11 = vld [vmem:[#allocation4 + $0x38] sm:$0xff] }
  0xa5   :  { %v168_v6 = vadd.f32 %v167_v3, %v153_v2  ;;  %v248_v15 = vld [vmem:[#allocation9] sm:$0xff] }
  0xa6   :  { %v256_v16 = vld [vmem:[#allocation9 + $0x40] sm:$0xff] }
  0xa7   :  { %v169_v8 = vadd.f32 %v168_v6, %v154_v4  ;;  %v504_v17 = vld [vmem:[#allocation9 + $0x800] sm:$0xff]  ;;  %v12325_v18 = vcombine.high %v248_v15, %v256_v16  ;;  %v12324_v20 = vcombine.low %v248_v15, %v256_v16 }
  0xa8   :  { %v512_v19 = vld [vmem:[#allocation9 + $0x840] sm:$0xff] }
  0xa9   :  { %v170_v10 = vadd.f32 %v169_v8, %v155_v5  ;;  %v12581_v21 = vcombine.high %v504_v17, %v512_v19  ;;  %v12580_v22 = vcombine.low %v504_v17, %v512_v19  ;;  %6506 = vmatprep.subr.bf16.mxu1 %v12325_v18  ;;  %v264_v23 = vld [vmem:[#allocation9 + $0x80] sm:$0xff] }
  0xaa   :  { %6507 = vmatpush1.bf16.msra.mxu1 %v12324_v20  ;;  %v272_v24 = vld [vmem:[#allocation9 + $0xc0] sm:$0xff] }
  0xab   :  { %v171_v12 = vadd.f32 %v170_v10, %v156_v7  ;;  %6547 = vmatprep.subr.bf16.mxu0 %v12581_v21  ;;  %v520_v25 = vld [vmem:[#allocation9 + $0x880] sm:$0xff]  ;;  %v12341_v26 = vcombine.high %v264_v23, %v272_v24  ;;  %v12340_v29 = vcombine.low %v264_v23, %v272_v24 }
  0xac   :  { %6548 = vmatpush1.bf16.msra.mxu0 %v12580_v22  ;;  %v528_v27 = vld [vmem:[#allocation9 + $0x8c0] sm:$0xff] }
  0xad   :  { %v172_v13 = vadd.f32 %v171_v12, %v157_v9  ;;  %v12597_v28 = vcombine.high %v520_v25, %v528_v27  ;;  %v12596_v30 = vcombine.low %v520_v25, %v528_v27  ;;  %v280_v31 = vld [vmem:[#allocation9 + $0x100] sm:$0xff]  ;;  %6508 = vmatprep.subr.bf16.mxu1 %v12341_v26 }
  0xae   :  { %v288_v32 = vld [vmem:[#allocation9 + $0x140] sm:$0xff]  ;;  %6509 = vmatpush1.bf16.msra.mxu1 %v12340_v29 }
  0xaf   :  { %v173_v14 = vadd.f32 %v172_v13, %v158_v11  ;;  %v536_v33 = vld [vmem:[#allocation9 + $0x900] sm:$0xff]  ;;  %v12357_v34 = vcombine.high %v280_v31, %v288_v32  ;;  %6549 = vmatprep.subr.bf16.mxu0 %v12597_v28  ;;  %v12356_v39 = vcombine.low %v280_v31, %v288_v32 }
  0xb0   :  { %v544_v35 = vld [vmem:[#allocation9 + $0x940] sm:$0xff]  ;;  %6550 = vmatpush1.bf16.msra.mxu0 %v12596_v30 }
  0xb1   :  { %174 = vadd.xlane.f32.xlu0 %v173_v14  ;;  %v296_v36 = vld [vmem:[#allocation9 + $0x180] sm:$0xff]  ;;  %v12613_v38 = vcombine.high %v536_v33, %v544_v35  ;;  %6510 = vmatprep.subr.bf16.mxu1 %v12357_v34  ;;  %v12612_v42 = vcombine.low %v536_v33, %v544_v35 }
  0xb2   :  { %v304_v37 = vld [vmem:[#allocation9 + $0x1c0] sm:$0xff]  ;;  %6511 = vmatpush1.bf16.msra.mxu1 %v12356_v39 }
  0xb3   :  { %v552_v40 = vld [vmem:[#allocation9 + $0x980] sm:$0xff]  ;;  %v12373_v43 = vcombine.high %v296_v36, %v304_v37  ;;  %6551 = vmatprep.subr.bf16.mxu0 %v12613_v38  ;;  %v12372_v49 = vcombine.low %v296_v36, %v304_v37 }
  0xb4   :  { %v560_v41 = vld [vmem:[#allocation9 + $0x9c0] sm:$0xff]  ;;  %6552 = vmatpush1.bf16.msra.mxu0 %v12612_v42 }
  0xb5   :  { %v12629_v44 = vcombine.high %v552_v40, %v560_v41  ;;  %v312_v45 = vld [vmem:[#allocation9 + $0x200] sm:$0xff]  ;;  %6512 = vmatprep.subr.bf16.mxu1 %v12373_v43  ;;  %v12628_v50 = vcombine.low %v552_v40, %v560_v41 }
  0xb6   :  { %v320_v46 = vld [vmem:[#allocation9 + $0x240] sm:$0xff]  ;;  %6513 = vmatpush1.bf16.msra.mxu1 %v12372_v49 }
  0xb7   :  { %v568_v47 = vld [vmem:[#allocation9 + $0xa00] sm:$0xff]  ;;  %v12389_v51 = vcombine.high %v312_v45, %v320_v46  ;;  %6553 = vmatprep.subr.bf16.mxu0 %v12629_v44  ;;  %v12388_v57 = vcombine.low %v312_v45, %v320_v46 }
  0xb8   :  { %v576_v48 = vld [vmem:[#allocation9 + $0xa40] sm:$0xff]  ;;  %6554 = vmatpush1.bf16.msra.mxu0 %v12628_v50 }
  0xb9   :  { %v12645_v52 = vcombine.high %v568_v47, %v576_v48  ;;  %v328_v53 = vld [vmem:[#allocation9 + $0x280] sm:$0xff]  ;;  %6514 = vmatprep.subr.bf16.mxu1 %v12389_v51  ;;  %v12644_v58 = vcombine.low %v568_v47, %v576_v48 }
  0xba   :  { %v336_v54 = vld [vmem:[#allocation9 + $0x2c0] sm:$0xff]  ;;  %6515 = vmatpush1.bf16.msra.mxu1 %v12388_v57 }
  0xbb   :  { %v584_v55 = vld [vmem:[#allocation9 + $0xa80] sm:$0xff]  ;;  %v12405_v59 = vcombine.high %v328_v53, %v336_v54  ;;  %6555 = vmatprep.subr.bf16.mxu0 %v12645_v52  ;;  %v12404_v1 = vcombine.low %v328_v53, %v336_v54 }
  0xbc   :  { %v592_v56 = vld [vmem:[#allocation9 + $0xac0] sm:$0xff]  ;;  %6556 = vmatpush1.bf16.msra.mxu0 %v12644_v58 }
  0xbd   :  { %v12661_v60 = vcombine.high %v584_v55, %v592_v56  ;;  %v344_v61 = vld [vmem:[#allocation9 + $0x300] sm:$0xff]  ;;  %6516 = vmatprep.subr.bf16.mxu1 %v12405_v59  ;;  %v12660_v2 = vcombine.low %v584_v55, %v592_v56 }
  0xbe   :  { %v352_v62 = vld [vmem:[#allocation9 + $0x340] sm:$0xff]  ;;  %6517 = vmatpush1.bf16.msra.mxu1 %v12404_v1 }
  0xbf   :  { %v600_v63 = vld [vmem:[#allocation9 + $0xb00] sm:$0xff]  ;;  %v12421_v3 = vcombine.high %v344_v61, %v352_v62  ;;  %6557 = vmatprep.subr.bf16.mxu0 %v12661_v60  ;;  %v12420_v9 = vcombine.low %v344_v61, %v352_v62 }
  0xc0   :  { %v608_v0 = vld [vmem:[#allocation9 + $0xb40] sm:$0xff]  ;;  %6558 = vmatpush1.bf16.msra.mxu0 %v12660_v2 }
  0xc1   :  { %v12677_v4 = vcombine.high %v600_v63, %v608_v0  ;;  %v360_v5 = vld [vmem:[#allocation9 + $0x380] sm:$0xff]  ;;  %6518 = vmatprep.subr.bf16.mxu1 %v12421_v3  ;;  %v12676_v12 = vcombine.low %v600_v63, %v608_v0 }
  0xc2   :  { %v368_v6 = vld [vmem:[#allocation9 + $0x3c0] sm:$0xff]  ;;  %6519 = vmatpush1.bf16.msra.mxu1 %v12420_v9 }
  0xc3   :  { %v616_v7 = vld [vmem:[#allocation9 + $0xb80] sm:$0xff]  ;;  %v12437_v13 = vcombine.high %v360_v5, %v368_v6  ;;  %6559 = vmatprep.subr.bf16.mxu0 %v12677_v4  ;;  %v12436_v17 = vcombine.low %v360_v5, %v368_v6 }
  0xc4   :  { %v624_v8 = vld [vmem:[#allocation9 + $0xbc0] sm:$0xff]  ;;  %6560 = vmatpush1.bf16.msra.mxu0 %v12676_v12 }
  0xc5   :  { %v376_v10 = vld [vmem:[#allocation9 + $0x400] sm:$0xff]  ;;  %v12693_v16 = vcombine.high %v616_v7, %v624_v8  ;;  %6520 = vmatprep.subr.bf16.mxu1 %v12437_v13  ;;  %v12692_v20 = vcombine.low %v616_v7, %v624_v8 }
  0xc6   :  { %v384_v11 = vld [vmem:[#allocation9 + $0x440] sm:$0xff]  ;;  %6521 = vmatpush1.bf16.msra.mxu1 %v12436_v17  ;;  %v249_v17 = vld [vmem:[#allocation9 + $0x8] sm:$0xff] }
  0xc7   :  { %v632_v14 = vld [vmem:[#allocation9 + $0xc00] sm:$0xff]  ;;  %v12453_v21 = vcombine.high %v376_v10, %v384_v11  ;;  %6561 = vmatprep.subr.bf16.mxu0 %v12693_v16  ;;  %v12452_v25 = vcombine.low %v376_v10, %v384_v11 }
  0xc8   :  { %v640_v15 = vld [vmem:[#allocation9 + $0xc40] sm:$0xff]  ;;  %6562 = vmatpush1.bf16.msra.mxu0 %v12692_v20 }
  0xc9   :  { %v392_v18 = vld [vmem:[#allocation9 + $0x480] sm:$0xff]  ;;  %v12709_v24 = vcombine.high %v632_v14, %v640_v15  ;;  %6522 = vmatprep.subr.bf16.mxu1 %v12453_v21  ;;  %v12708_v28 = vcombine.low %v632_v14, %v640_v15 }
  0xca   :  { %v400_v19 = vld [vmem:[#allocation9 + $0x4c0] sm:$0xff]  ;;  %6523 = vmatpush1.bf16.msra.mxu1 %v12452_v25 }
  0xcb   :  { %v648_v22 = vld [vmem:[#allocation9 + $0xc80] sm:$0xff]  ;;  %v12469_v29 = vcombine.high %v392_v18, %v400_v19  ;;  %6563 = vmatprep.subr.bf16.mxu0 %v12709_v24  ;;  %v12468_v33 = vcombine.low %v392_v18, %v400_v19  ;;  %v257_v19 = vld [vmem:[#allocation9 + $0x48] sm:$0xff] }
  0xcc   :  { %v656_v23 = vld [vmem:[#allocation9 + $0xcc0] sm:$0xff]  ;;  %6564 = vmatpush1.bf16.msra.mxu0 %v12708_v28  ;;  %v12326_v21 = vcombine.low %v249_v17, %v257_v19 }
  0xcd   :  { %v408_v26 = vld [vmem:[#allocation9 + $0x500] sm:$0xff]  ;;  %v12725_v32 = vcombine.high %v648_v22, %v656_v23  ;;  %6524 = vmatprep.subr.bf16.mxu1 %v12469_v29  ;;  %v12724_v36 = vcombine.low %v648_v22, %v656_v23  ;;  %v12327_v22 = vcombine.high %v249_v17, %v257_v19  ;;  %v321_v17 = vld [vmem:[#allocation9 + $0x248] sm:$0xff] }
  0xce   :  { %v416_v27 = vld [vmem:[#allocation9 + $0x540] sm:$0xff]  ;;  %6525 = vmatpush1.bf16.msra.mxu1 %v12468_v33  ;;  %v162_v33 = vld [vmem:[#allocation7 + $0x18] sm:$0xff] }
  0xcf   :  { %v664_v30 = vld [vmem:[#allocation9 + $0xd00] sm:$0xff]  ;;  %v12485_v37 = vcombine.high %v408_v26, %v416_v27  ;;  %6565 = vmatprep.subr.bf16.mxu0 %v12725_v32  ;;  %v12484_v41 = vcombine.low %v408_v26, %v416_v27  ;;  %v161_v32 = vld [vmem:[#allocation7 + $0x10] sm:$0xff] }
  0xd0   :  { %v672_v31 = vld [vmem:[#allocation9 + $0xd40] sm:$0xff]  ;;  %6566 = vmatpush1.bf16.msra.mxu0 %v12724_v36 }
  0xd1   :  { %v424_v34 = vld [vmem:[#allocation9 + $0x580] sm:$0xff]  ;;  %v12741_v40 = vcombine.high %v664_v30, %v672_v31  ;;  %6526 = vmatprep.subr.bf16.mxu1 %v12485_v37  ;;  %v12740_v44 = vcombine.low %v664_v30, %v672_v31  ;;  %v160_v31 = vld [vmem:[#allocation7 + $0x8] sm:$0xff] }
  0xd2   :  { %v432_v35 = vld [vmem:[#allocation9 + $0x5c0] sm:$0xff]  ;;  %6527 = vmatpush1.bf16.msra.mxu1 %v12484_v41 }
  0xd3   :  { %v680_v38 = vld [vmem:[#allocation9 + $0xd80] sm:$0xff]  ;;  %v12501_v45 = vcombine.high %v424_v34, %v432_v35  ;;  %6567 = vmatprep.subr.bf16.mxu0 %v12741_v40  ;;  %v12500_v49 = vcombine.low %v424_v34, %v432_v35  ;;  %v164_v34 = vld [vmem:[#allocation7 + $0x28] sm:$0xff] }
  0xd4   :  { %v688_v39 = vld [vmem:[#allocation9 + $0xdc0] sm:$0xff]  ;;  %6568 = vmatpush1.bf16.msra.mxu0 %v12740_v44 }
  0xd5   :  { %v440_v42 = vld [vmem:[#allocation9 + $0x600] sm:$0xff]  ;;  %v12757_v48 = vcombine.high %v680_v38, %v688_v39  ;;  %6528 = vmatprep.subr.bf16.mxu1 %v12501_v45  ;;  %v12756_v50 = vcombine.low %v680_v38, %v688_v39 }
  0xd6   :  { %v448_v43 = vld [vmem:[#allocation9 + $0x640] sm:$0xff]  ;;  %6529 = vmatpush1.bf16.msra.mxu1 %v12500_v49 }
  0xd7   :  { %v696_v46 = vld [vmem:[#allocation9 + $0xe00] sm:$0xff]  ;;  %v12517_v51 = vcombine.high %v440_v42, %v448_v43  ;;  %6569 = vmatprep.subr.bf16.mxu0 %v12757_v48  ;;  %v12516_v53 = vcombine.low %v440_v42, %v448_v43  ;;  %v265_v43 = vld [vmem:[#allocation9 + $0x88] sm:$0xff]  ;;  %v14991_v48 = vld [vmem:[#allocation4 + $0x10] sm:$0xff] }
  0xd8   :  { %v704_v47 = vld [vmem:[#allocation9 + $0xe40] sm:$0xff]  ;;  %6570 = vmatpush1.bf16.msra.mxu0 %v12756_v50  ;;  %v14992_v50 = vld [vmem:[#allocation4 + $0x18] sm:$0xff] }
  0xd9   :  { %v12773_v52 = vcombine.high %v696_v46, %v704_v47  ;;  %6530 = vmatprep.subr.bf16.mxu1 %v12517_v51  ;;  %v12772_v54 = vcombine.low %v696_v46, %v704_v47  ;;  %v456_v55 = vld [vmem:[#allocation9 + $0x680] sm:$0xff]  ;;  %v14990_v46 = vld [vmem:[#allocation4 + $0x8] sm:$0xff] }
  0xda   :  { %6531 = vmatpush1.bf16.msra.mxu1 %v12516_v53  ;;  %v464_v56 = vld [vmem:[#allocation9 + $0x6c0] sm:$0xff]  ;;  %v14993_v53 = vld [vmem:[#allocation4 + $0x28] sm:$0xff] }
  0xdb   :  { %6571 = vmatprep.subr.bf16.mxu0 %v12773_v52  ;;  %v712_v57 = vld [vmem:[#allocation9 + $0xe80] sm:$0xff]  ;;  %v12533_v58 = vcombine.high %v456_v55, %v464_v56  ;;  %v12532_v61 = vcombine.low %v456_v55, %v464_v56  ;;  %v273_v52 = vld [vmem:[#allocation9 + $0xc8] sm:$0xff] }
  0xdc   :  { %6572 = vmatpush1.bf16.msra.mxu0 %v12772_v54  ;;  %v720_v59 = vld [vmem:[#allocation9 + $0xec0] sm:$0xff] }
  0xdd   :  { %v12789_v60 = vcombine.high %v712_v57, %v720_v59  ;;  %v12788_v62 = vcombine.low %v712_v57, %v720_v59  ;;  %6532 = vmatprep.subr.bf16.mxu1 %v12533_v58  ;;  %v472_v63 = vld [vmem:[#allocation9 + $0x700] sm:$0xff] }
  0xde   :  { %6533 = vmatpush1.bf16.msra.mxu1 %v12532_v61  ;;  %v480_v0 = vld [vmem:[#allocation9 + $0x740] sm:$0xff]  ;;  %v281_v61 = vld [vmem:[#allocation9 + $0x108] sm:$0xff] }
  0xdf   :  { %6573 = vmatprep.subr.bf16.mxu0 %v12789_v60  ;;  %v728_v1 = vld [vmem:[#allocation9 + $0xf00] sm:$0xff]  ;;  %v12549_v2 = vcombine.high %v472_v63, %v480_v0  ;;  %v12548_v5 = vcombine.low %v472_v63, %v480_v0  ;;  %v12343_v63 = vcombine.high %v265_v43, %v273_v52  ;;  %v289_v0 = vld [vmem:[#allocation9 + $0x148] sm:$0xff] }
  0xe0   :  { %6574 = vmatpush1.bf16.msra.mxu0 %v12788_v62  ;;  %v736_v3 = vld [vmem:[#allocation9 + $0xf40] sm:$0xff] }
  0xe1   :  { %v12805_v4 = vcombine.high %v728_v1, %v736_v3  ;;  %v12804_v6 = vcombine.low %v728_v1, %v736_v3  ;;  %6534 = vmatprep.subr.bf16.mxu1 %v12549_v2  ;;  %v488_v7 = vld [vmem:[#allocation9 + $0x780] sm:$0xff]  ;;  %v12342_v3 = vcombine.low %v265_v43, %v273_v52 }
  0xe2   :  { %6535 = vmatpush1.bf16.msra.mxu1 %v12548_v5  ;;  %v496_v8 = vld [vmem:[#allocation9 + $0x7c0] sm:$0xff] }
  0xe3   :  { %6575 = vmatprep.subr.bf16.mxu0 %v12805_v4  ;;  %v744_v9 = vld [vmem:[#allocation9 + $0xf80] sm:$0xff]  ;;  %v12565_v10 = vcombine.high %v488_v7, %v496_v8  ;;  %v12564_v13 = vcombine.low %v488_v7, %v496_v8  ;;  %v297_v8 = vld [vmem:[#allocation9 + $0x188] sm:$0xff] }
  0xe4   :  { %6576 = vmatpush1.bf16.msra.mxu0 %v12804_v6  ;;  %v752_v11 = vld [vmem:[#allocation9 + $0xfc0] sm:$0xff]  ;;  %v12359_v6 = vcombine.high %v281_v61, %v289_v0 }
  0xe5   :  { %v12821_v12 = vcombine.high %v744_v9, %v752_v11  ;;  %v12820_v14 = vcombine.low %v744_v9, %v752_v11  ;;  %6536 = vmatprep.subr.bf16.mxu1 %v12565_v10  ;;  %v760_v15 = vld [vmem:[#allocation9 + $0x1000] sm:$0xff]  ;;  %v305_v9 = vld [vmem:[#allocation9 + $0x1c8] sm:$0xff]  ;;  %v12358_v11 = vcombine.low %v281_v61, %v289_v0 }
  0xe6   :  { %6537 = vmatpush1.bf16.msra.mxu1 %v12564_v13  ;;  %v768_v16 = vld [vmem:[#allocation9 + $0x1040] sm:$0xff]  ;;  %v12375_v13 = vcombine.high %v297_v8, %v305_v9  ;;  %v12374_v19 = vcombine.low %v297_v8, %v305_v9  ;;  %v393_v61 = vld [vmem:[#allocation9 + $0x488] sm:$0xff] }
  0xe7   :  { %6577 = vmatprep.subr.bf16.mxu0 %v12821_v12  ;;  %v12837_v18 = vcombine.high %v760_v15, %v768_v16  ;;  %v12836_v20 = vcombine.low %v760_v15, %v768_v16  ;;  %6670 = vmatprep.subr.bf16.mxu1 %v12327_v22  ;;  %v159_v30 = vld [vmem:[#allocation7] sm:$0xff]  ;;  %v313_v16 = vld [vmem:[#allocation9 + $0x208] sm:$0xff] }
  0xe8   :  { %6578 = vmatpush1.bf16.msra.mxu0 %v12820_v14  ;;  %v776_v41 = vld [vmem:[#allocation9 + $0x1080] sm:$0xff] }
  0xe9   :  { %6588 = vmatprep.subr.bf16.mxu0 %v12837_v18  ;;  %v784_v42 = vld [vmem:[#allocation9 + $0x10c0] sm:$0xff] }
  0xea   :  { %v14989_v44 = vld [vmem:[#allocation4] sm:$0xff]  ;;  %v12853_v62 = vcombine.high %v776_v41, %v784_v42  ;;  %v12852_v2 = vcombine.low %v776_v41, %v784_v42  ;;  %v361_v41 = vld [vmem:[#allocation9 + $0x388] sm:$0xff] }
  0xeb   :  { %v792_v59 = vld [vmem:[#allocation9 + $0x1100] sm:$0xff]  ;;  %v369_v42 = vld [vmem:[#allocation9 + $0x3c8] sm:$0xff] }
  0xec   :  { %v800_v60 = vld [vmem:[#allocation9 + $0x1140] sm:$0xff]  ;;  %v12438_v52 = vcombine.low %v361_v41, %v369_v42 }
  0xed   :  { %v808_v4 = vld [vmem:[#allocation9 + $0x1180] sm:$0xff]  ;;  %v12869_v5 = vcombine.high %v792_v59, %v800_v60  ;;  %v12868_v10 = vcombine.low %v792_v59, %v800_v60 }
  0xee   :  { %v816_v7 = vld [vmem:[#allocation9 + $0x11c0] sm:$0xff] }
  0xef   :  { %v12885_v12 = vcombine.high %v808_v4, %v816_v7  ;;  %v824_v14 = vld [vmem:[#allocation9 + $0x1200] sm:$0xff]  ;;  %v12884_v18 = vcombine.low %v808_v4, %v816_v7  ;;  %v417_v7 = vld [vmem:[#allocation9 + $0x548] sm:$0xff] }
  0xf0   :  { %v832_v15 = vld [vmem:[#allocation9 + $0x1240] sm:$0xff] }
  0xf1   :  { %v840_v22 = vld [vmem:[#allocation9 + $0x1280] sm:$0xff] }
  0xf2   :  { %v904_v59 = vld [vmem:[#allocation9 + $0x1480] sm:$0xff] }
  0xf3   :  { %v912_v60 = vld [vmem:[#allocation9 + $0x14c0] sm:$0xff] }
  0xf4   :  { %v920_v4 = vld [vmem:[#allocation9 + $0x1500] sm:$0xff]  ;;  %v12980_v8 = vcombine.low %v904_v59, %v912_v60 }
 0x13e   :  { %v175_v23 = vpop.xlane.xlu0 %174 }
 0x13f   :  { %v176_v24 = vrot.slane %v175_v23, 4 }
 0x141   :  { %v177_v25 = vadd.f32 %v176_v24, %v175_v23  ;;  %v848_v23 = vld [vmem:[#allocation9 + $0x12c0] sm:$0xff]  ;;  %v329_v24 = vld [vmem:[#allocation9 + $0x288] sm:$0xff] }
 0x143   :  { %v178_v26 = vrot.slane %v177_v25, 2 }
 0x145   :  { %v179_v27 = vadd.f32 %v178_v26, %v177_v25  ;;  %v337_v25 = vld [vmem:[#allocation9 + $0x2c8] sm:$0xff]  ;;  %v12900_v26 = vcombine.low %v824_v14, %v832_v15 }
 0x147   :  { %v180_v28 = vrot.slane %v179_v27, 1 }
 0x149   :  { %v181_v29 = vadd.f32 %v180_v28, %v179_v27  ;;  %v12390_v27 = vcombine.low %v313_v16, %v321_v17  ;;  %v12917_v28 = vcombine.high %v840_v22, %v848_v23 }
 0x14b   :  { %14091 = vpush %v181_v29  ;;  %v12407_v29 = vcombine.high %v329_v24, %v337_v25 }
 0x17c   :  { %s14092_s9 = spop %14091 }
 0x17d   :  { %s185_s28 = smul.f32 0.00012207031, %s14092_s9 }
 0x17f   :  { %s186_s29 = smul.f32 0.1, %s185_s28 }
 0x181   :  { %v15417_v35 = vstv %s186_s29 }
 0x182   :  { %v188_v36 = vmul.f32 %v15417_v35, %v159_v30  ;;  %v189_v37 = vmul.f32 %v15417_v35, %v160_v31  ;;  %v190_v38 = vmul.f32 %v15417_v35, %v161_v32  ;;  %v191_v39 = vmul.f32 %v15417_v35, %v162_v33  ;;  %v856_v30 = vld [vmem:[#allocation9 + $0x1300] sm:$0xff]  ;;  %v345_v32 = vld [vmem:[#allocation9 + $0x308] sm:$0xff] }
 0x183   :  { %v193_v40 = vmul.f32 %v15417_v35, %v164_v34  ;;  %v864_v31 = vld [vmem:[#allocation9 + $0x1340] sm:$0xff]  ;;  %v353_v33 = vld [vmem:[#allocation9 + $0x348] sm:$0xff]  ;;  %v12916_v34 = vcombine.low %v840_v22, %v848_v23 }
 0x184   :  { %v196_v45 = vadd.f32 %v14989_v44, %v188_v36  ;;  %v197_v47 = vadd.f32 %v14990_v46, %v189_v37  ;;  %v198_v49 = vadd.f32 %v14991_v48, %v190_v38  ;;  %v199_v51 = vadd.f32 %v14992_v50, %v191_v39  ;;  %v872_v39 = vld [vmem:[#allocation9 + $0x1380] sm:$0xff]  ;;  %v385_v50 = vld [vmem:[#allocation9 + $0x448] sm:$0xff] }
 0x185   :  { %v201_v54 = vadd.f32 %v14993_v53, %v193_v40  ;;  %v12406_v36 = vcombine.low %v329_v24, %v337_v25  ;;  %v12933_v37 = vcombine.high %v856_v30, %v864_v31  ;;  %v12423_v38 = vcombine.high %v345_v32, %v353_v33  ;;  %v880_v40 = vld [vmem:[#allocation9 + $0x13c0] sm:$0xff]  ;;  %v441_v22 = vld [vmem:[#allocation9 + $0x608] sm:$0xff] }
 0x186   :  { %v15424_v55 = vpack.c.bf16 %v196_v45, %v196_v45  ;;  %v15426_v56 = vpack.c.bf16 %v197_v47, %v197_v47  ;;  %v15428_v57 = vpack.c.bf16 %v198_v49, %v198_v49  ;;  %v15430_v58 = vpack.c.bf16 %v199_v51, %v199_v51  ;;  %v888_v47 = vld [vmem:[#allocation9 + $0x1400] sm:$0xff]  ;;  %v377_v49 = vld [vmem:[#allocation9 + $0x408] sm:$0xff] }
 0x187   :  { %v15434_v1 = vpack.c.bf16 %v201_v54, %v201_v54  ;;  %v12932_v43 = vcombine.low %v856_v30, %v864_v31  ;;  %v12422_v44 = vcombine.low %v345_v32, %v353_v33  ;;  %v12949_v45 = vcombine.high %v872_v39, %v880_v40  ;;  %v896_v48 = vld [vmem:[#allocation9 + $0x1440] sm:$0xff]  ;;  %v449_v23 = vld [vmem:[#allocation9 + $0x648] sm:$0xff] }
 0x188   :  { %6538 = vmatprep.mubr.bf16.mxu1 %v15426_v56  ;;  %6579 = vmatprep.mubr.bf16.mxu0 %v15430_v58  ;;  %v12439_v46 = vcombine.high %v361_v41, %v369_v42  ;;  %v12948_v51 = vcombine.low %v872_v39, %v880_v40  ;;  %v12965_v53 = vcombine.high %v888_v47, %v896_v48  ;;  %v457_v30 = vld [vmem:[#allocation9 + $0x688] sm:$0xff]  ;;  %v163_v41 = vld [vmem:[#allocation7 + $0x20] sm:$0xff] }
 0x189   :  { %6539 = vmatmul.mubr.bf16.vlgmr.msra.gmra.mrb[0].mxu1 %v15424_v55  ;;  %6580 = vmatmul.mubr.bf16.vlgmr.msra.gmra.mrb[0].mxu0 %v15428_v57  ;;  %v12455_v54 = vcombine.high %v377_v49, %v385_v50  ;;  %v12454_v0 = vcombine.low %v377_v49, %v385_v50  ;;  %v465_v31 = vld [vmem:[#allocation9 + $0x6c8] sm:$0xff]  ;;  %v12518_v33 = vcombine.low %v441_v22, %v449_v23 }
 0x18a   :  { %6589 = vmatpush1.bf16.msra.mxu0 %v12836_v20  ;;  %6671 = vmatpush1.bf16.msra.mxu1 %v12326_v21  ;;  %v12901_v20 = vcombine.high %v824_v14, %v832_v15  ;;  %v12391_v21 = vcombine.high %v313_v16, %v321_v17  ;;  %v425_v14 = vld [vmem:[#allocation9 + $0x588] sm:$0xff] }
 0x18b   :  { %6620 = vmatprep.mubr.bf16.mxu0 %v15434_v1  ;;  %6702 = vmatprep.mubr.bf16.mxu1 %v15426_v56  ;;  %v433_v15 = vld [vmem:[#allocation9 + $0x5c8] sm:$0xff] }
 0x18c   :  { %6590 = vmatprep.subr.bf16.mxu0 %v12853_v62  ;;  %6672 = vmatprep.subr.bf16.mxu1 %v12343_v63  ;;  %v401_v62 = vld [vmem:[#allocation9 + $0x4c8] sm:$0xff]  ;;  %v12964_v63 = vcombine.low %v888_v47, %v896_v48  ;;  %v12502_v25 = vcombine.low %v425_v14, %v433_v15  ;;  %v1000_v47 = vld [vmem:[#allocation9 + $0x1780] sm:$0xff] }
 0x18d   :  { %v12470_v9 = vcombine.low %v393_v61, %v401_v62  ;;  %v473_v39 = vld [vmem:[#allocation9 + $0x708] sm:$0xff]  ;;  %v1008_v48 = vld [vmem:[#allocation9 + $0x17c0] sm:$0xff] }
 0x18e   :  { %6591 = vmatpush1.bf16.msra.mxu0 %v12852_v2  ;;  %6673 = vmatpush1.bf16.msra.mxu1 %v12342_v3  ;;  %v12981_v2 = vcombine.high %v904_v59, %v912_v60  ;;  %v12471_v3 = vcombine.high %v393_v61, %v401_v62  ;;  %v481_v40 = vld [vmem:[#allocation9 + $0x748] sm:$0xff]  ;;  %v1016_v60 = vld [vmem:[#allocation9 + $0x1800] sm:$0xff] }
 0x18f   :  { %6592 = vmatprep.subr.bf16.mxu0 %v12869_v5  ;;  %6674 = vmatprep.subr.bf16.mxu1 %v12359_v6  ;;  %v928_v5 = vld [vmem:[#allocation9 + $0x1540] sm:$0xff]  ;;  %v409_v6 = vld [vmem:[#allocation9 + $0x508] sm:$0xff] }
 0x190   :  { %v12996_v16 = vcombine.low %v920_v4, %v928_v5  ;;  %v12486_v17 = vcombine.low %v409_v6, %v417_v7  ;;  %v489_v49 = vld [vmem:[#allocation9 + $0x788] sm:$0xff]  ;;  %v1024_v61 = vld [vmem:[#allocation9 + $0x1840] sm:$0xff] }
 0x191   :  { %v497_v50 = vld [vmem:[#allocation9 + $0x7c8] sm:$0xff] }
 0x192   :  { %6593 = vmatpush1.bf16.msra.mxu0 %v12868_v10  ;;  %6675 = vmatpush1.bf16.msra.mxu1 %v12358_v11  ;;  %v12997_v10 = vcombine.high %v920_v4, %v928_v5  ;;  %v12487_v11 = vcombine.high %v409_v6, %v417_v7  ;;  %v12567_v59 = vcombine.high %v489_v49, %v497_v50  ;;  %v14994_v4 = vld [vmem:[#allocation4 + $0x20] sm:$0xff] }
 0x193   :  { %6594 = vmatprep.subr.bf16.mxu0 %v12885_v12  ;;  %6676 = vmatprep.subr.bf16.mxu1 %v12375_v13  ;;  %v936_v12 = vld [vmem:[#allocation9 + $0x1580] sm:$0xff]  ;;  %v13093_v6 = vcombine.high %v1016_v60, %v1024_v61 }
 0x194   :  { %v944_v13 = vld [vmem:[#allocation9 + $0x15c0] sm:$0xff] }
 0x195   :  { %v13012_v24 = vcombine.low %v936_v12, %v944_v13 }
 0x196   :  { %6595 = vmatpush1.bf16.msra.mxu0 %v12884_v18  ;;  %6677 = vmatpush1.bf16.msra.mxu1 %v12374_v19  ;;  %v13013_v18 = vcombine.high %v936_v12, %v944_v13  ;;  %v12503_v19 = vcombine.high %v425_v14, %v433_v15  ;;  %v521_v12 = vld [vmem:[#allocation9 + $0x888] sm:$0xff]  ;;  %v13092_v14 = vcombine.low %v1016_v60, %v1024_v61 }
 0x197   :  { %6596 = vmatprep.subr.bf16.mxu0 %v12901_v20  ;;  %6678 = vmatprep.subr.bf16.mxu1 %v12391_v21  ;;  %v952_v20 = vld [vmem:[#allocation9 + $0x1600] sm:$0xff]  ;;  %v529_v13 = vld [vmem:[#allocation9 + $0x8c8] sm:$0xff] }
 0x198   :  { %v960_v21 = vld [vmem:[#allocation9 + $0x1640] sm:$0xff]  ;;  %v609_v60 = vld [vmem:[#allocation9 + $0xb48] sm:$0xff] }
 0x199   :  { %v13028_v32 = vcombine.low %v952_v20, %v960_v21 }
 0x19a   :  { %6597 = vmatpush1.bf16.msra.mxu0 %v12900_v26  ;;  %6679 = vmatpush1.bf16.msra.mxu1 %v12390_v27  ;;  %v13029_v26 = vcombine.high %v952_v20, %v960_v21  ;;  %v12519_v27 = vcombine.high %v441_v22, %v449_v23  ;;  %v1048_v20 = vld [vmem:[#allocation9 + $0x1900] sm:$0xff]  ;;  %v537_v22 = vld [vmem:[#allocation9 + $0x908] sm:$0xff] }
 0x19b   :  { %6598 = vmatprep.subr.bf16.mxu0 %v12917_v28  ;;  %6680 = vmatprep.subr.bf16.mxu1 %v12407_v29  ;;  %v968_v28 = vld [vmem:[#allocation9 + $0x1680] sm:$0xff]  ;;  %v545_v23 = vld [vmem:[#allocation9 + $0x948] sm:$0xff] }
 0x19c   :  { %v976_v29 = vld [vmem:[#allocation9 + $0x16c0] sm:$0xff] }
 0x19d   :  { %v13044_v42 = vcombine.low %v968_v28, %v976_v29  ;;  %v1056_v21 = vld [vmem:[#allocation9 + $0x1940] sm:$0xff] }
 0x19e   :  { %6599 = vmatpush1.bf16.msra.mxu0 %v12916_v34  ;;  %6681 = vmatpush1.bf16.msra.mxu1 %v12406_v36  ;;  %v13045_v34 = vcombine.high %v968_v28, %v976_v29  ;;  %v12535_v36 = vcombine.high %v457_v30, %v465_v31  ;;  %v1064_v28 = vld [vmem:[#allocation9 + $0x1980] sm:$0xff] }
 0x19f   :  { %6600 = vmatprep.subr.bf16.mxu0 %v12933_v37  ;;  %6682 = vmatprep.subr.bf16.mxu1 %v12423_v38  ;;  %v984_v37 = vld [vmem:[#allocation9 + $0x1700] sm:$0xff] }
 0x1a0   :  { %v992_v38 = vld [vmem:[#allocation9 + $0x1740] sm:$0xff] }
 0x1a1   :  { %v1072_v29 = vld [vmem:[#allocation9 + $0x19c0] sm:$0xff] }
 0x1a2   :  { %6601 = vmatpush1.bf16.msra.mxu0 %v12932_v43  ;;  %6683 = vmatpush1.bf16.msra.mxu1 %v12422_v44  ;;  %v12534_v43 = vcombine.low %v457_v30, %v465_v31  ;;  %v166_v44 = vld [vmem:[#allocation7 + $0x38] sm:$0xff]  ;;  %v553_v30 = vld [vmem:[#allocation9 + $0x988] sm:$0xff] }
 0x1a3   :  { %6602 = vmatprep.subr.bf16.mxu0 %v12949_v45  ;;  %6684 = vmatprep.subr.bf16.mxu1 %v12439_v46  ;;  %v13061_v45 = vcombine.high %v984_v37, %v992_v38  ;;  %v12551_v46 = vcombine.high %v473_v39, %v481_v40  ;;  %v195_v62 = vmul.f32 %v15417_v35, %v166_v44  ;;  %v561_v31 = vld [vmem:[#allocation9 + $0x9c8] sm:$0xff] }
 0x1a6   :  { %6603 = vmatpush1.bf16.msra.mxu0 %v12948_v51  ;;  %6685 = vmatpush1.bf16.msra.mxu1 %v12438_v52  ;;  %v13060_v51 = vcombine.low %v984_v37, %v992_v38  ;;  %v12550_v52 = vcombine.low %v473_v39, %v481_v40  ;;  %v1080_v37 = vld [vmem:[#allocation9 + $0x1a00] sm:$0xff]  ;;  %v569_v39 = vld [vmem:[#allocation9 + $0xa08] sm:$0xff] }
 0x1a7   :  { %6604 = vmatprep.subr.bf16.mxu0 %v12965_v53  ;;  %6686 = vmatprep.subr.bf16.mxu1 %v12455_v54  ;;  %v192_v53 = vmul.f32 %v15417_v35, %v163_v41  ;;  %v13077_v54 = vcombine.high %v1000_v47, %v1008_v48  ;;  %v1088_v38 = vld [vmem:[#allocation9 + $0x1a40] sm:$0xff]  ;;  %v577_v40 = vld [vmem:[#allocation9 + $0xa48] sm:$0xff]  ;;  %v13140_v41 = vcombine.low %v1064_v28, %v1072_v29 }
 0x1a8   :  { %v12647_v44 = vcombine.high %v569_v39, %v577_v40 }
 0x1a9   :  { %v200_v5 = vadd.f32 %v14994_v4, %v192_v53  ;;  %v1112_v53 = vld [vmem:[#allocation9 + $0x1b00] sm:$0xff]  ;;  %v617_v4 = vld [vmem:[#allocation9 + $0xb88] sm:$0xff] }
 0x1aa   :  { %6605 = vmatpush1.bf16.msra.mxu0 %v12964_v63  ;;  %6687 = vmatpush1.bf16.msra.mxu1 %v12454_v0  ;;  %v505_v63 = vld [vmem:[#allocation9 + $0x808] sm:$0xff] }
 0x1ab   :  { %6606 = vmatprep.subr.bf16.mxu0 %v12981_v2  ;;  %6688 = vmatprep.subr.bf16.mxu1 %v12471_v3  ;;  %v513_v0 = vld [vmem:[#allocation9 + $0x848] sm:$0xff]  ;;  %v13076_v2 = vcombine.low %v1000_v47, %v1008_v48  ;;  %v12566_v3 = vcombine.low %v489_v49, %v497_v50  ;;  %v15442_v15 = vpack.c.bf16 %v200_v5, %v200_v5 }
 0x1ac   :  { %v12583_v7 = vcombine.high %v505_v63, %v513_v0  ;;  %v585_v47 = vld [vmem:[#allocation9 + $0xa88] sm:$0xff]  ;;  %v13156_v49 = vcombine.low %v1080_v37, %v1088_v38  ;;  %v12646_v50 = vcombine.low %v569_v39, %v577_v40 }
 0x1ad   :  { %v593_v48 = vld [vmem:[#allocation9 + $0xac8] sm:$0xff] }
 0x1ae   :  { %6607 = vmatpush1.bf16.msra.mxu0 %v12980_v8  ;;  %6689 = vmatpush1.bf16.msra.mxu1 %v12470_v9  ;;  %v1032_v8 = vld [vmem:[#allocation9 + $0x1880] sm:$0xff]  ;;  %v625_v5 = vld [vmem:[#allocation9 + $0xbc8] sm:$0xff] }
 0x1af   :  { %6608 = vmatprep.subr.bf16.mxu0 %v12997_v10  ;;  %6690 = vmatprep.subr.bf16.mxu1 %v12487_v11  ;;  %v1040_v9 = vld [vmem:[#allocation9 + $0x18c0] sm:$0xff]  ;;  %v14995_v10 = vld [vmem:[#allocation4 + $0x38] sm:$0xff]  ;;  %v681_v39 = vld [vmem:[#allocation9 + $0xd88] sm:$0xff] }
 0x1b0   :  { %v203_v11 = vadd.f32 %v14995_v10, %v195_v62  ;;  %v12662_v62 = vcombine.low %v585_v47, %v593_v48  ;;  %v1144_v10 = vld [vmem:[#allocation9 + $0x1c00] sm:$0xff]  ;;  %v689_v40 = vld [vmem:[#allocation9 + $0xdc8] sm:$0xff] }
 0x1b2   :  { %6609 = vmatpush1.bf16.msra.mxu0 %v12996_v16  ;;  %6691 = vmatpush1.bf16.msra.mxu1 %v12486_v17  ;;  %v12582_v16 = vcombine.low %v505_v63, %v513_v0  ;;  %v15444_v17 = vpack.c.bf16 %v203_v11, %v203_v11  ;;  %v1152_v11 = vld [vmem:[#allocation9 + $0x1c40] sm:$0xff] }
 0x1b3   :  { %6610 = vmatprep.subr.bf16.mxu0 %v13013_v18  ;;  %6692 = vmatprep.subr.bf16.mxu1 %v12503_v19  ;;  %v13109_v18 = vcombine.high %v1032_v8, %v1040_v9  ;;  %v12599_v19 = vcombine.high %v521_v12, %v529_v13 }
 0x1b6   :  { %6611 = vmatpush1.bf16.msra.mxu0 %v13012_v24  ;;  %6693 = vmatpush1.bf16.msra.mxu1 %v12502_v25  ;;  %v13108_v24 = vcombine.low %v1032_v8, %v1040_v9  ;;  %v12598_v25 = vcombine.low %v521_v12, %v529_v13  ;;  %v12695_v9 = vcombine.high %v617_v4, %v625_v5  ;;  %v633_v12 = vld [vmem:[#allocation9 + $0xc08] sm:$0xff] }
 0x1b7   :  { %6612 = vmatprep.subr.bf16.mxu0 %v13029_v26  ;;  %6694 = vmatprep.subr.bf16.mxu1 %v12519_v27  ;;  %v13125_v26 = vcombine.high %v1048_v20, %v1056_v21  ;;  %v12615_v27 = vcombine.high %v537_v22, %v545_v23  ;;  %v641_v13 = vld [vmem:[#allocation9 + $0xc48] sm:$0xff] }
 0x1ba   :  { %6613 = vmatpush1.bf16.msra.mxu0 %v13028_v32  ;;  %6695 = vmatpush1.bf16.msra.mxu1 %v12518_v33  ;;  %v13124_v32 = vcombine.low %v1048_v20, %v1056_v21  ;;  %v12614_v33 = vcombine.low %v537_v22, %v545_v23  ;;  %v1160_v20 = vld [vmem:[#allocation9 + $0x1c80] sm:$0xff]  ;;  %v649_v22 = vld [vmem:[#allocation9 + $0xc88] sm:$0xff] }
 0x1bb   :  { %6614 = vmatprep.subr.bf16.mxu0 %v13045_v34  ;;  %6696 = vmatprep.subr.bf16.mxu1 %v12535_v36  ;;  %v13141_v34 = vcombine.high %v1064_v28, %v1072_v29  ;;  %v12631_v36 = vcombine.high %v553_v30, %v561_v31  ;;  %v1168_v21 = vld [vmem:[#allocation9 + $0x1cc0] sm:$0xff]  ;;  %v657_v23 = vld [vmem:[#allocation9 + $0xcc8] sm:$0xff] }
 0x1bc   :  { %v1176_v28 = vld [vmem:[#allocation9 + $0x1d00] sm:$0xff] }
 0x1bd   :  { %v1184_v29 = vld [vmem:[#allocation9 + $0x1d40] sm:$0xff] }
 0x1be   :  { %6615 = vmatpush1.bf16.msra.mxu0 %v13044_v42  ;;  %6697 = vmatpush1.bf16.msra.mxu1 %v12534_v43  ;;  %v12630_v42 = vcombine.low %v553_v30, %v561_v31  ;;  %v13157_v43 = vcombine.high %v1080_v37, %v1088_v38  ;;  %v665_v30 = vld [vmem:[#allocation9 + $0xd08] sm:$0xff]  ;;  %v1192_v37 = vld [vmem:[#allocation9 + $0x1d80] sm:$0xff] }
 0x1bf   :  { %6616 = vmatprep.subr.bf16.mxu0 %v13061_v45  ;;  %6698 = vmatprep.subr.bf16.mxu1 %v12551_v46  ;;  %v1096_v45 = vld [vmem:[#allocation9 + $0x1a80] sm:$0xff]  ;;  %v673_v31 = vld [vmem:[#allocation9 + $0xd48] sm:$0xff] }
 0x1c0   :  { %v1104_v46 = vld [vmem:[#allocation9 + $0x1ac0] sm:$0xff] }
 0x1c1   :  { %v13172_v61 = vcombine.low %v1096_v45, %v1104_v46  ;;  %v1200_v38 = vld [vmem:[#allocation9 + $0x1dc0] sm:$0xff] }
 0x1c2   :  { %6617 = vmatpush1.bf16.msra.mxu0 %v13060_v51  ;;  %6699 = vmatpush1.bf16.msra.mxu1 %v12550_v52  ;;  %v13173_v51 = vcombine.high %v1096_v45, %v1104_v46  ;;  %v12663_v52 = vcombine.high %v585_v47, %v593_v48  ;;  %v1208_v45 = vld [vmem:[#allocation9 + $0x1e00] sm:$0xff]  ;;  %v697_v47 = vld [vmem:[#allocation9 + $0xe08] sm:$0xff] }
 0x1c3   :  { %6618 = vmatprep.subr.bf16.mxu0 %v13077_v54  ;;  %6700 = vmatprep.subr.bf16.mxu1 %v12567_v59  ;;  %v1120_v54 = vld [vmem:[#allocation9 + $0x1b40] sm:$0xff]  ;;  %v601_v59 = vld [vmem:[#allocation9 + $0xb08] sm:$0xff] }
 0x1c4   :  { %v13189_v63 = vcombine.high %v1112_v53, %v1120_v54  ;;  %v12679_v0 = vcombine.high %v601_v59, %v609_v60  ;;  %v1216_v46 = vld [vmem:[#allocation9 + $0x1e40] sm:$0xff]  ;;  %v705_v48 = vld [vmem:[#allocation9 + $0xe48] sm:$0xff] }
 0x1c6   :  { %6619 = vmatpush1.bf16.msra.mxu0 %v13076_v2  ;;  %6701 = vmatpush1.bf16.msra.mxu1 %v12566_v3  ;;  %v1128_v2 = vld [vmem:[#allocation9 + $0x1b80] sm:$0xff] }
 0x1c7   :  { %6629 = vmatprep.subr.bf16.mxu0 %v13093_v6  ;;  %6711 = vmatprep.subr.bf16.mxu1 %v12583_v7  ;;  %v1136_v3 = vld [vmem:[#allocation9 + $0x1bc0] sm:$0xff]  ;;  %v13188_v6 = vcombine.low %v1112_v53, %v1120_v54  ;;  %v12678_v7 = vcombine.low %v601_v59, %v609_v60  ;;  %v713_v59 = vld [vmem:[#allocation9 + $0xe88] sm:$0xff] }
 0x1c8   :  { %v13205_v8 = vcombine.high %v1128_v2, %v1136_v3  ;;  %v1224_v53 = vld [vmem:[#allocation9 + $0x1e80] sm:$0xff]  ;;  %v721_v60 = vld [vmem:[#allocation9 + $0xec8] sm:$0xff] }
 0x1c9   :  { %6621 = vmatmul.mubr.bf16.vlgmr.msra.gmra.mrb[0].mxu0 %v15442_v15  ;;  %6703 = vmatmul.mubr.bf16.vlgmr.msra.gmra.mrb[4].mxu1 %v15424_v55  ;;  %v1232_v54 = vld [vmem:[#allocation9 + $0x1ec0] sm:$0xff] }
 0x1ca   :  { %6630 = vmatpush1.bf16.msra.mxu0 %v13092_v14  ;;  %6661 = vmatprep.mubr.bf16.mxu0 %v15444_v17  ;;  %v13204_v14 = vcombine.low %v1128_v2, %v1136_v3  ;;  %v1240_v2 = vld [vmem:[#allocation9 + $0x1f00] sm:$0xff] }
 0x1cb   :  { %6712 = vmatpush1.bf16.msra.mxu1 %v12582_v16  ;;  %6743 = vmatprep.mubr.bf16.mxu1 %v15430_v58  ;;  %v12694_v16 = vcombine.low %v617_v4, %v625_v5  ;;  %v1248_v3 = vld [vmem:[#allocation9 + $0x1f40] sm:$0xff]  ;;  %v729_v4 = vld [vmem:[#allocation9 + $0xf08] sm:$0xff] }
 0x1cc   :  { %6631 = vmatprep.subr.bf16.mxu0 %v13109_v18  ;;  %6713 = vmatprep.subr.bf16.mxu1 %v12599_v19  ;;  %v13221_v18 = vcombine.high %v1144_v10, %v1152_v11  ;;  %v12711_v19 = vcombine.high %v633_v12, %v641_v13  ;;  %v737_v5 = vld [vmem:[#allocation9 + $0xf48] sm:$0xff] }
 0x1ce   :  { %6632 = vmatpush1.bf16.msra.mxu0 %v13108_v24  ;;  %v13220_v24 = vcombine.low %v1144_v10, %v1152_v11  ;;  %v12807_v10 = vcombine.high %v729_v4, %v737_v5  ;;  %v1256_v11 = vld [vmem:[#allocation9 + $0x1f80] sm:$0xff] }
 0x1cf   :  { %6714 = vmatpush1.bf16.msra.mxu1 %v12598_v25  ;;  %6633 = vmatprep.subr.bf16.mxu0 %v13125_v26  ;;  %v12710_v25 = vcombine.low %v633_v12, %v641_v13  ;;  %v13237_v26 = vcombine.high %v1160_v20, %v1168_v21  ;;  %v1264_v12 = vld [vmem:[#allocation9 + $0x1fc0] sm:$0xff]  ;;  %v745_v13 = vld [vmem:[#allocation9 + $0xf88] sm:$0xff] }
 0x1d0   :  { %6715 = vmatprep.subr.bf16.mxu1 %v12615_v27  ;;  %v12727_v27 = vcombine.high %v649_v22, %v657_v23 }
 0x1d2   :  { %6634 = vmatpush1.bf16.msra.mxu0 %v13124_v32  ;;  %v13236_v32 = vcombine.low %v1160_v20, %v1168_v21  ;;  %v13333_v20 = vcombine.high %v1256_v11, %v1264_v12 }
 0x1d3   :  { %6716 = vmatpush1.bf16.msra.mxu1 %v12614_v33  ;;  %6635 = vmatprep.subr.bf16.mxu0 %v13141_v34  ;;  %v12726_v33 = vcombine.low %v649_v22, %v657_v23  ;;  %v13253_v34 = vcombine.high %v1176_v28, %v1184_v29  ;;  %v250_v22 = vld [vmem:[#allocation9 + $0x10] sm:$0xff] }
 0x1d4   :  { %6717 = vmatprep.subr.bf16.mxu1 %v12631_v36  ;;  %v12743_v36 = vcombine.high %v665_v30, %v673_v31  ;;  %v258_v23 = vld [vmem:[#allocation9 + $0x50] sm:$0xff] }
 0x1d6   :  { %6636 = vmatpush1.bf16.msra.mxu0 %v13140_v41  ;;  %v13252_v41 = vcombine.low %v1176_v28, %v1184_v29 }
 0x1d7   :  { %6718 = vmatpush1.bf16.msra.mxu1 %v12630_v42  ;;  %6637 = vmatprep.subr.bf16.mxu0 %v13157_v43  ;;  %v12742_v42 = vcombine.low %v665_v30, %v673_v31  ;;  %v13269_v43 = vcombine.high %v1192_v37, %v1200_v38  ;;  %v12329_v30 = vcombine.high %v250_v22, %v258_v23  ;;  %v777_v31 = vld [vmem:[#allocation9 + $0x1088] sm:$0xff] }
 0x1d8   :  { %6719 = vmatprep.subr.bf16.mxu1 %v12647_v44  ;;  %v12759_v44 = vcombine.high %v681_v39, %v689_v40 }
 0x1da   :  { %6638 = vmatpush1.bf16.msra.mxu0 %v13156_v49  ;;  %v13268_v49 = vcombine.low %v1192_v37, %v1200_v38 }
 0x1db   :  { %6720 = vmatpush1.bf16.msra.mxu1 %v12646_v50  ;;  %6639 = vmatprep.subr.bf16.mxu0 %v13173_v51  ;;  %v12758_v50 = vcombine.low %v681_v39, %v689_v40  ;;  %v13285_v51 = vcombine.high %v1208_v45, %v1216_v46  ;;  %v282_v40 = vld [vmem:[#allocation9 + $0x110] sm:$0xff] }
 0x1dc   :  { %6721 = vmatprep.subr.bf16.mxu1 %v12663_v52  ;;  %v12775_v52 = vcombine.high %v697_v47, %v705_v48 }
 0x1de   :  { %6640 = vmatpush1.bf16.msra.mxu0 %v13172_v61  ;;  %v13284_v61 = vcombine.low %v1208_v45, %v1216_v46 }
 0x1df   :  { %6722 = vmatpush1.bf16.msra.mxu1 %v12662_v62  ;;  %6641 = vmatprep.subr.bf16.mxu0 %v13189_v63  ;;  %v12774_v62 = vcombine.low %v697_v47, %v705_v48  ;;  %v13301_v63 = vcombine.high %v1224_v53, %v1232_v54 }
 0x1e0   :  { %6723 = vmatprep.subr.bf16.mxu1 %v12679_v0  ;;  %v12791_v0 = vcombine.high %v713_v59, %v721_v60 }
 0x1e2   :  { %6642 = vmatpush1.bf16.msra.mxu0 %v13188_v6  ;;  %v13300_v6 = vcombine.low %v1224_v53, %v1232_v54 }
 0x1e3   :  { %6724 = vmatpush1.bf16.msra.mxu1 %v12678_v7  ;;  %6643 = vmatprep.subr.bf16.mxu0 %v13205_v8  ;;  %v12790_v7 = vcombine.low %v713_v59, %v721_v60  ;;  %v13317_v8 = vcombine.high %v1240_v2, %v1248_v3 }
 0x1e4   :  { %6725 = vmatprep.subr.bf16.mxu1 %v12695_v9  ;;  %v165_v9 = vld [vmem:[#allocation7 + $0x30] sm:$0xff] }
 0x1e6   :  { %6644 = vmatpush1.bf16.msra.mxu0 %v13204_v14  ;;  %v753_v14 = vld [vmem:[#allocation9 + $0xfc8] sm:$0xff] }
 0x1e7   :  { %6726 = vmatpush1.bf16.msra.mxu1 %v12694_v16  ;;  %6645 = vmatprep.subr.bf16.mxu0 %v13221_v18  ;;  %v13316_v16 = vcombine.low %v1240_v2, %v1248_v3  ;;  %v194_v18 = vmul.f32 %v15417_v35, %v165_v9  ;;  %v12823_v21 = vcombine.high %v745_v13, %v753_v14  ;;  %v849_v9 = vld [vmem:[#allocation9 + $0x12c8] sm:$0xff] }
 0x1e8   :  { %6727 = vmatprep.subr.bf16.mxu1 %v12711_v19  ;;  %v12806_v19 = vcombine.low %v729_v4, %v737_v5  ;;  %v12822_v29 = vcombine.low %v745_v13, %v753_v14  ;;  %v346_v14 = vld [vmem:[#allocation9 + $0x310] sm:$0xff] }
 0x1ea   :  { %6646 = vmatpush1.bf16.msra.mxu0 %v13220_v24  ;;  %v761_v24 = vld [vmem:[#allocation9 + $0x1008] sm:$0xff] }
 0x1eb   :  { %6728 = vmatpush1.bf16.msra.mxu1 %v12710_v25  ;;  %6647 = vmatprep.subr.bf16.mxu0 %v13237_v26  ;;  %v769_v25 = vld [vmem:[#allocation9 + $0x1048] sm:$0xff]  ;;  %v13332_v26 = vcombine.low %v1256_v11, %v1264_v12 }
 0x1ec   :  { %6729 = vmatprep.subr.bf16.mxu1 %v12727_v27  ;;  %v14996_v27 = vld [vmem:[#allocation4 + $0x30] sm:$0xff]  ;;  %v12839_v35 = vcombine.high %v761_v24, %v769_v25  ;;  %v12838_v38 = vcombine.low %v761_v24, %v769_v25 }
 0x1ed   :  { %v202_v28 = vadd.f32 %v14996_v27, %v194_v18  ;;  %v857_v18 = vld [vmem:[#allocation9 + $0x1308] sm:$0xff]  ;;  %v362_v24 = vld [vmem:[#allocation9 + $0x390] sm:$0xff] }
 0x1ee   :  { %6648 = vmatpush1.bf16.msra.mxu0 %v13236_v32  ;;  %v785_v32 = vld [vmem:[#allocation9 + $0x10c8] sm:$0xff]  ;;  %v370_v25 = vld [vmem:[#allocation9 + $0x3d0] sm:$0xff] }
 0x1ef   :  { %6730 = vmatpush1.bf16.msra.mxu1 %v12726_v33  ;;  %6649 = vmatprep.subr.bf16.mxu0 %v13253_v34  ;;  %v12328_v33 = vcombine.low %v250_v22, %v258_v23  ;;  %v266_v34 = vld [vmem:[#allocation9 + $0x90] sm:$0xff]  ;;  %v15451_v37 = vpack.c.bf16 %v202_v28, %v202_v28  ;;  %v12855_v39 = vcombine.high %v777_v31, %v785_v32  ;;  %v881_v27 = vld [vmem:[#allocation9 + $0x13c8] sm:$0xff] }
 0x1f0   :  { %6731 = vmatprep.subr.bf16.mxu1 %v12743_v36  ;;  %v274_v36 = vld [vmem:[#allocation9 + $0xd0] sm:$0xff]  ;;  %v12854_v46 = vcombine.low %v777_v31, %v785_v32 }
 0x1f1   :  { %v12344_v45 = vcombine.low %v266_v34, %v274_v36  ;;  %v378_v31 = vld [vmem:[#allocation9 + $0x410] sm:$0xff] }
 0x1f2   :  { %6650 = vmatpush1.bf16.msra.mxu0 %v13252_v41  ;;  %v290_v41 = vld [vmem:[#allocation9 + $0x150] sm:$0xff] }
 0x1f3   :  { %6732 = vmatpush1.bf16.msra.mxu1 %v12742_v42  ;;  %6651 = vmatprep.subr.bf16.mxu0 %v13269_v43  ;;  %v12345_v42 = vcombine.high %v266_v34, %v274_v36  ;;  %v793_v43 = vld [vmem:[#allocation9 + $0x1108] sm:$0xff]  ;;  %v12361_v47 = vcombine.high %v282_v40, %v290_v41  ;;  %v12360_v53 = vcombine.low %v282_v40, %v290_v41  ;;  %v386_v32 = vld [vmem:[#allocation9 + $0x450] sm:$0xff] }
 0x1f4   :  { %6733 = vmatprep.subr.bf16.mxu1 %v12759_v44  ;;  %v801_v44 = vld [vmem:[#allocation9 + $0x1148] sm:$0xff]  ;;  %v12440_v36 = vcombine.low %v362_v24, %v370_v25  ;;  %v394_v41 = vld [vmem:[#allocation9 + $0x490] sm:$0xff] }
 0x1f5   :  { %v12871_v48 = vcombine.high %v793_v43, %v801_v44  ;;  %v12870_v54 = vcombine.low %v793_v43, %v801_v44  ;;  %v897_v34 = vld [vmem:[#allocation9 + $0x1448] sm:$0xff] }
 0x1f6   :  { %6652 = vmatpush1.bf16.msra.mxu0 %v13268_v49  ;;  %v298_v49 = vld [vmem:[#allocation9 + $0x190] sm:$0xff]  ;;  %v905_v43 = vld [vmem:[#allocation9 + $0x1488] sm:$0xff] }
 0x1f7   :  { %6734 = vmatpush1.bf16.msra.mxu1 %v12758_v50  ;;  %6653 = vmatprep.subr.bf16.mxu0 %v13285_v51  ;;  %v306_v50 = vld [vmem:[#allocation9 + $0x1d0] sm:$0xff]  ;;  %v809_v51 = vld [vmem:[#allocation9 + $0x1188] sm:$0xff] }
 0x1f8   :  { %6735 = vmatprep.subr.bf16.mxu1 %v12775_v52  ;;  %v817_v52 = vld [vmem:[#allocation9 + $0x11c8] sm:$0xff]  ;;  %v12377_v59 = vcombine.high %v298_v49, %v306_v50  ;;  %v12376_v2 = vcombine.low %v298_v49, %v306_v50  ;;  %v410_v49 = vld [vmem:[#allocation9 + $0x510] sm:$0xff] }
 0x1f9   :  { %v12887_v60 = vcombine.high %v809_v51, %v817_v52  ;;  %v12886_v3 = vcombine.low %v809_v51, %v817_v52  ;;  %v913_v44 = vld [vmem:[#allocation9 + $0x14c8] sm:$0xff]  ;;  %v418_v50 = vld [vmem:[#allocation9 + $0x550] sm:$0xff] }
 0x1fa   :  { %6654 = vmatpush1.bf16.msra.mxu0 %v13284_v61  ;;  %v314_v61 = vld [vmem:[#allocation9 + $0x210] sm:$0xff]  ;;  %v921_v51 = vld [vmem:[#allocation9 + $0x1508] sm:$0xff] }
 0x1fb   :  { %6736 = vmatpush1.bf16.msra.mxu1 %v12774_v62  ;;  %6655 = vmatprep.subr.bf16.mxu0 %v13301_v63  ;;  %v322_v62 = vld [vmem:[#allocation9 + $0x250] sm:$0xff]  ;;  %v825_v63 = vld [vmem:[#allocation9 + $0x1208] sm:$0xff] }
 0x1fc   :  { %6737 = vmatprep.subr.bf16.mxu1 %v12791_v0  ;;  %v833_v0 = vld [vmem:[#allocation9 + $0x1248] sm:$0xff]  ;;  %v12393_v4 = vcombine.high %v314_v61, %v322_v62 }
 0x1fd   :  { %v12903_v5 = vcombine.high %v825_v63, %v833_v0  ;;  %v12902_v11 = vcombine.low %v825_v63, %v833_v0  ;;  %v929_v52 = vld [vmem:[#allocation9 + $0x1548] sm:$0xff] }
 0x1fe   :  { %6656 = vmatpush1.bf16.msra.mxu0 %v13300_v6  ;;  %v330_v6 = vld [vmem:[#allocation9 + $0x290] sm:$0xff]  ;;  %v937_v63 = vld [vmem:[#allocation9 + $0x1588] sm:$0xff] }
 0x1ff   :  { %6738 = vmatpush1.bf16.msra.mxu1 %v12790_v7  ;;  %6657 = vmatprep.subr.bf16.mxu0 %v13317_v8  ;;  %v338_v7 = vld [vmem:[#allocation9 + $0x2d0] sm:$0xff]  ;;  %v841_v8 = vld [vmem:[#allocation9 + $0x1288] sm:$0xff] }
 0x200   :  { %6739 = vmatprep.subr.bf16.mxu1 %v12807_v10  ;;  %v12392_v10 = vcombine.low %v314_v61, %v322_v62  ;;  %v12409_v12 = vcombine.high %v330_v6, %v338_v7  ;;  %v12919_v13 = vcombine.high %v841_v8, %v849_v9  ;;  %v426_v61 = vld [vmem:[#allocation9 + $0x590] sm:$0xff]  ;;  %v945_v0 = vld [vmem:[#allocation9 + $0x15c8] sm:$0xff] }
 0x201   :  { %v434_v62 = vld [vmem:[#allocation9 + $0x5d0] sm:$0xff] }
 0x202   :  { %6658 = vmatpush1.bf16.msra.mxu0 %v13316_v16  ;;  %v354_v16 = vld [vmem:[#allocation9 + $0x350] sm:$0xff] }
 0x203   :  { %6740 = vmatpush1.bf16.msra.mxu1 %v12806_v19  ;;  %6659 = vmatprep.subr.bf16.mxu0 %v13333_v20  ;;  %v865_v19 = vld [vmem:[#allocation9 + $0x1348] sm:$0xff]  ;;  %v12408_v20 = vcombine.low %v330_v6, %v338_v7  ;;  %v12425_v22 = vcombine.high %v346_v14, %v354_v16  ;;  %v12424_v28 = vcombine.low %v346_v14, %v354_v16  ;;  %v442_v6 = vld [vmem:[#allocation9 + $0x610] sm:$0xff] }
 0x204   :  { %6741 = vmatprep.subr.bf16.mxu1 %v12823_v21  ;;  %v12918_v21 = vcombine.low %v841_v8, %v849_v9  ;;  %v12935_v23 = vcombine.high %v857_v18, %v865_v19  ;;  %v450_v7 = vld [vmem:[#allocation9 + $0x650] sm:$0xff]  ;;  %v953_v8 = vld [vmem:[#allocation9 + $0x1608] sm:$0xff] }
 0x205   :  { %v961_v9 = vld [vmem:[#allocation9 + $0x1648] sm:$0xff]  ;;  %v458_v14 = vld [vmem:[#allocation9 + $0x690] sm:$0xff] }
 0x206   :  { %6660 = vmatpush1.bf16.msra.mxu0 %v13332_v26  ;;  %v873_v26 = vld [vmem:[#allocation9 + $0x1388] sm:$0xff]  ;;  %v466_v16 = vld [vmem:[#allocation9 + $0x6d0] sm:$0xff] }
 0x207   :  { %6742 = vmatpush1.bf16.msra.mxu1 %v12822_v29  ;;  %6834 = vmatprep.subr.bf16.mxu0 %v12329_v30  ;;  %v12934_v29 = vcombine.low %v857_v18, %v865_v19  ;;  %v12441_v30 = vcombine.high %v362_v24, %v370_v25  ;;  %v969_v18 = vld [vmem:[#allocation9 + $0x1688] sm:$0xff]  ;;  %v474_v24 = vld [vmem:[#allocation9 + $0x710] sm:$0xff] }
 0x208   :  { %6752 = vmatprep.subr.bf16.mxu1 %v12839_v35  ;;  %v12951_v35 = vcombine.high %v873_v26, %v881_v27  ;;  %v977_v19 = vld [vmem:[#allocation9 + $0x16c8] sm:$0xff]  ;;  %v482_v25 = vld [vmem:[#allocation9 + $0x750] sm:$0xff] }
 0x209   :  { %6662 = vmatmul.mubr.bf16.vlgmr.msra.gmra.mrb[0].mxu0 %v15451_v37 }
 0x20a   :  { %6744 = vmatmul.mubr.bf16.vlgmr.msra.gmra.mrb[4].mxu1 %v15428_v57  ;;  %6835 = vmatpush1.bf16.msra.mxu0 %v12328_v33  ;;  %v889_v33 = vld [vmem:[#allocation9 + $0x1408] sm:$0xff] }
 0x20b   :  { %6753 = vmatpush1.bf16.msra.mxu1 %v12838_v38  ;;  %6784 = vmatprep.mubr.bf16.mxu1 %v15434_v1  ;;  %v12950_v38 = vcombine.low %v873_v26, %v881_v27  ;;  %v12967_v40 = vcombine.high %v889_v33, %v897_v34  ;;  %v985_v26 = vld [vmem:[#allocation9 + $0x1708] sm:$0xff] }
 0x20c   :  { %6866 = vmatprep.mubr.bf16.mxu0 %v15426_v56  ;;  %6754 = vmatprep.subr.bf16.mxu1 %v12855_v39  ;;  %v12457_v39 = vcombine.high %v378_v31, %v386_v32  ;;  %v993_v27 = vld [vmem:[#allocation9 + $0x1748] sm:$0xff] }
 0x20d   :  { %6836 = vmatprep.subr.bf16.mxu0 %v12345_v42  ;;  %v402_v42 = vld [vmem:[#allocation9 + $0x4d0] sm:$0xff] }
 0x20e   :  { %6837 = vmatpush1.bf16.msra.mxu0 %v12344_v45  ;;  %v12456_v45 = vcombine.low %v378_v31, %v386_v32  ;;  %v490_v31 = vld [vmem:[#allocation9 + $0x790] sm:$0xff] }
 0x20f   :  { %6755 = vmatpush1.bf16.msra.mxu1 %v12854_v46  ;;  %6838 = vmatprep.subr.bf16.mxu0 %v12361_v47  ;;  %v12966_v46 = vcombine.low %v889_v33, %v897_v34  ;;  %v12473_v47 = vcombine.high %v394_v41, %v402_v42  ;;  %v498_v32 = vld [vmem:[#allocation9 + $0x7d0] sm:$0xff]  ;;  %v1001_v33 = vld [vmem:[#allocation9 + $0x1788] sm:$0xff] }
 0x210   :  { %6756 = vmatprep.subr.bf16.mxu1 %v12871_v48  ;;  %v12983_v48 = vcombine.high %v905_v43, %v913_v44  ;;  %v1009_v34 = vld [vmem:[#allocation9 + $0x17c8] sm:$0xff] }
 0x212   :  { %6839 = vmatpush1.bf16.msra.mxu0 %v12360_v53  ;;  %v12472_v53 = vcombine.low %v394_v41, %v402_v42  ;;  %v506_v41 = vld [vmem:[#allocation9 + $0x810] sm:$0xff] }
 0x213   :  { %6757 = vmatpush1.bf16.msra.mxu1 %v12870_v54  ;;  %6840 = vmatprep.subr.bf16.mxu0 %v12377_v59  ;;  %v12982_v54 = vcombine.low %v905_v43, %v913_v44  ;;  %v12489_v59 = vcombine.high %v410_v49, %v418_v50  ;;  %v514_v42 = vld [vmem:[#allocation9 + $0x850] sm:$0xff]  ;;  %v1017_v43 = vld [vmem:[#allocation9 + $0x1808] sm:$0xff] }
 0x214   :  { %6758 = vmatprep.subr.bf16.mxu1 %v12887_v60  ;;  %v12999_v60 = vcombine.high %v921_v51, %v929_v52  ;;  %v1025_v44 = vld [vmem:[#allocation9 + $0x1848] sm:$0xff] }
 0x216   :  { %6841 = vmatpush1.bf16.msra.mxu0 %v12376_v2  ;;  %v12488_v2 = vcombine.low %v410_v49, %v418_v50  ;;  %v1033_v49 = vld [vmem:[#allocation9 + $0x1888] sm:$0xff] }
 0x217   :  { %6759 = vmatpush1.bf16.msra.mxu1 %v12886_v3  ;;  %6842 = vmatprep.subr.bf16.mxu0 %v12393_v4  ;;  %v12998_v3 = vcombine.low %v921_v51, %v929_v52  ;;  %v12505_v4 = vcombine.high %v426_v61, %v434_v62  ;;  %v1041_v50 = vld [vmem:[#allocation9 + $0x18c8] sm:$0xff]  ;;  %v12584_v51 = vcombine.low %v506_v41, %v514_v42  ;;  %v522_v52 = vld [vmem:[#allocation9 + $0x890] sm:$0xff] }
 0x218   :  { %6760 = vmatprep.subr.bf16.mxu1 %v12903_v5  ;;  %v13015_v5 = vcombine.high %v937_v63, %v945_v0 }
 0x21a   :  { %6843 = vmatpush1.bf16.msra.mxu0 %v12392_v10  ;;  %v12504_v10 = vcombine.low %v426_v61, %v434_v62  ;;  %v546_v61 = vld [vmem:[#allocation9 + $0x950] sm:$0xff] }
 0x21b   :  { %6761 = vmatpush1.bf16.msra.mxu1 %v12902_v11  ;;  %6844 = vmatprep.subr.bf16.mxu0 %v12409_v12  ;;  %v13014_v11 = vcombine.low %v937_v63, %v945_v0  ;;  %v12521_v12 = vcombine.high %v442_v6, %v450_v7  ;;  %v1049_v63 = vld [vmem:[#allocation9 + $0x1908] sm:$0xff] }
 0x21c   :  { %6762 = vmatprep.subr.bf16.mxu1 %v12919_v13  ;;  %v13031_v13 = vcombine.high %v953_v8, %v961_v9  ;;  %v1057_v0 = vld [vmem:[#allocation9 + $0x1948] sm:$0xff] }
 0x21e   :  { %6845 = vmatpush1.bf16.msra.mxu0 %v12408_v20  ;;  %v12520_v20 = vcombine.low %v442_v6, %v450_v7  ;;  %v554_v6 = vld [vmem:[#allocation9 + $0x990] sm:$0xff] }
 0x21f   :  { %6763 = vmatpush1.bf16.msra.mxu1 %v12918_v21  ;;  %6846 = vmatprep.subr.bf16.mxu0 %v12425_v22  ;;  %v13030_v21 = vcombine.low %v953_v8, %v961_v9  ;;  %v12537_v22 = vcombine.high %v458_v14, %v466_v16  ;;  %v562_v7 = vld [vmem:[#allocation9 + $0x9d0] sm:$0xff]  ;;  %v1065_v8 = vld [vmem:[#allocation9 + $0x1988] sm:$0xff] }
 0x220   :  { %6764 = vmatprep.subr.bf16.mxu1 %v12935_v23  ;;  %v13047_v23 = vcombine.high %v969_v18, %v977_v19  ;;  %v1073_v9 = vld [vmem:[#allocation9 + $0x19c8] sm:$0xff] }
 0x222   :  { %6847 = vmatpush1.bf16.msra.mxu0 %v12424_v28  ;;  %v12536_v28 = vcombine.low %v458_v14, %v466_v16  ;;  %v570_v14 = vld [vmem:[#allocation9 + $0xa10] sm:$0xff] }
 0x223   :  { %6765 = vmatpush1.bf16.msra.mxu1 %v12934_v29  ;;  %6848 = vmatprep.subr.bf16.mxu0 %v12441_v30  ;;  %v13046_v29 = vcombine.low %v969_v18, %v977_v19  ;;  %v12553_v30 = vcombine.high %v474_v24, %v482_v25  ;;  %v578_v16 = vld [vmem:[#allocation9 + $0xa50] sm:$0xff]  ;;  %v1081_v18 = vld [vmem:[#allocation9 + $0x1a08] sm:$0xff] }
 0x224   :  { %6766 = vmatprep.subr.bf16.mxu1 %v12951_v35  ;;  %v13063_v35 = vcombine.high %v985_v26, %v993_v27  ;;  %v1089_v19 = vld [vmem:[#allocation9 + $0x1a48] sm:$0xff] }
 0x226   :  { %6849 = vmatpush1.bf16.msra.mxu0 %v12440_v36  ;;  %v12552_v36 = vcombine.low %v474_v24, %v482_v25  ;;  %v586_v24 = vld [vmem:[#allocation9 + $0xa90] sm:$0xff] }
 0x227   :  { %6767 = vmatpush1.bf16.msra.mxu1 %v12950_v38  ;;  %6850 = vmatprep.subr.bf16.mxu0 %v12457_v39  ;;  %v13062_v38 = vcombine.low %v985_v26, %v993_v27  ;;  %v12569_v39 = vcombine.high %v490_v31, %v498_v32  ;;  %v594_v25 = vld [vmem:[#allocation9 + $0xad0] sm:$0xff]  ;;  %v1097_v26 = vld [vmem:[#allocation9 + $0x1a88] sm:$0xff] }
 0x228   :  { %6768 = vmatprep.subr.bf16.mxu1 %v12967_v40  ;;  %v13079_v40 = vcombine.high %v1001_v33, %v1009_v34  ;;  %v1105_v27 = vld [vmem:[#allocation9 + $0x1ac8] sm:$0xff] }
 0x22a   :  { %6851 = vmatpush1.bf16.msra.mxu0 %v12456_v45  ;;  %v12568_v45 = vcombine.low %v490_v31, %v498_v32  ;;  %v602_v31 = vld [vmem:[#allocation9 + $0xb10] sm:$0xff] }
 0x22b   :  { %6769 = vmatpush1.bf16.msra.mxu1 %v12966_v46  ;;  %6852 = vmatprep.subr.bf16.mxu0 %v12473_v47  ;;  %v13078_v46 = vcombine.low %v1001_v33, %v1009_v34  ;;  %v12585_v47 = vcombine.high %v506_v41, %v514_v42  ;;  %v610_v32 = vld [vmem:[#allocation9 + $0xb50] sm:$0xff]  ;;  %v1113_v33 = vld [vmem:[#allocation9 + $0x1b08] sm:$0xff] }
 0x22c   :  { %6770 = vmatprep.subr.bf16.mxu1 %v12983_v48  ;;  %v13095_v48 = vcombine.high %v1017_v43, %v1025_v44  ;;  %v1121_v34 = vld [vmem:[#allocation9 + $0x1b48] sm:$0xff]  ;;  %v618_v42 = vld [vmem:[#allocation9 + $0xb90] sm:$0xff] }
 0x22d   :  { %v13191_v41 = vcombine.high %v1113_v33, %v1121_v34 }
 0x22e   :  { %6853 = vmatpush1.bf16.msra.mxu0 %v12472_v53  ;;  %v530_v53 = vld [vmem:[#allocation9 + $0x8d0] sm:$0xff] }
 0x22f   :  { %6771 = vmatpush1.bf16.msra.mxu1 %v12982_v54  ;;  %6854 = vmatprep.subr.bf16.mxu0 %v12489_v59  ;;  %v13094_v54 = vcombine.low %v1017_v43, %v1025_v44  ;;  %v13111_v59 = vcombine.high %v1033_v49, %v1041_v50  ;;  %v12601_v62 = vcombine.high %v522_v52, %v530_v53  ;;  %v626_v43 = vld [vmem:[#allocation9 + $0xbd0] sm:$0xff] }
 0x230   :  { %6772 = vmatprep.subr.bf16.mxu1 %v12999_v60  ;;  %v538_v60 = vld [vmem:[#allocation9 + $0x910] sm:$0xff] }
 0x232   :  { %6855 = vmatpush1.bf16.msra.mxu0 %v12488_v2  ;;  %v12600_v2 = vcombine.low %v522_v52, %v530_v53  ;;  %v634_v53 = vld [vmem:[#allocation9 + $0xc10] sm:$0xff] }
 0x233   :  { %6773 = vmatpush1.bf16.msra.mxu1 %v12998_v3  ;;  %6856 = vmatprep.subr.bf16.mxu0 %v12505_v4  ;;  %v13110_v3 = vcombine.low %v1033_v49, %v1041_v50  ;;  %v12617_v4 = vcombine.high %v538_v60, %v546_v61  ;;  %v13190_v50 = vcombine.low %v1113_v33, %v1121_v34 }
 0x234   :  { %6774 = vmatprep.subr.bf16.mxu1 %v13015_v5  ;;  %v13127_v5 = vcombine.high %v1049_v63, %v1057_v0 }
 0x236   :  { %6857 = vmatpush1.bf16.msra.mxu0 %v12504_v10  ;;  %v12616_v10 = vcombine.low %v538_v60, %v546_v61  ;;  %v1153_v60 = vld [vmem:[#allocation9 + $0x1c48] sm:$0xff]  ;;  %v12696_v61 = vcombine.low %v618_v42, %v626_v43 }
 0x237   :  { %6775 = vmatpush1.bf16.msra.mxu1 %v13014_v11  ;;  %6858 = vmatprep.subr.bf16.mxu0 %v12521_v12  ;;  %v13126_v11 = vcombine.low %v1049_v63, %v1057_v0  ;;  %v12633_v12 = vcombine.high %v554_v6, %v562_v7 }
 0x238   :  { %6776 = vmatprep.subr.bf16.mxu1 %v13031_v13  ;;  %v13143_v13 = vcombine.high %v1065_v8, %v1073_v9 }
 0x23a   :  { %6859 = vmatpush1.bf16.msra.mxu0 %v12520_v20  ;;  %v12632_v20 = vcombine.low %v554_v6, %v562_v7 }
 0x23b   :  { %6777 = vmatpush1.bf16.msra.mxu1 %v13030_v21  ;;  %6860 = vmatprep.subr.bf16.mxu0 %v12537_v22  ;;  %v13142_v21 = vcombine.low %v1065_v8, %v1073_v9  ;;  %v12649_v22 = vcombine.high %v570_v14, %v578_v16 }
 0x23c   :  { %6778 = vmatprep.subr.bf16.mxu1 %v13047_v23  ;;  %v13159_v23 = vcombine.high %v1081_v18, %v1089_v19 }
 0x23e   :  { %6861 = vmatpush1.bf16.msra.mxu0 %v12536_v28  ;;  %v12648_v28 = vcombine.low %v570_v14, %v578_v16 }
 0x23f   :  { %6779 = vmatpush1.bf16.msra.mxu1 %v13046_v29  ;;  %6862 = vmatprep.subr.bf16.mxu0 %v12553_v30  ;;  %v13158_v29 = vcombine.low %v1081_v18, %v1089_v19  ;;  %v12665_v30 = vcombine.high %v586_v24, %v594_v25 }
 0x240   :  { %6780 = vmatprep.subr.bf16.mxu1 %v13063_v35  ;;  %v13175_v35 = vcombine.high %v1097_v26, %v1105_v27 }
 0x242   :  { %6863 = vmatpush1.bf16.msra.mxu0 %v12552_v36  ;;  %v12664_v36 = vcombine.low %v586_v24, %v594_v25 }
 0x243   :  { %6781 = vmatpush1.bf16.msra.mxu1 %v13062_v38  ;;  %6864 = vmatprep.subr.bf16.mxu0 %v12569_v39  ;;  %v13174_v38 = vcombine.low %v1097_v26, %v1105_v27  ;;  %v12681_v39 = vcombine.high %v602_v31, %v610_v32 }
 0x244   :  { %6782 = vmatprep.subr.bf16.mxu1 %v13079_v40 }
 0x246   :  { %6865 = vmatpush1.bf16.msra.mxu0 %v12568_v45  ;;  %v1129_v45 = vld [vmem:[#allocation9 + $0x1b88] sm:$0xff] }
 0x247   :  { %6783 = vmatpush1.bf16.msra.mxu1 %v13078_v46  ;;  %6875 = vmatprep.subr.bf16.mxu0 %v12585_v47  ;;  %v1137_v46 = vld [vmem:[#allocation9 + $0x1bc8] sm:$0xff] }
 0x248   :  { %6793 = vmatprep.subr.bf16.mxu1 %v13095_v48  ;;  %v12680_v48 = vcombine.low %v602_v31, %v610_v32  ;;  %v13207_v52 = vcombine.high %v1129_v45, %v1137_v46 }
 0x249   :  { %6867 = vmatmul.mubr.bf16.vlgmr.msra.gmra.mrb[4].mxu0 %v15424_v55 }
 0x24a   :  { %6785 = vmatmul.mubr.bf16.vlgmr.msra.gmra.mrb[4].mxu1 %v15442_v15  ;;  %6876 = vmatpush1.bf16.msra.mxu0 %v12584_v51  ;;  %v12697_v51 = vcombine.high %v618_v42, %v626_v43 }
 0x24b   :  { %6794 = vmatpush1.bf16.msra.mxu1 %v13094_v54  ;;  %6825 = vmatprep.mubr.bf16.mxu1 %v15444_v17  ;;  %v642_v54 = vld [vmem:[#allocation9 + $0xc50] sm:$0xff] }
 0x24c   :  { %6907 = vmatprep.mubr.bf16.mxu0 %v15430_v58  ;;  %6795 = vmatprep.subr.bf16.mxu1 %v13111_v59  ;;  %v1145_v59 = vld [vmem:[#allocation9 + $0x1c08] sm:$0xff]  ;;  %v12713_v63 = vcombine.high %v634_v53, %v642_v54  ;;  %v12712_v6 = vcombine.low %v634_v53, %v642_v54 }
 0x24d   :  { %6877 = vmatprep.subr.bf16.mxu0 %v12601_v62  ;;  %v13206_v62 = vcombine.low %v1129_v45, %v1137_v46  ;;  %v13223_v0 = vcombine.high %v1145_v59, %v1153_v60  ;;  %v13222_v7 = vcombine.low %v1145_v59, %v1153_v60  ;;  %v746_v59 = vld [vmem:[#allocation9 + $0xf90] sm:$0xff] }
 0x24e   :  { %6878 = vmatpush1.bf16.msra.mxu0 %v12600_v2  ;;  %v650_v2 = vld [vmem:[#allocation9 + $0xc90] sm:$0xff] }
 0x24f   :  { %6796 = vmatpush1.bf16.msra.mxu1 %v13110_v3  ;;  %6879 = vmatprep.subr.bf16.mxu0 %v12617_v4  ;;  %v658_v3 = vld [vmem:[#allocation9 + $0xcd0] sm:$0xff]  ;;  %v1161_v4 = vld [vmem:[#allocation9 + $0x1c88] sm:$0xff] }
 0x250   :  { %6797 = vmatprep.subr.bf16.mxu1 %v13127_v5  ;;  %v1169_v5 = vld [vmem:[#allocation9 + $0x1cc8] sm:$0xff]  ;;  %v12729_v8 = vcombine.high %v650_v2, %v658_v3  ;;  %v12728_v14 = vcombine.low %v650_v2, %v658_v3  ;;  %v754_v60 = vld [vmem:[#allocation9 + $0xfd0] sm:$0xff] }
 0x251   :  { %v13239_v9 = vcombine.high %v1161_v4, %v1169_v5  ;;  %v13238_v16 = vcombine.low %v1161_v4, %v1169_v5  ;;  %v12825_v2 = vcombine.high %v746_v59, %v754_v60  ;;  %v762_v4 = vld [vmem:[#allocation9 + $0x1010] sm:$0xff] }
 0x252   :  { %6880 = vmatpush1.bf16.msra.mxu0 %v12616_v10  ;;  %v666_v10 = vld [vmem:[#allocation9 + $0xd10] sm:$0xff] }
 0x253   :  { %6798 = vmatpush1.bf16.msra.mxu1 %v13126_v11  ;;  %6881 = vmatprep.subr.bf16.mxu0 %v12633_v12  ;;  %v674_v11 = vld [vmem:[#allocation9 + $0xd50] sm:$0xff]  ;;  %v1177_v12 = vld [vmem:[#allocation9 + $0x1d08] sm:$0xff] }
 0x254   :  { %6799 = vmatprep.subr.bf16.mxu1 %v13143_v13  ;;  %v1185_v13 = vld [vmem:[#allocation9 + $0x1d48] sm:$0xff]  ;;  %v12745_v18 = vcombine.high %v666_v10, %v674_v11  ;;  %v12744_v24 = vcombine.low %v666_v10, %v674_v11  ;;  %v770_v5 = vld [vmem:[#allocation9 + $0x1050] sm:$0xff] }
 0x255   :  { %v13255_v19 = vcombine.high %v1177_v12, %v1185_v13  ;;  %v13254_v25 = vcombine.low %v1177_v12, %v1185_v13  ;;  %v12841_v10 = vcombine.high %v762_v4, %v770_v5  ;;  %v778_v12 = vld [vmem:[#allocation9 + $0x1090] sm:$0xff] }
 0x256   :  { %6882 = vmatpush1.bf16.msra.mxu0 %v12632_v20  ;;  %v682_v20 = vld [vmem:[#allocation9 + $0xd90] sm:$0xff] }
 0x257   :  { %6800 = vmatpush1.bf16.msra.mxu1 %v13142_v21  ;;  %6883 = vmatprep.subr.bf16.mxu0 %v12649_v22  ;;  %v690_v21 = vld [vmem:[#allocation9 + $0xdd0] sm:$0xff]  ;;  %v1193_v22 = vld [vmem:[#allocation9 + $0x1d88] sm:$0xff] }
 0x258   :  { %6801 = vmatprep.subr.bf16.mxu1 %v13159_v23  ;;  %v1201_v23 = vld [vmem:[#allocation9 + $0x1dc8] sm:$0xff]  ;;  %v12761_v26 = vcombine.high %v682_v20, %v690_v21  ;;  %v12760_v31 = vcombine.low %v682_v20, %v690_v21  ;;  %v786_v13 = vld [vmem:[#allocation9 + $0x10d0] sm:$0xff] }
 0x259   :  { %v13271_v27 = vcombine.high %v1193_v22, %v1201_v23  ;;  %v13270_v32 = vcombine.low %v1193_v22, %v1201_v23  ;;  %v12857_v20 = vcombine.high %v778_v12, %v786_v13  ;;  %v794_v21 = vld [vmem:[#allocation9 + $0x1110] sm:$0xff] }
 0x25a   :  { %6884 = vmatpush1.bf16.msra.mxu0 %v12648_v28  ;;  %v698_v28 = vld [vmem:[#allocation9 + $0xe10] sm:$0xff] }
 0x25b   :  { %6802 = vmatpush1.bf16.msra.mxu1 %v13158_v29  ;;  %6885 = vmatprep.subr.bf16.mxu0 %v12665_v30  ;;  %v706_v29 = vld [vmem:[#allocation9 + $0xe50] sm:$0xff]  ;;  %v1209_v30 = vld [vmem:[#allocation9 + $0x1e08] sm:$0xff] }
 0x25c   :  { %v15461_v40 = vpop.f32.mrb[0].mxu1  ;;  %6803 = vmatprep.subr.bf16.mxu1 %v13175_v35  ;;  %v1217_v35 = vld [vmem:[#allocation9 + $0x1e48] sm:$0xff]  ;;  %v12777_v33 = vcombine.high %v698_v28, %v706_v29  ;;  %v12776_v42 = vcombine.low %v698_v28, %v706_v29  ;;  %v802_v22 = vld [vmem:[#allocation9 + $0x1150] sm:$0xff] }
 0x25d   :  { %v15463_v44 = vpop.f32.mrb[1].mxu1  ;;  %v13287_v34 = vcombine.high %v1209_v30, %v1217_v35  ;;  %v13286_v43 = vcombine.low %v1209_v30, %v1217_v35  ;;  %v12873_v28 = vcombine.high %v794_v21, %v802_v22  ;;  %v810_v30 = vld [vmem:[#allocation9 + $0x1190] sm:$0xff] }
 0x25e   :  { %6886 = vmatpush1.bf16.msra.mxu0 %v12664_v36  ;;  %v6544_v47 = vpop.f32.mrb[2].mxu1  ;;  %v714_v36 = vld [vmem:[#allocation9 + $0xe90] sm:$0xff] }
 0x25f   :  { %6804 = vmatpush1.bf16.msra.mxu1 %v13174_v38  ;;  %v6545_v49 = vpop.f32.mrb[3].mxu1  ;;  %6887 = vmatprep.subr.bf16.mxu0 %v12681_v39  ;;  %v722_v38 = vld [vmem:[#allocation9 + $0xed0] sm:$0xff]  ;;  %v1225_v39 = vld [vmem:[#allocation9 + $0x1e88] sm:$0xff] }
 0x260   :  { %6805 = vmatprep.subr.bf16.mxu1 %v13191_v41  ;;  %v1233_v41 = vld [vmem:[#allocation9 + $0x1ec8] sm:$0xff]  ;;  %v12793_v45 = vcombine.high %v714_v36, %v722_v38  ;;  %v730_v47 = vld [vmem:[#allocation9 + $0xf10] sm:$0xff] }
 0x261   :  { %v13303_v46 = vcombine.high %v1225_v39, %v1233_v41  ;;  %v1241_v49 = vld [vmem:[#allocation9 + $0x1f08] sm:$0xff]  ;;  %v818_v35 = vld [vmem:[#allocation9 + $0x11d0] sm:$0xff] }
 0x262   :  { %6888 = vmatpush1.bf16.msra.mxu0 %v12680_v48  ;;  %v738_v48 = vld [vmem:[#allocation9 + $0xf50] sm:$0xff] }
 0x263   :  { %6806 = vmatpush1.bf16.msra.mxu1 %v13190_v50  ;;  %6889 = vmatprep.subr.bf16.mxu0 %v12697_v51  ;;  %v1249_v50 = vld [vmem:[#allocation9 + $0x1f48] sm:$0xff]  ;;  %v12792_v51 = vcombine.low %v714_v36, %v722_v38  ;;  %v12809_v53 = vcombine.high %v730_v47, %v738_v48  ;;  %v12889_v36 = vcombine.high %v810_v30, %v818_v35 }
 0x264   :  { %6807 = vmatprep.subr.bf16.mxu1 %v13207_v52  ;;  %v13302_v52 = vcombine.low %v1225_v39, %v1233_v41  ;;  %v13319_v54 = vcombine.high %v1241_v49, %v1249_v50  ;;  %v826_v39 = vld [vmem:[#allocation9 + $0x1210] sm:$0xff] }
 0x265   :  { %v834_v41 = vld [vmem:[#allocation9 + $0x1250] sm:$0xff] }
 0x266   :  { %6890 = vmatpush1.bf16.msra.mxu0 %v12696_v61  ;;  %v1257_v61 = vld [vmem:[#allocation9 + $0x1f88] sm:$0xff] }
 0x267   :  { %6808 = vmatpush1.bf16.msra.mxu1 %v13206_v62  ;;  %6891 = vmatprep.subr.bf16.mxu0 %v12713_v63  ;;  %v1265_v62 = vld [vmem:[#allocation9 + $0x1fc8] sm:$0xff]  ;;  %v12808_v63 = vcombine.low %v730_v47, %v738_v48  ;;  %v12905_v47 = vcombine.high %v826_v39, %v834_v41 }
 0x268   :  { %6809 = vmatprep.subr.bf16.mxu1 %v13223_v0  ;;  %v13318_v0 = vcombine.low %v1241_v49, %v1249_v50  ;;  %v13335_v3 = vcombine.high %v1257_v61, %v1265_v62  ;;  %v842_v49 = vld [vmem:[#allocation9 + $0x1290] sm:$0xff] }
 0x269   :  { %v850_v50 = vld [vmem:[#allocation9 + $0x12d0] sm:$0xff] }
 0x26a   :  { %6892 = vmatpush1.bf16.msra.mxu0 %v12712_v6  ;;  %v251_v6 = vld [vmem:[#allocation9 + $0x18] sm:$0xff] }
 0x26b   :  { %6810 = vmatpush1.bf16.msra.mxu1 %v13222_v7  ;;  %6893 = vmatprep.subr.bf16.mxu0 %v12729_v8  ;;  %v259_v7 = vld [vmem:[#allocation9 + $0x58] sm:$0xff]  ;;  %v12824_v8 = vcombine.low %v746_v59, %v754_v60  ;;  %v12921_v59 = vcombine.high %v842_v49, %v850_v50 }
 0x26c   :  { %6811 = vmatprep.subr.bf16.mxu1 %v13239_v9  ;;  %v13334_v9 = vcombine.low %v1257_v61, %v1265_v62  ;;  %v12331_v11 = vcombine.high %v251_v6, %v259_v7  ;;  %v858_v61 = vld [vmem:[#allocation9 + $0x1310] sm:$0xff] }
 0x26d   :  { %v866_v62 = vld [vmem:[#allocation9 + $0x1350] sm:$0xff] }
 0x26e   :  { %6894 = vmatpush1.bf16.msra.mxu0 %v12728_v14  ;;  %v12840_v14 = vcombine.low %v762_v4, %v770_v5  ;;  %v12937_v4 = vcombine.high %v858_v61, %v866_v62 }
 0x26f   :  { %6812 = vmatpush1.bf16.msra.mxu1 %v13238_v16  ;;  %6895 = vmatprep.subr.bf16.mxu0 %v12745_v18  ;;  %v267_v16 = vld [vmem:[#allocation9 + $0x98] sm:$0xff] }
 0x270   :  { %6813 = vmatprep.subr.bf16.mxu1 %v13255_v19  ;;  %v275_v18 = vld [vmem:[#allocation9 + $0xd8] sm:$0xff]  ;;  %v12330_v19 = vcombine.low %v251_v6, %v259_v7  ;;  %v874_v6 = vld [vmem:[#allocation9 + $0x1390] sm:$0xff] }
 0x271   :  { %v12347_v23 = vcombine.high %v267_v16, %v275_v18  ;;  %v882_v7 = vld [vmem:[#allocation9 + $0x13d0] sm:$0xff] }
 0x272   :  { %6896 = vmatpush1.bf16.msra.mxu0 %v12744_v24  ;;  %v283_v24 = vld [vmem:[#allocation9 + $0x118] sm:$0xff] }
 0x273   :  { %6814 = vmatpush1.bf16.msra.mxu1 %v13254_v25  ;;  %6897 = vmatprep.subr.bf16.mxu0 %v12761_v26  ;;  %v291_v25 = vld [vmem:[#allocation9 + $0x158] sm:$0xff]  ;;  %v12856_v26 = vcombine.low %v778_v12, %v786_v13  ;;  %v12953_v12 = vcombine.high %v874_v6, %v882_v7 }
 0x274   :  { %6815 = vmatprep.subr.bf16.mxu1 %v13271_v27  ;;  %v12346_v27 = vcombine.low %v267_v16, %v275_v18  ;;  %v12363_v29 = vcombine.high %v283_v24, %v291_v25  ;;  %v898_v16 = vld [vmem:[#allocation9 + $0x1450] sm:$0xff]  ;;  %v379_v18 = vld [vmem:[#allocation9 + $0x418] sm:$0xff] }
 0x276   :  { %6898 = vmatpush1.bf16.msra.mxu0 %v12760_v31  ;;  %v299_v31 = vld [vmem:[#allocation9 + $0x198] sm:$0xff] }
 0x277   :  { %6816 = vmatpush1.bf16.msra.mxu1 %v13270_v32  ;;  %6899 = vmatprep.subr.bf16.mxu0 %v12777_v33  ;;  %v307_v32 = vld [vmem:[#allocation9 + $0x1d8] sm:$0xff]  ;;  %v12872_v33 = vcombine.low %v794_v21, %v802_v22 }
 0x278   :  { %6817 = vmatprep.subr.bf16.mxu1 %v13287_v34  ;;  %v12362_v34 = vcombine.low %v283_v24, %v291_v25  ;;  %v12379_v38 = vcombine.high %v299_v31, %v307_v32  ;;  %v906_v24 = vld [vmem:[#allocation9 + $0x1490] sm:$0xff] }
 0x279   :  { %v914_v25 = vld [vmem:[#allocation9 + $0x14d0] sm:$0xff] }
 0x27a   :  { %6900 = vmatpush1.bf16.msra.mxu0 %v12776_v42  ;;  %v315_v42 = vld [vmem:[#allocation9 + $0x218] sm:$0xff] }
 0x27b   :  { %6818 = vmatpush1.bf16.msra.mxu1 %v13286_v43  ;;  %6901 = vmatprep.subr.bf16.mxu0 %v12793_v45  ;;  %v323_v43 = vld [vmem:[#allocation9 + $0x258] sm:$0xff]  ;;  %v12888_v45 = vcombine.low %v810_v30, %v818_v35  ;;  %v12985_v30 = vcombine.high %v906_v24, %v914_v25 }
 0x27c   :  { %6819 = vmatprep.subr.bf16.mxu1 %v13303_v46  ;;  %v12378_v46 = vcombine.low %v299_v31, %v307_v32  ;;  %v12395_v48 = vcombine.high %v315_v42, %v323_v43  ;;  %v922_v31 = vld [vmem:[#allocation9 + $0x1510] sm:$0xff] }
 0x27d   :  { %v930_v32 = vld [vmem:[#allocation9 + $0x1550] sm:$0xff] }
 0x27e   :  { %6902 = vmatpush1.bf16.msra.mxu0 %v12792_v51  ;;  %v331_v51 = vld [vmem:[#allocation9 + $0x298] sm:$0xff] }
 0x27f   :  { %6820 = vmatpush1.bf16.msra.mxu1 %v13302_v52  ;;  %6903 = vmatprep.subr.bf16.mxu0 %v12809_v53  ;;  %v339_v52 = vld [vmem:[#allocation9 + $0x2d8] sm:$0xff]  ;;  %v12904_v53 = vcombine.low %v826_v39, %v834_v41  ;;  %v13001_v39 = vcombine.high %v922_v31, %v930_v32 }
 0x280   :  { %6821 = vmatprep.subr.bf16.mxu1 %v13319_v54  ;;  %v12394_v54 = vcombine.low %v315_v42, %v323_v43  ;;  %v12411_v60 = vcombine.high %v331_v51, %v339_v52  ;;  %v938_v42 = vld [vmem:[#allocation9 + $0x1590] sm:$0xff] }
 0x281   :  { %v946_v43 = vld [vmem:[#allocation9 + $0x15d0] sm:$0xff] }
 0x282   :  { %6904 = vmatpush1.bf16.msra.mxu0 %v12808_v63  ;;  %v347_v63 = vld [vmem:[#allocation9 + $0x318] sm:$0xff] }
 0x283   :  { %6822 = vmatpush1.bf16.msra.mxu1 %v13318_v0  ;;  %6905 = vmatprep.subr.bf16.mxu0 %v12825_v2  ;;  %v355_v0 = vld [vmem:[#allocation9 + $0x358] sm:$0xff]  ;;  %v12920_v2 = vcombine.low %v842_v49, %v850_v50  ;;  %v13017_v49 = vcombine.high %v938_v42, %v946_v43 }
 0x284   :  { %6823 = vmatprep.subr.bf16.mxu1 %v13335_v3  ;;  %v12410_v3 = vcombine.low %v331_v51, %v339_v52  ;;  %v12427_v5 = vcombine.high %v347_v63, %v355_v0  ;;  %v954_v51 = vld [vmem:[#allocation9 + $0x1610] sm:$0xff] }
 0x285   :  { %v962_v52 = vld [vmem:[#allocation9 + $0x1650] sm:$0xff] }
 0x286   :  { %6906 = vmatpush1.bf16.msra.mxu0 %v12824_v8  ;;  %v363_v8 = vld [vmem:[#allocation9 + $0x398] sm:$0xff] }
 0x287   :  { %6824 = vmatpush1.bf16.msra.mxu1 %v13334_v9  ;;  %6916 = vmatprep.subr.bf16.mxu0 %v12841_v10  ;;  %v371_v9 = vld [vmem:[#allocation9 + $0x3d8] sm:$0xff]  ;;  %v12936_v10 = vcombine.low %v858_v61, %v866_v62  ;;  %v13033_v61 = vcombine.high %v954_v51, %v962_v52 }
 0x288   :  { %6998 = vmatprep.subr.bf16.mxu1 %v12331_v11  ;;  %v12426_v11 = vcombine.low %v347_v63, %v355_v0  ;;  %v12443_v13 = vcombine.high %v363_v8, %v371_v9  ;;  %v12442_v21 = vcombine.low %v363_v8, %v371_v9  ;;  %v970_v63 = vld [vmem:[#allocation9 + $0x1690] sm:$0xff] }
 0x289   :  { %6908 = vmatmul.mubr.bf16.vlgmr.msra.gmra.mrb[4].mxu0 %v15428_v57  ;;  %v978_v0 = vld [vmem:[#allocation9 + $0x16d0] sm:$0xff] }
 0x28a   :  { %6826 = vmatmul.mubr.bf16.vlgmr.msra.gmra.mrb[4].mxu1 %v15451_v37  ;;  %6917 = vmatpush1.bf16.msra.mxu0 %v12840_v14  ;;  %v890_v14 = vld [vmem:[#allocation9 + $0x1410] sm:$0xff] }
 0x28b   :  { %6948 = vmatprep.mubr.bf16.mxu0 %v15434_v1  ;;  %6999 = vmatpush1.bf16.msra.mxu1 %v12330_v19  ;;  %v387_v19 = vld [vmem:[#allocation9 + $0x458] sm:$0xff]  ;;  %v12969_v22 = vcombine.high %v890_v14, %v898_v16  ;;  %v986_v8 = vld [vmem:[#allocation9 + $0x1710] sm:$0xff] }
 0x28c   :  { %7030 = vmatprep.mubr.bf16.mxu1 %v15426_v56  ;;  %6918 = vmatprep.subr.bf16.mxu0 %v12857_v20  ;;  %v12952_v20 = vcombine.low %v874_v6, %v882_v7  ;;  %v13049_v6 = vcombine.high %v970_v63, %v978_v0  ;;  %v994_v9 = vld [vmem:[#allocation9 + $0x1750] sm:$0xff] }
 0x28d   :  { %7000 = vmatprep.subr.bf16.mxu1 %v12347_v23  ;;  %v12459_v23 = vcombine.high %v379_v18, %v387_v19 }
 0x28e   :  { %6919 = vmatpush1.bf16.msra.mxu0 %v12856_v26  ;;  %v395_v26 = vld [vmem:[#allocation9 + $0x498] sm:$0xff] }
 0x28f   :  { %7001 = vmatpush1.bf16.msra.mxu1 %v12346_v27  ;;  %6920 = vmatprep.subr.bf16.mxu0 %v12873_v28  ;;  %v403_v27 = vld [vmem:[#allocation9 + $0x4d8] sm:$0xff]  ;;  %v12968_v28 = vcombine.low %v890_v14, %v898_v16  ;;  %v13065_v14 = vcombine.high %v986_v8, %v994_v9 }
 0x290   :  { %7002 = vmatprep.subr.bf16.mxu1 %v12363_v29  ;;  %v12458_v29 = vcombine.low %v379_v18, %v387_v19  ;;  %v12475_v35 = vcombine.high %v395_v26, %v403_v27  ;;  %v1002_v18 = vld [vmem:[#allocation9 + $0x1790] sm:$0xff] }
 0x291   :  { %v1010_v19 = vld [vmem:[#allocation9 + $0x17d0] sm:$0xff] }
 0x292   :  { %6921 = vmatpush1.bf16.msra.mxu0 %v12872_v33  ;;  %v411_v33 = vld [vmem:[#allocation9 + $0x518] sm:$0xff] }
 0x293   :  { %7003 = vmatpush1.bf16.msra.mxu1 %v12362_v34  ;;  %6922 = vmatprep.subr.bf16.mxu0 %v12889_v36  ;;  %v419_v34 = vld [vmem:[#allocation9 + $0x558] sm:$0xff]  ;;  %v12984_v36 = vcombine.low %v906_v24, %v914_v25  ;;  %v13081_v24 = vcombine.high %v1002_v18, %v1010_v19 }
 0x294   :  { %7004 = vmatprep.subr.bf16.mxu1 %v12379_v38  ;;  %v12474_v38 = vcombine.low %v395_v26, %v403_v27  ;;  %v12491_v41 = vcombine.high %v411_v33, %v419_v34  ;;  %v1018_v26 = vld [vmem:[#allocation9 + $0x1810] sm:$0xff] }
 0x295   :  { %v1026_v27 = vld [vmem:[#allocation9 + $0x1850] sm:$0xff] }
 0x296   :  { %6923 = vmatpush1.bf16.msra.mxu0 %v12888_v45  ;;  %v427_v45 = vld [vmem:[#allocation9 + $0x598] sm:$0xff] }
 0x297   :  { %7005 = vmatpush1.bf16.msra.mxu1 %v12378_v46  ;;  %6924 = vmatprep.subr.bf16.mxu0 %v12905_v47  ;;  %v435_v46 = vld [vmem:[#allocation9 + $0x5d8] sm:$0xff]  ;;  %v13000_v47 = vcombine.low %v922_v31, %v930_v32  ;;  %v13097_v31 = vcombine.high %v1018_v26, %v1026_v27 }
 0x298   :  { %7006 = vmatprep.subr.bf16.mxu1 %v12395_v48  ;;  %v12490_v48 = vcombine.low %v411_v33, %v419_v34  ;;  %v12507_v50 = vcombine.high %v427_v45, %v435_v46  ;;  %v1034_v33 = vld [vmem:[#allocation9 + $0x1890] sm:$0xff] }
 0x299   :  { %v1042_v34 = vld [vmem:[#allocation9 + $0x18d0] sm:$0xff] }
 0x29a   :  { %6925 = vmatpush1.bf16.msra.mxu0 %v12904_v53  ;;  %v443_v53 = vld [vmem:[#allocation9 + $0x618] sm:$0xff] }
 0x29b   :  { %7007 = vmatpush1.bf16.msra.mxu1 %v12394_v54  ;;  %6926 = vmatprep.subr.bf16.mxu0 %v12921_v59  ;;  %v451_v54 = vld [vmem:[#allocation9 + $0x658] sm:$0xff]  ;;  %v13016_v59 = vcombine.low %v938_v42, %v946_v43  ;;  %v13113_v42 = vcombine.high %v1034_v33, %v1042_v34  ;;  %v1050_v43 = vld [vmem:[#allocation9 + $0x1910] sm:$0xff] }
 0x29c   :  { %7008 = vmatprep.subr.bf16.mxu1 %v12411_v60  ;;  %v12506_v60 = vcombine.low %v427_v45, %v435_v46  ;;  %v12523_v62 = vcombine.high %v443_v53, %v451_v54  ;;  %v1058_v45 = vld [vmem:[#allocation9 + $0x1950] sm:$0xff] }
 0x29e   :  { %6927 = vmatpush1.bf16.msra.mxu0 %v12920_v2  ;;  %v459_v2 = vld [vmem:[#allocation9 + $0x698] sm:$0xff] }
 0x29f   :  { %7009 = vmatpush1.bf16.msra.mxu1 %v12410_v3  ;;  %6928 = vmatprep.subr.bf16.mxu0 %v12937_v4  ;;  %v467_v3 = vld [vmem:[#allocation9 + $0x6d8] sm:$0xff]  ;;  %v13032_v4 = vcombine.low %v954_v51, %v962_v52  ;;  %v13129_v52 = vcombine.high %v1050_v43, %v1058_v45 }
 0x2a0   :  { %7010 = vmatprep.subr.bf16.mxu1 %v12427_v5  ;;  %v12522_v5 = vcombine.low %v443_v53, %v451_v54  ;;  %v12539_v7 = vcombine.high %v459_v2, %v467_v3  ;;  %v1066_v54 = vld [vmem:[#allocation9 + $0x1990] sm:$0xff] }
 0x2a2   :  { %6929 = vmatpush1.bf16.msra.mxu0 %v12936_v10  ;;  %v475_v10 = vld [vmem:[#allocation9 + $0x718] sm:$0xff] }
 0x2a3   :  { %7011 = vmatpush1.bf16.msra.mxu1 %v12426_v11  ;;  %6930 = vmatprep.subr.bf16.mxu0 %v12953_v12  ;;  %v483_v11 = vld [vmem:[#allocation9 + $0x758] sm:$0xff]  ;;  %v13048_v12 = vcombine.low %v970_v63, %v978_v0 }
 0x2a4   :  { %7012 = vmatprep.subr.bf16.mxu1 %v12443_v13  ;;  %v12538_v13 = vcombine.low %v459_v2, %v467_v3  ;;  %v12555_v16 = vcombine.high %v475_v10, %v483_v11 }
 0x2a6   :  { %6931 = vmatpush1.bf16.msra.mxu0 %v12952_v20  ;;  %v491_v20 = vld [vmem:[#allocation9 + $0x798] sm:$0xff] }
 0x2a7   :  { %7013 = vmatpush1.bf16.msra.mxu1 %v12442_v21  ;;  %6932 = vmatprep.subr.bf16.mxu0 %v12969_v22  ;;  %v499_v21 = vld [vmem:[#allocation9 + $0x7d8] sm:$0xff]  ;;  %v13064_v22 = vcombine.low %v986_v8, %v994_v9 }
 0x2a8   :  { %7014 = vmatprep.subr.bf16.mxu1 %v12459_v23  ;;  %v12554_v23 = vcombine.low %v475_v10, %v483_v11  ;;  %v12571_v25 = vcombine.high %v491_v20, %v499_v21 }
 0x2aa   :  { %6933 = vmatpush1.bf16.msra.mxu0 %v12968_v28  ;;  %v507_v28 = vld [vmem:[#allocation9 + $0x818] sm:$0xff] }
 0x2ab   :  { %7015 = vmatpush1.bf16.msra.mxu1 %v12458_v29  ;;  %6934 = vmatprep.subr.bf16.mxu0 %v12985_v30  ;;  %v515_v29 = vld [vmem:[#allocation9 + $0x858] sm:$0xff]  ;;  %v13080_v30 = vcombine.low %v1002_v18, %v1010_v19  ;;  %v1106_v18 = vld [vmem:[#allocation9 + $0x1ad0] sm:$0xff] }
 0x2ac   :  { %7016 = vmatprep.subr.bf16.mxu1 %v12475_v35  ;;  %v12570_v35 = vcombine.low %v491_v20, %v499_v21  ;;  %v12587_v32 = vcombine.high %v507_v28, %v515_v29  ;;  %v587_v19 = vld [vmem:[#allocation9 + $0xa98] sm:$0xff] }
 0x2ad   :  { %v595_v20 = vld [vmem:[#allocation9 + $0xad8] sm:$0xff] }
 0x2ae   :  { %6935 = vmatpush1.bf16.msra.mxu0 %v12984_v36  ;;  %v13096_v36 = vcombine.low %v1018_v26, %v1026_v27  ;;  %v12667_v26 = vcombine.high %v587_v19, %v595_v20  ;;  %v1114_v27 = vld [vmem:[#allocation9 + $0x1b10] sm:$0xff] }
 0x2af   :  { %7017 = vmatpush1.bf16.msra.mxu1 %v12474_v38  ;;  %6936 = vmatprep.subr.bf16.mxu0 %v13001_v39  ;;  %v523_v38 = vld [vmem:[#allocation9 + $0x898] sm:$0xff] }
 0x2b0   :  { %7018 = vmatprep.subr.bf16.mxu1 %v12491_v41  ;;  %v531_v39 = vld [vmem:[#allocation9 + $0x8d8] sm:$0xff]  ;;  %v12586_v41 = vcombine.low %v507_v28, %v515_v29  ;;  %v1122_v28 = vld [vmem:[#allocation9 + $0x1b50] sm:$0xff] }
 0x2b1   :  { %v12603_v46 = vcombine.high %v523_v38, %v531_v39  ;;  %v12602_v51 = vcombine.low %v523_v38, %v531_v39  ;;  %v603_v29 = vld [vmem:[#allocation9 + $0xb18] sm:$0xff]  ;;  %v1130_v39 = vld [vmem:[#allocation9 + $0x1b90] sm:$0xff] }
 0x2b2   :  { %6937 = vmatpush1.bf16.msra.mxu0 %v13000_v47  ;;  %v539_v47 = vld [vmem:[#allocation9 + $0x918] sm:$0xff] }
 0x2b3   :  { %7019 = vmatpush1.bf16.msra.mxu1 %v12490_v48  ;;  %6938 = vmatprep.subr.bf16.mxu0 %v13017_v49  ;;  %v547_v48 = vld [vmem:[#allocation9 + $0x958] sm:$0xff]  ;;  %v13112_v49 = vcombine.low %v1034_v33, %v1042_v34  ;;  %v13193_v33 = vcombine.high %v1114_v27, %v1122_v28 }
 0x2b4   :  { %7020 = vmatprep.subr.bf16.mxu1 %v12507_v50  ;;  %v1278_v50 = vlaneseq  ;;  %v12619_v53 = vcombine.high %v539_v47, %v547_v48  ;;  %v12618_v0 = vcombine.low %v539_v47, %v547_v48 }
 0x2b6   :  { %6939 = vmatpush1.bf16.msra.mxu0 %v13016_v59  ;;  %v1074_v59 = vld [vmem:[#allocation9 + $0x19d0] sm:$0xff]  ;;  %v15473_v63 = vshrl.u32 %v1278_v50, 7 }
 0x2b7   :  { %7021 = vmatpush1.bf16.msra.mxu1 %v12506_v60  ;;  %6940 = vmatprep.subr.bf16.mxu0 %v13033_v61  ;;  %v555_v60 = vld [vmem:[#allocation9 + $0x998] sm:$0xff]  ;;  %v13145_v2 = vcombine.high %v1066_v54, %v1074_v59  ;;  %v13144_v8 = vcombine.low %v1066_v54, %v1074_v59 }
 0x2b8   :  { %7022 = vmatprep.subr.bf16.mxu1 %v12523_v62  ;;  %v563_v61 = vld [vmem:[#allocation9 + $0x9d8] sm:$0xff]  ;;  %v13128_v62 = vcombine.low %v1050_v43, %v1058_v45  ;;  %v15476_v9 = vsub.s32 0, %v15473_v63 }
 0x2b9   :  { %v12635_v3 = vcombine.high %v555_v60, %v563_v61  ;;  %v12634_v10 = vcombine.low %v555_v60, %v563_v61  ;;  %v619_v45 = vld [vmem:[#allocation9 + $0xb98] sm:$0xff] }
 0x2ba   :  { %6941 = vmatpush1.bf16.msra.mxu0 %v13032_v4  ;;  %v1082_v4 = vld [vmem:[#allocation9 + $0x1a10] sm:$0xff]  ;;  %v635_v54 = vld [vmem:[#allocation9 + $0xc18] sm:$0xff] }
 0x2bb   :  { %7023 = vmatpush1.bf16.msra.mxu1 %v12522_v5  ;;  %6942 = vmatprep.subr.bf16.mxu0 %v13049_v6  ;;  %v1090_v5 = vld [vmem:[#allocation9 + $0x1a50] sm:$0xff]  ;;  %v571_v6 = vld [vmem:[#allocation9 + $0xa18] sm:$0xff] }
 0x2bc   :  { %7024 = vmatprep.subr.bf16.mxu1 %v12539_v7  ;;  %v579_v7 = vld [vmem:[#allocation9 + $0xa58] sm:$0xff]  ;;  %v13161_v11 = vcombine.high %v1082_v4, %v1090_v5  ;;  %v13160_v21 = vcombine.low %v1082_v4, %v1090_v5 }
 0x2bd   :  { %v643_v59 = vld [vmem:[#allocation9 + $0xc58] sm:$0xff] }
 0x2be   :  { %6943 = vmatpush1.bf16.msra.mxu0 %v13048_v12  ;;  %v1274_v12 = vld [vmem:[#allocation10] sm:$0xff]  ;;  %v651_v4 = vld [vmem:[#allocation9 + $0xc98] sm:$0xff] }
 0x2bf   :  { %7025 = vmatpush1.bf16.msra.mxu1 %v12538_v13  ;;  %6944 = vmatprep.subr.bf16.mxu0 %v13065_v14  ;;  %v15479_v13 = vsub.s32 1, %v15473_v63  ;;  %v12651_v14 = vcombine.high %v571_v6, %v579_v7  ;;  %v659_v5 = vld [vmem:[#allocation9 + $0xcd8] sm:$0xff] }
 0x2c0   :  { %7026 = vmatprep.subr.bf16.mxu1 %v12555_v16  ;;  %v1098_v16 = vld [vmem:[#allocation9 + $0x1a90] sm:$0xff] }
 0x2c2   :  { %6945 = vmatpush1.bf16.msra.mxu0 %v13064_v22  ;;  %v1281_v22 = vrot.slane %v1274_v12, %v15476_v9 }
 0x2c3   :  { %7027 = vmatpush1.bf16.msra.mxu1 %v12554_v23  ;;  %6946 = vmatprep.subr.bf16.mxu0 %v13081_v24  ;;  %v12650_v23 = vcombine.low %v571_v6, %v579_v7  ;;  %v13177_v24 = vcombine.high %v1098_v16, %v1106_v18  ;;  %v12714_v7 = vcombine.low %v635_v54, %v643_v59 }
 0x2c4   :  { %7028 = vmatprep.subr.bf16.mxu1 %v12571_v25  ;;  %v1285_v25 = vrot.slane %v1274_v12, %v15479_v13  ;;  %v1186_v12 = vld [vmem:[#allocation9 + $0x1d50] sm:$0xff] }
 0x2c6   :  { %6947 = vmatpush1.bf16.msra.mxu0 %v13080_v30  ;;  %v611_v30 = vld [vmem:[#allocation9 + $0xb58] sm:$0xff]  ;;  %v6543_v34 = vadd.f32 %v15463_v44, %v1285_v25 }
 0x2c7   :  { %7029 = vmatpush1.bf16.msra.mxu1 %v12570_v35  ;;  %6957 = vmatprep.subr.bf16.mxu0 %v13097_v31  ;;  %v13176_v35 = vcombine.low %v1098_v16, %v1106_v18  ;;  %v6541_v31 = vadd.f32 %v15461_v40, %v1281_v22  ;;  %v12683_v38 = vcombine.high %v603_v29, %v611_v30  ;;  %v675_v16 = vld [vmem:[#allocation9 + $0xd58] sm:$0xff]  ;;  %v1194_v22 = vld [vmem:[#allocation9 + $0x1d90] sm:$0xff] }
 0x2c8   :  { %7039 = vmatprep.subr.bf16.mxu1 %v12587_v32  ;;  %v12666_v32 = vcombine.low %v587_v19, %v595_v20  ;;  %v13192_v40 = vcombine.low %v1114_v27, %v1122_v28  ;;  %v12682_v50 = vcombine.low %v603_v29, %v611_v30  ;;  %v12730_v19 = vcombine.low %v651_v4, %v659_v5  ;;  %v691_v25 = vld [vmem:[#allocation9 + $0xdd8] sm:$0xff]  ;;  %v1210_v30 = vld [vmem:[#allocation9 + $0x1e10] sm:$0xff] }
 0x2c9   :  { %6949 = vmatmul.mubr.bf16.vlgmr.msra.gmra.mrb[4].mxu0 %v15442_v15 }
 0x2ca   :  { %7031 = vmatmul.mubr.bf16.vlgmr.msra.gmra.mrb[8].mxu1 %v15424_v55  ;;  %6958 = vmatpush1.bf16.msra.mxu0 %v13096_v36 }
 0x2cb   :  { %6989 = vmatprep.mubr.bf16.mxu0 %v15444_v17  ;;  %7040 = vmatpush1.bf16.msra.mxu1 %v12586_v41  ;;  %v1138_v41 = vld [vmem:[#allocation9 + $0x1bd0] sm:$0xff] }
 0x2cc   :  { %7071 = vmatprep.mubr.bf16.mxu1 %v15430_v58  ;;  %6959 = vmatprep.subr.bf16.mxu0 %v13113_v42  ;;  %v13209_v44 = vcombine.high %v1130_v39, %v1138_v41  ;;  %v13208_v60 = vcombine.low %v1130_v39, %v1138_v41  ;;  %v1226_v39 = vld [vmem:[#allocation9 + $0x1e90] sm:$0xff] }
 0x2cd   :  { %7041 = vmatprep.subr.bf16.mxu1 %v12603_v46  ;;  %v627_v46 = vld [vmem:[#allocation9 + $0xbd8] sm:$0xff]  ;;  %v1234_v41 = vld [vmem:[#allocation9 + $0x1ed0] sm:$0xff] }
 0x2ce   :  { %6960 = vmatpush1.bf16.msra.mxu0 %v13112_v49  ;;  %v12698_v61 = vcombine.low %v619_v45, %v627_v46 }
 0x2cf   :  { %7042 = vmatpush1.bf16.msra.mxu1 %v12602_v51  ;;  %6961 = vmatprep.subr.bf16.mxu0 %v13129_v52  ;;  %v12699_v51 = vcombine.high %v619_v45, %v627_v46  ;;  %v1146_v52 = vld [vmem:[#allocation9 + $0x1c10] sm:$0xff]  ;;  %v723_v45 = vld [vmem:[#allocation9 + $0xed8] sm:$0xff] }
 0x2d0   :  { %7043 = vmatprep.subr.bf16.mxu1 %v12619_v53  ;;  %v1154_v53 = vld [vmem:[#allocation9 + $0x1c50] sm:$0xff] }
 0x2d1   :  { %v13224_v6 = vcombine.low %v1146_v52, %v1154_v53 }
 0x2d2   :  { %6962 = vmatpush1.bf16.msra.mxu0 %v13128_v62  ;;  %v13225_v62 = vcombine.high %v1146_v52, %v1154_v53  ;;  %v739_v52 = vld [vmem:[#allocation9 + $0xf58] sm:$0xff]  ;;  %v13304_v53 = vcombine.low %v1226_v39, %v1234_v41 }
 0x2d3   :  { %7044 = vmatpush1.bf16.msra.mxu1 %v12618_v0  ;;  %6963 = vmatprep.subr.bf16.mxu0 %v13145_v2  ;;  %v12715_v0 = vcombine.high %v635_v54, %v643_v59  ;;  %v1162_v2 = vld [vmem:[#allocation9 + $0x1c90] sm:$0xff] }
 0x2d4   :  { %7045 = vmatprep.subr.bf16.mxu1 %v12635_v3  ;;  %v1170_v3 = vld [vmem:[#allocation9 + $0x1cd0] sm:$0xff] }
 0x2d5   :  { %v13240_v18 = vcombine.low %v1162_v2, %v1170_v3 }
 0x2d6   :  { %6964 = vmatpush1.bf16.msra.mxu0 %v13144_v8  ;;  %v13241_v8 = vcombine.high %v1162_v2, %v1170_v3  ;;  %v755_v2 = vld [vmem:[#allocation9 + $0xfd8] sm:$0xff] }
 0x2d7   :  { %7046 = vmatpush1.bf16.msra.mxu1 %v12634_v10  ;;  %6965 = vmatprep.subr.bf16.mxu0 %v13161_v11  ;;  %v12731_v10 = vcombine.high %v651_v4, %v659_v5  ;;  %v1178_v11 = vld [vmem:[#allocation9 + $0x1d10] sm:$0xff] }
 0x2d8   :  { %7047 = vmatprep.subr.bf16.mxu1 %v12651_v14  ;;  %v667_v14 = vld [vmem:[#allocation9 + $0xd18] sm:$0xff]  ;;  %v13257_v20 = vcombine.high %v1178_v11, %v1186_v12 }
 0x2d9   :  { %v12746_v27 = vcombine.low %v667_v14, %v675_v16 }
 0x2da   :  { %6966 = vmatpush1.bf16.msra.mxu0 %v13160_v21  ;;  %v12747_v21 = vcombine.high %v667_v14, %v675_v16 }
 0x2db   :  { %7048 = vmatpush1.bf16.msra.mxu1 %v12650_v23  ;;  %6967 = vmatprep.subr.bf16.mxu0 %v13177_v24  ;;  %v1202_v23 = vld [vmem:[#allocation9 + $0x1dd0] sm:$0xff]  ;;  %v683_v24 = vld [vmem:[#allocation9 + $0xd98] sm:$0xff] }
 0x2dc   :  { %v6663_v36 = vpop.f32.mrb[0].mxu0  ;;  %7049 = vmatprep.subr.bf16.mxu1 %v12667_v26  ;;  %v13256_v26 = vcombine.low %v1178_v11, %v1186_v12  ;;  %v13273_v28 = vcombine.high %v1194_v22, %v1202_v23  ;;  %v12763_v29 = vcombine.high %v683_v24, %v691_v25  ;;  %v771_v11 = vld [vmem:[#allocation9 + $0x1058] sm:$0xff] }
 0x2dd   :  { %v15485_v42 = vadd.f32 %v6663_v36, %v6541_v31  ;;  %v6665_v43 = vpop.f32.mrb[1].mxu0  ;;  %v699_v31 = vld [vmem:[#allocation9 + $0xe18] sm:$0xff] }
 0x2de   :  { %v15487_v47 = vadd.f32 %v6665_v43, %v6543_v34  ;;  %v6667_v48 = vpop.f32.mrb[2].mxu0  ;;  %6968 = vmatpush1.bf16.msra.mxu0 %v13176_v35  ;;  %v1218_v35 = vld [vmem:[#allocation9 + $0x1e50] sm:$0xff]  ;;  %v12762_v34 = vcombine.low %v683_v24, %v691_v25  ;;  %v715_v43 = vld [vmem:[#allocation9 + $0xe98] sm:$0xff] }
 0x2df   :  { %7050 = vmatpush1.bf16.msra.mxu1 %v12666_v32  ;;  %v6668_v49 = vpop.f32.mrb[3].mxu0  ;;  %6969 = vmatprep.subr.bf16.mxu0 %v13193_v33  ;;  %v707_v32 = vld [vmem:[#allocation9 + $0xe58] sm:$0xff]  ;;  %v13272_v33 = vcombine.low %v1194_v22, %v1202_v23  ;;  %v13289_v36 = vcombine.high %v1210_v30, %v1218_v35  ;;  %v13288_v46 = vcombine.low %v1210_v30, %v1218_v35  ;;  %v268_v22 = vld [vmem:[#allocation9 + $0xa0] sm:$0xff] }
 0x2e0   :  { %7051 = vmatprep.subr.bf16.mxu1 %v12683_v38  ;;  %v12779_v38 = vcombine.high %v699_v31, %v707_v32  ;;  %v12778_v48 = vcombine.low %v699_v31, %v707_v32  ;;  %v12795_v49 = vcombine.high %v715_v43, %v723_v45  ;;  %v12794_v54 = vcombine.low %v715_v43, %v723_v45  ;;  %v276_v23 = vld [vmem:[#allocation9 + $0xe0] sm:$0xff]  ;;  %v803_v30 = vld [vmem:[#allocation9 + $0x1158] sm:$0xff] }
 0x2e1   :  { %v12348_v35 = vcombine.low %v268_v22, %v276_v23 }
 0x2e2   :  { %6970 = vmatpush1.bf16.msra.mxu0 %v13192_v40  ;;  %v13305_v40 = vcombine.high %v1226_v39, %v1234_v41  ;;  %v819_v39 = vld [vmem:[#allocation9 + $0x11d8] sm:$0xff] }
 0x2e3   :  { %7052 = vmatpush1.bf16.msra.mxu1 %v12682_v50  ;;  %6971 = vmatprep.subr.bf16.mxu0 %v13209_v44  ;;  %v1242_v50 = vld [vmem:[#allocation9 + $0x1f10] sm:$0xff] }
 0x2e4   :  { %7053 = vmatprep.subr.bf16.mxu1 %v12699_v51  ;;  %v1250_v44 = vld [vmem:[#allocation9 + $0x1f50] sm:$0xff]  ;;  %v731_v51 = vld [vmem:[#allocation9 + $0xf18] sm:$0xff] }
 0x2e5   :  { %v13321_v59 = vcombine.high %v1242_v50, %v1250_v44  ;;  %v13320_v3 = vcombine.low %v1242_v50, %v1250_v44  ;;  %v12810_v4 = vcombine.low %v731_v51, %v739_v52  ;;  %v835_v50 = vld [vmem:[#allocation9 + $0x1258] sm:$0xff] }
 0x2e6   :  { %6972 = vmatpush1.bf16.msra.mxu0 %v13208_v60  ;;  %v12811_v60 = vcombine.high %v731_v51, %v739_v52 }
 0x2e7   :  { %7054 = vmatpush1.bf16.msra.mxu1 %v12698_v61  ;;  %6973 = vmatprep.subr.bf16.mxu0 %v13225_v62  ;;  %v1258_v61 = vld [vmem:[#allocation9 + $0x1f90] sm:$0xff] }
 0x2e8   :  { %7055 = vmatprep.subr.bf16.mxu1 %v12715_v0  ;;  %v1266_v62 = vld [vmem:[#allocation9 + $0x1fd0] sm:$0xff]  ;;  %v747_v0 = vld [vmem:[#allocation9 + $0xf98] sm:$0xff] }
 0x2e9   :  { %v13337_v5 = vcombine.high %v1258_v61, %v1266_v62  ;;  %v13336_v12 = vcombine.low %v1258_v61, %v1266_v62  ;;  %v12826_v14 = vcombine.low %v747_v0, %v755_v2  ;;  %v851_v61 = vld [vmem:[#allocation9 + $0x12d8] sm:$0xff] }
 0x2ea   :  { %6974 = vmatpush1.bf16.msra.mxu0 %v13224_v6  ;;  %v12827_v6 = vcombine.high %v747_v0, %v755_v2 }
 0x2eb   :  { %7056 = vmatpush1.bf16.msra.mxu1 %v12714_v7  ;;  %6975 = vmatprep.subr.bf16.mxu0 %v13241_v8  ;;  %v252_v7 = vld [vmem:[#allocation9 + $0x20] sm:$0xff] }
 0x2ec   :  { %7057 = vmatprep.subr.bf16.mxu1 %v12731_v10  ;;  %v260_v8 = vld [vmem:[#allocation9 + $0x60] sm:$0xff]  ;;  %v763_v10 = vld [vmem:[#allocation9 + $0x1018] sm:$0xff] }
 0x2ed   :  { %v12333_v16 = vcombine.high %v252_v7, %v260_v8  ;;  %v12842_v24 = vcombine.low %v763_v10, %v771_v11 }
 0x2ee   :  { %6976 = vmatpush1.bf16.msra.mxu0 %v13240_v18  ;;  %v12843_v18 = vcombine.high %v763_v10, %v771_v11 }
 0x2ef   :  { %7058 = vmatpush1.bf16.msra.mxu1 %v12730_v19  ;;  %6977 = vmatprep.subr.bf16.mxu0 %v13257_v20  ;;  %v779_v19 = vld [vmem:[#allocation9 + $0x1098] sm:$0xff] }
 0x2f0   :  { %7059 = vmatprep.subr.bf16.mxu1 %v12747_v21  ;;  %v787_v20 = vld [vmem:[#allocation9 + $0x10d8] sm:$0xff]  ;;  %v12332_v21 = vcombine.low %v252_v7, %v260_v8 }
 0x2f1   :  { %v12859_v25 = vcombine.high %v779_v19, %v787_v20  ;;  %v12858_v31 = vcombine.low %v779_v19, %v787_v20  ;;  %v867_v7 = vld [vmem:[#allocation9 + $0x1358] sm:$0xff] }
 0x2f2   :  { %6978 = vmatpush1.bf16.msra.mxu0 %v13256_v26  ;;  %v284_v26 = vld [vmem:[#allocation9 + $0x120] sm:$0xff]  ;;  %v883_v19 = vld [vmem:[#allocation9 + $0x13d8] sm:$0xff] }
 0x2f3   :  { %7060 = vmatpush1.bf16.msra.mxu1 %v12746_v27  ;;  %6979 = vmatprep.subr.bf16.mxu0 %v13273_v28  ;;  %v292_v27 = vld [vmem:[#allocation9 + $0x160] sm:$0xff]  ;;  %v12349_v28 = vcombine.high %v268_v22, %v276_v23 }
 0x2f4   :  { %7061 = vmatprep.subr.bf16.mxu1 %v12763_v29  ;;  %v795_v29 = vld [vmem:[#allocation9 + $0x1118] sm:$0xff]  ;;  %v12365_v32 = vcombine.high %v284_v26, %v292_v27  ;;  %v12364_v41 = vcombine.low %v284_v26, %v292_v27 }
 0x2f5   :  { %v12874_v43 = vcombine.low %v795_v29, %v803_v30  ;;  %v891_v26 = vld [vmem:[#allocation9 + $0x1418] sm:$0xff] }
 0x2f6   :  { %6980 = vmatpush1.bf16.msra.mxu0 %v13272_v33  ;;  %v12875_v33 = vcombine.high %v795_v29, %v803_v30  ;;  %v899_v27 = vld [vmem:[#allocation9 + $0x1458] sm:$0xff] }
 0x2f7   :  { %7062 = vmatpush1.bf16.msra.mxu1 %v12762_v34  ;;  %6981 = vmatprep.subr.bf16.mxu0 %v13289_v36  ;;  %v300_v34 = vld [vmem:[#allocation9 + $0x1a0] sm:$0xff] }
 0x2f8   :  { %7063 = vmatprep.subr.bf16.mxu1 %v12779_v38  ;;  %v308_v36 = vld [vmem:[#allocation9 + $0x1e0] sm:$0xff]  ;;  %v811_v38 = vld [vmem:[#allocation9 + $0x1198] sm:$0xff] }
 0x2f9   :  { %v12381_v45 = vcombine.high %v300_v34, %v308_v36  ;;  %v12380_v44 = vcombine.low %v300_v34, %v308_v36  ;;  %v12890_v51 = vcombine.low %v811_v38, %v819_v39  ;;  %v915_v34 = vld [vmem:[#allocation9 + $0x14d8] sm:$0xff] }
 0x2fa   :  { %6982 = vmatpush1.bf16.msra.mxu0 %v13288_v46  ;;  %v12891_v46 = vcombine.high %v811_v38, %v819_v39  ;;  %v12970_v38 = vcombine.low %v891_v26, %v899_v27 }
 0x2fb   :  { %7064 = vmatpush1.bf16.msra.mxu1 %v12778_v48  ;;  %6983 = vmatprep.subr.bf16.mxu0 %v13305_v40  ;;  %v316_v48 = vld [vmem:[#allocation9 + $0x220] sm:$0xff] }
 0x2fc   :  { %7065 = vmatprep.subr.bf16.mxu1 %v12795_v49  ;;  %v324_v40 = vld [vmem:[#allocation9 + $0x260] sm:$0xff]  ;;  %v827_v49 = vld [vmem:[#allocation9 + $0x1218] sm:$0xff] }
 0x2fd   :  { %v12397_v52 = vcombine.high %v316_v48, %v324_v40  ;;  %v12396_v62 = vcombine.low %v316_v48, %v324_v40  ;;  %v12906_v0 = vcombine.low %v827_v49, %v835_v50  ;;  %v931_v48 = vld [vmem:[#allocation9 + $0x1558] sm:$0xff] }
 0x2fe   :  { %6984 = vmatpush1.bf16.msra.mxu0 %v13304_v53  ;;  %v12907_v53 = vcombine.high %v827_v49, %v835_v50 }
 0x2ff   :  { %7066 = vmatpush1.bf16.msra.mxu1 %v12794_v54  ;;  %6985 = vmatprep.subr.bf16.mxu0 %v13321_v59  ;;  %v332_v54 = vld [vmem:[#allocation9 + $0x2a0] sm:$0xff] }
 0x300   :  { %7067 = vmatprep.subr.bf16.mxu1 %v12811_v60  ;;  %v340_v59 = vld [vmem:[#allocation9 + $0x2e0] sm:$0xff]  ;;  %v843_v60 = vld [vmem:[#allocation9 + $0x1298] sm:$0xff] }
 0x301   :  { %v12413_v2 = vcombine.high %v332_v54, %v340_v59  ;;  %v12412_v8 = vcombine.low %v332_v54, %v340_v59  ;;  %v12922_v10 = vcombine.low %v843_v60, %v851_v61  ;;  %v947_v54 = vld [vmem:[#allocation9 + $0x15d8] sm:$0xff] }
 0x302   :  { %6986 = vmatpush1.bf16.msra.mxu0 %v13320_v3  ;;  %v12923_v3 = vcombine.high %v843_v60, %v851_v61 }
 0x303   :  { %7068 = vmatpush1.bf16.msra.mxu1 %v12810_v4  ;;  %6987 = vmatprep.subr.bf16.mxu0 %v13337_v5  ;;  %v348_v4 = vld [vmem:[#allocation9 + $0x320] sm:$0xff] }
 0x304   :  { %7069 = vmatprep.subr.bf16.mxu1 %v12827_v6  ;;  %v356_v5 = vld [vmem:[#allocation9 + $0x360] sm:$0xff]  ;;  %v859_v6 = vld [vmem:[#allocation9 + $0x1318] sm:$0xff] }
 0x305   :  { %v12429_v11 = vcombine.high %v348_v4, %v356_v5  ;;  %v12428_v20 = vcombine.low %v348_v4, %v356_v5  ;;  %v963_v4 = vld [vmem:[#allocation9 + $0x1658] sm:$0xff] }
 0x306   :  { %6988 = vmatpush1.bf16.msra.mxu0 %v13336_v12  ;;  %v12939_v12 = vcombine.high %v859_v6, %v867_v7 }
 0x307   :  { %7070 = vmatpush1.bf16.msra.mxu1 %v12826_v14  ;;  %7162 = vmatprep.subr.bf16.mxu0 %v12333_v16  ;;  %v364_v14 = vld [vmem:[#allocation9 + $0x3a0] sm:$0xff] }
 0x308   :  { %7080 = vmatprep.subr.bf16.mxu1 %v12843_v18  ;;  %v372_v16 = vld [vmem:[#allocation9 + $0x3e0] sm:$0xff]  ;;  %v875_v18 = vld [vmem:[#allocation9 + $0x1398] sm:$0xff] }
 0x309   :  { %6990 = vmatmul.mubr.bf16.vlgmr.msra.gmra.mrb[4].mxu0 %v15451_v37  ;;  %v12445_v22 = vcombine.high %v364_v14, %v372_v16  ;;  %v12955_v23 = vcombine.high %v875_v18, %v883_v19  ;;  %v12954_v29 = vcombine.low %v875_v18, %v883_v19 }
 0x30a   :  { %7072 = vmatmul.mubr.bf16.vlgmr.msra.gmra.mrb[8].mxu1 %v15428_v57  ;;  %7163 = vmatpush1.bf16.msra.mxu0 %v12332_v21  ;;  %v12938_v21 = vcombine.low %v859_v6, %v867_v7 }
 0x30b   :  { %7081 = vmatpush1.bf16.msra.mxu1 %v12842_v24  ;;  %7112 = vmatprep.mubr.bf16.mxu1 %v15434_v1  ;;  %v380_v24 = vld [vmem:[#allocation9 + $0x420] sm:$0xff] }
 0x30c   :  { %7194 = vmatprep.mubr.bf16.mxu0 %v15426_v56  ;;  %7082 = vmatprep.subr.bf16.mxu1 %v12859_v25  ;;  %v388_v25 = vld [vmem:[#allocation9 + $0x460] sm:$0xff] }
 0x30d   :  { %7164 = vmatprep.subr.bf16.mxu0 %v12349_v28  ;;  %v12444_v28 = vcombine.low %v364_v14, %v372_v16  ;;  %v12461_v30 = vcombine.high %v380_v24, %v388_v25  ;;  %v12460_v36 = vcombine.low %v380_v24, %v388_v25  ;;  %v979_v14 = vld [vmem:[#allocation9 + $0x16d8] sm:$0xff] }
 0x30e   :  { %7165 = vmatpush1.bf16.msra.mxu0 %v12348_v35  ;;  %v12971_v35 = vcombine.high %v891_v26, %v899_v27  ;;  %v995_v24 = vld [vmem:[#allocation9 + $0x1758] sm:$0xff] }
 0x30f   :  { %7083 = vmatpush1.bf16.msra.mxu1 %v12858_v31  ;;  %7166 = vmatprep.subr.bf16.mxu0 %v12365_v32  ;;  %v396_v31 = vld [vmem:[#allocation9 + $0x4a0] sm:$0xff] }
 0x310   :  { %7084 = vmatprep.subr.bf16.mxu1 %v12875_v33  ;;  %v404_v32 = vld [vmem:[#allocation9 + $0x4e0] sm:$0xff]  ;;  %v907_v33 = vld [vmem:[#allocation9 + $0x1498] sm:$0xff] }
 0x311   :  { %v12477_v39 = vcombine.high %v396_v31, %v404_v32  ;;  %v12476_v40 = vcombine.low %v396_v31, %v404_v32  ;;  %v12986_v49 = vcombine.low %v907_v33, %v915_v34  ;;  %v1011_v31 = vld [vmem:[#allocation9 + $0x17d8] sm:$0xff] }
 0x312   :  { %7167 = vmatpush1.bf16.msra.mxu0 %v12364_v41  ;;  %v12987_v41 = vcombine.high %v907_v33, %v915_v34 }
 0x313   :  { %7085 = vmatpush1.bf16.msra.mxu1 %v12874_v43  ;;  %7168 = vmatprep.subr.bf16.mxu0 %v12381_v45  ;;  %v412_v43 = vld [vmem:[#allocation9 + $0x520] sm:$0xff] }
 0x314   :  { %7086 = vmatprep.subr.bf16.mxu1 %v12891_v46  ;;  %v420_v45 = vld [vmem:[#allocation9 + $0x560] sm:$0xff]  ;;  %v923_v46 = vld [vmem:[#allocation9 + $0x1518] sm:$0xff] }
 0x315   :  { %v12493_v50 = vcombine.high %v412_v43, %v420_v45  ;;  %v12492_v59 = vcombine.low %v412_v43, %v420_v45  ;;  %v13002_v60 = vcombine.low %v923_v46, %v931_v48  ;;  %v1027_v43 = vld [vmem:[#allocation9 + $0x1858] sm:$0xff] }
 0x316   :  { %7169 = vmatpush1.bf16.msra.mxu0 %v12380_v44  ;;  %v13003_v44 = vcombine.high %v923_v46, %v931_v48 }
 0x317   :  { %7087 = vmatpush1.bf16.msra.mxu1 %v12890_v51  ;;  %7170 = vmatprep.subr.bf16.mxu0 %v12397_v52  ;;  %v428_v51 = vld [vmem:[#allocation9 + $0x5a0] sm:$0xff] }
 0x318   :  { %7088 = vmatprep.subr.bf16.mxu1 %v12907_v53  ;;  %v436_v52 = vld [vmem:[#allocation9 + $0x5e0] sm:$0xff]  ;;  %v939_v53 = vld [vmem:[#allocation9 + $0x1598] sm:$0xff] }
 0x319   :  { %v12509_v61 = vcombine.high %v428_v51, %v436_v52  ;;  %v12508_v5 = vcombine.low %v428_v51, %v436_v52  ;;  %v13018_v6 = vcombine.low %v939_v53, %v947_v54  ;;  %v524_v51 = vld [vmem:[#allocation9 + $0x8a0] sm:$0xff] }
 0x31a   :  { %7171 = vmatpush1.bf16.msra.mxu0 %v12396_v62  ;;  %v13019_v62 = vcombine.high %v939_v53, %v947_v54  ;;  %v532_v52 = vld [vmem:[#allocation9 + $0x8e0] sm:$0xff] }
 0x31b   :  { %7089 = vmatpush1.bf16.msra.mxu1 %v12906_v0  ;;  %7172 = vmatprep.subr.bf16.mxu0 %v12413_v2  ;;  %v444_v0 = vld [vmem:[#allocation9 + $0x620] sm:$0xff] }
 0x31c   :  { %7090 = vmatprep.subr.bf16.mxu1 %v12923_v3  ;;  %v452_v2 = vld [vmem:[#allocation9 + $0x660] sm:$0xff]  ;;  %v955_v3 = vld [vmem:[#allocation9 + $0x1618] sm:$0xff] }
 0x31d   :  { %v12525_v7 = vcombine.high %v444_v0, %v452_v2  ;;  %v12524_v16 = vcombine.low %v444_v0, %v452_v2  ;;  %v13034_v18 = vcombine.low %v955_v3, %v963_v4  ;;  %v1059_v0 = vld [vmem:[#allocation9 + $0x1958] sm:$0xff]  ;;  %v12604_v2 = vcombine.low %v524_v51, %v532_v52 }
 0x31e   :  { %7173 = vmatpush1.bf16.msra.mxu0 %v12412_v8  ;;  %v13035_v8 = vcombine.high %v955_v3, %v963_v4 }
 0x31f   :  { %7091 = vmatpush1.bf16.msra.mxu1 %v12922_v10  ;;  %7174 = vmatprep.subr.bf16.mxu0 %v12429_v11  ;;  %v460_v10 = vld [vmem:[#allocation9 + $0x6a0] sm:$0xff] }
 0x320   :  { %7092 = vmatprep.subr.bf16.mxu1 %v12939_v12  ;;  %v468_v11 = vld [vmem:[#allocation9 + $0x6e0] sm:$0xff]  ;;  %v971_v12 = vld [vmem:[#allocation9 + $0x1698] sm:$0xff] }
 0x321   :  { %v12541_v19 = vcombine.high %v460_v10, %v468_v11  ;;  %v12540_v25 = vcombine.low %v460_v10, %v468_v11  ;;  %v13050_v26 = vcombine.low %v971_v12, %v979_v14  ;;  %v1075_v10 = vld [vmem:[#allocation9 + $0x19d8] sm:$0xff] }
 0x322   :  { %7175 = vmatpush1.bf16.msra.mxu0 %v12428_v20  ;;  %v13051_v20 = vcombine.high %v971_v12, %v979_v14 }
 0x323   :  { %7093 = vmatpush1.bf16.msra.mxu1 %v12938_v21  ;;  %7176 = vmatprep.subr.bf16.mxu0 %v12445_v22  ;;  %v476_v21 = vld [vmem:[#allocation9 + $0x720] sm:$0xff] }
 0x324   :  { %7094 = vmatprep.subr.bf16.mxu1 %v12955_v23  ;;  %v484_v22 = vld [vmem:[#allocation9 + $0x760] sm:$0xff]  ;;  %v987_v23 = vld [vmem:[#allocation9 + $0x1718] sm:$0xff] }
 0x325   :  { %v12557_v27 = vcombine.high %v476_v21, %v484_v22  ;;  %v12556_v32 = vcombine.low %v476_v21, %v484_v22  ;;  %v13066_v33 = vcombine.low %v987_v23, %v995_v24  ;;  %v1091_v21 = vld [vmem:[#allocation9 + $0x1a58] sm:$0xff] }
 0x326   :  { %7177 = vmatpush1.bf16.msra.mxu0 %v12444_v28  ;;  %v13067_v28 = vcombine.high %v987_v23, %v995_v24 }
 0x327   :  { %7095 = vmatpush1.bf16.msra.mxu1 %v12954_v29  ;;  %7178 = vmatprep.subr.bf16.mxu0 %v12461_v30  ;;  %v492_v29 = vld [vmem:[#allocation9 + $0x7a0] sm:$0xff] }
 0x328   :  { %7096 = vmatprep.subr.bf16.mxu1 %v12971_v35  ;;  %v500_v30 = vld [vmem:[#allocation9 + $0x7e0] sm:$0xff]  ;;  %v1003_v35 = vld [vmem:[#allocation9 + $0x1798] sm:$0xff] }
 0x329   :  { %v12573_v34 = vcombine.high %v492_v29, %v500_v30  ;;  %v12572_v45 = vcombine.low %v492_v29, %v500_v30  ;;  %v13082_v46 = vcombine.low %v1003_v35, %v1011_v31  ;;  %v1107_v29 = vld [vmem:[#allocation9 + $0x1ad8] sm:$0xff] }
 0x32a   :  { %7179 = vmatpush1.bf16.msra.mxu0 %v12460_v36  ;;  %v13083_v36 = vcombine.high %v1003_v35, %v1011_v31 }
 0x32b   :  { %7097 = vmatpush1.bf16.msra.mxu1 %v12970_v38  ;;  %7180 = vmatprep.subr.bf16.mxu0 %v12477_v39  ;;  %v508_v38 = vld [vmem:[#allocation9 + $0x820] sm:$0xff] }
 0x32c   :  { %7098 = vmatprep.subr.bf16.mxu1 %v12987_v41  ;;  %v516_v39 = vld [vmem:[#allocation9 + $0x860] sm:$0xff]  ;;  %v1019_v41 = vld [vmem:[#allocation9 + $0x1818] sm:$0xff] }
 0x32d   :  { %v12589_v48 = vcombine.high %v508_v38, %v516_v39  ;;  %v13098_v53 = vcombine.low %v1019_v41, %v1027_v43 }
 0x32e   :  { %7181 = vmatpush1.bf16.msra.mxu0 %v12476_v40  ;;  %v13099_v40 = vcombine.high %v1019_v41, %v1027_v43 }
 0x32f   :  { %7099 = vmatpush1.bf16.msra.mxu1 %v12986_v49  ;;  %7182 = vmatprep.subr.bf16.mxu0 %v12493_v50  ;;  %v1035_v49 = vld [vmem:[#allocation9 + $0x1898] sm:$0xff] }
 0x330   :  { %7100 = vmatprep.subr.bf16.mxu1 %v13003_v44  ;;  %v1043_v50 = vld [vmem:[#allocation9 + $0x18d8] sm:$0xff]  ;;  %v12588_v44 = vcombine.low %v508_v38, %v516_v39 }
 0x331   :  { %v13115_v54 = vcombine.high %v1035_v49, %v1043_v50  ;;  %v13114_v3 = vcombine.low %v1035_v49, %v1043_v50  ;;  %v1123_v38 = vld [vmem:[#allocation9 + $0x1b58] sm:$0xff] }
 0x332   :  { %7183 = vmatpush1.bf16.msra.mxu0 %v12492_v59  ;;  %v540_v59 = vld [vmem:[#allocation9 + $0x920] sm:$0xff]  ;;  %v1131_v49 = vld [vmem:[#allocation9 + $0x1b98] sm:$0xff] }
 0x333   :  { %7101 = vmatpush1.bf16.msra.mxu1 %v13002_v60  ;;  %7184 = vmatprep.subr.bf16.mxu0 %v12509_v61  ;;  %v548_v60 = vld [vmem:[#allocation9 + $0x960] sm:$0xff]  ;;  %v12605_v61 = vcombine.high %v524_v51, %v532_v52  ;;  %v1139_v50 = vld [vmem:[#allocation9 + $0x1bd8] sm:$0xff] }
 0x334   :  { %7102 = vmatprep.subr.bf16.mxu1 %v13019_v62  ;;  %v1051_v62 = vld [vmem:[#allocation9 + $0x1918] sm:$0xff]  ;;  %v12621_v4 = vcombine.high %v540_v59, %v548_v60  ;;  %v12620_v11 = vcombine.low %v540_v59, %v548_v60  ;;  %v13211_v60 = vcombine.high %v1131_v49, %v1139_v50 }
 0x335   :  { %v13130_v12 = vcombine.low %v1051_v62, %v1059_v0 }
 0x336   :  { %7185 = vmatpush1.bf16.msra.mxu0 %v12508_v5  ;;  %v13131_v5 = vcombine.high %v1051_v62, %v1059_v0  ;;  %v644_v62 = vld [vmem:[#allocation9 + $0xc60] sm:$0xff]  ;;  %v1147_v0 = vld [vmem:[#allocation9 + $0x1c18] sm:$0xff] }
 0x337   :  { %7103 = vmatpush1.bf16.msra.mxu1 %v13018_v6  ;;  %7186 = vmatprep.subr.bf16.mxu0 %v12525_v7  ;;  %v556_v6 = vld [vmem:[#allocation9 + $0x9a0] sm:$0xff] }
 0x338   :  { %7104 = vmatprep.subr.bf16.mxu1 %v13035_v8  ;;  %v564_v7 = vld [vmem:[#allocation9 + $0x9e0] sm:$0xff]  ;;  %v1067_v8 = vld [vmem:[#allocation9 + $0x1998] sm:$0xff] }
 0x339   :  { %v12637_v14 = vcombine.high %v556_v6, %v564_v7  ;;  %v12636_v22 = vcombine.low %v556_v6, %v564_v7  ;;  %v13146_v23 = vcombine.low %v1067_v8, %v1075_v10  ;;  %v652_v7 = vld [vmem:[#allocation9 + $0xca0] sm:$0xff] }
 0x33a   :  { %7187 = vmatpush1.bf16.msra.mxu0 %v12524_v16  ;;  %v13147_v16 = vcombine.high %v1067_v8, %v1075_v10  ;;  %v660_v8 = vld [vmem:[#allocation9 + $0xce0] sm:$0xff]  ;;  %v1163_v10 = vld [vmem:[#allocation9 + $0x1c98] sm:$0xff] }
 0x33b   :  { %7105 = vmatpush1.bf16.msra.mxu1 %v13034_v18  ;;  %7188 = vmatprep.subr.bf16.mxu0 %v12541_v19  ;;  %v572_v18 = vld [vmem:[#allocation9 + $0xa20] sm:$0xff] }
 0x33c   :  { %7106 = vmatprep.subr.bf16.mxu1 %v13051_v20  ;;  %v580_v19 = vld [vmem:[#allocation9 + $0xa60] sm:$0xff]  ;;  %v1083_v20 = vld [vmem:[#allocation9 + $0x1a18] sm:$0xff] }
 0x33d   :  { %v12653_v24 = vcombine.high %v572_v18, %v580_v19  ;;  %v12652_v30 = vcombine.low %v572_v18, %v580_v19  ;;  %v13162_v35 = vcombine.low %v1083_v20, %v1091_v21  ;;  %v668_v19 = vld [vmem:[#allocation9 + $0xd20] sm:$0xff] }
 0x33e   :  { %7189 = vmatpush1.bf16.msra.mxu0 %v12540_v25  ;;  %v13163_v25 = vcombine.high %v1083_v20, %v1091_v21  ;;  %v676_v20 = vld [vmem:[#allocation9 + $0xd60] sm:$0xff]  ;;  %v1179_v21 = vld [vmem:[#allocation9 + $0x1d18] sm:$0xff] }
 0x33f   :  { %7107 = vmatpush1.bf16.msra.mxu1 %v13050_v26  ;;  %7190 = vmatprep.subr.bf16.mxu0 %v12557_v27  ;;  %v588_v26 = vld [vmem:[#allocation9 + $0xaa0] sm:$0xff] }
 0x340   :  { %7108 = vmatprep.subr.bf16.mxu1 %v13067_v28  ;;  %v596_v27 = vld [vmem:[#allocation9 + $0xae0] sm:$0xff]  ;;  %v1099_v28 = vld [vmem:[#allocation9 + $0x1a98] sm:$0xff] }
 0x341   :  { %v12669_v31 = vcombine.high %v588_v26, %v596_v27  ;;  %v12668_v39 = vcombine.low %v588_v26, %v596_v27  ;;  %v13178_v41 = vcombine.low %v1099_v28, %v1107_v29  ;;  %v684_v27 = vld [vmem:[#allocation9 + $0xda0] sm:$0xff] }
 0x342   :  { %7191 = vmatpush1.bf16.msra.mxu0 %v12556_v32  ;;  %v13179_v32 = vcombine.high %v1099_v28, %v1107_v29  ;;  %v692_v28 = vld [vmem:[#allocation9 + $0xde0] sm:$0xff]  ;;  %v1195_v29 = vld [vmem:[#allocation9 + $0x1d98] sm:$0xff] }
 0x343   :  { %7109 = vmatpush1.bf16.msra.mxu1 %v13066_v33  ;;  %7192 = vmatprep.subr.bf16.mxu0 %v12573_v34  ;;  %v604_v33 = vld [vmem:[#allocation9 + $0xb20] sm:$0xff] }
 0x344   :  { %7110 = vmatprep.subr.bf16.mxu1 %v13083_v36  ;;  %v612_v34 = vld [vmem:[#allocation9 + $0xb60] sm:$0xff]  ;;  %v1115_v36 = vld [vmem:[#allocation9 + $0x1b18] sm:$0xff] }
 0x345   :  { %v12685_v43 = vcombine.high %v604_v33, %v612_v34  ;;  %v12684_v51 = vcombine.low %v604_v33, %v612_v34  ;;  %v700_v34 = vld [vmem:[#allocation9 + $0xe20] sm:$0xff] }
 0x346   :  { %7193 = vmatpush1.bf16.msra.mxu0 %v12572_v45  ;;  %v13195_v45 = vcombine.high %v1115_v36, %v1123_v38 }
 0x347   :  { %7111 = vmatpush1.bf16.msra.mxu1 %v13082_v46  ;;  %7203 = vmatprep.subr.bf16.mxu0 %v12589_v48  ;;  %v620_v46 = vld [vmem:[#allocation9 + $0xba0] sm:$0xff] }
 0x348   :  { %7121 = vmatprep.subr.bf16.mxu1 %v13099_v40  ;;  %v628_v48 = vld [vmem:[#allocation9 + $0xbe0] sm:$0xff] }
 0x349   :  { %7195 = vmatmul.mubr.bf16.vlgmr.msra.gmra.mrb[8].mxu0 %v15424_v55 }
 0x34a   :  { %7113 = vmatmul.mubr.bf16.vlgmr.msra.gmra.mrb[8].mxu1 %v15442_v15  ;;  %7204 = vmatpush1.bf16.msra.mxu0 %v12588_v44 }
 0x34b   :  { %7122 = vmatpush1.bf16.msra.mxu1 %v13098_v53  ;;  %7153 = vmatprep.mubr.bf16.mxu1 %v15444_v17  ;;  %v13194_v53 = vcombine.low %v1115_v36, %v1123_v38  ;;  %v708_v36 = vld [vmem:[#allocation9 + $0xe60] sm:$0xff]  ;;  %v1211_v38 = vld [vmem:[#allocation9 + $0x1e18] sm:$0xff] }
 0x34c   :  { %7235 = vmatprep.mubr.bf16.mxu0 %v15430_v58  ;;  %7123 = vmatprep.subr.bf16.mxu1 %v13115_v54  ;;  %v12701_v54 = vcombine.high %v620_v46, %v628_v48 }
 0x34d   :  { %7205 = vmatprep.subr.bf16.mxu0 %v12605_v61  ;;  %v636_v61 = vld [vmem:[#allocation9 + $0xc20] sm:$0xff] }
 0x34e   :  { %7206 = vmatpush1.bf16.msra.mxu0 %v12604_v2  ;;  %v1155_v2 = vld [vmem:[#allocation9 + $0x1c58] sm:$0xff] }
 0x34f   :  { %7124 = vmatpush1.bf16.msra.mxu1 %v13114_v3  ;;  %7207 = vmatprep.subr.bf16.mxu0 %v12621_v4  ;;  %v12700_v3 = vcombine.low %v620_v46, %v628_v48  ;;  %v13210_v4 = vcombine.low %v1131_v49, %v1139_v50  ;;  %v13227_v6 = vcombine.high %v1147_v0, %v1155_v2  ;;  %v716_v48 = vld [vmem:[#allocation9 + $0xea0] sm:$0xff]  ;;  %v1227_v50 = vld [vmem:[#allocation9 + $0x1e98] sm:$0xff] }
 0x350   :  { %7125 = vmatprep.subr.bf16.mxu1 %v13131_v5  ;;  %v12717_v5 = vcombine.high %v636_v61, %v644_v62  ;;  %v724_v49 = vld [vmem:[#allocation9 + $0xee0] sm:$0xff] }
 0x352   :  { %7208 = vmatpush1.bf16.msra.mxu0 %v12620_v11  ;;  %v1171_v11 = vld [vmem:[#allocation9 + $0x1cd8] sm:$0xff] }
 0x353   :  { %7126 = vmatpush1.bf16.msra.mxu1 %v13130_v12  ;;  %7209 = vmatprep.subr.bf16.mxu0 %v12637_v14  ;;  %v12716_v12 = vcombine.low %v636_v61, %v644_v62  ;;  %v13226_v14 = vcombine.low %v1147_v0, %v1155_v2  ;;  %v13243_v18 = vcombine.high %v1163_v10, %v1171_v11  ;;  %v740_v61 = vld [vmem:[#allocation9 + $0xf60] sm:$0xff]  ;;  %v1243_v62 = vld [vmem:[#allocation9 + $0x1f18] sm:$0xff] }
 0x354   :  { %7127 = vmatprep.subr.bf16.mxu1 %v13147_v16  ;;  %v12733_v16 = vcombine.high %v652_v7, %v660_v8  ;;  %v1251_v0 = vld [vmem:[#allocation9 + $0x1f58] sm:$0xff]  ;;  %v12796_v2 = vcombine.low %v716_v48, %v724_v49 }
 0x356   :  { %7210 = vmatpush1.bf16.msra.mxu0 %v12636_v22  ;;  %v1187_v22 = vld [vmem:[#allocation9 + $0x1d58] sm:$0xff] }
 0x357   :  { %7128 = vmatpush1.bf16.msra.mxu1 %v13146_v23  ;;  %7211 = vmatprep.subr.bf16.mxu0 %v12653_v24  ;;  %v12732_v23 = vcombine.low %v652_v7, %v660_v8  ;;  %v13242_v24 = vcombine.low %v1163_v10, %v1171_v11  ;;  %v13259_v26 = vcombine.high %v1179_v21, %v1187_v22  ;;  %v756_v7 = vld [vmem:[#allocation9 + $0xfe0] sm:$0xff]  ;;  %v1259_v8 = vld [vmem:[#allocation9 + $0x1f98] sm:$0xff] }
 0x358   :  { %7129 = vmatprep.subr.bf16.mxu1 %v13163_v25  ;;  %v12749_v25 = vcombine.high %v668_v19, %v676_v20  ;;  %v1267_v10 = vld [vmem:[#allocation9 + $0x1fd8] sm:$0xff] }
 0x35a   :  { %7212 = vmatpush1.bf16.msra.mxu0 %v12652_v30  ;;  %v1203_v30 = vld [vmem:[#allocation9 + $0x1dd8] sm:$0xff] }
 0x35b   :  { %7130 = vmatpush1.bf16.msra.mxu1 %v13162_v35  ;;  %7213 = vmatprep.subr.bf16.mxu0 %v12669_v31  ;;  %v12748_v35 = vcombine.low %v668_v19, %v676_v20  ;;  %v13258_v31 = vcombine.low %v1179_v21, %v1187_v22  ;;  %v13275_v33 = vcombine.high %v1195_v29, %v1203_v30  ;;  %v772_v19 = vld [vmem:[#allocation9 + $0x1060] sm:$0xff]  ;;  %v253_v20 = vld [vmem:[#allocation9 + $0x28] sm:$0xff] }
 0x35c   :  { %7131 = vmatprep.subr.bf16.mxu1 %v13179_v32  ;;  %v12765_v32 = vcombine.high %v684_v27, %v692_v28  ;;  %v261_v21 = vld [vmem:[#allocation9 + $0x68] sm:$0xff] }
 0x35d   :  { %v15497_v40 = vpop.f32.mrb[4].mxu1 }
 0x35e   :  { %v15499_v44 = vpop.f32.mrb[5].mxu1  ;;  %7214 = vmatpush1.bf16.msra.mxu0 %v12668_v39  ;;  %v1219_v39 = vld [vmem:[#allocation9 + $0x1e58] sm:$0xff] }
 0x35f   :  { %v6831_v52 = vpop.f32.mrb[6].mxu1  ;;  %7132 = vmatpush1.bf16.msra.mxu1 %v13178_v41  ;;  %7215 = vmatprep.subr.bf16.mxu0 %v12685_v43  ;;  %v12764_v41 = vcombine.low %v684_v27, %v692_v28  ;;  %v13274_v43 = vcombine.low %v1195_v29, %v1203_v30  ;;  %v13291_v46 = vcombine.high %v1211_v38, %v1219_v39  ;;  %v788_v27 = vld [vmem:[#allocation9 + $0x10e0] sm:$0xff]  ;;  %v269_v29 = vld [vmem:[#allocation9 + $0xa8] sm:$0xff] }
 0x360   :  { %v6832_v59 = vpop.f32.mrb[7].mxu1  ;;  %7133 = vmatprep.subr.bf16.mxu1 %v13195_v45  ;;  %v12781_v45 = vcombine.high %v700_v34, %v708_v36  ;;  %v12780_v52 = vcombine.low %v700_v34, %v708_v36  ;;  %v277_v30 = vld [vmem:[#allocation9 + $0xe8] sm:$0xff] }
 0x361   :  { %v12351_v34 = vcombine.high %v269_v29, %v277_v30  ;;  %v285_v36 = vld [vmem:[#allocation9 + $0x128] sm:$0xff] }
 0x362   :  { %7216 = vmatpush1.bf16.msra.mxu0 %v12684_v51  ;;  %v1235_v51 = vld [vmem:[#allocation9 + $0x1ed8] sm:$0xff] }
 0x363   :  { %7134 = vmatpush1.bf16.msra.mxu1 %v13194_v53  ;;  %7217 = vmatprep.subr.bf16.mxu0 %v12701_v54  ;;  %v13290_v53 = vcombine.low %v1211_v38, %v1219_v39  ;;  %v12797_v54 = vcombine.high %v716_v48, %v724_v49  ;;  %v13307_v59 = vcombine.high %v1227_v50, %v1235_v51  ;;  %v293_v38 = vld [vmem:[#allocation9 + $0x168] sm:$0xff]  ;;  %v820_v48 = vld [vmem:[#allocation9 + $0x11e0] sm:$0xff] }
 0x364   :  { %7135 = vmatprep.subr.bf16.mxu1 %v13211_v60  ;;  %v732_v60 = vld [vmem:[#allocation9 + $0xf20] sm:$0xff]  ;;  %v301_v49 = vld [vmem:[#allocation9 + $0x1a8] sm:$0xff] }
 0x365   :  { %v12812_v11 = vcombine.low %v732_v60, %v740_v61 }
 0x366   :  { %7218 = vmatpush1.bf16.msra.mxu0 %v12700_v3  ;;  %v13306_v3 = vcombine.low %v1227_v50, %v1235_v51  ;;  %v309_v50 = vld [vmem:[#allocation9 + $0x1e8] sm:$0xff] }
 0x367   :  { %7136 = vmatpush1.bf16.msra.mxu1 %v13210_v4  ;;  %7219 = vmatprep.subr.bf16.mxu0 %v12717_v5  ;;  %v12813_v4 = vcombine.high %v732_v60, %v740_v61  ;;  %v13323_v5 = vcombine.high %v1243_v62, %v1251_v0  ;;  %v836_v60 = vld [vmem:[#allocation9 + $0x1260] sm:$0xff]  ;;  %v317_v61 = vld [vmem:[#allocation9 + $0x228] sm:$0xff] }
 0x368   :  { %7137 = vmatprep.subr.bf16.mxu1 %v13227_v6  ;;  %v748_v6 = vld [vmem:[#allocation9 + $0xfa0] sm:$0xff] }
 0x369   :  { %v12828_v22 = vcombine.low %v748_v6, %v756_v7 }
 0x36a   :  { %7220 = vmatpush1.bf16.msra.mxu0 %v12716_v12  ;;  %v13322_v12 = vcombine.low %v1243_v62, %v1251_v0  ;;  %v325_v62 = vld [vmem:[#allocation9 + $0x268] sm:$0xff] }
 0x36b   :  { %7138 = vmatpush1.bf16.msra.mxu1 %v13226_v14  ;;  %7221 = vmatprep.subr.bf16.mxu0 %v12733_v16  ;;  %v12829_v14 = vcombine.high %v748_v6, %v756_v7  ;;  %v13339_v16 = vcombine.high %v1259_v8, %v1267_v10  ;;  %v852_v6 = vld [vmem:[#allocation9 + $0x12e0] sm:$0xff]  ;;  %v333_v7 = vld [vmem:[#allocation9 + $0x2a8] sm:$0xff] }
 0x36c   :  { %7139 = vmatprep.subr.bf16.mxu1 %v13243_v18  ;;  %v764_v18 = vld [vmem:[#allocation9 + $0x1020] sm:$0xff] }
 0x36d   :  { %v12844_v28 = vcombine.low %v764_v18, %v772_v19 }
 0x36e   :  { %7222 = vmatpush1.bf16.msra.mxu0 %v12732_v23  ;;  %v13338_v23 = vcombine.low %v1259_v8, %v1267_v10  ;;  %v341_v8 = vld [vmem:[#allocation9 + $0x2e8] sm:$0xff] }
 0x36f   :  { %7140 = vmatpush1.bf16.msra.mxu1 %v13242_v24  ;;  %7223 = vmatprep.subr.bf16.mxu0 %v12749_v25  ;;  %v12845_v24 = vcombine.high %v764_v18, %v772_v19  ;;  %v12335_v25 = vcombine.high %v253_v20, %v261_v21  ;;  %v868_v18 = vld [vmem:[#allocation9 + $0x1360] sm:$0xff]  ;;  %v349_v19 = vld [vmem:[#allocation9 + $0x328] sm:$0xff] }
 0x370   :  { %7141 = vmatprep.subr.bf16.mxu1 %v13259_v26  ;;  %v780_v26 = vld [vmem:[#allocation9 + $0x10a0] sm:$0xff] }
 0x371   :  { %v12860_v39 = vcombine.low %v780_v26, %v788_v27 }
 0x372   :  { %7224 = vmatpush1.bf16.msra.mxu0 %v12748_v35  ;;  %v12334_v35 = vcombine.low %v253_v20, %v261_v21  ;;  %v357_v20 = vld [vmem:[#allocation9 + $0x368] sm:$0xff] }
 0x373   :  { %7142 = vmatpush1.bf16.msra.mxu1 %v13258_v31  ;;  %7225 = vmatprep.subr.bf16.mxu0 %v12765_v32  ;;  %v12861_v31 = vcombine.high %v780_v26, %v788_v27  ;;  %v796_v32 = vld [vmem:[#allocation9 + $0x1120] sm:$0xff]  ;;  %v365_v27 = vld [vmem:[#allocation9 + $0x3a8] sm:$0xff] }
 0x374   :  { %7143 = vmatprep.subr.bf16.mxu1 %v13275_v33  ;;  %v804_v33 = vld [vmem:[#allocation9 + $0x1160] sm:$0xff] }
 0x375   :  { %v12876_v51 = vcombine.low %v796_v32, %v804_v33  ;;  %v884_v26 = vld [vmem:[#allocation9 + $0x13e0] sm:$0xff] }
 0x376   :  { %7226 = vmatpush1.bf16.msra.mxu0 %v12764_v41  ;;  %v12350_v41 = vcombine.low %v269_v29, %v277_v30  ;;  %v12430_v30 = vcombine.low %v349_v19, %v357_v20 }
 0x377   :  { %7144 = vmatpush1.bf16.msra.mxu1 %v13274_v43  ;;  %7227 = vmatprep.subr.bf16.mxu0 %v12781_v45  ;;  %v12877_v43 = vcombine.high %v796_v32, %v804_v33  ;;  %v12367_v45 = vcombine.high %v285_v36, %v293_v38  ;;  %v892_v32 = vld [vmem:[#allocation9 + $0x1420] sm:$0xff] }
 0x378   :  { %7145 = vmatprep.subr.bf16.mxu1 %v13291_v46  ;;  %v812_v46 = vld [vmem:[#allocation9 + $0x11a0] sm:$0xff] }
 0x379   :  { %v12892_v0 = vcombine.low %v812_v46, %v820_v48  ;;  %v900_v33 = vld [vmem:[#allocation9 + $0x1460] sm:$0xff] }
 0x37a   :  { %7228 = vmatpush1.bf16.msra.mxu0 %v12780_v52  ;;  %v12366_v52 = vcombine.low %v285_v36, %v293_v38  ;;  %v389_v36 = vld [vmem:[#allocation9 + $0x468] sm:$0xff] }
 0x37b   :  { %7146 = vmatpush1.bf16.msra.mxu1 %v13290_v53  ;;  %7229 = vmatprep.subr.bf16.mxu0 %v12797_v54  ;;  %v12893_v53 = vcombine.high %v812_v46, %v820_v48  ;;  %v12383_v54 = vcombine.high %v301_v49, %v309_v50  ;;  %v916_v46 = vld [vmem:[#allocation9 + $0x14e0] sm:$0xff]  ;;  %v397_v48 = vld [vmem:[#allocation9 + $0x4a8] sm:$0xff] }
 0x37c   :  { %7147 = vmatprep.subr.bf16.mxu1 %v13307_v59  ;;  %v828_v59 = vld [vmem:[#allocation9 + $0x1220] sm:$0xff] }
 0x37d   :  { %v12908_v10 = vcombine.low %v828_v59, %v836_v60 }
 0x37e   :  { %7230 = vmatpush1.bf16.msra.mxu0 %v12796_v2  ;;  %v12382_v2 = vcombine.low %v301_v49, %v309_v50  ;;  %v405_v49 = vld [vmem:[#allocation9 + $0x4e8] sm:$0xff]  ;;  %v12972_v50 = vcombine.low %v892_v32, %v900_v33 }
 0x37f   :  { %7148 = vmatpush1.bf16.msra.mxu1 %v13306_v3  ;;  %7231 = vmatprep.subr.bf16.mxu0 %v12813_v4  ;;  %v12909_v3 = vcombine.high %v828_v59, %v836_v60  ;;  %v12399_v4 = vcombine.high %v317_v61, %v325_v62  ;;  %v932_v59 = vld [vmem:[#allocation9 + $0x1560] sm:$0xff]  ;;  %v413_v60 = vld [vmem:[#allocation9 + $0x528] sm:$0xff] }
 0x380   :  { %7149 = vmatprep.subr.bf16.mxu1 %v13323_v5  ;;  %v844_v5 = vld [vmem:[#allocation9 + $0x12a0] sm:$0xff] }
 0x381   :  { %v12924_v21 = vcombine.low %v844_v5, %v852_v6 }
 0x382   :  { %7232 = vmatpush1.bf16.msra.mxu0 %v12812_v11  ;;  %v12398_v11 = vcombine.low %v317_v61, %v325_v62  ;;  %v421_v61 = vld [vmem:[#allocation9 + $0x568] sm:$0xff] }
 0x383   :  { %7150 = vmatpush1.bf16.msra.mxu1 %v13322_v12  ;;  %7233 = vmatprep.subr.bf16.mxu0 %v12829_v14  ;;  %v12925_v12 = vcombine.high %v844_v5, %v852_v6  ;;  %v12415_v14 = vcombine.high %v333_v7, %v341_v8  ;;  %v948_v5 = vld [vmem:[#allocation9 + $0x15e0] sm:$0xff]  ;;  %v429_v6 = vld [vmem:[#allocation9 + $0x5a8] sm:$0xff] }
 0x384   :  { %7151 = vmatprep.subr.bf16.mxu1 %v13339_v16  ;;  %v860_v16 = vld [vmem:[#allocation9 + $0x1320] sm:$0xff] }
 0x385   :  { %v12940_v29 = vcombine.low %v860_v16, %v868_v18 }
 0x386   :  { %7234 = vmatpush1.bf16.msra.mxu0 %v12828_v22  ;;  %v12414_v22 = vcombine.low %v333_v7, %v341_v8  ;;  %v437_v7 = vld [vmem:[#allocation9 + $0x5e8] sm:$0xff] }
 0x387   :  { %7152 = vmatpush1.bf16.msra.mxu1 %v13338_v23  ;;  %7244 = vmatprep.subr.bf16.mxu0 %v12845_v24  ;;  %v12941_v23 = vcombine.high %v860_v16, %v868_v18  ;;  %v12431_v24 = vcombine.high %v349_v19, %v357_v20  ;;  %v964_v16 = vld [vmem:[#allocation9 + $0x1660] sm:$0xff]  ;;  %v445_v18 = vld [vmem:[#allocation9 + $0x628] sm:$0xff] }
 0x388   :  { %7326 = vmatprep.subr.bf16.mxu1 %v12335_v25  ;;  %v876_v25 = vld [vmem:[#allocation9 + $0x13a0] sm:$0xff]  ;;  %v453_v19 = vld [vmem:[#allocation9 + $0x668] sm:$0xff] }
 0x389   :  { %7236 = vmatmul.mubr.bf16.vlgmr.msra.gmra.mrb[8].mxu0 %v15428_v57  ;;  %v12956_v38 = vcombine.low %v876_v25, %v884_v26 }
 0x38a   :  { %7154 = vmatmul.mubr.bf16.vlgmr.msra.gmra.mrb[8].mxu1 %v15451_v37  ;;  %7245 = vmatpush1.bf16.msra.mxu0 %v12844_v28  ;;  %v373_v28 = vld [vmem:[#allocation9 + $0x3e8] sm:$0xff] }
 0x38b   :  { %7276 = vmatprep.mubr.bf16.mxu0 %v15434_v1  ;;  %7327 = vmatpush1.bf16.msra.mxu1 %v12334_v35  ;;  %v12957_v35 = vcombine.high %v876_v25, %v884_v26  ;;  %v980_v25 = vld [vmem:[#allocation9 + $0x16e0] sm:$0xff]  ;;  %v461_v26 = vld [vmem:[#allocation9 + $0x6a8] sm:$0xff] }
 0x38c   :  { %7358 = vmatprep.mubr.bf16.mxu1 %v15426_v56  ;;  %7246 = vmatprep.subr.bf16.mxu0 %v12861_v31  ;;  %v12447_v31 = vcombine.high %v365_v27, %v373_v28 }
 0x38d   :  { %7328 = vmatprep.subr.bf16.mxu1 %v12351_v34  ;;  %v381_v34 = vld [vmem:[#allocation9 + $0x428] sm:$0xff] }
 0x38e   :  { %7247 = vmatpush1.bf16.msra.mxu0 %v12860_v39  ;;  %v12446_v39 = vcombine.low %v365_v27, %v373_v28  ;;  %v469_v27 = vld [vmem:[#allocation9 + $0x6e8] sm:$0xff] }
 0x38f   :  { %7329 = vmatpush1.bf16.msra.mxu1 %v12350_v41  ;;  %7248 = vmatprep.subr.bf16.mxu0 %v12877_v43  ;;  %v12973_v41 = vcombine.high %v892_v32, %v900_v33  ;;  %v12463_v43 = vcombine.high %v381_v34, %v389_v36  ;;  %v996_v32 = vld [vmem:[#allocation9 + $0x1760] sm:$0xff]  ;;  %v477_v33 = vld [vmem:[#allocation9 + $0x728] sm:$0xff] }
 0x390   :  { %7330 = vmatprep.subr.bf16.mxu1 %v12367_v45  ;;  %v908_v45 = vld [vmem:[#allocation9 + $0x14a0] sm:$0xff] }
 0x391   :  { %v12988_v62 = vcombine.low %v908_v45, %v916_v46 }
 0x392   :  { %7249 = vmatpush1.bf16.msra.mxu0 %v12876_v51  ;;  %v12462_v51 = vcombine.low %v381_v34, %v389_v36  ;;  %v485_v34 = vld [vmem:[#allocation9 + $0x768] sm:$0xff] }
 0x393   :  { %7331 = vmatpush1.bf16.msra.mxu1 %v12366_v52  ;;  %7250 = vmatprep.subr.bf16.mxu0 %v12893_v53  ;;  %v12989_v52 = vcombine.high %v908_v45, %v916_v46  ;;  %v12479_v53 = vcombine.high %v397_v48, %v405_v49  ;;  %v1012_v45 = vld [vmem:[#allocation9 + $0x17e0] sm:$0xff]  ;;  %v493_v46 = vld [vmem:[#allocation9 + $0x7a8] sm:$0xff] }
 0x394   :  { %7332 = vmatprep.subr.bf16.mxu1 %v12383_v54  ;;  %v924_v54 = vld [vmem:[#allocation9 + $0x1520] sm:$0xff] }
 0x395   :  { %v13004_v8 = vcombine.low %v924_v54, %v932_v59 }
 0x396   :  { %7251 = vmatpush1.bf16.msra.mxu0 %v12892_v0  ;;  %v12478_v0 = vcombine.low %v397_v48, %v405_v49  ;;  %v501_v48 = vld [vmem:[#allocation9 + $0x7e8] sm:$0xff] }
 0x397   :  { %7333 = vmatpush1.bf16.msra.mxu1 %v12382_v2  ;;  %7252 = vmatprep.subr.bf16.mxu0 %v12909_v3  ;;  %v13005_v2 = vcombine.high %v924_v54, %v932_v59  ;;  %v12495_v3 = vcombine.high %v413_v60, %v421_v61  ;;  %v1028_v54 = vld [vmem:[#allocation9 + $0x1860] sm:$0xff]  ;;  %v509_v59 = vld [vmem:[#allocation9 + $0x828] sm:$0xff] }
 0x398   :  { %7334 = vmatprep.subr.bf16.mxu1 %v12399_v4  ;;  %v940_v4 = vld [vmem:[#allocation9 + $0x15a0] sm:$0xff] }
 0x399   :  { %v13020_v20 = vcombine.low %v940_v4, %v948_v5 }
 0x39a   :  { %7253 = vmatpush1.bf16.msra.mxu0 %v12908_v10  ;;  %v12494_v10 = vcombine.low %v413_v60, %v421_v61  ;;  %v517_v60 = vld [vmem:[#allocation9 + $0x868] sm:$0xff] }
 0x39b   :  { %7335 = vmatpush1.bf16.msra.mxu1 %v12398_v11  ;;  %7254 = vmatprep.subr.bf16.mxu0 %v12925_v12  ;;  %v13021_v11 = vcombine.high %v940_v4, %v948_v5  ;;  %v12511_v12 = vcombine.high %v429_v6, %v437_v7  ;;  %v1044_v4 = vld [vmem:[#allocation9 + $0x18e0] sm:$0xff] }
 0x39c   :  { %7336 = vmatprep.subr.bf16.mxu1 %v12415_v14  ;;  %v956_v14 = vld [vmem:[#allocation9 + $0x1620] sm:$0xff] }
 0x39d   :  { %v13036_v28 = vcombine.low %v956_v14, %v964_v16 }
 0x39e   :  { %7255 = vmatpush1.bf16.msra.mxu0 %v12924_v21  ;;  %v12510_v21 = vcombine.low %v429_v6, %v437_v7  ;;  %v525_v6 = vld [vmem:[#allocation9 + $0x8a8] sm:$0xff] }
 0x39f   :  { %7337 = vmatpush1.bf16.msra.mxu1 %v12414_v22  ;;  %7256 = vmatprep.subr.bf16.mxu0 %v12941_v23  ;;  %v13037_v22 = vcombine.high %v956_v14, %v964_v16  ;;  %v12527_v23 = vcombine.high %v445_v18, %v453_v19  ;;  %v533_v7 = vld [vmem:[#allocation9 + $0x8e8] sm:$0xff] }
 0x3a0   :  { %7338 = vmatprep.subr.bf16.mxu1 %v12431_v24  ;;  %v972_v24 = vld [vmem:[#allocation9 + $0x16a0] sm:$0xff]  ;;  %v12607_v14 = vcombine.high %v525_v6, %v533_v7  ;;  %v541_v16 = vld [vmem:[#allocation9 + $0x928] sm:$0xff] }
 0x3a1   :  { %v13052_v36 = vcombine.low %v972_v24, %v980_v25 }
 0x3a2   :  { %7257 = vmatpush1.bf16.msra.mxu0 %v12940_v29  ;;  %v12526_v29 = vcombine.low %v445_v18, %v453_v19  ;;  %v549_v18 = vld [vmem:[#allocation9 + $0x968] sm:$0xff] }
 0x3a3   :  { %7339 = vmatpush1.bf16.msra.mxu1 %v12430_v30  ;;  %7258 = vmatprep.subr.bf16.mxu0 %v12957_v35  ;;  %v13053_v30 = vcombine.high %v972_v24, %v980_v25  ;;  %v12543_v35 = vcombine.high %v461_v26, %v469_v27  ;;  %v1076_v24 = vld [vmem:[#allocation9 + $0x19e0] sm:$0xff]  ;;  %v557_v25 = vld [vmem:[#allocation9 + $0x9a8] sm:$0xff] }
 0x3a4   :  { %7340 = vmatprep.subr.bf16.mxu1 %v12447_v31  ;;  %v988_v31 = vld [vmem:[#allocation9 + $0x1720] sm:$0xff] }
 0x3a5   :  { %v13068_v49 = vcombine.low %v988_v31, %v996_v32 }
 0x3a6   :  { %7259 = vmatpush1.bf16.msra.mxu0 %v12956_v38  ;;  %v12542_v38 = vcombine.low %v461_v26, %v469_v27  ;;  %v565_v26 = vld [vmem:[#allocation9 + $0x9e8] sm:$0xff] }
 0x3a7   :  { %7341 = vmatpush1.bf16.msra.mxu1 %v12446_v39  ;;  %7260 = vmatprep.subr.bf16.mxu0 %v12973_v41  ;;  %v13069_v39 = vcombine.high %v988_v31, %v996_v32  ;;  %v12559_v41 = vcombine.high %v477_v33, %v485_v34  ;;  %v1092_v31 = vld [vmem:[#allocation9 + $0x1a60] sm:$0xff]  ;;  %v573_v32 = vld [vmem:[#allocation9 + $0xa28] sm:$0xff] }
 0x3a8   :  { %7342 = vmatprep.subr.bf16.mxu1 %v12463_v43  ;;  %v1004_v43 = vld [vmem:[#allocation9 + $0x17a0] sm:$0xff] }
 0x3a9   :  { %v13084_v61 = vcombine.low %v1004_v43, %v1012_v45 }
 0x3aa   :  { %7261 = vmatpush1.bf16.msra.mxu0 %v12972_v50  ;;  %v12558_v50 = vcombine.low %v477_v33, %v485_v34  ;;  %v581_v33 = vld [vmem:[#allocation9 + $0xa68] sm:$0xff] }
 0x3ab   :  { %7343 = vmatpush1.bf16.msra.mxu1 %v12462_v51  ;;  %7262 = vmatprep.subr.bf16.mxu0 %v12989_v52  ;;  %v13085_v51 = vcombine.high %v1004_v43, %v1012_v45  ;;  %v12575_v52 = vcombine.high %v493_v46, %v501_v48  ;;  %v1108_v43 = vld [vmem:[#allocation9 + $0x1ae0] sm:$0xff]  ;;  %v589_v45 = vld [vmem:[#allocation9 + $0xaa8] sm:$0xff] }
 0x3ac   :  { %7344 = vmatprep.subr.bf16.mxu1 %v12479_v53  ;;  %v1020_v53 = vld [vmem:[#allocation9 + $0x1820] sm:$0xff] }
 0x3ad   :  { %v13100_v5 = vcombine.low %v1020_v53, %v1028_v54 }
 0x3ae   :  { %7263 = vmatpush1.bf16.msra.mxu0 %v12988_v62  ;;  %v12574_v62 = vcombine.low %v493_v46, %v501_v48  ;;  %v597_v46 = vld [vmem:[#allocation9 + $0xae8] sm:$0xff] }
 0x3af   :  { %7345 = vmatpush1.bf16.msra.mxu1 %v12478_v0  ;;  %7264 = vmatprep.subr.bf16.mxu0 %v13005_v2  ;;  %v13101_v0 = vcombine.high %v1020_v53, %v1028_v54  ;;  %v12591_v2 = vcombine.high %v509_v59, %v517_v60  ;;  %v1124_v53 = vld [vmem:[#allocation9 + $0x1b60] sm:$0xff]  ;;  %v605_v54 = vld [vmem:[#allocation9 + $0xb28] sm:$0xff] }
 0x3b0   :  { %7346 = vmatprep.subr.bf16.mxu1 %v12495_v3  ;;  %v1036_v3 = vld [vmem:[#allocation9 + $0x18a0] sm:$0xff] }
 0x3b1   :  { %v13116_v19 = vcombine.low %v1036_v3, %v1044_v4 }
 0x3b2   :  { %7265 = vmatpush1.bf16.msra.mxu0 %v13004_v8  ;;  %v12590_v8 = vcombine.low %v509_v59, %v517_v60  ;;  %v613_v59 = vld [vmem:[#allocation9 + $0xb68] sm:$0xff] }
 0x3b3   :  { %7347 = vmatpush1.bf16.msra.mxu1 %v12494_v10  ;;  %7266 = vmatprep.subr.bf16.mxu0 %v13021_v11  ;;  %v13117_v10 = vcombine.high %v1036_v3, %v1044_v4  ;;  %v1052_v11 = vld [vmem:[#allocation9 + $0x1920] sm:$0xff] }
 0x3b4   :  { %7348 = vmatprep.subr.bf16.mxu1 %v12511_v12  ;;  %v1060_v12 = vld [vmem:[#allocation9 + $0x1960] sm:$0xff] }
 0x3b5   :  { %v13132_v27 = vcombine.low %v1052_v11, %v1060_v12  ;;  %v1132_v3 = vld [vmem:[#allocation9 + $0x1ba0] sm:$0xff] }
 0x3b6   :  { %7267 = vmatpush1.bf16.msra.mxu0 %v13020_v20  ;;  %v12606_v20 = vcombine.low %v525_v6, %v533_v7  ;;  %v1140_v4 = vld [vmem:[#allocation9 + $0x1be0] sm:$0xff]  ;;  %v621_v6 = vld [vmem:[#allocation9 + $0xba8] sm:$0xff] }
 0x3b7   :  { %7349 = vmatpush1.bf16.msra.mxu1 %v12510_v21  ;;  %7268 = vmatprep.subr.bf16.mxu0 %v13037_v22  ;;  %v13133_v21 = vcombine.high %v1052_v11, %v1060_v12  ;;  %v12623_v22 = vcombine.high %v541_v16, %v549_v18  ;;  %v629_v7 = vld [vmem:[#allocation9 + $0xbe8] sm:$0xff]  ;;  %v12686_v12 = vcombine.low %v605_v54, %v613_v59 }
 0x3b8   :  { %7350 = vmatprep.subr.bf16.mxu1 %v12527_v23  ;;  %v1068_v23 = vld [vmem:[#allocation9 + $0x19a0] sm:$0xff] }
 0x3b9   :  { %v13148_v34 = vcombine.low %v1068_v23, %v1076_v24 }
 0x3ba   :  { %7269 = vmatpush1.bf16.msra.mxu0 %v13036_v28  ;;  %v12622_v28 = vcombine.low %v541_v16, %v549_v18  ;;  %v12703_v16 = vcombine.high %v621_v6, %v629_v7  ;;  %v1148_v18 = vld [vmem:[#allocation9 + $0x1c20] sm:$0xff] }
 0x3bb   :  { %7351 = vmatpush1.bf16.msra.mxu1 %v12526_v29  ;;  %7270 = vmatprep.subr.bf16.mxu0 %v13053_v30  ;;  %v13149_v29 = vcombine.high %v1068_v23, %v1076_v24  ;;  %v12639_v30 = vcombine.high %v557_v25, %v565_v26  ;;  %v12702_v23 = vcombine.low %v621_v6, %v629_v7  ;;  %v1228_v7 = vld [vmem:[#allocation9 + $0x1ea0] sm:$0xff] }
 0x3bc   :  { %7352 = vmatprep.subr.bf16.mxu1 %v12543_v35  ;;  %v1084_v35 = vld [vmem:[#allocation9 + $0x1a20] sm:$0xff] }
 0x3bd   :  { %v13164_v48 = vcombine.low %v1084_v35, %v1092_v31 }
 0x3be   :  { %7271 = vmatpush1.bf16.msra.mxu0 %v13052_v36  ;;  %v12638_v36 = vcombine.low %v557_v25, %v565_v26  ;;  %v1164_v26 = vld [vmem:[#allocation9 + $0x1ca0] sm:$0xff] }
 0x3bf   :  { %7353 = vmatpush1.bf16.msra.mxu1 %v12542_v38  ;;  %7272 = vmatprep.subr.bf16.mxu0 %v13069_v39  ;;  %v13165_v38 = vcombine.high %v1084_v35, %v1092_v31  ;;  %v12655_v39 = vcombine.high %v573_v32, %v581_v33 }
 0x3c0   :  { %7354 = vmatprep.subr.bf16.mxu1 %v12559_v41  ;;  %v1100_v41 = vld [vmem:[#allocation9 + $0x1aa0] sm:$0xff] }
 0x3c1   :  { %v13180_v60 = vcombine.low %v1100_v41, %v1108_v43 }
 0x3c2   :  { %7273 = vmatpush1.bf16.msra.mxu0 %v13068_v49  ;;  %v12654_v49 = vcombine.low %v573_v32, %v581_v33  ;;  %v1180_v33 = vld [vmem:[#allocation9 + $0x1d20] sm:$0xff] }
 0x3c3   :  { %7355 = vmatpush1.bf16.msra.mxu1 %v12558_v50  ;;  %7274 = vmatprep.subr.bf16.mxu0 %v13085_v51  ;;  %v13181_v50 = vcombine.high %v1100_v41, %v1108_v43  ;;  %v12671_v51 = vcombine.high %v589_v45, %v597_v46 }
 0x3c4   :  { %7356 = vmatprep.subr.bf16.mxu1 %v12575_v52  ;;  %v1116_v52 = vld [vmem:[#allocation9 + $0x1b20] sm:$0xff] }
 0x3c6   :  { %7275 = vmatpush1.bf16.msra.mxu0 %v13084_v61  ;;  %v12670_v61 = vcombine.low %v589_v45, %v597_v46  ;;  %v1196_v46 = vld [vmem:[#allocation9 + $0x1da0] sm:$0xff] }
 0x3c7   :  { %7357 = vmatpush1.bf16.msra.mxu1 %v12574_v62  ;;  %7285 = vmatprep.subr.bf16.mxu0 %v13101_v0  ;;  %v13197_v62 = vcombine.high %v1116_v52, %v1124_v53 }
 0x3c8   :  { %7367 = vmatprep.subr.bf16.mxu1 %v12591_v2  ;;  %v12687_v2 = vcombine.high %v605_v54, %v613_v59  ;;  %v1212_v59 = vld [vmem:[#allocation9 + $0x1e20] sm:$0xff] }
 0x3c9   :  { %7277 = vmatmul.mubr.bf16.vlgmr.msra.gmra.mrb[8].mxu0 %v15442_v15 }
 0x3ca   :  { %7359 = vmatmul.mubr.bf16.vlgmr.msra.gmra.mrb[12].mxu1 %v15424_v55  ;;  %7286 = vmatpush1.bf16.msra.mxu0 %v13100_v5 }
 0x3cb   :  { %7317 = vmatprep.mubr.bf16.mxu0 %v15444_v17  ;;  %7368 = vmatpush1.bf16.msra.mxu1 %v12590_v8 }
 0x3cc   :  { %7399 = vmatprep.mubr.bf16.mxu1 %v15430_v58  ;;  %7287 = vmatprep.subr.bf16.mxu0 %v13117_v10  ;;  %v13196_v10 = vcombine.low %v1116_v52, %v1124_v53 }
 0x3cd   :  { %7369 = vmatprep.subr.bf16.mxu1 %v12607_v14  ;;  %v13213_v14 = vcombine.high %v1132_v3, %v1140_v4 }
 0x3ce   :  { %7288 = vmatpush1.bf16.msra.mxu0 %v13116_v19  ;;  %v1156_v19 = vld [vmem:[#allocation9 + $0x1c60] sm:$0xff] }
 0x3cf   :  { %7370 = vmatpush1.bf16.msra.mxu1 %v12606_v20  ;;  %7289 = vmatprep.subr.bf16.mxu0 %v13133_v21  ;;  %v637_v20 = vld [vmem:[#allocation9 + $0xc28] sm:$0xff]  ;;  %v13229_v24 = vcombine.high %v1148_v18, %v1156_v19 }
 0x3d0   :  { %7371 = vmatprep.subr.bf16.mxu1 %v12623_v22  ;;  %v645_v21 = vld [vmem:[#allocation9 + $0xc68] sm:$0xff]  ;;  %v13212_v22 = vcombine.low %v1132_v3, %v1140_v4 }
 0x3d1   :  { %v12719_v25 = vcombine.high %v637_v20, %v645_v21  ;;  %v12718_v35 = vcombine.low %v637_v20, %v645_v21  ;;  %v1252_v20 = vld [vmem:[#allocation9 + $0x1f60] sm:$0xff]  ;;  %v733_v21 = vld [vmem:[#allocation9 + $0xf28] sm:$0xff] }
 0x3d2   :  { %7290 = vmatpush1.bf16.msra.mxu0 %v13132_v27  ;;  %v1172_v27 = vld [vmem:[#allocation9 + $0x1ce0] sm:$0xff] }
 0x3d3   :  { %7372 = vmatpush1.bf16.msra.mxu1 %v12622_v28  ;;  %7291 = vmatprep.subr.bf16.mxu0 %v13149_v29  ;;  %v653_v28 = vld [vmem:[#allocation9 + $0xca8] sm:$0xff]  ;;  %v13245_v31 = vcombine.high %v1164_v26, %v1172_v27 }
 0x3d4   :  { %7373 = vmatprep.subr.bf16.mxu1 %v12639_v30  ;;  %v661_v29 = vld [vmem:[#allocation9 + $0xce8] sm:$0xff]  ;;  %v13228_v30 = vcombine.low %v1148_v18, %v1156_v19  ;;  %v1244_v19 = vld [vmem:[#allocation9 + $0x1f20] sm:$0xff] }
 0x3d5   :  { %v12735_v32 = vcombine.high %v653_v28, %v661_v29  ;;  %v12734_v41 = vcombine.low %v653_v28, %v661_v29  ;;  %v1268_v28 = vld [vmem:[#allocation9 + $0x1fe0] sm:$0xff]  ;;  %v749_v29 = vld [vmem:[#allocation9 + $0xfa8] sm:$0xff] }
 0x3d6   :  { %7292 = vmatpush1.bf16.msra.mxu0 %v13148_v34  ;;  %v1188_v34 = vld [vmem:[#allocation9 + $0x1d60] sm:$0xff] }
 0x3d7   :  { %7374 = vmatpush1.bf16.msra.mxu1 %v12638_v36  ;;  %7293 = vmatprep.subr.bf16.mxu0 %v13165_v38  ;;  %v669_v36 = vld [vmem:[#allocation9 + $0xd28] sm:$0xff]  ;;  %v13261_v43 = vcombine.high %v1180_v33, %v1188_v34 }
 0x3d8   :  { %7375 = vmatprep.subr.bf16.mxu1 %v12655_v39  ;;  %v677_v38 = vld [vmem:[#allocation9 + $0xd68] sm:$0xff]  ;;  %v13244_v39 = vcombine.low %v1164_v26, %v1172_v27  ;;  %v1260_v27 = vld [vmem:[#allocation9 + $0x1fa0] sm:$0xff] }
 0x3d9   :  { %v12751_v45 = vcombine.high %v669_v36, %v677_v38  ;;  %v12750_v52 = vcombine.low %v669_v36, %v677_v38  ;;  %v262_v36 = vld [vmem:[#allocation9 + $0x70] sm:$0xff]  ;;  %v765_v38 = vld [vmem:[#allocation9 + $0x1028] sm:$0xff] }
 0x3da   :  { %7294 = vmatpush1.bf16.msra.mxu0 %v13164_v48  ;;  %v1204_v48 = vld [vmem:[#allocation9 + $0x1de0] sm:$0xff] }
 0x3db   :  { %7376 = vmatpush1.bf16.msra.mxu1 %v12654_v49  ;;  %7295 = vmatprep.subr.bf16.mxu0 %v13181_v50  ;;  %v685_v49 = vld [vmem:[#allocation9 + $0xda8] sm:$0xff]  ;;  %v13277_v53 = vcombine.high %v1196_v46, %v1204_v48 }
 0x3dc   :  { %v15509_v0 = vpop.f32.mrb[4].mxu0  ;;  %7377 = vmatprep.subr.bf16.mxu1 %v12671_v51  ;;  %v693_v50 = vld [vmem:[#allocation9 + $0xde8] sm:$0xff]  ;;  %v13260_v51 = vcombine.low %v1180_v33, %v1188_v34  ;;  %v254_v34 = vld [vmem:[#allocation9 + $0x30] sm:$0xff] }
 0x3dd   :  { %v15511_v5 = vpop.f32.mrb[5].mxu0  ;;  %v12767_v54 = vcombine.high %v685_v49, %v693_v50  ;;  %v12766_v3 = vcombine.low %v685_v49, %v693_v50  ;;  %v789_v49 = vld [vmem:[#allocation9 + $0x10e8] sm:$0xff]  ;;  %v12336_v50 = vcombine.low %v254_v34, %v262_v36 }
 0x3de   :  { %v6995_v8 = vpop.f32.mrb[6].mxu0  ;;  %7296 = vmatpush1.bf16.msra.mxu0 %v13180_v60  ;;  %v1220_v60 = vld [vmem:[#allocation9 + $0x1e60] sm:$0xff] }
 0x3df   :  { %7378 = vmatpush1.bf16.msra.mxu1 %v12670_v61  ;;  %v6996_v11 = vpop.f32.mrb[7].mxu0  ;;  %7297 = vmatprep.subr.bf16.mxu0 %v13197_v62  ;;  %v701_v61 = vld [vmem:[#allocation9 + $0xe28] sm:$0xff]  ;;  %v13293_v4 = vcombine.high %v1212_v59, %v1220_v60  ;;  %v1236_v8 = vld [vmem:[#allocation9 + $0x1ee0] sm:$0xff] }
 0x3e0   :  { %7379 = vmatprep.subr.bf16.mxu1 %v12687_v2  ;;  %v709_v62 = vld [vmem:[#allocation9 + $0xe68] sm:$0xff]  ;;  %v13276_v2 = vcombine.low %v1196_v46, %v1204_v48 }
 0x3e1   :  { %v12783_v6 = vcombine.high %v701_v61, %v709_v62  ;;  %v725_v11 = vld [vmem:[#allocation9 + $0xee8] sm:$0xff] }
 0x3e2   :  { %7298 = vmatpush1.bf16.msra.mxu0 %v13196_v10  ;;  %v717_v10 = vld [vmem:[#allocation9 + $0xea8] sm:$0xff] }
 0x3e3   :  { %7380 = vmatpush1.bf16.msra.mxu1 %v12686_v12  ;;  %7299 = vmatprep.subr.bf16.mxu0 %v13213_v14  ;;  %v13292_v12 = vcombine.low %v1212_v59, %v1220_v60  ;;  %v12782_v14 = vcombine.low %v701_v61, %v709_v62  ;;  %v12799_v18 = vcombine.high %v717_v10, %v725_v11  ;;  %v781_v48 = vld [vmem:[#allocation9 + $0x10a8] sm:$0xff]  ;;  %v286_v59 = vld [vmem:[#allocation9 + $0x130] sm:$0xff] }
 0x3e4   :  { %7381 = vmatprep.subr.bf16.mxu1 %v12703_v16  ;;  %v13309_v16 = vcombine.high %v1228_v7, %v1236_v8  ;;  %v294_v60 = vld [vmem:[#allocation9 + $0x170] sm:$0xff]  ;;  %v797_v62 = vld [vmem:[#allocation9 + $0x1128] sm:$0xff] }
 0x3e6   :  { %7300 = vmatpush1.bf16.msra.mxu0 %v13212_v22  ;;  %v741_v22 = vld [vmem:[#allocation9 + $0xf68] sm:$0xff] }
 0x3e7   :  { %7382 = vmatpush1.bf16.msra.mxu1 %v12702_v23  ;;  %7301 = vmatprep.subr.bf16.mxu0 %v13229_v24  ;;  %v13308_v23 = vcombine.low %v1228_v7, %v1236_v8  ;;  %v12798_v24 = vcombine.low %v717_v10, %v725_v11  ;;  %v12815_v26 = vcombine.high %v733_v21, %v741_v22  ;;  %v302_v8 = vld [vmem:[#allocation9 + $0x1b0] sm:$0xff]  ;;  %v813_v11 = vld [vmem:[#allocation9 + $0x11a8] sm:$0xff] }
 0x3e8   :  { %7383 = vmatprep.subr.bf16.mxu1 %v12719_v25  ;;  %v13325_v25 = vcombine.high %v1244_v19, %v1252_v20  ;;  %v310_v10 = vld [vmem:[#allocation9 + $0x1f0] sm:$0xff] }
 0x3ea   :  { %7302 = vmatpush1.bf16.msra.mxu0 %v13228_v30  ;;  %v757_v30 = vld [vmem:[#allocation9 + $0xfe8] sm:$0xff] }
 0x3eb   :  { %7384 = vmatpush1.bf16.msra.mxu1 %v12718_v35  ;;  %7303 = vmatprep.subr.bf16.mxu0 %v13245_v31  ;;  %v13324_v35 = vcombine.low %v1244_v19, %v1252_v20  ;;  %v12814_v31 = vcombine.low %v733_v21, %v741_v22  ;;  %v12831_v33 = vcombine.high %v749_v29, %v757_v30  ;;  %v318_v20 = vld [vmem:[#allocation9 + $0x230] sm:$0xff]  ;;  %v829_v22 = vld [vmem:[#allocation9 + $0x1228] sm:$0xff] }
 0x3ec   :  { %7385 = vmatprep.subr.bf16.mxu1 %v12735_v32  ;;  %v13341_v32 = vcombine.high %v1260_v27, %v1268_v28  ;;  %v326_v21 = vld [vmem:[#allocation9 + $0x270] sm:$0xff] }
 0x3ee   :  { %7304 = vmatpush1.bf16.msra.mxu0 %v13244_v39  ;;  %v773_v39 = vld [vmem:[#allocation9 + $0x1068] sm:$0xff] }
 0x3ef   :  { %7386 = vmatpush1.bf16.msra.mxu1 %v12734_v41  ;;  %7305 = vmatprep.subr.bf16.mxu0 %v13261_v43  ;;  %v13340_v41 = vcombine.low %v1260_v27, %v1268_v28  ;;  %v12830_v43 = vcombine.low %v749_v29, %v757_v30  ;;  %v12847_v46 = vcombine.high %v765_v38, %v773_v39  ;;  %v334_v28 = vld [vmem:[#allocation9 + $0x2b0] sm:$0xff]  ;;  %v845_v30 = vld [vmem:[#allocation9 + $0x12a8] sm:$0xff] }
 0x3f0   :  { %7387 = vmatprep.subr.bf16.mxu1 %v12751_v45  ;;  %v12337_v45 = vcombine.high %v254_v34, %v262_v36  ;;  %v342_v29 = vld [vmem:[#allocation9 + $0x2f0] sm:$0xff] }
 0x3f1   :  { %v350_v36 = vld [vmem:[#allocation9 + $0x330] sm:$0xff] }
 0x3f2   :  { %7306 = vmatpush1.bf16.msra.mxu0 %v13260_v51  ;;  %v270_v51 = vld [vmem:[#allocation9 + $0xb0] sm:$0xff] }
 0x3f3   :  { %7388 = vmatpush1.bf16.msra.mxu1 %v12750_v52  ;;  %7307 = vmatprep.subr.bf16.mxu0 %v13277_v53  ;;  %v278_v52 = vld [vmem:[#allocation9 + $0xf0] sm:$0xff]  ;;  %v12846_v53 = vcombine.low %v765_v38, %v773_v39  ;;  %v861_v39 = vld [vmem:[#allocation9 + $0x1328] sm:$0xff] }
 0x3f4   :  { %7389 = vmatprep.subr.bf16.mxu1 %v12767_v54  ;;  %v12863_v54 = vcombine.high %v781_v48, %v789_v49  ;;  %v12353_v61 = vcombine.high %v270_v51, %v278_v52  ;;  %v358_v38 = vld [vmem:[#allocation9 + $0x370] sm:$0xff] }
 0x3f6   :  { %7308 = vmatpush1.bf16.msra.mxu0 %v13276_v2  ;;  %v805_v2 = vld [vmem:[#allocation9 + $0x1168] sm:$0xff] }
 0x3f7   :  { %7390 = vmatpush1.bf16.msra.mxu1 %v12766_v3  ;;  %7309 = vmatprep.subr.bf16.mxu0 %v13293_v4  ;;  %v12352_v3 = vcombine.low %v270_v51, %v278_v52  ;;  %v12862_v4 = vcombine.low %v781_v48, %v789_v49  ;;  %v12879_v7 = vcombine.high %v797_v62, %v805_v2  ;;  %v366_v49 = vld [vmem:[#allocation9 + $0x3b0] sm:$0xff]  ;;  %v877_v51 = vld [vmem:[#allocation9 + $0x13a8] sm:$0xff] }
 0x3f8   :  { %7391 = vmatprep.subr.bf16.mxu1 %v12783_v6  ;;  %v12369_v6 = vcombine.high %v286_v59, %v294_v60  ;;  %v885_v52 = vld [vmem:[#allocation9 + $0x13e8] sm:$0xff] }
 0x3fa   :  { %7310 = vmatpush1.bf16.msra.mxu0 %v13292_v12  ;;  %v821_v12 = vld [vmem:[#allocation9 + $0x11e8] sm:$0xff] }
 0x3fb   :  { %7392 = vmatpush1.bf16.msra.mxu1 %v12782_v14  ;;  %7311 = vmatprep.subr.bf16.mxu0 %v13309_v16  ;;  %v12368_v14 = vcombine.low %v286_v59, %v294_v60  ;;  %v12878_v16 = vcombine.low %v797_v62, %v805_v2  ;;  %v12895_v19 = vcombine.high %v813_v11, %v821_v12  ;;  %v390_v62 = vld [vmem:[#allocation9 + $0x470] sm:$0xff]  ;;  %v893_v2 = vld [vmem:[#allocation9 + $0x1428] sm:$0xff] }
 0x3fc   :  { %7393 = vmatprep.subr.bf16.mxu1 %v12799_v18  ;;  %v12385_v18 = vcombine.high %v302_v8, %v310_v10  ;;  %v12959_v60 = vcombine.high %v877_v51, %v885_v52 }
 0x3fe   :  { %7312 = vmatpush1.bf16.msra.mxu0 %v13308_v23  ;;  %v837_v23 = vld [vmem:[#allocation9 + $0x1268] sm:$0xff] }
 0x3ff   :  { %7394 = vmatpush1.bf16.msra.mxu1 %v12798_v24  ;;  %7313 = vmatprep.subr.bf16.mxu0 %v13325_v25  ;;  %v12384_v24 = vcombine.low %v302_v8, %v310_v10  ;;  %v12894_v25 = vcombine.low %v813_v11, %v821_v12  ;;  %v12911_v27 = vcombine.high %v829_v22, %v837_v23  ;;  %v398_v10 = vld [vmem:[#allocation9 + $0x4b0] sm:$0xff]  ;;  %v909_v12 = vld [vmem:[#allocation9 + $0x14a8] sm:$0xff] }
 0x400   :  { %7395 = vmatprep.subr.bf16.mxu1 %v12815_v26  ;;  %v12401_v26 = vcombine.high %v318_v20, %v326_v21  ;;  %v406_v11 = vld [vmem:[#allocation9 + $0x4f0] sm:$0xff] }
 0x402   :  { %7314 = vmatpush1.bf16.msra.mxu0 %v13324_v35  ;;  %v853_v35 = vld [vmem:[#allocation9 + $0x12e8] sm:$0xff] }
 0x403   :  { %7396 = vmatpush1.bf16.msra.mxu1 %v12814_v31  ;;  %7315 = vmatprep.subr.bf16.mxu0 %v13341_v32  ;;  %v12400_v31 = vcombine.low %v318_v20, %v326_v21  ;;  %v12910_v32 = vcombine.low %v829_v22, %v837_v23  ;;  %v12927_v34 = vcombine.high %v845_v30, %v853_v35  ;;  %v414_v21 = vld [vmem:[#allocation9 + $0x530] sm:$0xff]  ;;  %v925_v23 = vld [vmem:[#allocation9 + $0x1528] sm:$0xff] }
 0x404   :  { %7397 = vmatprep.subr.bf16.mxu1 %v12831_v33  ;;  %v12417_v33 = vcombine.high %v334_v28, %v342_v29  ;;  %v422_v22 = vld [vmem:[#allocation9 + $0x570] sm:$0xff] }
 0x406   :  { %7316 = vmatpush1.bf16.msra.mxu0 %v13340_v41  ;;  %v869_v41 = vld [vmem:[#allocation9 + $0x1368] sm:$0xff] }
 0x407   :  { %7398 = vmatpush1.bf16.msra.mxu1 %v12830_v43  ;;  %7490 = vmatprep.subr.bf16.mxu0 %v12337_v45  ;;  %v12416_v43 = vcombine.low %v334_v28, %v342_v29  ;;  %v12926_v45 = vcombine.low %v845_v30, %v853_v35  ;;  %v12943_v48 = vcombine.high %v861_v39, %v869_v41  ;;  %v430_v29 = vld [vmem:[#allocation9 + $0x5b0] sm:$0xff]  ;;  %v941_v35 = vld [vmem:[#allocation9 + $0x15a8] sm:$0xff] }
 0x408   :  { %7408 = vmatprep.subr.bf16.mxu1 %v12847_v46  ;;  %v12433_v46 = vcombine.high %v350_v36, %v358_v38  ;;  %v438_v30 = vld [vmem:[#allocation9 + $0x5f0] sm:$0xff] }
 0x409   :  { %7318 = vmatmul.mubr.bf16.vlgmr.msra.gmra.mrb[8].mxu0 %v15451_v37 }
 0x40a   :  { %7400 = vmatmul.mubr.bf16.vlgmr.msra.gmra.mrb[12].mxu1 %v15428_v57  ;;  %7491 = vmatpush1.bf16.msra.mxu0 %v12336_v50  ;;  %v374_v50 = vld [vmem:[#allocation9 + $0x3f0] sm:$0xff] }
 0x40b   :  { %7409 = vmatpush1.bf16.msra.mxu1 %v12846_v53  ;;  %7440 = vmatprep.mubr.bf16.mxu1 %v15434_v1  ;;  %v12432_v53 = vcombine.low %v350_v36, %v358_v38  ;;  %v12449_v59 = vcombine.high %v366_v49, %v374_v50  ;;  %v446_v38 = vld [vmem:[#allocation9 + $0x630] sm:$0xff] }
 0x40c   :  { %7522 = vmatprep.mubr.bf16.mxu0 %v15426_v56  ;;  %7410 = vmatprep.subr.bf16.mxu1 %v12863_v54  ;;  %v12942_v54 = vcombine.low %v861_v39, %v869_v41  ;;  %v454_v39 = vld [vmem:[#allocation9 + $0x670] sm:$0xff]  ;;  %v957_v41 = vld [vmem:[#allocation9 + $0x1628] sm:$0xff] }
 0x40d   :  { %7492 = vmatprep.subr.bf16.mxu0 %v12353_v61  ;;  %v382_v61 = vld [vmem:[#allocation9 + $0x430] sm:$0xff] }
 0x40e   :  { %7493 = vmatpush1.bf16.msra.mxu0 %v12352_v3  ;;  %v901_v3 = vld [vmem:[#allocation9 + $0x1468] sm:$0xff] }
 0x40f   :  { %7411 = vmatpush1.bf16.msra.mxu1 %v12862_v4  ;;  %7494 = vmatprep.subr.bf16.mxu0 %v12369_v6  ;;  %v12448_v4 = vcombine.low %v366_v49, %v374_v50  ;;  %v12958_v6 = vcombine.low %v877_v51, %v885_v52  ;;  %v12975_v8 = vcombine.high %v893_v2, %v901_v3  ;;  %v462_v50 = vld [vmem:[#allocation9 + $0x6b0] sm:$0xff]  ;;  %v973_v52 = vld [vmem:[#allocation9 + $0x16a8] sm:$0xff] }
 0x410   :  { %7412 = vmatprep.subr.bf16.mxu1 %v12879_v7  ;;  %v12465_v7 = vcombine.high %v382_v61, %v390_v62  ;;  %v470_v51 = vld [vmem:[#allocation9 + $0x6f0] sm:$0xff] }
 0x412   :  { %7495 = vmatpush1.bf16.msra.mxu0 %v12368_v14  ;;  %v917_v14 = vld [vmem:[#allocation9 + $0x14e8] sm:$0xff] }
 0x413   :  { %7413 = vmatpush1.bf16.msra.mxu1 %v12878_v16  ;;  %7496 = vmatprep.subr.bf16.mxu0 %v12385_v18  ;;  %v12464_v16 = vcombine.low %v382_v61, %v390_v62  ;;  %v12974_v18 = vcombine.low %v893_v2, %v901_v3  ;;  %v12991_v20 = vcombine.high %v909_v12, %v917_v14  ;;  %v478_v62 = vld [vmem:[#allocation9 + $0x730] sm:$0xff]  ;;  %v989_v3 = vld [vmem:[#allocation9 + $0x1728] sm:$0xff] }
 0x414   :  { %7414 = vmatprep.subr.bf16.mxu1 %v12895_v19  ;;  %v12481_v19 = vcombine.high %v398_v10, %v406_v11  ;;  %v486_v2 = vld [vmem:[#allocation9 + $0x770] sm:$0xff] }
 0x416   :  { %7497 = vmatpush1.bf16.msra.mxu0 %v12384_v24  ;;  %v933_v24 = vld [vmem:[#allocation9 + $0x1568] sm:$0xff] }
 0x417   :  { %7415 = vmatpush1.bf16.msra.mxu1 %v12894_v25  ;;  %7498 = vmatprep.subr.bf16.mxu0 %v12401_v26  ;;  %v12480_v25 = vcombine.low %v398_v10, %v406_v11  ;;  %v12990_v26 = vcombine.low %v909_v12, %v917_v14  ;;  %v13007_v28 = vcombine.high %v925_v23, %v933_v24  ;;  %v494_v11 = vld [vmem:[#allocation9 + $0x7b0] sm:$0xff]  ;;  %v1005_v14 = vld [vmem:[#allocation9 + $0x17a8] sm:$0xff] }
 0x418   :  { %7416 = vmatprep.subr.bf16.mxu1 %v12911_v27  ;;  %v12497_v27 = vcombine.high %v414_v21, %v422_v22  ;;  %v502_v12 = vld [vmem:[#allocation9 + $0x7f0] sm:$0xff] }
 0x41a   :  { %7499 = vmatpush1.bf16.msra.mxu0 %v12400_v31  ;;  %v949_v31 = vld [vmem:[#allocation9 + $0x15e8] sm:$0xff] }
 0x41b   :  { %7417 = vmatpush1.bf16.msra.mxu1 %v12910_v32  ;;  %7500 = vmatprep.subr.bf16.mxu0 %v12417_v33  ;;  %v12496_v32 = vcombine.low %v414_v21, %v422_v22  ;;  %v13006_v33 = vcombine.low %v925_v23, %v933_v24  ;;  %v13023_v36 = vcombine.high %v941_v35, %v949_v31  ;;  %v510_v22 = vld [vmem:[#allocation9 + $0x830] sm:$0xff]  ;;  %v1021_v24 = vld [vmem:[#allocation9 + $0x1828] sm:$0xff] }
 0x41c   :  { %7418 = vmatprep.subr.bf16.mxu1 %v12927_v34  ;;  %v12513_v34 = vcombine.high %v430_v29, %v438_v30  ;;  %v518_v23 = vld [vmem:[#allocation9 + $0x870] sm:$0xff] }
 0x41e   :  { %7501 = vmatpush1.bf16.msra.mxu0 %v12416_v43  ;;  %v965_v43 = vld [vmem:[#allocation9 + $0x1668] sm:$0xff] }
 0x41f   :  { %7419 = vmatpush1.bf16.msra.mxu1 %v12926_v45  ;;  %7502 = vmatprep.subr.bf16.mxu0 %v12433_v46  ;;  %v12512_v45 = vcombine.low %v430_v29, %v438_v30  ;;  %v13022_v46 = vcombine.low %v941_v35, %v949_v31  ;;  %v13039_v49 = vcombine.high %v957_v41, %v965_v43  ;;  %v1037_v30 = vld [vmem:[#allocation9 + $0x18a8] sm:$0xff] }
 0x420   :  { %7420 = vmatprep.subr.bf16.mxu1 %v12943_v48  ;;  %v12529_v48 = vcombine.high %v446_v38, %v454_v39  ;;  %v1045_v35 = vld [vmem:[#allocation9 + $0x18e8] sm:$0xff]  ;;  %v12592_v31 = vcombine.low %v510_v22, %v518_v23 }
 0x422   :  { %7503 = vmatpush1.bf16.msra.mxu0 %v12432_v53  ;;  %v981_v53 = vld [vmem:[#allocation9 + $0x16e8] sm:$0xff] }
 0x423   :  { %7421 = vmatpush1.bf16.msra.mxu1 %v12942_v54  ;;  %7504 = vmatprep.subr.bf16.mxu0 %v12449_v59  ;;  %v12528_v54 = vcombine.low %v446_v38, %v454_v39  ;;  %v13038_v59 = vcombine.low %v957_v41, %v965_v43  ;;  %v13055_v61 = vcombine.high %v973_v52, %v981_v53  ;;  %v542_v38 = vld [vmem:[#allocation9 + $0x930] sm:$0xff]  ;;  %v1053_v43 = vld [vmem:[#allocation9 + $0x1928] sm:$0xff] }
 0x424   :  { %7422 = vmatprep.subr.bf16.mxu1 %v12959_v60  ;;  %v12545_v60 = vcombine.high %v462_v50, %v470_v51  ;;  %v550_v39 = vld [vmem:[#allocation9 + $0x970] sm:$0xff] }
 0x426   :  { %7505 = vmatpush1.bf16.msra.mxu0 %v12448_v4  ;;  %v997_v4 = vld [vmem:[#allocation9 + $0x1768] sm:$0xff] }
 0x427   :  { %7423 = vmatpush1.bf16.msra.mxu1 %v12958_v6  ;;  %7506 = vmatprep.subr.bf16.mxu0 %v12465_v7  ;;  %v12544_v6 = vcombine.low %v462_v50, %v470_v51  ;;  %v13054_v7 = vcombine.low %v973_v52, %v981_v53  ;;  %v13071_v10 = vcombine.high %v989_v3, %v997_v4  ;;  %v558_v51 = vld [vmem:[#allocation9 + $0x9b0] sm:$0xff]  ;;  %v1069_v53 = vld [vmem:[#allocation9 + $0x19a8] sm:$0xff] }
 0x428   :  { %7424 = vmatprep.subr.bf16.mxu1 %v12975_v8  ;;  %v12561_v8 = vcombine.high %v478_v62, %v486_v2  ;;  %v566_v52 = vld [vmem:[#allocation9 + $0x9f0] sm:$0xff] }
 0x42a   :  { %7507 = vmatpush1.bf16.msra.mxu0 %v12464_v16  ;;  %v1013_v16 = vld [vmem:[#allocation9 + $0x17e8] sm:$0xff] }
 0x42b   :  { %7425 = vmatpush1.bf16.msra.mxu1 %v12974_v18  ;;  %7508 = vmatprep.subr.bf16.mxu0 %v12481_v19  ;;  %v12560_v18 = vcombine.low %v478_v62, %v486_v2  ;;  %v13070_v19 = vcombine.low %v989_v3, %v997_v4  ;;  %v13087_v21 = vcombine.high %v1005_v14, %v1013_v16  ;;  %v574_v2 = vld [vmem:[#allocation9 + $0xa30] sm:$0xff]  ;;  %v1085_v4 = vld [vmem:[#allocation9 + $0x1a28] sm:$0xff] }
 0x42c   :  { %7426 = vmatprep.subr.bf16.mxu1 %v12991_v20  ;;  %v12577_v20 = vcombine.high %v494_v11, %v502_v12  ;;  %v582_v3 = vld [vmem:[#allocation9 + $0xa70] sm:$0xff] }
 0x42e   :  { %7509 = vmatpush1.bf16.msra.mxu0 %v12480_v25  ;;  %v1029_v25 = vld [vmem:[#allocation9 + $0x1868] sm:$0xff] }
 0x42f   :  { %7427 = vmatpush1.bf16.msra.mxu1 %v12990_v26  ;;  %7510 = vmatprep.subr.bf16.mxu0 %v12497_v27  ;;  %v12576_v26 = vcombine.low %v494_v11, %v502_v12  ;;  %v13086_v27 = vcombine.low %v1005_v14, %v1013_v16  ;;  %v13103_v29 = vcombine.high %v1021_v24, %v1029_v25  ;;  %v590_v12 = vld [vmem:[#allocation9 + $0xab0] sm:$0xff]  ;;  %v1101_v16 = vld [vmem:[#allocation9 + $0x1aa8] sm:$0xff] }
 0x430   :  { %7428 = vmatprep.subr.bf16.mxu1 %v13007_v28  ;;  %v12593_v28 = vcombine.high %v510_v22, %v518_v23  ;;  %v598_v14 = vld [vmem:[#allocation9 + $0xaf0] sm:$0xff] }
 0x431   :  { %v606_v23 = vld [vmem:[#allocation9 + $0xb30] sm:$0xff] }
 0x432   :  { %7511 = vmatpush1.bf16.msra.mxu0 %v12496_v32  ;;  %v526_v32 = vld [vmem:[#allocation9 + $0x8b0] sm:$0xff] }
 0x433   :  { %7429 = vmatpush1.bf16.msra.mxu1 %v13006_v33  ;;  %7512 = vmatprep.subr.bf16.mxu0 %v12513_v34  ;;  %v534_v33 = vld [vmem:[#allocation9 + $0x8f0] sm:$0xff]  ;;  %v13102_v34 = vcombine.low %v1021_v24, %v1029_v25  ;;  %v1117_v25 = vld [vmem:[#allocation9 + $0x1b28] sm:$0xff] }
 0x434   :  { %7430 = vmatprep.subr.bf16.mxu1 %v13023_v36  ;;  %v13119_v36 = vcombine.high %v1037_v30, %v1045_v35  ;;  %v12609_v41 = vcombine.high %v526_v32, %v534_v33  ;;  %v614_v24 = vld [vmem:[#allocation9 + $0xb70] sm:$0xff] }
 0x436   :  { %7513 = vmatpush1.bf16.msra.mxu0 %v12512_v45  ;;  %v1061_v45 = vld [vmem:[#allocation9 + $0x1968] sm:$0xff] }
 0x437   :  { %7431 = vmatpush1.bf16.msra.mxu1 %v13022_v46  ;;  %7514 = vmatprep.subr.bf16.mxu0 %v12529_v48  ;;  %v12608_v46 = vcombine.low %v526_v32, %v534_v33  ;;  %v13118_v48 = vcombine.low %v1037_v30, %v1045_v35  ;;  %v13135_v50 = vcombine.high %v1053_v43, %v1061_v45  ;;  %v622_v35 = vld [vmem:[#allocation9 + $0xbb0] sm:$0xff]  ;;  %v1133_v33 = vld [vmem:[#allocation9 + $0x1ba8] sm:$0xff] }
 0x438   :  { %7432 = vmatprep.subr.bf16.mxu1 %v13039_v49  ;;  %v12625_v49 = vcombine.high %v542_v38, %v550_v39 }
 0x43a   :  { %7515 = vmatpush1.bf16.msra.mxu0 %v12528_v54  ;;  %v1077_v54 = vld [vmem:[#allocation9 + $0x19e8] sm:$0xff] }
 0x43b   :  { %7433 = vmatpush1.bf16.msra.mxu1 %v13038_v59  ;;  %7516 = vmatprep.subr.bf16.mxu0 %v12545_v60  ;;  %v12624_v59 = vcombine.low %v542_v38, %v550_v39  ;;  %v13134_v60 = vcombine.low %v1053_v43, %v1061_v45  ;;  %v13151_v62 = vcombine.high %v1069_v53, %v1077_v54 }
 0x43c   :  { %7434 = vmatprep.subr.bf16.mxu1 %v13055_v61  ;;  %v12641_v61 = vcombine.high %v558_v51, %v566_v52  ;;  %v12688_v38 = vcombine.low %v606_v23, %v614_v24 }
 0x43e   :  { %7517 = vmatpush1.bf16.msra.mxu0 %v12544_v6  ;;  %v1093_v6 = vld [vmem:[#allocation9 + $0x1a68] sm:$0xff] }
 0x43f   :  { %7435 = vmatpush1.bf16.msra.mxu1 %v13054_v7  ;;  %7518 = vmatprep.subr.bf16.mxu0 %v12561_v8  ;;  %v12640_v7 = vcombine.low %v558_v51, %v566_v52  ;;  %v13150_v8 = vcombine.low %v1069_v53, %v1077_v54  ;;  %v13167_v11 = vcombine.high %v1085_v4, %v1093_v6  ;;  %v1157_v51 = vld [vmem:[#allocation9 + $0x1c68] sm:$0xff] }
 0x440   :  { %7436 = vmatprep.subr.bf16.mxu1 %v13071_v10  ;;  %v12657_v10 = vcombine.high %v574_v2, %v582_v3 }
 0x442   :  { %7519 = vmatpush1.bf16.msra.mxu0 %v12560_v18  ;;  %v1109_v18 = vld [vmem:[#allocation9 + $0x1ae8] sm:$0xff] }
 0x443   :  { %7437 = vmatpush1.bf16.msra.mxu1 %v13070_v19  ;;  %7520 = vmatprep.subr.bf16.mxu0 %v12577_v20  ;;  %v12656_v19 = vcombine.low %v574_v2, %v582_v3  ;;  %v13166_v20 = vcombine.low %v1085_v4, %v1093_v6  ;;  %v13183_v22 = vcombine.high %v1101_v16, %v1109_v18  ;;  %v1173_v2 = vld [vmem:[#allocation9 + $0x1ce8] sm:$0xff] }
 0x444   :  { %7438 = vmatprep.subr.bf16.mxu1 %v13087_v21  ;;  %v12673_v21 = vcombine.high %v590_v12, %v598_v14 }
 0x446   :  { %7521 = vmatpush1.bf16.msra.mxu0 %v12576_v26  ;;  %v1125_v26 = vld [vmem:[#allocation9 + $0x1b68] sm:$0xff] }
 0x447   :  { %7439 = vmatpush1.bf16.msra.mxu1 %v13086_v27  ;;  %7531 = vmatprep.subr.bf16.mxu0 %v12593_v28  ;;  %v12672_v27 = vcombine.low %v590_v12, %v598_v14  ;;  %v13182_v28 = vcombine.low %v1101_v16, %v1109_v18  ;;  %v13199_v30 = vcombine.high %v1117_v25, %v1125_v26  ;;  %v1189_v12 = vld [vmem:[#allocation9 + $0x1d68] sm:$0xff] }
 0x448   :  { %7449 = vmatprep.subr.bf16.mxu1 %v13103_v29  ;;  %v12689_v29 = vcombine.high %v606_v23, %v614_v24  ;;  %v1205_v23 = vld [vmem:[#allocation9 + $0x1de8] sm:$0xff] }
 0x449   :  { %7523 = vmatmul.mubr.bf16.vlgmr.msra.gmra.mrb[12].mxu0 %v15424_v55 }
 0x44a   :  { %7441 = vmatmul.mubr.bf16.vlgmr.msra.gmra.mrb[12].mxu1 %v15442_v15  ;;  %7532 = vmatpush1.bf16.msra.mxu0 %v12592_v31  ;;  %v630_v31 = vld [vmem:[#allocation9 + $0xbf0] sm:$0xff] }
 0x44b   :  { %7450 = vmatpush1.bf16.msra.mxu1 %v13102_v34  ;;  %7481 = vmatprep.mubr.bf16.mxu1 %v15444_v17  ;;  %v1141_v34 = vld [vmem:[#allocation9 + $0x1be8] sm:$0xff]  ;;  %v12705_v43 = vcombine.high %v622_v35, %v630_v31  ;;  %v12704_v52 = vcombine.low %v622_v35, %v630_v31 }
 0x44c   :  { %7563 = vmatprep.mubr.bf16.mxu0 %v15430_v58  ;;  %7451 = vmatprep.subr.bf16.mxu1 %v13119_v36  ;;  %v13214_v53 = vcombine.low %v1133_v33, %v1141_v34  ;;  %v1221_v35 = vld [vmem:[#allocation9 + $0x1e68] sm:$0xff] }
 0x44d   :  { %7533 = vmatprep.subr.bf16.mxu0 %v12609_v41  ;;  %v13198_v41 = vcombine.low %v1117_v25, %v1125_v26 }
 0x44e   :  { %7534 = vmatpush1.bf16.msra.mxu0 %v12608_v46  ;;  %v13215_v46 = vcombine.high %v1133_v33, %v1141_v34 }
 0x44f   :  { %7452 = vmatpush1.bf16.msra.mxu1 %v13118_v48  ;;  %7535 = vmatprep.subr.bf16.mxu0 %v12625_v49  ;;  %v638_v48 = vld [vmem:[#allocation9 + $0xc30] sm:$0xff] }
 0x450   :  { %7453 = vmatprep.subr.bf16.mxu1 %v13135_v50  ;;  %v646_v49 = vld [vmem:[#allocation9 + $0xc70] sm:$0xff]  ;;  %v1149_v50 = vld [vmem:[#allocation9 + $0x1c28] sm:$0xff] }
 0x451   :  { %v12721_v54 = vcombine.high %v638_v48, %v646_v49  ;;  %v12720_v3 = vcombine.low %v638_v48, %v646_v49  ;;  %v13230_v4 = vcombine.low %v1149_v50, %v1157_v51 }
 0x452   :  { %7536 = vmatpush1.bf16.msra.mxu0 %v12624_v59  ;;  %v13231_v59 = vcombine.high %v1149_v50, %v1157_v51  ;;  %v734_v51 = vld [vmem:[#allocation9 + $0xf30] sm:$0xff] }
 0x453   :  { %7454 = vmatpush1.bf16.msra.mxu1 %v13134_v60  ;;  %7537 = vmatprep.subr.bf16.mxu0 %v12641_v61  ;;  %v654_v60 = vld [vmem:[#allocation9 + $0xcb0] sm:$0xff] }
 0x454   :  { %7455 = vmatprep.subr.bf16.mxu1 %v13151_v62  ;;  %v662_v61 = vld [vmem:[#allocation9 + $0xcf0] sm:$0xff]  ;;  %v1165_v62 = vld [vmem:[#allocation9 + $0x1ca8] sm:$0xff] }
 0x455   :  { %v12737_v6 = vcombine.high %v654_v60, %v662_v61  ;;  %v12736_v14 = vcombine.low %v654_v60, %v662_v61  ;;  %v13246_v16 = vcombine.low %v1165_v62, %v1173_v2 }
 0x456   :  { %7538 = vmatpush1.bf16.msra.mxu0 %v12640_v7  ;;  %v13247_v7 = vcombine.high %v1165_v62, %v1173_v2  ;;  %v750_v2 = vld [vmem:[#allocation9 + $0xfb0] sm:$0xff] }
 0x457   :  { %7456 = vmatpush1.bf16.msra.mxu1 %v13150_v8  ;;  %7539 = vmatprep.subr.bf16.mxu0 %v12657_v10  ;;  %v670_v8 = vld [vmem:[#allocation9 + $0xd30] sm:$0xff] }
 0x458   :  { %7457 = vmatprep.subr.bf16.mxu1 %v13167_v11  ;;  %v678_v10 = vld [vmem:[#allocation9 + $0xd70] sm:$0xff]  ;;  %v1181_v11 = vld [vmem:[#allocation9 + $0x1d28] sm:$0xff] }
 0x459   :  { %v12753_v18 = vcombine.high %v670_v8, %v678_v10  ;;  %v12752_v24 = vcombine.low %v670_v8, %v678_v10  ;;  %v13262_v25 = vcombine.low %v1181_v11, %v1189_v12 }
 0x45a   :  { %7540 = vmatpush1.bf16.msra.mxu0 %v12656_v19  ;;  %v13263_v19 = vcombine.high %v1181_v11, %v1189_v12  ;;  %v766_v12 = vld [vmem:[#allocation9 + $0x1030] sm:$0xff] }
 0x45b   :  { %7458 = vmatpush1.bf16.msra.mxu1 %v13166_v20  ;;  %7541 = vmatprep.subr.bf16.mxu0 %v12673_v21  ;;  %v686_v20 = vld [vmem:[#allocation9 + $0xdb0] sm:$0xff] }
 0x45c   :  { %7459 = vmatprep.subr.bf16.mxu1 %v13183_v22  ;;  %v694_v21 = vld [vmem:[#allocation9 + $0xdf0] sm:$0xff]  ;;  %v1197_v22 = vld [vmem:[#allocation9 + $0x1da8] sm:$0xff] }
 0x45d   :  { %v15521_v32 = vpop.f32.mrb[8].mxu1  ;;  %v12769_v26 = vcombine.high %v686_v20, %v694_v21  ;;  %v12768_v31 = vcombine.low %v686_v20, %v694_v21  ;;  %v13278_v33 = vcombine.low %v1197_v22, %v1205_v23 }
 0x45e   :  { %v15523_v36 = vpop.f32.mrb[9].mxu1  ;;  %7542 = vmatpush1.bf16.msra.mxu0 %v12672_v27  ;;  %v13279_v27 = vcombine.high %v1197_v22, %v1205_v23  ;;  %v782_v23 = vld [vmem:[#allocation9 + $0x10b0] sm:$0xff] }
 0x45f   :  { %v7159_v39 = vpop.f32.mrb[10].mxu1  ;;  %7460 = vmatpush1.bf16.msra.mxu1 %v13182_v28  ;;  %7543 = vmatprep.subr.bf16.mxu0 %v12689_v29  ;;  %v702_v28 = vld [vmem:[#allocation9 + $0xe30] sm:$0xff] }
 0x460   :  { %v7160_v45 = vpop.f32.mrb[11].mxu1  ;;  %7461 = vmatprep.subr.bf16.mxu1 %v13199_v30  ;;  %v710_v29 = vld [vmem:[#allocation9 + $0xe70] sm:$0xff]  ;;  %v1213_v30 = vld [vmem:[#allocation9 + $0x1e28] sm:$0xff] }
 0x461   :  { %v12785_v34 = vcombine.high %v702_v28, %v710_v29  ;;  %v718_v39 = vld [vmem:[#allocation9 + $0xeb0] sm:$0xff]  ;;  %v1237_v45 = vld [vmem:[#allocation9 + $0x1ee8] sm:$0xff]  ;;  %v13294_v48 = vcombine.low %v1213_v30, %v1221_v35 }
 0x462   :  { %7544 = vmatpush1.bf16.msra.mxu0 %v12688_v38  ;;  %v13295_v38 = vcombine.high %v1213_v30, %v1221_v35  ;;  %v798_v30 = vld [vmem:[#allocation9 + $0x1130] sm:$0xff] }
 0x463   :  { %7462 = vmatpush1.bf16.msra.mxu1 %v13198_v41  ;;  %7545 = vmatprep.subr.bf16.mxu0 %v12705_v43  ;;  %v726_v41 = vld [vmem:[#allocation9 + $0xef0] sm:$0xff]  ;;  %v1229_v43 = vld [vmem:[#allocation9 + $0x1ea8] sm:$0xff] }
 0x464   :  { %7463 = vmatprep.subr.bf16.mxu1 %v13215_v46  ;;  %v12784_v46 = vcombine.low %v702_v28, %v710_v29  ;;  %v12801_v49 = vcombine.high %v718_v39, %v726_v41  ;;  %v13311_v50 = vcombine.high %v1229_v43, %v1237_v45  ;;  %v13310_v60 = vcombine.low %v1229_v43, %v1237_v45  ;;  %v806_v35 = vld [vmem:[#allocation9 + $0x1170] sm:$0xff] }
 0x465   :  { %v814_v45 = vld [vmem:[#allocation9 + $0x11b0] sm:$0xff] }
 0x466   :  { %7546 = vmatpush1.bf16.msra.mxu0 %v12704_v52  ;;  %v742_v52 = vld [vmem:[#allocation9 + $0xf70] sm:$0xff] }
 0x467   :  { %7464 = vmatpush1.bf16.msra.mxu1 %v13214_v53  ;;  %7547 = vmatprep.subr.bf16.mxu0 %v12721_v54  ;;  %v1245_v53 = vld [vmem:[#allocation9 + $0x1f28] sm:$0xff]  ;;  %v12817_v61 = vcombine.high %v734_v51, %v742_v52 }
 0x468   :  { %7465 = vmatprep.subr.bf16.mxu1 %v13231_v59  ;;  %v1253_v54 = vld [vmem:[#allocation9 + $0x1f68] sm:$0xff]  ;;  %v12800_v59 = vcombine.low %v718_v39, %v726_v41  ;;  %v12881_v41 = vcombine.high %v798_v30, %v806_v35 }
 0x469   :  { %v13327_v62 = vcombine.high %v1245_v53, %v1253_v54  ;;  %v13326_v8 = vcombine.low %v1245_v53, %v1253_v54  ;;  %v830_v54 = vld [vmem:[#allocation9 + $0x1230] sm:$0xff] }
 0x46a   :  { %7548 = vmatpush1.bf16.msra.mxu0 %v12720_v3  ;;  %v758_v3 = vld [vmem:[#allocation9 + $0xff0] sm:$0xff] }
 0x46b   :  { %7466 = vmatpush1.bf16.msra.mxu1 %v13230_v4  ;;  %7549 = vmatprep.subr.bf16.mxu0 %v12737_v6  ;;  %v1261_v4 = vld [vmem:[#allocation9 + $0x1fa8] sm:$0xff]  ;;  %v12833_v10 = vcombine.high %v750_v2, %v758_v3 }
 0x46c   :  { %7467 = vmatprep.subr.bf16.mxu1 %v13247_v7  ;;  %v1269_v6 = vld [vmem:[#allocation9 + $0x1fe8] sm:$0xff]  ;;  %v12816_v7 = vcombine.low %v734_v51, %v742_v52 }
 0x46d   :  { %v13343_v11 = vcombine.high %v1261_v4, %v1269_v6  ;;  %v13342_v20 = vcombine.low %v1261_v4, %v1269_v6  ;;  %v846_v4 = vld [vmem:[#allocation9 + $0x12b0] sm:$0xff] }
 0x46e   :  { %7550 = vmatpush1.bf16.msra.mxu0 %v12736_v14  ;;  %v774_v14 = vld [vmem:[#allocation9 + $0x1070] sm:$0xff] }
 0x46f   :  { %7468 = vmatpush1.bf16.msra.mxu1 %v13246_v16  ;;  %7551 = vmatprep.subr.bf16.mxu0 %v12753_v18  ;;  %v255_v16 = vld [vmem:[#allocation9 + $0x38] sm:$0xff]  ;;  %v12849_v21 = vcombine.high %v766_v12, %v774_v14  ;;  %v854_v6 = vld [vmem:[#allocation9 + $0x12f0] sm:$0xff] }
 0x470   :  { %7469 = vmatprep.subr.bf16.mxu1 %v13263_v19  ;;  %v263_v18 = vld [vmem:[#allocation9 + $0x78] sm:$0xff]  ;;  %v12832_v19 = vcombine.low %v750_v2, %v758_v3 }
 0x471   :  { %v12339_v22 = vcombine.high %v255_v16, %v263_v18  ;;  %v12338_v28 = vcombine.low %v255_v16, %v263_v18  ;;  %v862_v16 = vld [vmem:[#allocation9 + $0x1330] sm:$0xff] }
 0x472   :  { %7552 = vmatpush1.bf16.msra.mxu0 %v12752_v24  ;;  %v790_v24 = vld [vmem:[#allocation9 + $0x10f0] sm:$0xff] }
 0x473   :  { %7470 = vmatpush1.bf16.msra.mxu1 %v13262_v25  ;;  %7553 = vmatprep.subr.bf16.mxu0 %v12769_v26  ;;  %v12848_v25 = vcombine.low %v766_v12, %v774_v14  ;;  %v271_v26 = vld [vmem:[#allocation9 + $0xb8] sm:$0xff]  ;;  %v12865_v29 = vcombine.high %v782_v23, %v790_v24  ;;  %v12929_v12 = vcombine.high %v846_v4, %v854_v6  ;;  %v870_v18 = vld [vmem:[#allocation9 + $0x1370] sm:$0xff] }
 0x474   :  { %7471 = vmatprep.subr.bf16.mxu1 %v13279_v27  ;;  %v279_v27 = vld [vmem:[#allocation9 + $0xf8] sm:$0xff] }
 0x475   :  { %v12354_v39 = vcombine.low %v271_v26, %v279_v27 }
 0x476   :  { %7554 = vmatpush1.bf16.msra.mxu0 %v12768_v31  ;;  %v12355_v31 = vcombine.high %v271_v26, %v279_v27  ;;  %v886_v26 = vld [vmem:[#allocation9 + $0x13f0] sm:$0xff]  ;;  %v367_v27 = vld [vmem:[#allocation9 + $0x3b8] sm:$0xff] }
 0x477   :  { %7472 = vmatpush1.bf16.msra.mxu1 %v13278_v33  ;;  %7555 = vmatprep.subr.bf16.mxu0 %v12785_v34  ;;  %v287_v33 = vld [vmem:[#allocation9 + $0x138] sm:$0xff] }
 0x478   :  { %7473 = vmatprep.subr.bf16.mxu1 %v13295_v38  ;;  %v295_v34 = vld [vmem:[#allocation9 + $0x178] sm:$0xff]  ;;  %v12864_v38 = vcombine.low %v782_v23, %v790_v24  ;;  %v12945_v23 = vcombine.high %v862_v16, %v870_v18 }
 0x479   :  { %v12371_v43 = vcombine.high %v287_v33, %v295_v34  ;;  %v12370_v51 = vcombine.low %v287_v33, %v295_v34  ;;  %v894_v33 = vld [vmem:[#allocation9 + $0x1430] sm:$0xff] }
 0x47a   :  { %7556 = vmatpush1.bf16.msra.mxu0 %v12784_v46  ;;  %v822_v46 = vld [vmem:[#allocation9 + $0x11f0] sm:$0xff] }
 0x47b   :  { %7474 = vmatpush1.bf16.msra.mxu1 %v13294_v48  ;;  %7557 = vmatprep.subr.bf16.mxu0 %v12801_v49  ;;  %v303_v48 = vld [vmem:[#allocation9 + $0x1b8] sm:$0xff]  ;;  %v12897_v52 = vcombine.high %v814_v45, %v822_v46  ;;  %v902_v34 = vld [vmem:[#allocation9 + $0x1470] sm:$0xff] }
 0x47c   :  { %7475 = vmatprep.subr.bf16.mxu1 %v13311_v50  ;;  %v311_v49 = vld [vmem:[#allocation9 + $0x1f8] sm:$0xff]  ;;  %v12880_v50 = vcombine.low %v798_v30, %v806_v35 }
 0x47d   :  { %v12387_v53 = vcombine.high %v303_v48, %v311_v49 }
 0x47e   :  { %7558 = vmatpush1.bf16.msra.mxu0 %v12800_v59  ;;  %v838_v59 = vld [vmem:[#allocation9 + $0x1270] sm:$0xff] }
 0x47f   :  { %7476 = vmatpush1.bf16.msra.mxu1 %v13310_v60  ;;  %7559 = vmatprep.subr.bf16.mxu0 %v12817_v61  ;;  %v319_v60 = vld [vmem:[#allocation9 + $0x238] sm:$0xff]  ;;  %v12913_v2 = vcombine.high %v830_v54, %v838_v59 }
 0x480   :  { %7477 = vmatprep.subr.bf16.mxu1 %v13327_v62  ;;  %v327_v61 = vld [vmem:[#allocation9 + $0x278] sm:$0xff]  ;;  %v12386_v62 = vcombine.low %v303_v48, %v311_v49  ;;  %v910_v48 = vld [vmem:[#allocation9 + $0x14b0] sm:$0xff] }
 0x481   :  { %v12403_v3 = vcombine.high %v319_v60, %v327_v61  ;;  %v918_v49 = vld [vmem:[#allocation9 + $0x14f0] sm:$0xff] }
 0x482   :  { %7560 = vmatpush1.bf16.msra.mxu0 %v12816_v7  ;;  %v335_v7 = vld [vmem:[#allocation9 + $0x2b8] sm:$0xff] }
 0x483   :  { %7478 = vmatpush1.bf16.msra.mxu1 %v13326_v8  ;;  %7561 = vmatprep.subr.bf16.mxu0 %v12833_v10  ;;  %v343_v8 = vld [vmem:[#allocation9 + $0x2f8] sm:$0xff]  ;;  %v12912_v10 = vcombine.low %v830_v54, %v838_v59  ;;  %v12993_v54 = vcombine.high %v910_v48, %v918_v49 }
 0x484   :  { %7479 = vmatprep.subr.bf16.mxu1 %v13343_v11  ;;  %v12402_v11 = vcombine.low %v319_v60, %v327_v61  ;;  %v12419_v14 = vcombine.high %v335_v7, %v343_v8  ;;  %v926_v60 = vld [vmem:[#allocation9 + $0x1530] sm:$0xff] }
 0x485   :  { %v934_v61 = vld [vmem:[#allocation9 + $0x1570] sm:$0xff] }
 0x486   :  { %7562 = vmatpush1.bf16.msra.mxu0 %v12832_v19  ;;  %v351_v19 = vld [vmem:[#allocation9 + $0x338] sm:$0xff] }
 0x487   :  { %7480 = vmatpush1.bf16.msra.mxu1 %v13342_v20  ;;  %7572 = vmatprep.subr.bf16.mxu0 %v12849_v21  ;;  %v359_v20 = vld [vmem:[#allocation9 + $0x378] sm:$0xff]  ;;  %v12928_v21 = vcombine.low %v846_v4, %v854_v6  ;;  %v13009_v4 = vcombine.high %v926_v60, %v934_v61 }
 0x488   :  { %7654 = vmatprep.subr.bf16.mxu1 %v12339_v22  ;;  %v12418_v22 = vcombine.low %v335_v7, %v343_v8  ;;  %v12435_v24 = vcombine.high %v351_v19, %v359_v20  ;;  %v12434_v30 = vcombine.low %v351_v19, %v359_v20  ;;  %v942_v7 = vld [vmem:[#allocation9 + $0x15b0] sm:$0xff] }
 0x489   :  { %7564 = vmatmul.mubr.bf16.vlgmr.msra.gmra.mrb[12].mxu0 %v15428_v57  ;;  %v950_v8 = vld [vmem:[#allocation9 + $0x15f0] sm:$0xff] }
 0x48a   :  { %7482 = vmatmul.mubr.bf16.vlgmr.msra.gmra.mrb[12].mxu1 %v15451_v37  ;;  %7573 = vmatpush1.bf16.msra.mxu0 %v12848_v25  ;;  %v878_v25 = vld [vmem:[#allocation9 + $0x13b0] sm:$0xff] }
 0x48b   :  { %7604 = vmatprep.mubr.bf16.mxu0 %v15434_v1  ;;  %7655 = vmatpush1.bf16.msra.mxu1 %v12338_v28  ;;  %v375_v28 = vld [vmem:[#allocation9 + $0x3f8] sm:$0xff]  ;;  %v12961_v35 = vcombine.high %v878_v25, %v886_v26  ;;  %v958_v19 = vld [vmem:[#allocation9 + $0x1630] sm:$0xff] }
 0x48c   :  { %7686 = vmatprep.mubr.bf16.mxu1 %v15426_v56  ;;  %7574 = vmatprep.subr.bf16.mxu0 %v12865_v29  ;;  %v12896_v56 = vcombine.low %v814_v45, %v822_v46  ;;  %v12944_v29 = vcombine.low %v862_v16, %v870_v18  ;;  %v12977_v45 = vcombine.high %v894_v33, %v902_v34  ;;  %v966_v20 = vld [vmem:[#allocation9 + $0x1670] sm:$0xff] }
 0x48d   :  { %7656 = vmatprep.subr.bf16.mxu1 %v12355_v31  ;;  %v12451_v31 = vcombine.high %v367_v27, %v375_v28  ;;  %v13025_v16 = vcombine.high %v942_v7, %v950_v8 }
 0x48e   :  { %7575 = vmatpush1.bf16.msra.mxu0 %v12864_v38  ;;  %v383_v38 = vld [vmem:[#allocation9 + $0x438] sm:$0xff] }
 0x48f   :  { %7657 = vmatpush1.bf16.msra.mxu1 %v12354_v39  ;;  %7576 = vmatprep.subr.bf16.mxu0 %v12881_v41  ;;  %v391_v39 = vld [vmem:[#allocation9 + $0x478] sm:$0xff]  ;;  %v12960_v41 = vcombine.low %v878_v25, %v886_v26  ;;  %v13041_v25 = vcombine.high %v958_v19, %v966_v20 }
 0x490   :  { %7658 = vmatprep.subr.bf16.mxu1 %v12371_v43  ;;  %v12450_v43 = vcombine.low %v367_v27, %v375_v28  ;;  %v12467_v46 = vcombine.high %v383_v38, %v391_v39  ;;  %v974_v27 = vld [vmem:[#allocation9 + $0x16b0] sm:$0xff] }
 0x491   :  { %v982_v28 = vld [vmem:[#allocation9 + $0x16f0] sm:$0xff] }
 0x492   :  { %7577 = vmatpush1.bf16.msra.mxu0 %v12880_v50  ;;  %v399_v50 = vld [vmem:[#allocation9 + $0x4b8] sm:$0xff] }
 0x493   :  { %7659 = vmatpush1.bf16.msra.mxu1 %v12370_v51  ;;  %7578 = vmatprep.subr.bf16.mxu0 %v12897_v52  ;;  %v407_v51 = vld [vmem:[#allocation9 + $0x4f8] sm:$0xff]  ;;  %v12976_v52 = vcombine.low %v894_v33, %v902_v34  ;;  %v13057_v33 = vcombine.high %v974_v27, %v982_v28 }
 0x494   :  { %7660 = vmatprep.subr.bf16.mxu1 %v12387_v53  ;;  %v12466_v53 = vcombine.low %v383_v38, %v391_v39  ;;  %v12483_v59 = vcombine.high %v399_v50, %v407_v51  ;;  %v990_v38 = vld [vmem:[#allocation9 + $0x1730] sm:$0xff] }
 0x495   :  { %v998_v39 = vld [vmem:[#allocation9 + $0x1770] sm:$0xff] }
 0x496   :  { %7579 = vmatpush1.bf16.msra.mxu0 %v12896_v56  ;;  %v415_v56 = vld [vmem:[#allocation9 + $0x538] sm:$0xff] }
 0x497   :  { %7661 = vmatpush1.bf16.msra.mxu1 %v12386_v62  ;;  %7580 = vmatprep.subr.bf16.mxu0 %v12913_v2  ;;  %v423_v62 = vld [vmem:[#allocation9 + $0x578] sm:$0xff]  ;;  %v12992_v2 = vcombine.low %v910_v48, %v918_v49  ;;  %v13073_v48 = vcombine.high %v990_v38, %v998_v39 }
 0x498   :  { %7662 = vmatprep.subr.bf16.mxu1 %v12403_v3  ;;  %v12482_v3 = vcombine.low %v399_v50, %v407_v51  ;;  %v12499_v6 = vcombine.high %v415_v56, %v423_v62  ;;  %v1006_v50 = vld [vmem:[#allocation9 + $0x17b0] sm:$0xff] }
 0x499   :  { %v1014_v51 = vld [vmem:[#allocation9 + $0x17f0] sm:$0xff] }
 0x49a   :  { %7581 = vmatpush1.bf16.msra.mxu0 %v12912_v10  ;;  %v431_v10 = vld [vmem:[#allocation9 + $0x5b8] sm:$0xff] }
 0x49b   :  { %7663 = vmatpush1.bf16.msra.mxu1 %v12402_v11  ;;  %7582 = vmatprep.subr.bf16.mxu0 %v12929_v12  ;;  %v439_v11 = vld [vmem:[#allocation9 + $0x5f8] sm:$0xff]  ;;  %v13008_v12 = vcombine.low %v926_v60, %v934_v61  ;;  %v13089_v60 = vcombine.high %v1006_v50, %v1014_v51 }
 0x49c   :  { %7664 = vmatprep.subr.bf16.mxu1 %v12419_v14  ;;  %v12498_v14 = vcombine.low %v415_v56, %v423_v62  ;;  %v12515_v18 = vcombine.high %v431_v10, %v439_v11  ;;  %v1022_v56 = vld [vmem:[#allocation9 + $0x1830] sm:$0xff] }
 0x49d   :  { %v1030_v62 = vld [vmem:[#allocation9 + $0x1870] sm:$0xff] }
 0x49e   :  { %7583 = vmatpush1.bf16.msra.mxu0 %v12928_v21  ;;  %v447_v21 = vld [vmem:[#allocation9 + $0x638] sm:$0xff] }
 0x49f   :  { %7665 = vmatpush1.bf16.msra.mxu1 %v12418_v22  ;;  %7584 = vmatprep.subr.bf16.mxu0 %v12945_v23  ;;  %v455_v22 = vld [vmem:[#allocation9 + $0x678] sm:$0xff]  ;;  %v13024_v23 = vcombine.low %v942_v7, %v950_v8  ;;  %v13105_v7 = vcombine.high %v1022_v56, %v1030_v62 }
 0x4a0   :  { %7666 = vmatprep.subr.bf16.mxu1 %v12435_v24  ;;  %v12514_v24 = vcombine.low %v431_v10, %v439_v11  ;;  %v12531_v26 = vcombine.high %v447_v21, %v455_v22  ;;  %v1038_v10 = vld [vmem:[#allocation9 + $0x18b0] sm:$0xff] }
 0x4a1   :  { %v1046_v11 = vld [vmem:[#allocation9 + $0x18f0] sm:$0xff] }
 0x4a2   :  { %7585 = vmatpush1.bf16.msra.mxu0 %v12944_v29  ;;  %v463_v29 = vld [vmem:[#allocation9 + $0x6b8] sm:$0xff] }
 0x4a3   :  { %7667 = vmatpush1.bf16.msra.mxu1 %v12434_v30  ;;  %7586 = vmatprep.subr.bf16.mxu0 %v12961_v35  ;;  %v471_v30 = vld [vmem:[#allocation9 + $0x6f8] sm:$0xff]  ;;  %v13040_v35 = vcombine.low %v958_v19, %v966_v20  ;;  %v13121_v19 = vcombine.high %v1038_v10, %v1046_v11  ;;  %v1054_v20 = vld [vmem:[#allocation9 + $0x1930] sm:$0xff] }
 0x4a4   :  { %7668 = vmatprep.subr.bf16.mxu1 %v12451_v31  ;;  %v12530_v31 = vcombine.low %v447_v21, %v455_v22  ;;  %v12547_v34 = vcombine.high %v463_v29, %v471_v30  ;;  %v1062_v21 = vld [vmem:[#allocation9 + $0x1970] sm:$0xff] }
 0x4a6   :  { %7587 = vmatpush1.bf16.msra.mxu0 %v12960_v41  ;;  %v479_v41 = vld [vmem:[#allocation9 + $0x738] sm:$0xff] }
 0x4a7   :  { %7669 = vmatpush1.bf16.msra.mxu1 %v12450_v43  ;;  %7588 = vmatprep.subr.bf16.mxu0 %v12977_v45  ;;  %v487_v43 = vld [vmem:[#allocation9 + $0x778] sm:$0xff]  ;;  %v13056_v45 = vcombine.low %v974_v27, %v982_v28  ;;  %v13137_v27 = vcombine.high %v1054_v20, %v1062_v21 }
 0x4a8   :  { %7670 = vmatprep.subr.bf16.mxu1 %v12467_v46  ;;  %v12546_v46 = vcombine.low %v463_v29, %v471_v30  ;;  %v12563_v49 = vcombine.high %v479_v41, %v487_v43  ;;  %v1070_v29 = vld [vmem:[#allocation9 + $0x19b0] sm:$0xff] }
 0x4a9   :  { %v1078_v30 = vld [vmem:[#allocation9 + $0x19f0] sm:$0xff] }
 0x4aa   :  { %7589 = vmatpush1.bf16.msra.mxu0 %v12976_v52  ;;  %v495_v52 = vld [vmem:[#allocation9 + $0x7b8] sm:$0xff] }
 0x4ab   :  { %7671 = vmatpush1.bf16.msra.mxu1 %v12466_v53  ;;  %7590 = vmatprep.subr.bf16.mxu0 %v12993_v54  ;;  %v503_v53 = vld [vmem:[#allocation9 + $0x7f8] sm:$0xff]  ;;  %v13072_v54 = vcombine.low %v990_v38, %v998_v39  ;;  %v1086_v39 = vld [vmem:[#allocation9 + $0x1a30] sm:$0xff] }
 0x4ac   :  { %7672 = vmatprep.subr.bf16.mxu1 %v12483_v59  ;;  %v12562_v59 = vcombine.low %v479_v41, %v487_v43  ;;  %v12579_v61 = vcombine.high %v495_v52, %v503_v53  ;;  %v1094_v41 = vld [vmem:[#allocation9 + $0x1a70] sm:$0xff]  ;;  %v575_v43 = vld [vmem:[#allocation9 + $0xa38] sm:$0xff] }
 0x4ae   :  { %7591 = vmatpush1.bf16.msra.mxu0 %v12992_v2  ;;  %v511_v2 = vld [vmem:[#allocation9 + $0x838] sm:$0xff] }
 0x4af   :  { %7673 = vmatpush1.bf16.msra.mxu1 %v12482_v3  ;;  %7592 = vmatprep.subr.bf16.mxu0 %v13009_v4  ;;  %v519_v3 = vld [vmem:[#allocation9 + $0x878] sm:$0xff]  ;;  %v13088_v4 = vcombine.low %v1006_v50, %v1014_v51  ;;  %v1102_v50 = vld [vmem:[#allocation9 + $0x1ab0] sm:$0xff] }
 0x4b0   :  { %7674 = vmatprep.subr.bf16.mxu1 %v12499_v6  ;;  %v12578_v6 = vcombine.low %v495_v52, %v503_v53  ;;  %v12595_v8 = vcombine.high %v511_v2, %v519_v3  ;;  %v1110_v51 = vld [vmem:[#allocation9 + $0x1af0] sm:$0xff]  ;;  %v591_v52 = vld [vmem:[#allocation9 + $0xab8] sm:$0xff] }
 0x4b1   :  { %v599_v53 = vld [vmem:[#allocation9 + $0xaf8] sm:$0xff] }
 0x4b2   :  { %7593 = vmatpush1.bf16.msra.mxu0 %v13008_v12  ;;  %v13104_v12 = vcombine.low %v1022_v56, %v1030_v62  ;;  %v1118_v56 = vld [vmem:[#allocation9 + $0x1b30] sm:$0xff] }
 0x4b3   :  { %7675 = vmatpush1.bf16.msra.mxu1 %v12498_v14  ;;  %7594 = vmatprep.subr.bf16.mxu0 %v13025_v16  ;;  %v527_v14 = vld [vmem:[#allocation9 + $0x8b8] sm:$0xff]  ;;  %v1126_v62 = vld [vmem:[#allocation9 + $0x1b70] sm:$0xff] }
 0x4b4   :  { %7676 = vmatprep.subr.bf16.mxu1 %v12515_v18  ;;  %v535_v16 = vld [vmem:[#allocation9 + $0x8f8] sm:$0xff]  ;;  %v12594_v18 = vcombine.low %v511_v2, %v519_v3 }
 0x4b5   :  { %v12611_v22 = vcombine.high %v527_v14, %v535_v16  ;;  %v607_v2 = vld [vmem:[#allocation9 + $0xb38] sm:$0xff] }
 0x4b6   :  { %7595 = vmatpush1.bf16.msra.mxu0 %v13024_v23  ;;  %v543_v23 = vld [vmem:[#allocation9 + $0x938] sm:$0xff] }
 0x4b7   :  { %7677 = vmatpush1.bf16.msra.mxu1 %v12514_v24  ;;  %7596 = vmatprep.subr.bf16.mxu0 %v13041_v25  ;;  %v551_v24 = vld [vmem:[#allocation9 + $0x978] sm:$0xff]  ;;  %v13120_v25 = vcombine.low %v1038_v10, %v1046_v11  ;;  %v1134_v11 = vld [vmem:[#allocation9 + $0x1bb0] sm:$0xff] }
 0x4b8   :  { %7678 = vmatprep.subr.bf16.mxu1 %v12531_v26  ;;  %v12610_v26 = vcombine.low %v527_v14, %v535_v16  ;;  %v12627_v28 = vcombine.high %v543_v23, %v551_v24  ;;  %v615_v3 = vld [vmem:[#allocation9 + $0xb78] sm:$0xff] }
 0x4b9   :  { %v12691_v10 = vcombine.high %v607_v2, %v615_v3  ;;  %v623_v16 = vld [vmem:[#allocation9 + $0xbb8] sm:$0xff] }
 0x4ba   :  { %7597 = vmatpush1.bf16.msra.mxu0 %v13040_v35  ;;  %v559_v35 = vld [vmem:[#allocation9 + $0x9b8] sm:$0xff] }
 0x4bb   :  { %7679 = vmatpush1.bf16.msra.mxu1 %v12530_v31  ;;  %7598 = vmatprep.subr.bf16.mxu0 %v13057_v33  ;;  %v567_v31 = vld [vmem:[#allocation9 + $0x9f8] sm:$0xff]  ;;  %v13136_v33 = vcombine.low %v1054_v20, %v1062_v21  ;;  %v13200_v20 = vcombine.low %v1118_v56, %v1126_v62 }
 0x4bc   :  { %7680 = vmatprep.subr.bf16.mxu1 %v12547_v34  ;;  %v13153_v34 = vcombine.high %v1070_v29, %v1078_v30  ;;  %v12643_v38 = vcombine.high %v559_v35, %v567_v31 }
 0x4be   :  { %7599 = vmatpush1.bf16.msra.mxu0 %v13056_v45  ;;  %v583_v45 = vld [vmem:[#allocation9 + $0xa78] sm:$0xff] }
 0x4bf   :  { %7681 = vmatpush1.bf16.msra.mxu1 %v12546_v46  ;;  %7600 = vmatprep.subr.bf16.mxu0 %v13073_v48  ;;  %v12642_v46 = vcombine.low %v559_v35, %v567_v31  ;;  %v13169_v48 = vcombine.high %v1086_v39, %v1094_v41 }
 0x4c0   :  { %7682 = vmatprep.subr.bf16.mxu1 %v12563_v49  ;;  %v12659_v49 = vcombine.high %v575_v43, %v583_v45 }
 0x4c2   :  { %7601 = vmatpush1.bf16.msra.mxu0 %v13072_v54  ;;  %v13168_v54 = vcombine.low %v1086_v39, %v1094_v41 }
 0x4c3   :  { %7683 = vmatpush1.bf16.msra.mxu1 %v12562_v59  ;;  %7602 = vmatprep.subr.bf16.mxu0 %v13089_v60  ;;  %v12658_v59 = vcombine.low %v575_v43, %v583_v45  ;;  %v13185_v60 = vcombine.high %v1102_v50, %v1110_v51 }
 0x4c4   :  { %7684 = vmatprep.subr.bf16.mxu1 %v12579_v61  ;;  %v12675_v61 = vcombine.high %v591_v52, %v599_v53 }
 0x4c6   :  { %7603 = vmatpush1.bf16.msra.mxu0 %v13088_v4  ;;  %v13184_v4 = vcombine.low %v1102_v50, %v1110_v51 }
 0x4c7   :  { %7685 = vmatpush1.bf16.msra.mxu1 %v12578_v6  ;;  %7613 = vmatprep.subr.bf16.mxu0 %v13105_v7  ;;  %v12674_v6 = vcombine.low %v591_v52, %v599_v53  ;;  %v13201_v7 = vcombine.high %v1118_v56, %v1126_v62 }
 0x4c8   :  { %7695 = vmatprep.subr.bf16.mxu1 %v12595_v8 }
 0x4c9   :  { %7605 = vmatmul.mubr.bf16.vlgmr.msra.gmra.mrb[12].mxu0 %v15442_v15 }
 0x4ca   :  { %7687 = vmatmul.mubr.bf16.vlgmr.msra.gmra.mrb[16].mxu1 %v15424_v55  ;;  %7614 = vmatpush1.bf16.msra.mxu0 %v13104_v12  ;;  %v12626_v55 = vcombine.low %v543_v23, %v551_v24  ;;  %v1142_v12 = vld [vmem:[#allocation9 + $0x1bf0] sm:$0xff] }
 0x4cb   :  { %7645 = vmatprep.mubr.bf16.mxu0 %v15444_v17  ;;  %7696 = vmatpush1.bf16.msra.mxu1 %v12594_v18  ;;  %v631_v18 = vld [vmem:[#allocation9 + $0xbf8] sm:$0xff]  ;;  %v13217_v23 = vcombine.high %v1134_v11, %v1142_v12 }
 0x4cc   :  { %7727 = vmatprep.mubr.bf16.mxu1 %v15430_v58  ;;  %7615 = vmatprep.subr.bf16.mxu0 %v13121_v19  ;;  %v13152_v58 = vcombine.low %v1070_v29, %v1078_v30  ;;  %v12707_v24 = vcombine.high %v623_v16, %v631_v18  ;;  %v13216_v29 = vcombine.low %v1134_v11, %v1142_v12 }
 0x4cd   :  { %7697 = vmatprep.subr.bf16.mxu1 %v12611_v22  ;;  %v12690_v22 = vcombine.low %v607_v2, %v615_v3  ;;  %v12706_v30 = vcombine.low %v623_v16, %v631_v18 }
 0x4ce   :  { %7616 = vmatpush1.bf16.msra.mxu0 %v13120_v25  ;;  %v1150_v25 = vld [vmem:[#allocation9 + $0x1c30] sm:$0xff] }
 0x4cf   :  { %7698 = vmatpush1.bf16.msra.mxu1 %v12610_v26  ;;  %7617 = vmatprep.subr.bf16.mxu0 %v13137_v27  ;;  %v1158_v26 = vld [vmem:[#allocation9 + $0x1c70] sm:$0xff]  ;;  %v639_v27 = vld [vmem:[#allocation9 + $0xc38] sm:$0xff] }
 0x4d0   :  { %7699 = vmatprep.subr.bf16.mxu1 %v12627_v28  ;;  %v647_v28 = vld [vmem:[#allocation9 + $0xc78] sm:$0xff]  ;;  %v13233_v35 = vcombine.high %v1150_v25, %v1158_v26  ;;  %v13232_v39 = vcombine.low %v1150_v25, %v1158_v26 }
 0x4d1   :  { %v12723_v31 = vcombine.high %v639_v27, %v647_v28  ;;  %v12722_v41 = vcombine.low %v639_v27, %v647_v28  ;;  %v1246_v27 = vld [vmem:[#allocation9 + $0x1f30] sm:$0xff] }
 0x4d2   :  { %7618 = vmatpush1.bf16.msra.mxu0 %v13136_v33  ;;  %v1166_v33 = vld [vmem:[#allocation9 + $0x1cb0] sm:$0xff] }
 0x4d3   :  { %7700 = vmatpush1.bf16.msra.mxu1 %v12626_v55  ;;  %7619 = vmatprep.subr.bf16.mxu0 %v13153_v34  ;;  %v1174_v55 = vld [vmem:[#allocation9 + $0x1cf0] sm:$0xff]  ;;  %v655_v34 = vld [vmem:[#allocation9 + $0xcb8] sm:$0xff] }
 0x4d4   :  { %7701 = vmatprep.subr.bf16.mxu1 %v12643_v38  ;;  %v663_v38 = vld [vmem:[#allocation9 + $0xcf8] sm:$0xff]  ;;  %v13249_v43 = vcombine.high %v1166_v33, %v1174_v55  ;;  %v13248_v50 = vcombine.low %v1166_v33, %v1174_v55  ;;  %v1254_v28 = vld [vmem:[#allocation9 + $0x1f70] sm:$0xff] }
 0x4d5   :  { %v12739_v45 = vcombine.high %v655_v34, %v663_v38  ;;  %v12738_v51 = vcombine.low %v655_v34, %v663_v38  ;;  %v13329_v33 = vcombine.high %v1246_v27, %v1254_v28  ;;  %v1262_v34 = vld [vmem:[#allocation9 + $0x1fb0] sm:$0xff] }
 0x4d6   :  { %7620 = vmatpush1.bf16.msra.mxu0 %v13152_v58  ;;  %v1182_v58 = vld [vmem:[#allocation9 + $0x1d30] sm:$0xff] }
 0x4d7   :  { %7702 = vmatpush1.bf16.msra.mxu1 %v12642_v46  ;;  %7621 = vmatprep.subr.bf16.mxu0 %v13169_v48  ;;  %v1190_v46 = vld [vmem:[#allocation9 + $0x1d70] sm:$0xff]  ;;  %v671_v48 = vld [vmem:[#allocation9 + $0xd38] sm:$0xff] }
 0x4d8   :  { %7703 = vmatprep.subr.bf16.mxu1 %v12659_v49  ;;  %v679_v49 = vld [vmem:[#allocation9 + $0xd78] sm:$0xff]  ;;  %v13265_v52 = vcombine.high %v1182_v58, %v1190_v46  ;;  %v13264_v56 = vcombine.low %v1182_v58, %v1190_v46  ;;  %v1270_v38 = vld [vmem:[#allocation9 + $0x1ff0] sm:$0xff] }
 0x4d9   :  { %v12755_v53 = vcombine.high %v671_v48, %v679_v49  ;;  %v12754_v62 = vcombine.low %v671_v48, %v679_v49  ;;  %v13345_v58 = vcombine.high %v1262_v34, %v1270_v38  ;;  %v767_v48 = vld [vmem:[#allocation9 + $0x1038] sm:$0xff] }
 0x4da   :  { %7622 = vmatpush1.bf16.msra.mxu0 %v13168_v54  ;;  %v1198_v54 = vld [vmem:[#allocation9 + $0x1db0] sm:$0xff]  ;;  %v775_v49 = vld [vmem:[#allocation9 + $0x1078] sm:$0xff] }
 0x4db   :  { %7704 = vmatpush1.bf16.msra.mxu1 %v12658_v59  ;;  %7623 = vmatprep.subr.bf16.mxu0 %v13185_v60  ;;  %v1206_v59 = vld [vmem:[#allocation9 + $0x1df0] sm:$0xff]  ;;  %v687_v60 = vld [vmem:[#allocation9 + $0xdb8] sm:$0xff] }
 0x4dc   :  { %v15533_v8 = vpop.f32.mrb[8].mxu0  ;;  %7705 = vmatprep.subr.bf16.mxu1 %v12675_v61  ;;  %v695_v61 = vld [vmem:[#allocation9 + $0xdf8] sm:$0xff]  ;;  %v13281_v2 = vcombine.high %v1198_v54, %v1206_v59  ;;  %v13280_v11 = vcombine.low %v1198_v54, %v1206_v59 }
 0x4dd   :  { %v15535_v14 = vpop.f32.mrb[9].mxu0  ;;  %v12771_v3 = vcombine.high %v687_v60, %v695_v61  ;;  %v12770_v12 = vcombine.low %v687_v60, %v695_v61  ;;  %v783_v54 = vld [vmem:[#allocation9 + $0x10b8] sm:$0xff]  ;;  %v7819_v60 = vmax.f32 %v15487_v47, 0.0  ;;  %v14109_v61 = vld [vmem:[#allocation12] ss:$16 sps:$4 sm:$0xff]  }
 0x4de   :  { %v7323_v19 = vpop.f32.mrb[10].mxu0  ;;  %7624 = vmatpush1.bf16.msra.mxu0 %v13184_v4  ;;  %v1214_v4 = vld [vmem:[#allocation9 + $0x1e30] sm:$0xff]  ;;  %v791_v59 = vld [vmem:[#allocation9 + $0x10f8] sm:$0xff] }
 0x4df   :  { %7706 = vmatpush1.bf16.msra.mxu1 %v12674_v6  ;;  %v7324_v21 = vpop.f32.mrb[11].mxu0  ;;  %7625 = vmatprep.subr.bf16.mxu0 %v13201_v7  ;;  %v1222_v6 = vld [vmem:[#allocation9 + $0x1e70] sm:$0xff]  ;;  %v703_v7 = vld [vmem:[#allocation9 + $0xe38] sm:$0xff]  ;;  %v12866_v47 = vcombine.low %v783_v54, %v791_v59 }
 0x4e0   :  { %7707 = vmatprep.subr.bf16.mxu1 %v12691_v10  ;;  %v711_v10 = vld [vmem:[#allocation9 + $0xe78] sm:$0xff]  ;;  %v13297_v16 = vcombine.high %v1214_v4, %v1222_v6  ;;  %v1230_v19 = vld [vmem:[#allocation9 + $0x1eb0] sm:$0xff] }
 0x4e1   :  { %v12787_v18 = vcombine.high %v703_v7, %v711_v10  ;;  %v719_v21 = vld [vmem:[#allocation9 + $0xeb8] sm:$0xff] }
 0x4e2   :  { %7626 = vmatpush1.bf16.msra.mxu0 %v13200_v20  ;;  %v1238_v20 = vld [vmem:[#allocation9 + $0x1ef0] sm:$0xff] }
 0x4e3   :  { %7708 = vmatpush1.bf16.msra.mxu1 %v12690_v22  ;;  %7627 = vmatprep.subr.bf16.mxu0 %v13217_v23  ;;  %v727_v22 = vld [vmem:[#allocation9 + $0xef8] sm:$0xff]  ;;  %v13296_v23 = vcombine.low %v1214_v4, %v1222_v6  ;;  %v13313_v25 = vcombine.high %v1230_v19, %v1238_v20  ;;  %v15539_v6 = vpack.c.bf16 %v7819_v60, %v7819_v60 }
 0x4e4   :  { %7709 = vmatprep.subr.bf16.mxu1 %v12707_v24  ;;  %v12786_v24 = vcombine.low %v703_v7, %v711_v10  ;;  %v12803_v26 = vcombine.high %v719_v21, %v727_v22  ;;  %v807_v4 = vld [vmem:[#allocation9 + $0x1178] sm:$0xff]  ;;  %v14112_v7 = vld [vmem:[#allocation12 + $0x20] ss:$16 sps:$4 sm:$0xff]   ;;  %v14117_v10 = vld [vmem:[#allocation12 + $0x44] ss:$16 sps:$4 sm:$0xff]  }
 0x4e5   :  { %v919_v60 = vld [vmem:[#allocation9 + $0x14f8] sm:$0xff] }
 0x4e6   :  { %7628 = vmatpush1.bf16.msra.mxu0 %v13216_v29  ;;  %v735_v29 = vld [vmem:[#allocation9 + $0xf38] sm:$0xff] }
 0x4e7   :  { %7710 = vmatpush1.bf16.msra.mxu1 %v12706_v30  ;;  %7629 = vmatprep.subr.bf16.mxu0 %v13233_v35  ;;  %v743_v30 = vld [vmem:[#allocation9 + $0xf78] sm:$0xff]  ;;  %v13312_v35 = vcombine.low %v1230_v19, %v1238_v20 }
 0x4e8   :  { %7711 = vmatprep.subr.bf16.mxu1 %v12723_v31  ;;  %v12802_v31 = vcombine.low %v719_v21, %v727_v22  ;;  %v12819_v55 = vcombine.high %v735_v29, %v743_v30  ;;  %v831_v21 = vld [vmem:[#allocation9 + $0x1238] sm:$0xff] }
 0x4e9   :  { %v839_v22 = vld [vmem:[#allocation9 + $0x1278] sm:$0xff] }
 0x4ea   :  { %7630 = vmatpush1.bf16.msra.mxu0 %v13232_v39  ;;  %v751_v39 = vld [vmem:[#allocation9 + $0xfb8] sm:$0xff] }
 0x4eb   :  { %7712 = vmatpush1.bf16.msra.mxu1 %v12722_v41  ;;  %7631 = vmatprep.subr.bf16.mxu0 %v13249_v43  ;;  %v759_v41 = vld [vmem:[#allocation9 + $0xff8] sm:$0xff]  ;;  %v13328_v43 = vcombine.low %v1246_v27, %v1254_v28  ;;  %v14121_v28 = vld [vmem:[#allocation12 + $0x80] ss:$16 sps:$4 sm:$0xff]  }
 0x4ec   :  { %7713 = vmatprep.subr.bf16.mxu1 %v12739_v45  ;;  %v12818_v45 = vcombine.low %v735_v29, %v743_v30  ;;  %v12835_v46 = vcombine.high %v751_v39, %v759_v41  ;;  %v855_v27 = vld [vmem:[#allocation9 + $0x12f8] sm:$0xff]  ;;  %v12914_v29 = vcombine.low %v831_v21, %v839_v22  ;;  %v14126_v30 = vld [vmem:[#allocation12 + $0xa4] ss:$16 sps:$4 sm:$0xff]  }
 0x4ee   :  { %7632 = vmatpush1.bf16.msra.mxu0 %v13248_v50  ;;  %v13344_v50 = vcombine.low %v1262_v34, %v1270_v38  ;;  %v14129_v38 = vld [vmem:[#allocation12 + $0xc4] ss:$16 sps:$4 sm:$0xff]  }
 0x4ef   :  { %7714 = vmatpush1.bf16.msra.mxu1 %v12738_v51  ;;  %7633 = vmatprep.subr.bf16.mxu0 %v13265_v52  ;;  %v12834_v51 = vcombine.low %v751_v39, %v759_v41  ;;  %v14111_v52 = vld [vmem:[#allocation12 + $0x4] ss:$16 sps:$4 sm:$0xff]   ;;  %v879_v41 = vld [vmem:[#allocation9 + $0x13b8] sm:$0xff] }
 0x4f0   :  { %7715 = vmatprep.subr.bf16.mxu1 %v12755_v53  ;;  %v12851_v53 = vcombine.high %v767_v48, %v775_v49 }
 0x4f2   :  { %7634 = vmatpush1.bf16.msra.mxu0 %v13264_v56  ;;  %v12850_v56 = vcombine.low %v767_v48, %v775_v49  ;;  %v895_v49 = vld [vmem:[#allocation9 + $0x1438] sm:$0xff] }
 0x4f3   :  { %7716 = vmatpush1.bf16.msra.mxu1 %v12754_v62  ;;  %7635 = vmatprep.subr.bf16.mxu0 %v13281_v2  ;;  %v12867_v62 = vcombine.high %v783_v54, %v791_v59  ;;  %v14114_v2 = vld [vmem:[#allocation12 + $0x24] ss:$16 sps:$4 sm:$0xff]   ;;  %v911_v59 = vld [vmem:[#allocation9 + $0x14b8] sm:$0xff] }
 0x4f4   :  { %7717 = vmatprep.subr.bf16.mxu1 %v12771_v3  ;;  %v799_v3 = vld [vmem:[#allocation9 + $0x1138] sm:$0xff] }
 0x4f5   :  { %v12882_v19 = vcombine.low %v799_v3, %v807_v4 }
 0x4f6   :  { %7636 = vmatpush1.bf16.msra.mxu0 %v13280_v11  ;;  %v12883_v11 = vcombine.high %v799_v3, %v807_v4  ;;  %v927_v3 = vld [vmem:[#allocation9 + $0x1538] sm:$0xff] }
 0x4f7   :  { %7718 = vmatpush1.bf16.msra.mxu1 %v12770_v12  ;;  %7637 = vmatprep.subr.bf16.mxu0 %v13297_v16  ;;  %v815_v12 = vld [vmem:[#allocation9 + $0x11b8] sm:$0xff] }
 0x4f8   :  { %7719 = vmatprep.subr.bf16.mxu1 %v12787_v18  ;;  %v823_v16 = vld [vmem:[#allocation9 + $0x11f8] sm:$0xff]  ;;  %v14115_v18 = vld [vmem:[#allocation12 + $0x40] ss:$16 sps:$4 sm:$0xff]  }
 0x4f9   :  { %v12899_v20 = vcombine.high %v815_v12, %v823_v16  ;;  %v935_v4 = vld [vmem:[#allocation9 + $0x1578] sm:$0xff] }
 0x4fa   :  { %7638 = vmatpush1.bf16.msra.mxu0 %v13296_v23  ;;  %v12898_v23 = vcombine.low %v815_v12, %v823_v16  ;;  %v943_v12 = vld [vmem:[#allocation9 + $0x15b8] sm:$0xff] }
 0x4fb   :  { %7720 = vmatpush1.bf16.msra.mxu1 %v12786_v24  ;;  %7639 = vmatprep.subr.bf16.mxu0 %v13313_v25  ;;  %v14123_v24 = vld [vmem:[#allocation12 + $0x84] ss:$16 sps:$4 sm:$0xff]   ;;  %v12915_v25 = vcombine.high %v831_v21, %v839_v22  ;;  %v951_v16 = vld [vmem:[#allocation9 + $0x15f8] sm:$0xff] }
 0x4fc   :  { %7721 = vmatprep.subr.bf16.mxu1 %v12803_v26  ;;  %v847_v26 = vld [vmem:[#allocation9 + $0x12b8] sm:$0xff] }
 0x4fd   :  { %v12930_v34 = vcombine.low %v847_v26, %v855_v27  ;;  %v959_v21 = vld [vmem:[#allocation9 + $0x1638] sm:$0xff] }
 0x4fe   :  { %7640 = vmatpush1.bf16.msra.mxu0 %v13312_v35  ;;  %v12931_v35 = vcombine.high %v847_v26, %v855_v27  ;;  %v967_v22 = vld [vmem:[#allocation9 + $0x1678] sm:$0xff] }
 0x4ff   :  { %7722 = vmatpush1.bf16.msra.mxu1 %v12802_v31  ;;  %7641 = vmatprep.subr.bf16.mxu0 %v13329_v33  ;;  %v863_v31 = vld [vmem:[#allocation9 + $0x1338] sm:$0xff] }
 0x500   :  { %7723 = vmatprep.subr.bf16.mxu1 %v12819_v55  ;;  %v871_v33 = vld [vmem:[#allocation9 + $0x1378] sm:$0xff]  ;;  %v14124_v55 = vld [vmem:[#allocation12 + $0xa0] ss:$16 sps:$4 sm:$0xff]  }
 0x501   :  { %v12947_v39 = vcombine.high %v863_v31, %v871_v33  ;;  %v975_v26 = vld [vmem:[#allocation9 + $0x16b8] sm:$0xff] }
 0x502   :  { %7642 = vmatpush1.bf16.msra.mxu0 %v13328_v43  ;;  %v887_v43 = vld [vmem:[#allocation9 + $0x13f8] sm:$0xff] }
 0x503   :  { %7724 = vmatpush1.bf16.msra.mxu1 %v12818_v45  ;;  %7643 = vmatprep.subr.bf16.mxu0 %v13345_v58  ;;  %v14127_v45 = vld [vmem:[#allocation12 + $0xc0] ss:$16 sps:$4 sm:$0xff]   ;;  %v12946_v58 = vcombine.low %v863_v31, %v871_v33  ;;  %v12963_v48 = vcombine.high %v879_v41, %v887_v43  ;;  %v983_v27 = vld [vmem:[#allocation9 + $0x16f8] sm:$0xff] }
 0x504   :  { %7725 = vmatprep.subr.bf16.mxu1 %v12835_v46  ;;  %v14132_v46 = vld [vmem:[#allocation12 + $0xe4] ss:$16 sps:$4 sm:$0xff]   ;;  %v991_v31 = vld [vmem:[#allocation9 + $0x1738] sm:$0xff] }
 0x505   :  { %v999_v33 = vld [vmem:[#allocation9 + $0x1778] sm:$0xff] }
 0x506   :  { %7644 = vmatpush1.bf16.msra.mxu0 %v13344_v50  ;;  %v903_v50 = vld [vmem:[#allocation9 + $0x1478] sm:$0xff] }
 0x507   :  { %7726 = vmatpush1.bf16.msra.mxu1 %v12834_v51  ;;  %10929 = vmatprep.subr.bf16.mxu0 %v14111_v52  ;;  %v14130_v51 = vld [vmem:[#allocation12 + $0xe0] ss:$16 sps:$4 sm:$0xff]   ;;  %v12962_v52 = vcombine.low %v879_v41, %v887_v43  ;;  %v12979_v54 = vcombine.high %v895_v49, %v903_v50  ;;  %v13075_v41 = vcombine.high %v991_v31, %v999_v33  ;;  %v1007_v43 = vld [vmem:[#allocation9 + $0x17b8] sm:$0xff] }
 0x508   :  { %7736 = vmatprep.subr.bf16.mxu1 %v12851_v53  ;;  %v14135_v53 = vld [vmem:[#allocation12 + $0x104] ss:$16 sps:$4 sm:$0xff]  }
 0x509   :  { %7646 = vmatmul.mubr.bf16.vlgmr.msra.gmra.mrb[12].mxu0 %v15451_v37 }
 0x50a   :  { %7728 = vmatmul.mubr.bf16.vlgmr.msra.gmra.mrb[16].mxu1 %v15428_v57  ;;  %10930 = vmatpush1.bf16.msra.mxu0 %v14109_v61  ;;  %v14120_v57 = vld [vmem:[#allocation12 + $0x64] ss:$16 sps:$4 sm:$0xff]   ;;  %v14133_v61 = vld [vmem:[#allocation12 + $0x100] ss:$16 sps:$4 sm:$0xff]  }
 0x50b   :  { %7737 = vmatpush1.bf16.msra.mxu1 %v12850_v56  ;;  %7768 = vmatprep.mubr.bf16.mxu1 %v15434_v1  ;;  %v14118_v1 = vld [vmem:[#allocation12 + $0x60] ss:$16 sps:$4 sm:$0xff]   ;;  %v12978_v56 = vcombine.low %v895_v49, %v903_v50  ;;  %v13074_v49 = vcombine.low %v991_v31, %v999_v33  ;;  %v14156_v50 = vld [vmem:[#allocation12 + $0x1e4] ss:$16 sps:$4 sm:$0xff]  }
 0x50c   :  { %10961 = vmatprep.mubr.bf16.mxu0 %v15539_v6  ;;  %7738 = vmatprep.subr.bf16.mxu1 %v12867_v62  ;;  %v14138_v62 = vld [vmem:[#allocation12 + $0x124] ss:$16 sps:$4 sm:$0xff]   ;;  %v14169_v31 = vld [vmem:[#allocation12 + $0x480] ss:$16 sps:$4 sm:$0xff]  }
 0x50d   :  { %10931 = vmatprep.subr.bf16.mxu0 %v14114_v2  ;;  %v12995_v2 = vcombine.high %v911_v59, %v919_v60 }
 0x50e   :  { %10932 = vmatpush1.bf16.msra.mxu0 %v14112_v7  ;;  %v14136_v7 = vld [vmem:[#allocation12 + $0x120] ss:$16 sps:$4 sm:$0xff]  }
 0x50f   :  { %7739 = vmatpush1.bf16.msra.mxu1 %v12866_v47  ;;  %10933 = vmatprep.subr.bf16.mxu0 %v14117_v10  ;;  %v12994_v47 = vcombine.low %v911_v59, %v919_v60  ;;  %v14141_v10 = vld [vmem:[#allocation12 + $0x144] ss:$16 sps:$4 sm:$0xff]   ;;  %v14154_v59 = vld [vmem:[#allocation12 + $0x1e0] ss:$16 sps:$4 sm:$0xff]   ;;  %v7818_v60 = vmax.f32 %v15485_v42, 0.0 }
 0x510   :  { %7740 = vmatprep.subr.bf16.mxu1 %v12883_v11  ;;  %v13011_v11 = vcombine.high %v927_v3, %v935_v4  ;;  %v14162_v42 = vld [vmem:[#allocation12 + $0x424] ss:$16 sps:$4 sm:$0xff]  }
 0x512   :  { %10934 = vmatpush1.bf16.msra.mxu0 %v14115_v18  ;;  %v14139_v18 = vld [vmem:[#allocation12 + $0x140] ss:$16 sps:$4 sm:$0xff]  }
 0x513   :  { %7741 = vmatpush1.bf16.msra.mxu1 %v12882_v19  ;;  %10935 = vmatprep.subr.bf16.mxu0 %v14120_v57  ;;  %v13010_v19 = vcombine.low %v927_v3, %v935_v4  ;;  %v14144_v57 = vld [vmem:[#allocation12 + $0x164] ss:$16 sps:$4 sm:$0xff]   ;;  %v1047_v3 = vld [vmem:[#allocation9 + $0x18f8] sm:$0xff] }
 0x514   :  { %7742 = vmatprep.subr.bf16.mxu1 %v12899_v20  ;;  %v13027_v20 = vcombine.high %v943_v12, %v951_v16 }
 0x516   :  { %10936 = vmatpush1.bf16.msra.mxu0 %v14118_v1  ;;  %v14142_v1 = vld [vmem:[#allocation12 + $0x160] ss:$16 sps:$4 sm:$0xff]  }
 0x517   :  { %7743 = vmatpush1.bf16.msra.mxu1 %v12898_v23  ;;  %10937 = vmatprep.subr.bf16.mxu0 %v14123_v24  ;;  %v13026_v23 = vcombine.low %v943_v12, %v951_v16  ;;  %v14147_v24 = vld [vmem:[#allocation12 + $0x184] ss:$16 sps:$4 sm:$0xff]   ;;  %v1063_v12 = vld [vmem:[#allocation9 + $0x1978] sm:$0xff] }
 0x518   :  { %7744 = vmatprep.subr.bf16.mxu1 %v12915_v25  ;;  %v13043_v25 = vcombine.high %v959_v21, %v967_v22 }
 0x51a   :  { %10938 = vmatpush1.bf16.msra.mxu0 %v14121_v28  ;;  %v14145_v28 = vld [vmem:[#allocation12 + $0x180] ss:$16 sps:$4 sm:$0xff]  }
 0x51b   :  { %7745 = vmatpush1.bf16.msra.mxu1 %v12914_v29  ;;  %10939 = vmatprep.subr.bf16.mxu0 %v14126_v30  ;;  %v13042_v29 = vcombine.low %v959_v21, %v967_v22  ;;  %v14150_v30 = vld [vmem:[#allocation12 + $0x1a4] ss:$16 sps:$4 sm:$0xff]   ;;  %v1071_v21 = vld [vmem:[#allocation9 + $0x19b8] sm:$0xff] }
 0x51c   :  { %7746 = vmatprep.subr.bf16.mxu1 %v12931_v35  ;;  %v13059_v35 = vcombine.high %v975_v26, %v983_v27  ;;  %v1079_v22 = vld [vmem:[#allocation9 + $0x19f8] sm:$0xff] }
 0x51e   :  { %10940 = vmatpush1.bf16.msra.mxu0 %v14124_v55  ;;  %v1300_v55 = vsub.s32 5, %v15473_v63 }
 0x51f   :  { %7747 = vmatpush1.bf16.msra.mxu1 %v12930_v34  ;;  %10941 = vmatprep.subr.bf16.mxu0 %v14129_v38  ;;  %v14148_v34 = vld [vmem:[#allocation12 + $0x1a0] ss:$16 sps:$4 sm:$0xff]   ;;  %v13058_v38 = vcombine.low %v975_v26, %v983_v27  ;;  %v1095_v26 = vld [vmem:[#allocation9 + $0x1a78] sm:$0xff]  ;;  %v13154_v27 = vcombine.low %v1071_v21, %v1079_v22 }
 0x520   :  { %7748 = vmatprep.subr.bf16.mxu1 %v12947_v39  ;;  %v14153_v39 = vld [vmem:[#allocation12 + $0x1c4] ss:$16 sps:$4 sm:$0xff]  }
 0x522   :  { %10942 = vmatpush1.bf16.msra.mxu0 %v14127_v45  ;;  %v1015_v45 = vld [vmem:[#allocation9 + $0x17f8] sm:$0xff] }
 0x523   :  { %7749 = vmatpush1.bf16.msra.mxu1 %v12946_v58  ;;  %10943 = vmatprep.subr.bf16.mxu0 %v14132_v46  ;;  %v15545_v58 = vld [vmem:[#allocation10] sm:$0xff] }
 0x524   :  { %7750 = vmatprep.subr.bf16.mxu1 %v12963_v48  ;;  %v1301_v46 = vrot.slane %v15545_v58, %v1300_v55  ;;  %v14151_v48 = vld [vmem:[#allocation12 + $0x1c0] ss:$16 sps:$4 sm:$0xff]  }
 0x526   :  { %10944 = vmatpush1.bf16.msra.mxu0 %v14130_v51  ;;  %v13091_v51 = vcombine.high %v1007_v43, %v1015_v45 }
 0x527   :  { %7751 = vmatpush1.bf16.msra.mxu1 %v12962_v52  ;;  %10945 = vmatprep.subr.bf16.mxu0 %v14135_v53  ;;  %v1023_v52 = vld [vmem:[#allocation9 + $0x1838] sm:$0xff] }
 0x528   :  { %7752 = vmatprep.subr.bf16.mxu1 %v12979_v54  ;;  %v1031_v53 = vld [vmem:[#allocation9 + $0x1878] sm:$0xff]  ;;  %v13982_v54 = vadd.f32 %v15511_v5, %v1301_v46  ;;  %v14177_v46 = vld [vmem:[#allocation12 + $0x4c4] ss:$16 sps:$4 sm:$0xff]  }
 0x52a   :  { %10946 = vmatpush1.bf16.msra.mxu0 %v14133_v61  ;;  %v13090_v61 = vcombine.low %v1007_v43, %v1015_v45  ;;  %v7823_v4 = vmax.f32 %v13982_v54, 0.0  ;;  %v14172_v43 = vld [vmem:[#allocation12 + $0x4a0] ss:$16 sps:$4 sm:$0xff]  }
 0x52b   :  { %7753 = vmatpush1.bf16.msra.mxu1 %v12978_v56  ;;  %10947 = vmatprep.subr.bf16.mxu0 %v14138_v62  ;;  %v14159_v56 = vld [vmem:[#allocation12 + $0x404] ss:$16 sps:$4 sm:$0xff]   ;;  %v13107_v62 = vcombine.high %v1023_v52, %v1031_v53 }
 0x52c   :  { %7754 = vmatprep.subr.bf16.mxu1 %v12995_v2  ;;  %v1039_v2 = vld [vmem:[#allocation9 + $0x18b8] sm:$0xff]  ;;  %v15555_v16 = vpack.c.bf16 %v7823_v4, %v7823_v4 }
 0x52d   :  { %v13123_v5 = vcombine.high %v1039_v2, %v1047_v3 }
 0x52e   :  { %10948 = vmatpush1.bf16.msra.mxu0 %v14136_v7  ;;  %v14157_v7 = vld [vmem:[#allocation12 + $0x400] ss:$16 sps:$4 sm:$0xff]  }
 0x52f   :  { %7755 = vmatpush1.bf16.msra.mxu1 %v12994_v47  ;;  %10949 = vmatprep.subr.bf16.mxu0 %v14141_v10  ;;  %v15552_v47 = vpack.c.bf16 %v7818_v60, %v7818_v60  ;;  %v13106_v10 = vcombine.low %v1023_v52, %v1031_v53  ;;  %v14175_v53 = vld [vmem:[#allocation12 + $0x4c0] ss:$16 sps:$4 sm:$0xff]   ;;  %v14180_v60 = vld [vmem:[#allocation12 + $0x4e4] ss:$16 sps:$4 sm:$0xff]  }
 0x530   :  { %7756 = vmatprep.subr.bf16.mxu1 %v13011_v11  ;;  %v1055_v11 = vld [vmem:[#allocation9 + $0x1938] sm:$0xff] }
 0x532   :  { %10950 = vmatpush1.bf16.msra.mxu0 %v14139_v18  ;;  %v14160_v18 = vld [vmem:[#allocation12 + $0x420] ss:$16 sps:$4 sm:$0xff]  }
 0x533   :  { %7757 = vmatpush1.bf16.msra.mxu1 %v13010_v19  ;;  %10951 = vmatprep.subr.bf16.mxu0 %v14144_v57  ;;  %v13122_v19 = vcombine.low %v1039_v2, %v1047_v3  ;;  %v14165_v57 = vld [vmem:[#allocation12 + $0x444] ss:$16 sps:$4 sm:$0xff]   ;;  %v1159_v2 = vld [vmem:[#allocation9 + $0x1c78] sm:$0xff]  ;;  %v14178_v3 = vld [vmem:[#allocation12 + $0x4e0] ss:$16 sps:$4 sm:$0xff]  }
 0x534   :  { %7758 = vmatprep.subr.bf16.mxu1 %v13027_v20  ;;  %v13139_v20 = vcombine.high %v1055_v11, %v1063_v12 }
 0x536   :  { %10952 = vmatpush1.bf16.msra.mxu0 %v14142_v1  ;;  %v14163_v1 = vld [vmem:[#allocation12 + $0x440] ss:$16 sps:$4 sm:$0xff]  }
 0x537   :  { %7759 = vmatpush1.bf16.msra.mxu1 %v13026_v23  ;;  %10953 = vmatprep.subr.bf16.mxu0 %v14147_v24  ;;  %v13138_v23 = vcombine.low %v1055_v11, %v1063_v12  ;;  %v13155_v24 = vcombine.high %v1071_v21, %v1079_v22  ;;  %v14181_v11 = vld [vmem:[#allocation12 + $0x500] ss:$16 sps:$4 sm:$0xff]  }
 0x538   :  { %7760 = vmatprep.subr.bf16.mxu1 %v13043_v25  ;;  %v1087_v25 = vld [vmem:[#allocation9 + $0x1a38] sm:$0xff]  ;;  %v14184_v21 = vld [vmem:[#allocation12 + $0x520] ss:$16 sps:$4 sm:$0xff]  }
 0x539   :  { %v13170_v33 = vcombine.low %v1087_v25, %v1095_v26 }
 0x53a   :  { %10954 = vmatpush1.bf16.msra.mxu0 %v14145_v28  ;;  %v14171_v28 = vld [vmem:[#allocation12 + $0x484] ss:$16 sps:$4 sm:$0xff]  }
 0x53b   :  { %7761 = vmatpush1.bf16.msra.mxu1 %v13042_v29  ;;  %10955 = vmatprep.subr.bf16.mxu0 %v14150_v30  ;;  %v13171_v29 = vcombine.high %v1087_v25, %v1095_v26  ;;  %v1103_v30 = vld [vmem:[#allocation9 + $0x1ab8] sm:$0xff]  ;;  %v14187_v25 = vld [vmem:[#allocation12 + $0x540] ss:$16 sps:$4 sm:$0xff]  }
 0x53c   :  { %7762 = vmatprep.subr.bf16.mxu1 %v13059_v35  ;;  %v1111_v35 = vld [vmem:[#allocation9 + $0x1af8] sm:$0xff] }
 0x53d   :  { %v13186_v45 = vcombine.low %v1103_v30, %v1111_v35 }
 0x53e   :  { %10956 = vmatpush1.bf16.msra.mxu0 %v14148_v34  ;;  %v14174_v34 = vld [vmem:[#allocation12 + $0x4a4] ss:$16 sps:$4 sm:$0xff]  }
 0x53f   :  { %7763 = vmatpush1.bf16.msra.mxu1 %v13058_v38  ;;  %10957 = vmatprep.subr.bf16.mxu0 %v14153_v39  ;;  %v13187_v38 = vcombine.high %v1103_v30, %v1111_v35  ;;  %v1119_v39 = vld [vmem:[#allocation9 + $0x1b38] sm:$0xff]  ;;  %v14190_v30 = vld [vmem:[#allocation12 + $0x560] ss:$16 sps:$4 sm:$0xff]  }
 0x540   :  { %7764 = vmatprep.subr.bf16.mxu1 %v13075_v41  ;;  %v1127_v41 = vld [vmem:[#allocation9 + $0x1b78] sm:$0xff] }
 0x542   :  { %10958 = vmatpush1.bf16.msra.mxu0 %v14151_v48  ;;  %v13203_v48 = vcombine.high %v1119_v39, %v1127_v41 }
 0x543   :  { %7765 = vmatpush1.bf16.msra.mxu1 %v13074_v49  ;;  %10959 = vmatprep.subr.bf16.mxu0 %v14156_v50  ;;  %v1135_v50 = vld [vmem:[#allocation9 + $0x1bb8] sm:$0xff] }
 0x544   :  { %7766 = vmatprep.subr.bf16.mxu1 %v13091_v51  ;;  %v1143_v51 = vld [vmem:[#allocation9 + $0x1bf8] sm:$0xff] }
 0x545   :  { %v13218_v4 = vcombine.low %v1135_v50, %v1143_v51 }
 0x546   :  { %10960 = vmatpush1.bf16.msra.mxu0 %v14154_v59  ;;  %v13202_v59 = vcombine.low %v1119_v39, %v1127_v41  ;;  %v14193_v39 = vld [vmem:[#allocation12 + $0x580] ss:$16 sps:$4 sm:$0xff]   ;;  %v1296_v41 = vsub.s32 4, %v15473_v63 }
 0x547   :  { %7767 = vmatpush1.bf16.msra.mxu1 %v13090_v61  ;;  %11011 = vmatprep.subr.bf16.mxu0 %v14159_v56  ;;  %v13219_v56 = vcombine.high %v1135_v50, %v1143_v51  ;;  %v1247_v50 = vld [vmem:[#allocation9 + $0x1f38] sm:$0xff] }
 0x548   :  { %7777 = vmatprep.subr.bf16.mxu1 %v13107_v62  ;;  %v1151_v62 = vld [vmem:[#allocation9 + $0x1c38] sm:$0xff] }
 0x549   :  { %10962 = vmatmul.mubr.bf16.vlgmr.msra.gmra.mrb[16].mxu0 %v15552_v47  ;;  %v13234_v12 = vcombine.low %v1151_v62, %v1159_v2  ;;  %v1255_v51 = vld [vmem:[#allocation9 + $0x1f78] sm:$0xff] }
 0x54a   :  { %7769 = vmatmul.mubr.bf16.vlgmr.msra.gmra.mrb[16].mxu1 %v15442_v15  ;;  %11012 = vmatpush1.bf16.msra.mxu0 %v14157_v7  ;;  %v14168_v15 = vld [vmem:[#allocation12 + $0x464] ss:$16 sps:$4 sm:$0xff]  }
 0x54b   :  { %7778 = vmatpush1.bf16.msra.mxu1 %v13106_v10  ;;  %7809 = vmatprep.mubr.bf16.mxu1 %v15444_v17  ;;  %v14166_v17 = vld [vmem:[#allocation12 + $0x460] ss:$16 sps:$4 sm:$0xff]   ;;  %v14183_v7 = vld [vmem:[#allocation12 + $0x504] ss:$16 sps:$4 sm:$0xff]   ;;  %v13235_v10 = vcombine.high %v1151_v62, %v1159_v2  ;;  %v1263_v2 = vld [vmem:[#allocation9 + $0x1fb8] sm:$0xff] }
 0x54c   :  { %11043 = vmatprep.mubr.bf16.mxu0 %v15555_v16  ;;  %7779 = vmatprep.subr.bf16.mxu1 %v13123_v5  ;;  %v1167_v5 = vld [vmem:[#allocation9 + $0x1cb8] sm:$0xff] }
 0x54d   :  { %11013 = vmatprep.subr.bf16.mxu0 %v14162_v42  ;;  %v1175_v42 = vld [vmem:[#allocation9 + $0x1cf8] sm:$0xff] }
 0x54e   :  { %11014 = vmatpush1.bf16.msra.mxu0 %v14160_v18  ;;  %v14186_v18 = vld [vmem:[#allocation12 + $0x524] ss:$16 sps:$4 sm:$0xff]   ;;  %v13250_v22 = vcombine.low %v1167_v5, %v1175_v42 }
 0x54f   :  { %7780 = vmatpush1.bf16.msra.mxu1 %v13122_v19  ;;  %11015 = vmatprep.subr.bf16.mxu0 %v14165_v57  ;;  %v13251_v19 = vcombine.high %v1167_v5, %v1175_v42  ;;  %v1183_v57 = vld [vmem:[#allocation9 + $0x1d38] sm:$0xff]  ;;  %v13330_v5 = vcombine.low %v1247_v50, %v1255_v51  ;;  %v14204_v42 = vld [vmem:[#allocation12 + $0x5e4] ss:$16 sps:$4 sm:$0xff]  }
 0x550   :  { %7781 = vmatprep.subr.bf16.mxu1 %v13139_v20  ;;  %v1191_v20 = vld [vmem:[#allocation9 + $0x1d78] sm:$0xff] }
 0x551   :  { %v13266_v26 = vcombine.low %v1183_v57, %v1191_v20 }
 0x552   :  { %11016 = vmatpush1.bf16.msra.mxu0 %v14163_v1  ;;  %v14189_v1 = vld [vmem:[#allocation12 + $0x544] ss:$16 sps:$4 sm:$0xff]  }
 0x553   :  { %7782 = vmatpush1.bf16.msra.mxu1 %v13138_v23  ;;  %11017 = vmatprep.subr.bf16.mxu0 %v14168_v15  ;;  %v13267_v23 = vcombine.high %v1183_v57, %v1191_v20  ;;  %v1199_v15 = vld [vmem:[#allocation9 + $0x1db8] sm:$0xff] }
 0x554   :  { %7783 = vmatprep.subr.bf16.mxu1 %v13155_v24  ;;  %v1207_v24 = vld [vmem:[#allocation9 + $0x1df8] sm:$0xff] }
 0x555   :  { %v13282_v35 = vcombine.low %v1199_v15, %v1207_v24 }
 0x556   :  { %11018 = vmatpush1.bf16.msra.mxu0 %v14166_v17  ;;  %v14192_v17 = vld [vmem:[#allocation12 + $0x564] ss:$16 sps:$4 sm:$0xff]  }
 0x557   :  { %7784 = vmatpush1.bf16.msra.mxu1 %v13154_v27  ;;  %11019 = vmatprep.subr.bf16.mxu0 %v14171_v28  ;;  %v13283_v27 = vcombine.high %v1199_v15, %v1207_v24  ;;  %v1215_v28 = vld [vmem:[#allocation9 + $0x1e38] sm:$0xff]  ;;  %v14205_v24 = vld [vmem:[#allocation12 + $0x200] ss:$16 sps:$4 sm:$0xff]  }
 0x558   :  { %7785 = vmatprep.subr.bf16.mxu1 %v13171_v29  ;;  %v1223_v29 = vld [vmem:[#allocation9 + $0x1e78] sm:$0xff] }
 0x55a   :  { %11020 = vmatpush1.bf16.msra.mxu0 %v14169_v31  ;;  %v14195_v31 = vld [vmem:[#allocation12 + $0x584] ss:$16 sps:$4 sm:$0xff]  }
 0x55b   :  { %7786 = vmatpush1.bf16.msra.mxu1 %v13170_v33  ;;  %11021 = vmatprep.subr.bf16.mxu0 %v14174_v34  ;;  %v13299_v33 = vcombine.high %v1215_v28, %v1223_v29  ;;  %v1231_v34 = vld [vmem:[#allocation9 + $0x1eb8] sm:$0xff] }
 0x55c   :  { %7787 = vmatprep.subr.bf16.mxu1 %v13187_v38  ;;  %v1239_v38 = vld [vmem:[#allocation9 + $0x1ef8] sm:$0xff] }
 0x55d   :  { %v15560_v49 = vpop.f32.mrb[12].mxu1 }
 0x55e   :  { %v15562_v52 = vpop.f32.mrb[13].mxu1  ;;  %11022 = vmatpush1.bf16.msra.mxu0 %v14172_v43  ;;  %v13298_v43 = vcombine.low %v1215_v28, %v1223_v29  ;;  %v14222_v28 = vld [vmem:[#allocation12 + $0x844] ss:$16 sps:$4 sm:$0xff]  }
 0x55f   :  { %v7487_v54 = vpop.f32.mrb[14].mxu1  ;;  %7788 = vmatpush1.bf16.msra.mxu1 %v13186_v45  ;;  %11023 = vmatprep.subr.bf16.mxu0 %v14177_v46  ;;  %v14198_v45 = vld [vmem:[#allocation12 + $0x5a4] ss:$16 sps:$4 sm:$0xff]   ;;  %v13315_v46 = vcombine.high %v1231_v34, %v1239_v38 }
 0x560   :  { %v7488_v61 = vpop.f32.mrb[15].mxu1  ;;  %7789 = vmatprep.subr.bf16.mxu1 %v13203_v48  ;;  %v15566_v48 = vsub.s32 3, %v15473_v63  ;;  %v1297_v54 = vrot.slane %v15545_v58, %v1296_v41  ;;  %v14219_v29 = vld [vmem:[#allocation12 + $0x244] ss:$16 sps:$4 sm:$0xff]  }
 0x561   :  { %v14201_v61 = vld [vmem:[#allocation12 + $0x5c4] ss:$16 sps:$4 sm:$0xff]  }
 0x562   :  { %11024 = vmatpush1.bf16.msra.mxu0 %v14175_v53  ;;  %v14196_v53 = vld [vmem:[#allocation12 + $0x5a0] ss:$16 sps:$4 sm:$0xff]   ;;  %v1293_v62 = vrot.slane %v15545_v58, %v15566_v48 }
 0x563   :  { %7790 = vmatpush1.bf16.msra.mxu1 %v13202_v59  ;;  %11025 = vmatprep.subr.bf16.mxu0 %v14180_v60  ;;  %v15571_v59 = vld [vmem:[#allocation10 + $0x8] sm:$0xff]  ;;  %v13314_v60 = vcombine.low %v1231_v34, %v1239_v38  ;;  %v14223_v34 = vld [vmem:[#allocation12 + $0x260] ss:$16 sps:$4 sm:$0xff]   ;;  %v14234_v38 = vld [vmem:[#allocation12 + $0x884] ss:$16 sps:$4 sm:$0xff]  }
 0x564   :  { %7791 = vmatprep.subr.bf16.mxu1 %v13219_v56  ;;  %v13331_v56 = vcombine.high %v1247_v50, %v1255_v51  ;;  %v14237_v50 = vld [vmem:[#allocation12 + $0x2a4] ss:$16 sps:$4 sm:$0xff]   ;;  %v14238_v51 = vld [vmem:[#allocation12 + $0x8a0] ss:$16 sps:$4 sm:$0xff]  }
 0x566   :  { %11026 = vmatpush1.bf16.msra.mxu0 %v14178_v3  ;;  %v1271_v3 = vld [vmem:[#allocation9 + $0x1ff8] sm:$0xff] }
 0x567   :  { %7792 = vmatpush1.bf16.msra.mxu1 %v13218_v4  ;;  %11027 = vmatprep.subr.bf16.mxu0 %v14183_v7  ;;  %v1317_v4 = vrot.slane %v15571_v59, %v15479_v13  ;;  %v14199_v7 = vld [vmem:[#allocation12 + $0x5c0] ss:$16 sps:$4 sm:$0xff]   ;;  %v13346_v20 = vcombine.low %v1263_v2, %v1271_v3 }
 0x568   :  { %7793 = vmatprep.subr.bf16.mxu1 %v13235_v10  ;;  %v13981_v10 = vadd.f32 %v15509_v0, %v1297_v54  ;;  %v14246_v54 = vld [vmem:[#allocation12 + $0x8c4] ss:$16 sps:$4 sm:$0xff]  }
 0x56a   :  { %11028 = vmatpush1.bf16.msra.mxu0 %v14181_v11  ;;  %v13347_v11 = vcombine.high %v1263_v2, %v1271_v3  ;;  %v7822_v57 = vmax.f32 %v13981_v10, 0.0  ;;  %v14249_v2 = vld [vmem:[#allocation12 + $0x2e4] ss:$16 sps:$4 sm:$0xff]   ;;  %v14250_v3 = vld [vmem:[#allocation12 + $0x8e0] ss:$16 sps:$4 sm:$0xff]  }
 0x56b   :  { %7794 = vmatpush1.bf16.msra.mxu1 %v13234_v12  ;;  %11029 = vmatprep.subr.bf16.mxu0 %v14186_v18  ;;  %v13980_v12 = vadd.f32 %v15499_v44, %v1293_v62  ;;  %v13986_v18 = vadd.f32 %v15535_v14, %v1317_v4  ;;  %v14213_v44 = vld [vmem:[#allocation12 + $0x224] ss:$16 sps:$4 sm:$0xff]   ;;  %v14247_v4 = vld [vmem:[#allocation12 + $0x2e0] ss:$16 sps:$4 sm:$0xff]  }
 0x56c   :  { %7795 = vmatprep.subr.bf16.mxu1 %v13251_v19  ;;  %v14202_v19 = vld [vmem:[#allocation12 + $0x5e0] ss:$16 sps:$4 sm:$0xff]   ;;  %v15580_v15 = vpack.c.bf16 %v7822_v57, %v7822_v57  ;;  %v14252_v62 = vld [vmem:[#allocation12 + $0x8e4] ss:$16 sps:$4 sm:$0xff]  }
 0x56d   :  { %v7821_v0 = vmax.f32 %v13980_v12, 0.0  ;;  %v14255_v10 = vld [vmem:[#allocation12 + $0x304] ss:$16 sps:$4 sm:$0xff]  }
 0x56e   :  { %11030 = vmatpush1.bf16.msra.mxu0 %v14184_v21  ;;  %v14210_v21 = vld [vmem:[#allocation12 + $0x804] ss:$16 sps:$4 sm:$0xff]  }
 0x56f   :  { %7796 = vmatpush1.bf16.msra.mxu1 %v13250_v22  ;;  %11031 = vmatprep.subr.bf16.mxu0 %v14189_v1  ;;  %v14207_v22 = vld [vmem:[#allocation12 + $0x204] ss:$16 sps:$4 sm:$0xff]   ;;  %v7827_v1 = vmax.f32 %v13986_v18, 0.0  ;;  %v15582_v14 = vpack.c.bf16 %v7821_v0, %v7821_v0  ;;  %v14262_v18 = vld [vmem:[#allocation12 + $0x920] ss:$16 sps:$4 sm:$0xff]  }
 0x570   :  { %7797 = vmatprep.subr.bf16.mxu1 %v13267_v23  ;;  %v14208_v23 = vld [vmem:[#allocation12 + $0x800] ss:$16 sps:$4 sm:$0xff]   ;;  %v14261_v12 = vld [vmem:[#allocation12 + $0x324] ss:$16 sps:$4 sm:$0xff]  }
 0x571   :  { %v14270_v57 = vld [vmem:[#allocation12 + $0x944] ss:$16 sps:$4 sm:$0xff]  }
 0x572   :  { %11032 = vmatpush1.bf16.msra.mxu0 %v14187_v25  ;;  %v14216_v25 = vld [vmem:[#allocation12 + $0x824] ss:$16 sps:$4 sm:$0xff]  }
 0x573   :  { %7798 = vmatpush1.bf16.msra.mxu1 %v13266_v26  ;;  %11033 = vmatprep.subr.bf16.mxu0 %v14192_v17  ;;  %v15585_v26 = vpack.c.bf16 %v7827_v1, %v7827_v1  ;;  %v14214_v17 = vld [vmem:[#allocation12 + $0x820] ss:$16 sps:$4 sm:$0xff]   ;;  %v14276_v0 = vld [vmem:[#allocation12 + $0x964] ss:$16 sps:$4 sm:$0xff]  }
 0x574   :  { %7799 = vmatprep.subr.bf16.mxu1 %v13283_v27  ;;  %v14211_v27 = vld [vmem:[#allocation12 + $0x220] ss:$16 sps:$4 sm:$0xff]   ;;  %v14273_v1 = vld [vmem:[#allocation12 + $0x364] ss:$16 sps:$4 sm:$0xff]  }
 0x576   :  { %11034 = vmatpush1.bf16.msra.mxu0 %v14190_v30  ;;  %v14220_v30 = vld [vmem:[#allocation12 + $0x840] ss:$16 sps:$4 sm:$0xff]  }
 0x577   :  { %7800 = vmatpush1.bf16.msra.mxu1 %v13282_v35  ;;  %11035 = vmatprep.subr.bf16.mxu0 %v14195_v31  ;;  %v14217_v35 = vld [vmem:[#allocation12 + $0x240] ss:$16 sps:$4 sm:$0xff]   ;;  %v14228_v31 = vld [vmem:[#allocation12 + $0x864] ss:$16 sps:$4 sm:$0xff]  }
 0x578   :  { %7801 = vmatprep.subr.bf16.mxu1 %v13299_v33  ;;  %v14226_v33 = vld [vmem:[#allocation12 + $0x860] ss:$16 sps:$4 sm:$0xff]  }
 0x57a   :  { %11036 = vmatpush1.bf16.msra.mxu0 %v14193_v39  ;;  %v14231_v39 = vld [vmem:[#allocation12 + $0x284] ss:$16 sps:$4 sm:$0xff]  }
 0x57b   :  { %7802 = vmatpush1.bf16.msra.mxu1 %v13298_v43  ;;  %11037 = vmatprep.subr.bf16.mxu0 %v14198_v45  ;;  %v14232_v43 = vld [vmem:[#allocation12 + $0x880] ss:$16 sps:$4 sm:$0xff]  }
 0x57c   :  { %7803 = vmatprep.subr.bf16.mxu1 %v13315_v46  ;;  %v14229_v45 = vld [vmem:[#allocation12 + $0x280] ss:$16 sps:$4 sm:$0xff]   ;;  %v14240_v46 = vld [vmem:[#allocation12 + $0x8a4] ss:$16 sps:$4 sm:$0xff]  }
 0x57e   :  { %11038 = vmatpush1.bf16.msra.mxu0 %v14196_v53  ;;  %v14235_v53 = vld [vmem:[#allocation12 + $0x2a0] ss:$16 sps:$4 sm:$0xff]  }
 0x57f   :  { %7804 = vmatpush1.bf16.msra.mxu1 %v13314_v60  ;;  %11039 = vmatprep.subr.bf16.mxu0 %v14201_v61  ;;  %v14243_v60 = vld [vmem:[#allocation12 + $0x2c4] ss:$16 sps:$4 sm:$0xff]   ;;  %v14244_v61 = vld [vmem:[#allocation12 + $0x8c0] ss:$16 sps:$4 sm:$0xff]  }
 0x580   :  { %7805 = vmatprep.subr.bf16.mxu1 %v13331_v56  ;;  %v14241_v56 = vld [vmem:[#allocation12 + $0x2c0] ss:$16 sps:$4 sm:$0xff]  }
 0x582   :  { %11040 = vmatpush1.bf16.msra.mxu0 %v14199_v7  ;;  %v14258_v7 = vld [vmem:[#allocation12 + $0x904] ss:$16 sps:$4 sm:$0xff]  }
 0x583   :  { %7806 = vmatpush1.bf16.msra.mxu1 %v13330_v5  ;;  %11041 = vmatprep.subr.bf16.mxu0 %v14204_v42  ;;  %v14256_v5 = vld [vmem:[#allocation12 + $0x900] ss:$16 sps:$4 sm:$0xff]  }
 0x584   :  { %7807 = vmatprep.subr.bf16.mxu1 %v13347_v11  ;;  %v14253_v42 = vld [vmem:[#allocation12 + $0x300] ss:$16 sps:$4 sm:$0xff]   ;;  %v14264_v11 = vld [vmem:[#allocation12 + $0x924] ss:$16 sps:$4 sm:$0xff]  }
 0x586   :  { %11042 = vmatpush1.bf16.msra.mxu0 %v14202_v19  ;;  %v14259_v19 = vld [vmem:[#allocation12 + $0x320] ss:$16 sps:$4 sm:$0xff]  }
 0x587   :  { %7808 = vmatpush1.bf16.msra.mxu1 %v13346_v20  ;;  %11093 = vmatprep.subr.bf16.mxu0 %v14210_v21  ;;  %v14267_v20 = vld [vmem:[#allocation12 + $0x344] ss:$16 sps:$4 sm:$0xff]   ;;  %v14268_v21 = vld [vmem:[#allocation12 + $0x940] ss:$16 sps:$4 sm:$0xff]  }
 0x588   :  { %10970 = vmatprep.subr.bf16.mxu1 %v14207_v22  ;;  %v14265_v22 = vld [vmem:[#allocation12 + $0x340] ss:$16 sps:$4 sm:$0xff]  }
 0x589   :  { %11044 = vmatmul.mubr.bf16.vlgmr.msra.gmra.mrb[20].mxu0 %v15580_v15 }
 0x58a   :  { %7810 = vmatmul.mubr.bf16.vlgmr.msra.gmra.mrb[16].mxu1 %v15451_v37  ;;  %11094 = vmatpush1.bf16.msra.mxu0 %v14208_v23  ;;  %v14225_v37 = vld [vmem:[#allocation12 + $0x264] ss:$16 sps:$4 sm:$0xff]   ;;  %v14274_v23 = vld [vmem:[#allocation12 + $0x960] ss:$16 sps:$4 sm:$0xff]  }
 0x58b   :  { %10971 = vmatpush1.bf16.msra.mxu1 %v14205_v24  ;;  %11002 = vmatprep.mubr.bf16.mxu1 %v15582_v14  ;;  %v14271_v24 = vld [vmem:[#allocation12 + $0x360] ss:$16 sps:$4 sm:$0xff]  }
 0x58c   :  { %11125 = vmatprep.mubr.bf16.mxu0 %v15585_v26  ;;  %10972 = vmatprep.subr.bf16.mxu1 %v14213_v44  ;;  %v14282_v44 = vld [vmem:[#allocation12 + $0x984] ss:$16 sps:$4 sm:$0xff]  }
 0x58d   :  { %11095 = vmatprep.subr.bf16.mxu0 %v14216_v25  ;;  %v14279_v25 = vld [vmem:[#allocation12 + $0x384] ss:$16 sps:$4 sm:$0xff]  }
 0x58e   :  { %11096 = vmatpush1.bf16.msra.mxu0 %v14214_v17  ;;  %v14280_v17 = vld [vmem:[#allocation12 + $0x980] ss:$16 sps:$4 sm:$0xff]  }
 0x58f   :  { %10973 = vmatpush1.bf16.msra.mxu1 %v14211_v27  ;;  %11097 = vmatprep.subr.bf16.mxu0 %v14222_v28  ;;  %v14277_v27 = vld [vmem:[#allocation12 + $0x380] ss:$16 sps:$4 sm:$0xff]   ;;  %v14288_v28 = vld [vmem:[#allocation12 + $0x9a4] ss:$16 sps:$4 sm:$0xff]  }
 0x590   :  { %10974 = vmatprep.subr.bf16.mxu1 %v14219_v29  ;;  %v15591_v29 = vsub.s32 2, %v15473_v63 }
 0x592   :  { %11098 = vmatpush1.bf16.msra.mxu0 %v14220_v30  ;;  %v14285_v30 = vld [vmem:[#allocation12 + $0x3a4] ss:$16 sps:$4 sm:$0xff]  }
 0x593   :  { %10975 = vmatpush1.bf16.msra.mxu1 %v14217_v35  ;;  %11099 = vmatprep.subr.bf16.mxu0 %v14228_v31  ;;  %v1308_v35 = vsub.s32 7, %v15473_v63  ;;  %v14286_v31 = vld [vmem:[#allocation12 + $0x9a0] ss:$16 sps:$4 sm:$0xff]  }
 0x594   :  { %10976 = vmatprep.subr.bf16.mxu1 %v14225_v37  ;;  %v1313_v37 = vrot.slane %v15571_v59, %v15476_v9 }
 0x596   :  { %11100 = vmatpush1.bf16.msra.mxu0 %v14226_v33  ;;  %v14283_v33 = vld [vmem:[#allocation12 + $0x3a0] ss:$16 sps:$4 sm:$0xff]  }
 0x597   :  { %10977 = vmatpush1.bf16.msra.mxu1 %v14223_v34  ;;  %11101 = vmatprep.subr.bf16.mxu0 %v14234_v38  ;;  %v14294_v34 = vld [vmem:[#allocation12 + $0x9c4] ss:$16 sps:$4 sm:$0xff]   ;;  %v1289_v38 = vrot.slane %v15545_v58, %v15591_v29 }
 0x598   :  { %10978 = vmatprep.subr.bf16.mxu1 %v14231_v39  ;;  %v14291_v39 = vld [vmem:[#allocation12 + $0x3c4] ss:$16 sps:$4 sm:$0xff]  }
 0x59a   :  { %11102 = vmatpush1.bf16.msra.mxu0 %v14232_v43  ;;  %v1309_v43 = vrot.slane %v15545_v58, %v1308_v35 }
 0x59b   :  { %10979 = vmatpush1.bf16.msra.mxu1 %v14229_v45  ;;  %11103 = vmatprep.subr.bf16.mxu0 %v14240_v46  ;;  %v14292_v45 = vld [vmem:[#allocation12 + $0x9c0] ss:$16 sps:$4 sm:$0xff]   ;;  %v13985_v46 = vadd.f32 %v15533_v8, %v1313_v37  ;;  %v14303_v8 = vld [vmem:[#allocation12 + $0x604] ss:$16 sps:$4 sm:$0xff]  }
 0x59c   :  { %10980 = vmatprep.subr.bf16.mxu1 %v14237_v50  ;;  %v14289_v50 = vld [vmem:[#allocation12 + $0x3c0] ss:$16 sps:$4 sm:$0xff]  }
 0x59d   :  { %v14331_v37 = vld [vmem:[#allocation12 + $0x6a0] ss:$16 sps:$4 sm:$0xff]  }
 0x59e   :  { %11104 = vmatpush1.bf16.msra.mxu0 %v14238_v51  ;;  %v14300_v51 = vld [vmem:[#allocation12 + $0x9e4] ss:$16 sps:$4 sm:$0xff]  }
 0x59f   :  { %10981 = vmatpush1.bf16.msra.mxu1 %v14235_v53  ;;  %11105 = vmatprep.subr.bf16.mxu0 %v14246_v54  ;;  %v13979_v53 = vadd.f32 %v15497_v40, %v1289_v38  ;;  %v14297_v54 = vld [vmem:[#allocation12 + $0x3e4] ss:$16 sps:$4 sm:$0xff]   ;;  %v14301_v40 = vld [vmem:[#allocation12 + $0x600] ss:$16 sps:$4 sm:$0xff]  }
 0x5a0   :  { %10982 = vmatprep.subr.bf16.mxu1 %v14243_v60  ;;  %v13984_v60 = vadd.f32 %v15523_v36, %v1309_v43  ;;  %v14309_v36 = vld [vmem:[#allocation12 + $0x624] ss:$16 sps:$4 sm:$0xff]  }
 0x5a1   :  { %v14339_v38 = vld [vmem:[#allocation12 + $0x6c4] ss:$16 sps:$4 sm:$0xff]  }
 0x5a2   :  { %11106 = vmatpush1.bf16.msra.mxu0 %v14244_v61  ;;  %v14298_v61 = vld [vmem:[#allocation12 + $0x9e0] ss:$16 sps:$4 sm:$0xff]  }
 0x5a3   :  { %10983 = vmatpush1.bf16.msra.mxu1 %v14241_v56  ;;  %11107 = vmatprep.subr.bf16.mxu0 %v14252_v62  ;;  %v7826_v56 = vmax.f32 %v13985_v46, 0.0  ;;  %v14295_v62 = vld [vmem:[#allocation12 + $0x3e0] ss:$16 sps:$4 sm:$0xff]  }
 0x5a4   :  { %10984 = vmatprep.subr.bf16.mxu1 %v14249_v2  ;;  %v14306_v2 = vld [vmem:[#allocation12 + $0xc04] ss:$16 sps:$4 sm:$0xff]   ;;  %v14340_v46 = vld [vmem:[#allocation12 + $0xcc0] ss:$16 sps:$4 sm:$0xff]  }
 0x5a6   :  { %11108 = vmatpush1.bf16.msra.mxu0 %v14250_v3  ;;  %v7820_v3 = vmax.f32 %v13979_v53, 0.0  ;;  %v14348_v53 = vld [vmem:[#allocation12 + $0xce4] ss:$16 sps:$4 sm:$0xff]  }
 0x5a7   :  { %10985 = vmatpush1.bf16.msra.mxu1 %v14247_v4  ;;  %11109 = vmatprep.subr.bf16.mxu0 %v14258_v7  ;;  %v7825_v4 = vmax.f32 %v13984_v60, 0.0  ;;  %v14304_v7 = vld [vmem:[#allocation12 + $0xc00] ss:$16 sps:$4 sm:$0xff]  }
 0x5a8   :  { %10986 = vmatprep.subr.bf16.mxu1 %v14255_v10  ;;  %v15604_v10 = vpack.c.bf16 %v7826_v56, %v7826_v56  ;;  %v14343_v56 = vld [vmem:[#allocation12 + $0x6e0] ss:$16 sps:$4 sm:$0xff]  }
 0x5aa   :  { %11110 = vmatpush1.bf16.msra.mxu0 %v14256_v5  ;;  %v15606_v5 = vpack.c.bf16 %v7820_v3, %v7820_v3  ;;  %v14352_v3 = vld [vmem:[#allocation12 + $0xd00] ss:$16 sps:$4 sm:$0xff]  }
 0x5ab   :  { %10987 = vmatpush1.bf16.msra.mxu1 %v14253_v42  ;;  %11111 = vmatprep.subr.bf16.mxu0 %v14264_v11  ;;  %v14312_v42 = vld [vmem:[#allocation12 + $0xc24] ss:$16 sps:$4 sm:$0xff]   ;;  %v15608_v11 = vpack.c.bf16 %v7825_v4, %v7825_v4 }
 0x5ac   :  { %10988 = vmatprep.subr.bf16.mxu1 %v14261_v12  ;;  %v14310_v12 = vld [vmem:[#allocation12 + $0xc20] ss:$16 sps:$4 sm:$0xff]   ;;  %v14360_v4 = vld [vmem:[#allocation12 + $0xd24] ss:$16 sps:$4 sm:$0xff]  }
 0x5ae   :  { %11112 = vmatpush1.bf16.msra.mxu0 %v14262_v18  ;;  %v14307_v18 = vld [vmem:[#allocation12 + $0x620] ss:$16 sps:$4 sm:$0xff]  }
 0x5af   :  { %10989 = vmatpush1.bf16.msra.mxu1 %v14259_v19  ;;  %11113 = vmatprep.subr.bf16.mxu0 %v14270_v57  ;;  %v14318_v19 = vld [vmem:[#allocation12 + $0xc44] ss:$16 sps:$4 sm:$0xff]  }
 0x5b0   :  { %10990 = vmatprep.subr.bf16.mxu1 %v14267_v20  ;;  %v14315_v57 = vld [vmem:[#allocation12 + $0x644] ss:$16 sps:$4 sm:$0xff]   ;;  %v14316_v20 = vld [vmem:[#allocation12 + $0xc40] ss:$16 sps:$4 sm:$0xff]  }
 0x5b2   :  { %11114 = vmatpush1.bf16.msra.mxu0 %v14268_v21  ;;  %v14313_v21 = vld [vmem:[#allocation12 + $0x640] ss:$16 sps:$4 sm:$0xff]  }
 0x5b3   :  { %10991 = vmatpush1.bf16.msra.mxu1 %v14265_v22  ;;  %11115 = vmatprep.subr.bf16.mxu0 %v14276_v0  ;;  %v14324_v22 = vld [vmem:[#allocation12 + $0xc64] ss:$16 sps:$4 sm:$0xff]  }
 0x5b4   :  { %10992 = vmatprep.subr.bf16.mxu1 %v14273_v1  ;;  %v14321_v0 = vld [vmem:[#allocation12 + $0x664] ss:$16 sps:$4 sm:$0xff]   ;;  %v14322_v1 = vld [vmem:[#allocation12 + $0xc60] ss:$16 sps:$4 sm:$0xff]  }
 0x5b6   :  { %11116 = vmatpush1.bf16.msra.mxu0 %v14274_v23  ;;  %v14319_v23 = vld [vmem:[#allocation12 + $0x660] ss:$16 sps:$4 sm:$0xff]  }
 0x5b7   :  { %10993 = vmatpush1.bf16.msra.mxu1 %v14271_v24  ;;  %11117 = vmatprep.subr.bf16.mxu0 %v14282_v44  ;;  %v14330_v24 = vld [vmem:[#allocation12 + $0xc84] ss:$16 sps:$4 sm:$0xff]  }
 0x5b8   :  { %10994 = vmatprep.subr.bf16.mxu1 %v14279_v25  ;;  %v14327_v44 = vld [vmem:[#allocation12 + $0x684] ss:$16 sps:$4 sm:$0xff]   ;;  %v14328_v25 = vld [vmem:[#allocation12 + $0xc80] ss:$16 sps:$4 sm:$0xff]  }
 0x5ba   :  { %11118 = vmatpush1.bf16.msra.mxu0 %v14280_v17  ;;  %v14325_v17 = vld [vmem:[#allocation12 + $0x680] ss:$16 sps:$4 sm:$0xff]  }
 0x5bb   :  { %10995 = vmatpush1.bf16.msra.mxu1 %v14277_v27  ;;  %11119 = vmatprep.subr.bf16.mxu0 %v14288_v28  ;;  %v14336_v27 = vld [vmem:[#allocation12 + $0xca4] ss:$16 sps:$4 sm:$0xff]  }
 0x5bc   :  { %10996 = vmatprep.subr.bf16.mxu1 %v14285_v30  ;;  %v14333_v28 = vld [vmem:[#allocation12 + $0x6a4] ss:$16 sps:$4 sm:$0xff]   ;;  %v1333_v30 = vrot.slane %v15571_v59, %v1300_v55 }
 0x5be   :  { %11120 = vmatpush1.bf16.msra.mxu0 %v14286_v31  ;;  %v14334_v31 = vld [vmem:[#allocation12 + $0xca0] ss:$16 sps:$4 sm:$0xff]  }
 0x5bf   :  { %10997 = vmatpush1.bf16.msra.mxu1 %v14283_v33  ;;  %11121 = vmatprep.subr.bf16.mxu0 %v14294_v34  ;;  %v14342_v33 = vld [vmem:[#allocation12 + $0xcc4] ss:$16 sps:$4 sm:$0xff]  }
 0x5c0   :  { %10998 = vmatprep.subr.bf16.mxu1 %v14291_v39 }
 0x5c2   :  { %11122 = vmatpush1.bf16.msra.mxu0 %v14292_v45 }
 0x5c3   :  { %10999 = vmatpush1.bf16.msra.mxu1 %v14289_v50  ;;  %11123 = vmatprep.subr.bf16.mxu0 %v14300_v51  ;;  %v14337_v51 = vld [vmem:[#allocation12 + $0x6c0] ss:$16 sps:$4 sm:$0xff]  }
 0x5c4   :  { %11000 = vmatprep.subr.bf16.mxu1 %v14297_v54  ;;  %v14345_v54 = vld [vmem:[#allocation12 + $0x6e4] ss:$16 sps:$4 sm:$0xff]  }
 0x5c6   :  { %11124 = vmatpush1.bf16.msra.mxu0 %v14298_v61  ;;  %v14346_v61 = vld [vmem:[#allocation12 + $0xce0] ss:$16 sps:$4 sm:$0xff]  }
 0x5c7   :  { %11001 = vmatpush1.bf16.msra.mxu1 %v14295_v62  ;;  %11175 = vmatprep.subr.bf16.mxu0 %v14306_v2  ;;  %v14354_v62 = vld [vmem:[#allocation12 + $0xd04] ss:$16 sps:$4 sm:$0xff]  }
 0x5c8   :  { %11052 = vmatprep.subr.bf16.mxu1 %v14303_v8  ;;  %v14351_v2 = vld [vmem:[#allocation12 + $0x704] ss:$16 sps:$4 sm:$0xff]   ;;  %v14349_v8 = vld [vmem:[#allocation12 + $0x700] ss:$16 sps:$4 sm:$0xff]  }
 0x5c9   :  { %11126 = vmatmul.mubr.bf16.vlgmr.msra.gmra.mrb[24].mxu0 %v15604_v10 }
 0x5ca   :  { %11003 = vmatmul.mubr.bf16.vlgmr.msra.gmra.mrb[20].mxu1 %v15606_v5  ;;  %11176 = vmatpush1.bf16.msra.mxu0 %v14304_v7  ;;  %v14357_v7 = vld [vmem:[#allocation12 + $0x724] ss:$16 sps:$4 sm:$0xff]  }
 0x5cb   :  { %11053 = vmatpush1.bf16.msra.mxu1 %v14301_v40  ;;  %11084 = vmatprep.mubr.bf16.mxu1 %v15608_v11  ;;  %v14358_v40 = vld [vmem:[#allocation12 + $0xd20] ss:$16 sps:$4 sm:$0xff]  }
 0x5cc   :  { %11054 = vmatprep.subr.bf16.mxu1 %v14309_v36  ;;  %11177 = vmatprep.subr.bf16.mxu0 %v14312_v42  ;;  %v14355_v36 = vld [vmem:[#allocation12 + $0x720] ss:$16 sps:$4 sm:$0xff]   ;;  %v14366_v42 = vld [vmem:[#allocation12 + $0xd44] ss:$16 sps:$4 sm:$0xff]  }
 0x5ce   :  { %11178 = vmatpush1.bf16.msra.mxu0 %v14310_v12  ;;  %v14363_v12 = vld [vmem:[#allocation12 + $0x744] ss:$16 sps:$4 sm:$0xff]  }
 0x5cf   :  { %11055 = vmatpush1.bf16.msra.mxu1 %v14307_v18  ;;  %11179 = vmatprep.subr.bf16.mxu0 %v14318_v19  ;;  %v14364_v18 = vld [vmem:[#allocation12 + $0xd40] ss:$16 sps:$4 sm:$0xff]  }
 0x5d0   :  { %11056 = vmatprep.subr.bf16.mxu1 %v14315_v57  ;;  %v14361_v19 = vld [vmem:[#allocation12 + $0x740] ss:$16 sps:$4 sm:$0xff]   ;;  %v14372_v57 = vld [vmem:[#allocation12 + $0xd64] ss:$16 sps:$4 sm:$0xff]  }
 0x5d2   :  { %11180 = vmatpush1.bf16.msra.mxu0 %v14316_v20  ;;  %v14369_v20 = vld [vmem:[#allocation12 + $0x764] ss:$16 sps:$4 sm:$0xff]  }
 0x5d3   :  { %11057 = vmatpush1.bf16.msra.mxu1 %v14313_v21  ;;  %11181 = vmatprep.subr.bf16.mxu0 %v14324_v22  ;;  %v14370_v21 = vld [vmem:[#allocation12 + $0xd60] ss:$16 sps:$4 sm:$0xff]  }
 0x5d4   :  { %11058 = vmatprep.subr.bf16.mxu1 %v14321_v0  ;;  %v14367_v22 = vld [vmem:[#allocation12 + $0x760] ss:$16 sps:$4 sm:$0xff]   ;;  %v14378_v0 = vld [vmem:[#allocation12 + $0xd84] ss:$16 sps:$4 sm:$0xff]  }
 0x5d6   :  { %11182 = vmatpush1.bf16.msra.mxu0 %v14322_v1  ;;  %v14375_v1 = vld [vmem:[#allocation12 + $0x784] ss:$16 sps:$4 sm:$0xff]  }
 0x5d7   :  { %11059 = vmatpush1.bf16.msra.mxu1 %v14319_v23  ;;  %11183 = vmatprep.subr.bf16.mxu0 %v14330_v24  ;;  %v14376_v23 = vld [vmem:[#allocation12 + $0xd80] ss:$16 sps:$4 sm:$0xff]  }
 0x5d8   :  { %11060 = vmatprep.subr.bf16.mxu1 %v14327_v44  ;;  %v14373_v24 = vld [vmem:[#allocation12 + $0x780] ss:$16 sps:$4 sm:$0xff]   ;;  %v14384_v44 = vld [vmem:[#allocation12 + $0xda4] ss:$16 sps:$4 sm:$0xff]  }
 0x5da   :  { %11184 = vmatpush1.bf16.msra.mxu0 %v14328_v25  ;;  %v1304_v25 = vsub.s32 6, %v15473_v63  ;;  %v14594_v63 = vld [vmem:[#allocation12 + $0x80c] ss:$16 sps:$4 sm:$0xff]  }
 0x5db   :  { %11061 = vmatpush1.bf16.msra.mxu1 %v14325_v17  ;;  %11185 = vmatprep.subr.bf16.mxu0 %v14336_v27  ;;  %v14381_v17 = vld [vmem:[#allocation12 + $0x7a4] ss:$16 sps:$4 sm:$0xff]   ;;  %v14382_v27 = vld [vmem:[#allocation12 + $0xda0] ss:$16 sps:$4 sm:$0xff]  }
 0x5dc   :  { %v15616_v34 = vpop.f32.mrb[12].mxu0  ;;  %11062 = vmatprep.subr.bf16.mxu1 %v14333_v28  ;;  %v1329_v28 = vrot.slane %v15571_v59, %v1296_v41  ;;  %v14396_v41 = vld [vmem:[#allocation12 + $0xde4] ss:$16 sps:$4 sm:$0xff]  }
 0x5dd   :  { %v7649_v39 = vpop.f32.mrb[13].mxu0 }
 0x5de   :  { %v13990_v43 = vadd.f32 %v7649_v39, %v1333_v30  ;;  %v7651_v45 = vpop.f32.mrb[14].mxu0  ;;  %11186 = vmatpush1.bf16.msra.mxu0 %v14334_v31  ;;  %v14379_v30 = vld [vmem:[#allocation12 + $0x7a0] ss:$16 sps:$4 sm:$0xff]   ;;  %v14390_v31 = vld [vmem:[#allocation12 + $0xdc4] ss:$16 sps:$4 sm:$0xff]  }
 0x5df   :  { %11063 = vmatpush1.bf16.msra.mxu1 %v14331_v37  ;;  %v7652_v50 = vpop.f32.mrb[15].mxu0  ;;  %11187 = vmatprep.subr.bf16.mxu0 %v14342_v33  ;;  %v1305_v37 = vrot.slane %v15545_v58, %v1304_v25  ;;  %v14387_v33 = vld [vmem:[#allocation12 + $0x7c4] ss:$16 sps:$4 sm:$0xff]   ;;  %v14388_v39 = vld [vmem:[#allocation12 + $0xdc0] ss:$16 sps:$4 sm:$0xff]  }
 0x5e0   :  { %v7831_v55 = vmax.f32 %v13990_v43, 0.0  ;;  %11064 = vmatprep.subr.bf16.mxu1 %v14339_v38  ;;  %v1325_v38 = vrot.slane %v15571_v59, %v15566_v48  ;;  %v13989_v43 = vadd.f32 %v15616_v34, %v1329_v28  ;;  %v14385_v45 = vld [vmem:[#allocation12 + $0x7c0] ss:$16 sps:$4 sm:$0xff]   ;;  %v14393_v50 = vld [vmem:[#allocation12 + $0x7e4] ss:$16 sps:$4 sm:$0xff]  }
 0x5e1   :  { %v14394_v58 = vld [vmem:[#allocation12 + $0xde0] ss:$16 sps:$4 sm:$0xff]   ;;  %v14399_v34 = vld [vmem:[#allocation12 + $0xa04] ss:$16 sps:$4 sm:$0xff]  }
 0x5e2   :  { %v15618_v60 = vpack.c.bf16 %v7831_v55, %v7831_v55  ;;  %11188 = vmatpush1.bf16.msra.mxu0 %v14340_v46  ;;  %v13983_v46 = vadd.f32 %v15521_v32, %v1305_v37  ;;  %v14391_v55 = vld [vmem:[#allocation12 + $0x7e0] ss:$16 sps:$4 sm:$0xff]  }
 0x5e3   :  { %11065 = vmatpush1.bf16.msra.mxu1 %v14337_v51  ;;  %11189 = vmatprep.subr.bf16.mxu0 %v14348_v53  ;;  %v13988_v51 = vadd.f32 %v15562_v52, %v1325_v38  ;;  %v7830_v53 = vmax.f32 %v13989_v43, 0.0  ;;  %v14397_v32 = vld [vmem:[#allocation12 + $0xa00] ss:$16 sps:$4 sm:$0xff]   ;;  %v14405_v52 = vld [vmem:[#allocation12 + $0xa24] ss:$16 sps:$4 sm:$0xff]  }
 0x5e4   :  { %11207 = vmatprep.mubr.bf16.mxu0 %v15618_v60  ;;  %11066 = vmatprep.subr.bf16.mxu1 %v14345_v54  ;;  %v14402_v54 = vld [vmem:[#allocation12 + $0xc] ss:$16 sps:$4 sm:$0xff]  }
 0x5e5   :  { %v14444_v43 = vld [vmem:[#allocation12 + $0xec] ss:$16 sps:$4 sm:$0xff]  }
 0x5e6   :  { %11190 = vmatpush1.bf16.msra.mxu0 %v14346_v61  ;;  %v7824_v61 = vmax.f32 %v13983_v46, 0.0  ;;  %v14439_v46 = vld [vmem:[#allocation12 + $0xae0] ss:$16 sps:$4 sm:$0xff]  }
 0x5e7   :  { %11067 = vmatpush1.bf16.msra.mxu1 %v14343_v56  ;;  %11191 = vmatprep.subr.bf16.mxu0 %v14354_v62  ;;  %v7829_v56 = vmax.f32 %v13988_v51, 0.0  ;;  %v14400_v62 = vld [vmem:[#allocation12 + $0x8] ss:$16 sps:$4 sm:$0xff]   ;;  %v14447_v51 = vld [vmem:[#allocation12 + $0xb04] ss:$16 sps:$4 sm:$0xff]  }
 0x5e8   :  { %11068 = vmatprep.subr.bf16.mxu1 %v14351_v2  ;;  %v15633_v2 = vpack.c.bf16 %v7830_v53, %v7830_v53  ;;  %v14445_v53 = vld [vmem:[#allocation12 + $0xb00] ss:$16 sps:$4 sm:$0xff]  }
 0x5ea   :  { %11192 = vmatpush1.bf16.msra.mxu0 %v14352_v3  ;;  %v15635_v3 = vpack.c.bf16 %v7824_v61, %v7824_v61  ;;  %v14454_v61 = vld [vmem:[#allocation12 + $0x128] ss:$16 sps:$4 sm:$0xff]  }
 0x5eb   :  { %11069 = vmatpush1.bf16.msra.mxu1 %v14349_v8  ;;  %11193 = vmatprep.subr.bf16.mxu0 %v14360_v4  ;;  %v15637_v8 = vpack.c.bf16 %v7829_v56, %v7829_v56  ;;  %v14408_v4 = vld [vmem:[#allocation12 + $0x2c] ss:$16 sps:$4 sm:$0xff]  }
 0x5ec   :  { %11070 = vmatprep.subr.bf16.mxu1 %v14357_v7  ;;  %v14406_v7 = vld [vmem:[#allocation12 + $0x28] ss:$16 sps:$4 sm:$0xff]   ;;  %v14462_v56 = vld [vmem:[#allocation12 + $0x14c] ss:$16 sps:$4 sm:$0xff]  }
 0x5ee   :  { %11194 = vmatpush1.bf16.msra.mxu0 %v14358_v40  ;;  %v14403_v40 = vld [vmem:[#allocation12 + $0xa20] ss:$16 sps:$4 sm:$0xff]  }
 0x5ef   :  { %11071 = vmatpush1.bf16.msra.mxu1 %v14355_v36  ;;  %11195 = vmatprep.subr.bf16.mxu0 %v14366_v42  ;;  %v14414_v36 = vld [vmem:[#allocation12 + $0x4c] ss:$16 sps:$4 sm:$0xff]   ;;  %v14411_v42 = vld [vmem:[#allocation12 + $0xa44] ss:$16 sps:$4 sm:$0xff]  }
 0x5f0   :  { %11072 = vmatprep.subr.bf16.mxu1 %v14363_v12  ;;  %v14412_v12 = vld [vmem:[#allocation12 + $0x48] ss:$16 sps:$4 sm:$0xff]  }
 0x5f2   :  { %11196 = vmatpush1.bf16.msra.mxu0 %v14364_v18  ;;  %v14409_v18 = vld [vmem:[#allocation12 + $0xa40] ss:$16 sps:$4 sm:$0xff]  }
 0x5f3   :  { %11073 = vmatpush1.bf16.msra.mxu1 %v14361_v19  ;;  %11197 = vmatprep.subr.bf16.mxu0 %v14372_v57  ;;  %v14420_v19 = vld [vmem:[#allocation12 + $0x6c] ss:$16 sps:$4 sm:$0xff]   ;;  %v14417_v57 = vld [vmem:[#allocation12 + $0xa64] ss:$16 sps:$4 sm:$0xff]  }
 0x5f4   :  { %11074 = vmatprep.subr.bf16.mxu1 %v14369_v20  ;;  %v14418_v20 = vld [vmem:[#allocation12 + $0x68] ss:$16 sps:$4 sm:$0xff]  }
 0x5f6   :  { %11198 = vmatpush1.bf16.msra.mxu0 %v14370_v21  ;;  %v14415_v21 = vld [vmem:[#allocation12 + $0xa60] ss:$16 sps:$4 sm:$0xff]  }
 0x5f7   :  { %11075 = vmatpush1.bf16.msra.mxu1 %v14367_v22  ;;  %11199 = vmatprep.subr.bf16.mxu0 %v14378_v0  ;;  %v14426_v22 = vld [vmem:[#allocation12 + $0x8c] ss:$16 sps:$4 sm:$0xff]   ;;  %v14423_v0 = vld [vmem:[#allocation12 + $0xa84] ss:$16 sps:$4 sm:$0xff]  }
 0x5f8   :  { %11076 = vmatprep.subr.bf16.mxu1 %v14375_v1  ;;  %v14421_v1 = vld [vmem:[#allocation12 + $0xa80] ss:$16 sps:$4 sm:$0xff]  }
 0x5fa   :  { %11200 = vmatpush1.bf16.msra.mxu0 %v14376_v23  ;;  %v14432_v23 = vld [vmem:[#allocation12 + $0xac] ss:$16 sps:$4 sm:$0xff]  }
 0x5fb   :  { %11077 = vmatpush1.bf16.msra.mxu1 %v14373_v24  ;;  %11201 = vmatprep.subr.bf16.mxu0 %v14384_v44  ;;  %v14429_v24 = vld [vmem:[#allocation12 + $0xaa4] ss:$16 sps:$4 sm:$0xff]   ;;  %v14430_v44 = vld [vmem:[#allocation12 + $0xa8] ss:$16 sps:$4 sm:$0xff]  }
 0x5fc   :  { %11078 = vmatprep.subr.bf16.mxu1 %v14381_v17  ;;  %v14427_v17 = vld [vmem:[#allocation12 + $0xaa0] ss:$16 sps:$4 sm:$0xff]  }
 0x5fe   :  { %11202 = vmatpush1.bf16.msra.mxu0 %v14382_v27  ;;  %v14438_v27 = vld [vmem:[#allocation12 + $0xcc] ss:$16 sps:$4 sm:$0xff]  }
 0x5ff   :  { %11079 = vmatpush1.bf16.msra.mxu1 %v14379_v30  ;;  %11203 = vmatprep.subr.bf16.mxu0 %v14390_v31  ;;  %v14435_v30 = vld [vmem:[#allocation12 + $0xac4] ss:$16 sps:$4 sm:$0xff]  }
 0x600   :  { %11080 = vmatprep.subr.bf16.mxu1 %v14387_v33  ;;  %v14436_v33 = vld [vmem:[#allocation12 + $0xc8] ss:$16 sps:$4 sm:$0xff]  }
 0x602   :  { %11204 = vmatpush1.bf16.msra.mxu0 %v14388_v39  ;;  %v14433_v39 = vld [vmem:[#allocation12 + $0xac0] ss:$16 sps:$4 sm:$0xff]  }
 0x603   :  { %11081 = vmatpush1.bf16.msra.mxu1 %v14385_v45  ;;  %11205 = vmatprep.subr.bf16.mxu0 %v14396_v41  ;;  %v14441_v45 = vld [vmem:[#allocation12 + $0xae4] ss:$16 sps:$4 sm:$0xff]   ;;  %v14442_v41 = vld [vmem:[#allocation12 + $0xe8] ss:$16 sps:$4 sm:$0xff]  }
 0x604   :  { %11082 = vmatprep.subr.bf16.mxu1 %v14393_v50  ;;  %v14450_v50 = vld [vmem:[#allocation12 + $0x10c] ss:$16 sps:$4 sm:$0xff]  }
 0x606   :  { %11206 = vmatpush1.bf16.msra.mxu0 %v14394_v58  ;;  %v14448_v58 = vld [vmem:[#allocation12 + $0x108] ss:$16 sps:$4 sm:$0xff]  }
 0x607   :  { %11083 = vmatpush1.bf16.msra.mxu1 %v14391_v55  ;;  %11257 = vmatprep.subr.bf16.mxu0 %v14402_v54  ;;  %v14456_v55 = vld [vmem:[#allocation12 + $0x12c] ss:$16 sps:$4 sm:$0xff]   ;;  %v14453_v54 = vld [vmem:[#allocation12 + $0xb24] ss:$16 sps:$4 sm:$0xff]  }
 0x608   :  { %11134 = vmatprep.subr.bf16.mxu1 %v14399_v34  ;;  %v14451_v34 = vld [vmem:[#allocation12 + $0xb20] ss:$16 sps:$4 sm:$0xff]  }
 0x609   :  { %11208 = vmatmul.mubr.bf16.vlgmr.msra.gmra.mrb[28].mxu0 %v15633_v2 }
 0x60a   :  { %11085 = vmatmul.mubr.bf16.vlgmr.msra.gmra.mrb[24].mxu1 %v15635_v3  ;;  %11258 = vmatpush1.bf16.msra.mxu0 %v14400_v62  ;;  %v14459_v62 = vld [vmem:[#allocation12 + $0xb44] ss:$16 sps:$4 sm:$0xff]  }
 0x60b   :  { %11135 = vmatpush1.bf16.msra.mxu1 %v14397_v32  ;;  %11166 = vmatprep.mubr.bf16.mxu1 %v15637_v8  ;;  %v14460_v32 = vld [vmem:[#allocation12 + $0x148] ss:$16 sps:$4 sm:$0xff]  }
 0x60c   :  { %11289 = vmatprep.mubr.bf16.mxu0 %v15539_v6  ;;  %11136 = vmatprep.subr.bf16.mxu1 %v14405_v52  ;;  %v14424_v6 = vld [vmem:[#allocation12 + $0x88] ss:$16 sps:$4 sm:$0xff]   ;;  %v14457_v52 = vld [vmem:[#allocation12 + $0xb40] ss:$16 sps:$4 sm:$0xff]  }
 0x60d   :  { %11259 = vmatprep.subr.bf16.mxu0 %v14408_v4  ;;  %v14468_v4 = vld [vmem:[#allocation12 + $0x16c] ss:$16 sps:$4 sm:$0xff]  }
 0x60e   :  { %11260 = vmatpush1.bf16.msra.mxu0 %v14406_v7  ;;  %v14465_v7 = vld [vmem:[#allocation12 + $0xb64] ss:$16 sps:$4 sm:$0xff]  }
 0x60f   :  { %11137 = vmatpush1.bf16.msra.mxu1 %v14403_v40  ;;  %11261 = vmatprep.subr.bf16.mxu0 %v14414_v36  ;;  %v14466_v40 = vld [vmem:[#allocation12 + $0x168] ss:$16 sps:$4 sm:$0xff]   ;;  %v14463_v36 = vld [vmem:[#allocation12 + $0xb60] ss:$16 sps:$4 sm:$0xff]  }
 0x610   :  { %11138 = vmatprep.subr.bf16.mxu1 %v14411_v42  ;;  %v14474_v42 = vld [vmem:[#allocation12 + $0x18c] ss:$16 sps:$4 sm:$0xff]  }
 0x612   :  { %11262 = vmatpush1.bf16.msra.mxu0 %v14412_v12  ;;  %v14471_v12 = vld [vmem:[#allocation12 + $0xb84] ss:$16 sps:$4 sm:$0xff]  }
 0x613   :  { %11139 = vmatpush1.bf16.msra.mxu1 %v14409_v18  ;;  %11263 = vmatprep.subr.bf16.mxu0 %v14420_v19  ;;  %v14472_v18 = vld [vmem:[#allocation12 + $0x188] ss:$16 sps:$4 sm:$0xff]   ;;  %v14469_v19 = vld [vmem:[#allocation12 + $0xb80] ss:$16 sps:$4 sm:$0xff]  }
 0x614   :  { %11140 = vmatprep.subr.bf16.mxu1 %v14417_v57  ;;  %v14480_v57 = vld [vmem:[#allocation12 + $0x1ac] ss:$16 sps:$4 sm:$0xff]  }
 0x616   :  { %11264 = vmatpush1.bf16.msra.mxu0 %v14418_v20  ;;  %v14477_v20 = vld [vmem:[#allocation12 + $0xba4] ss:$16 sps:$4 sm:$0xff]  }
 0x617   :  { %11141 = vmatpush1.bf16.msra.mxu1 %v14415_v21  ;;  %11265 = vmatprep.subr.bf16.mxu0 %v14426_v22  ;;  %v14478_v21 = vld [vmem:[#allocation12 + $0x1a8] ss:$16 sps:$4 sm:$0xff]   ;;  %v14475_v22 = vld [vmem:[#allocation12 + $0xba0] ss:$16 sps:$4 sm:$0xff]  }
 0x618   :  { %11142 = vmatprep.subr.bf16.mxu1 %v14423_v0  ;;  %v14486_v0 = vld [vmem:[#allocation12 + $0x1cc] ss:$16 sps:$4 sm:$0xff]  }
 0x61a   :  { %11266 = vmatpush1.bf16.msra.mxu0 %v14424_v6  ;;  %v1321_v6 = vrot.slane %v15571_v59, %v15591_v29  ;;  %v14495_v59 = vld [vmem:[#allocation12 + $0xe04] ss:$16 sps:$4 sm:$0xff]  }
 0x61b   :  { %11143 = vmatpush1.bf16.msra.mxu1 %v14421_v1  ;;  %11267 = vmatprep.subr.bf16.mxu0 %v14432_v23  ;;  %v14483_v1 = vld [vmem:[#allocation12 + $0xbc4] ss:$16 sps:$4 sm:$0xff]   ;;  %v14484_v23 = vld [vmem:[#allocation12 + $0x1c8] ss:$16 sps:$4 sm:$0xff]  }
 0x61c   :  { %v15643_v28 = vpop.f32.mrb[16].mxu0  ;;  %11144 = vmatprep.subr.bf16.mxu1 %v14429_v24  ;;  %v14481_v24 = vld [vmem:[#allocation12 + $0xbc0] ss:$16 sps:$4 sm:$0xff]  }
 0x61d   :  { %v15645_v31 = vpop.f32.mrb[17].mxu0 }
 0x61e   :  { %v10967_v37 = vpop.f32.mrb[18].mxu0  ;;  %11268 = vmatpush1.bf16.msra.mxu0 %v14430_v44  ;;  %v14492_v44 = vld [vmem:[#allocation12 + $0x1ec] ss:$16 sps:$4 sm:$0xff]  }
 0x61f   :  { %11145 = vmatpush1.bf16.msra.mxu1 %v14427_v17  ;;  %v10968_v38 = vpop.f32.mrb[19].mxu0  ;;  %11269 = vmatprep.subr.bf16.mxu0 %v14438_v27  ;;  %v13987_v17 = vadd.f32 %v15560_v49, %v1321_v6  ;;  %v14489_v27 = vld [vmem:[#allocation12 + $0xbe4] ss:$16 sps:$4 sm:$0xff]   ;;  %v14487_v37 = vld [vmem:[#allocation12 + $0xbe0] ss:$16 sps:$4 sm:$0xff]  }
 0x620   :  { %11146 = vmatprep.subr.bf16.mxu1 %v14435_v30  ;;  %v14490_v30 = vld [vmem:[#allocation12 + $0x1e8] ss:$16 sps:$4 sm:$0xff]   ;;  %v14501_v49 = vld [vmem:[#allocation12 + $0xe24] ss:$16 sps:$4 sm:$0xff]  }
 0x621   :  { %v7828_v38 = vmax.f32 %v13987_v17, 0.0  ;;  %v14537_v17 = vld [vmem:[#allocation12 + $0xee4] ss:$16 sps:$4 sm:$0xff]  }
 0x622   :  { %11270 = vmatpush1.bf16.msra.mxu0 %v14436_v33  ;;  %v14498_v33 = vld [vmem:[#allocation12 + $0x40c] ss:$16 sps:$4 sm:$0xff]  }
 0x623   :  { %11147 = vmatpush1.bf16.msra.mxu1 %v14433_v39  ;;  %11271 = vmatprep.subr.bf16.mxu0 %v14444_v43  ;;  %v14496_v39 = vld [vmem:[#allocation12 + $0x408] ss:$16 sps:$4 sm:$0xff]   ;;  %v14493_v43 = vld [vmem:[#allocation12 + $0xe00] ss:$16 sps:$4 sm:$0xff]  }
 0x624   :  { %11148 = vmatprep.subr.bf16.mxu1 %v14441_v45  ;;  %v15650_v45 = vpack.c.bf16 %v7828_v38, %v7828_v38  ;;  %v14546_v38 = vld [vmem:[#allocation12 + $0x50c] ss:$16 sps:$4 sm:$0xff]  }
 0x626   :  { %11272 = vmatpush1.bf16.msra.mxu0 %v14442_v41  ;;  %v14504_v41 = vld [vmem:[#allocation12 + $0x42c] ss:$16 sps:$4 sm:$0xff]  }
 0x627   :  { %11149 = vmatpush1.bf16.msra.mxu1 %v14439_v46  ;;  %11273 = vmatprep.subr.bf16.mxu0 %v14450_v50  ;;  %v14502_v46 = vld [vmem:[#allocation12 + $0x428] ss:$16 sps:$4 sm:$0xff]   ;;  %v14499_v50 = vld [vmem:[#allocation12 + $0xe20] ss:$16 sps:$4 sm:$0xff]  }
 0x628   :  { %11150 = vmatprep.subr.bf16.mxu1 %v14447_v51  ;;  %v14510_v51 = vld [vmem:[#allocation12 + $0x44c] ss:$16 sps:$4 sm:$0xff]  }
 0x62a   :  { %11274 = vmatpush1.bf16.msra.mxu0 %v14448_v58  ;;  %v14507_v58 = vld [vmem:[#allocation12 + $0xe44] ss:$16 sps:$4 sm:$0xff]  }
 0x62b   :  { %11151 = vmatpush1.bf16.msra.mxu1 %v14445_v53  ;;  %11275 = vmatprep.subr.bf16.mxu0 %v14456_v55  ;;  %v14508_v53 = vld [vmem:[#allocation12 + $0x448] ss:$16 sps:$4 sm:$0xff]   ;;  %v14505_v55 = vld [vmem:[#allocation12 + $0xe40] ss:$16 sps:$4 sm:$0xff]  }
 0x62c   :  { %11152 = vmatprep.subr.bf16.mxu1 %v14453_v54  ;;  %v14516_v54 = vld [vmem:[#allocation12 + $0x46c] ss:$16 sps:$4 sm:$0xff]  }
 0x62e   :  { %11276 = vmatpush1.bf16.msra.mxu0 %v14454_v61  ;;  %v14514_v61 = vld [vmem:[#allocation12 + $0x468] ss:$16 sps:$4 sm:$0xff]  }
 0x62f   :  { %11153 = vmatpush1.bf16.msra.mxu1 %v14451_v34  ;;  %11277 = vmatprep.subr.bf16.mxu0 %v14462_v56  ;;  %v14511_v34 = vld [vmem:[#allocation12 + $0xe60] ss:$16 sps:$4 sm:$0xff]   ;;  %v14522_v56 = vld [vmem:[#allocation12 + $0x48c] ss:$16 sps:$4 sm:$0xff]  }
 0x630   :  { %11154 = vmatprep.subr.bf16.mxu1 %v14459_v62  ;;  %v14520_v62 = vld [vmem:[#allocation12 + $0x488] ss:$16 sps:$4 sm:$0xff]  }
 0x632   :  { %11278 = vmatpush1.bf16.msra.mxu0 %v14460_v32  ;;  %v14517_v32 = vld [vmem:[#allocation12 + $0xe80] ss:$16 sps:$4 sm:$0xff]  }
 0x633   :  { %11155 = vmatpush1.bf16.msra.mxu1 %v14457_v52  ;;  %11279 = vmatprep.subr.bf16.mxu0 %v14468_v4  ;;  %v14528_v52 = vld [vmem:[#allocation12 + $0x4ac] ss:$16 sps:$4 sm:$0xff]   ;;  %v14525_v4 = vld [vmem:[#allocation12 + $0xea4] ss:$16 sps:$4 sm:$0xff]  }
 0x634   :  { %11156 = vmatprep.subr.bf16.mxu1 %v14465_v7  ;;  %v14526_v7 = vld [vmem:[#allocation12 + $0x4a8] ss:$16 sps:$4 sm:$0xff]  }
 0x636   :  { %11280 = vmatpush1.bf16.msra.mxu0 %v14466_v40  ;;  %v15655_v40 = vld [vmem:[#allocation10 + $0x8] sm:$0xff] }
 0x637   :  { %11157 = vmatpush1.bf16.msra.mxu1 %v14463_v36  ;;  %11281 = vmatprep.subr.bf16.mxu0 %v14474_v42  ;;  %v1341_v36 = vrot.slane %v15655_v40, %v1308_v35  ;;  %v14523_v42 = vld [vmem:[#allocation12 + $0xea0] ss:$16 sps:$4 sm:$0xff]  }
 0x638   :  { %11158 = vmatprep.subr.bf16.mxu1 %v14471_v12  ;;  %v14534_v12 = vld [vmem:[#allocation12 + $0x4cc] ss:$16 sps:$4 sm:$0xff]   ;;  %v14529_v35 = vld [vmem:[#allocation12 + $0xec0] ss:$16 sps:$4 sm:$0xff]  }
 0x63a   :  { %11282 = vmatpush1.bf16.msra.mxu0 %v14472_v18 }
 0x63b   :  { %11159 = vmatpush1.bf16.msra.mxu1 %v14469_v19  ;;  %11283 = vmatprep.subr.bf16.mxu0 %v14480_v57  ;;  %v14531_v19 = vld [vmem:[#allocation12 + $0xec4] ss:$16 sps:$4 sm:$0xff]  }
 0x63c   :  { %11160 = vmatprep.subr.bf16.mxu1 %v14477_v20 }
 0x63e   :  { %11284 = vmatpush1.bf16.msra.mxu0 %v14478_v21 }
 0x63f   :  { %11161 = vmatpush1.bf16.msra.mxu1 %v14475_v22  ;;  %11285 = vmatprep.subr.bf16.mxu0 %v14486_v0  ;;  %v14532_v0 = vld [vmem:[#allocation12 + $0x4c8] ss:$16 sps:$4 sm:$0xff]  }
 0x640   :  { %11162 = vmatprep.subr.bf16.mxu1 %v14483_v1 }
 0x642   :  { %11286 = vmatpush1.bf16.msra.mxu0 %v14484_v23 }
 0x643   :  { %11163 = vmatpush1.bf16.msra.mxu1 %v14481_v24  ;;  %11287 = vmatprep.subr.bf16.mxu0 %v14492_v44  ;;  %v14540_v24 = vld [vmem:[#allocation12 + $0x4ec] ss:$16 sps:$4 sm:$0xff]  }
 0x644   :  { %11164 = vmatprep.subr.bf16.mxu1 %v14489_v27 }
 0x646   :  { %11288 = vmatpush1.bf16.msra.mxu0 %v14490_v30  ;;  %v14538_v30 = vld [vmem:[#allocation12 + $0x4e8] ss:$16 sps:$4 sm:$0xff]  }
 0x647   :  { %11165 = vmatpush1.bf16.msra.mxu1 %v14487_v37  ;;  %11339 = vmatprep.subr.bf16.mxu0 %v14498_v33  ;;  %v14535_v33 = vld [vmem:[#allocation12 + $0xee0] ss:$16 sps:$4 sm:$0xff]  }
 0x648   :  { %11216 = vmatprep.subr.bf16.mxu1 %v14495_v59  ;;  %v14543_v59 = vld [vmem:[#allocation12 + $0xf04] ss:$16 sps:$4 sm:$0xff]  }
 0x649   :  { %11290 = vmatmul.mubr.bf16.vlgmr.msra.gmra.mrb[32].mxu0 %v15552_v47  ;;  %v14513_v47 = vld [vmem:[#allocation12 + $0xe64] ss:$16 sps:$4 sm:$0xff]  }
 0x64a   :  { %11167 = vmatmul.mubr.bf16.vlgmr.msra.gmra.mrb[28].mxu1 %v15650_v45  ;;  %11340 = vmatpush1.bf16.msra.mxu0 %v14496_v39  ;;  %v14544_v39 = vld [vmem:[#allocation12 + $0x508] ss:$16 sps:$4 sm:$0xff]  }
 0x64b   :  { %11217 = vmatpush1.bf16.msra.mxu1 %v14493_v43  ;;  %11371 = vmatprep.mubr.bf16.mxu0 %v15555_v16  ;;  %v14519_v16 = vld [vmem:[#allocation12 + $0xe84] ss:$16 sps:$4 sm:$0xff]   ;;  %v14541_v43 = vld [vmem:[#allocation12 + $0xf00] ss:$16 sps:$4 sm:$0xff]  }
 0x64c   :  { %11218 = vmatprep.subr.bf16.mxu1 %v14501_v49  ;;  %11341 = vmatprep.subr.bf16.mxu0 %v14504_v41  ;;  %v14552_v49 = vld [vmem:[#allocation12 + $0x52c] ss:$16 sps:$4 sm:$0xff]   ;;  %v14549_v41 = vld [vmem:[#allocation12 + $0xf24] ss:$16 sps:$4 sm:$0xff]  }
 0x64e   :  { %11342 = vmatpush1.bf16.msra.mxu0 %v14502_v46  ;;  %v14550_v46 = vld [vmem:[#allocation12 + $0x528] ss:$16 sps:$4 sm:$0xff]  }
 0x64f   :  { %11219 = vmatpush1.bf16.msra.mxu1 %v14499_v50  ;;  %11343 = vmatprep.subr.bf16.mxu0 %v14510_v51  ;;  %v14547_v50 = vld [vmem:[#allocation12 + $0xf20] ss:$16 sps:$4 sm:$0xff]   ;;  %v14558_v51 = vld [vmem:[#allocation12 + $0x54c] ss:$16 sps:$4 sm:$0xff]  }
 0x650   :  { %11220 = vmatprep.subr.bf16.mxu1 %v14507_v58  ;;  %v14555_v58 = vld [vmem:[#allocation12 + $0xf44] ss:$16 sps:$4 sm:$0xff]  }
 0x652   :  { %11344 = vmatpush1.bf16.msra.mxu0 %v14508_v53  ;;  %v14556_v53 = vld [vmem:[#allocation12 + $0x548] ss:$16 sps:$4 sm:$0xff]  }
 0x653   :  { %11221 = vmatpush1.bf16.msra.mxu1 %v14505_v55  ;;  %11345 = vmatprep.subr.bf16.mxu0 %v14516_v54  ;;  %v14553_v55 = vld [vmem:[#allocation12 + $0xf40] ss:$16 sps:$4 sm:$0xff]   ;;  %v14564_v54 = vld [vmem:[#allocation12 + $0x56c] ss:$16 sps:$4 sm:$0xff]  }
 0x654   :  { %11222 = vmatprep.subr.bf16.mxu1 %v14513_v47  ;;  %v14561_v47 = vld [vmem:[#allocation12 + $0xf64] ss:$16 sps:$4 sm:$0xff]  }
 0x656   :  { %11346 = vmatpush1.bf16.msra.mxu0 %v14514_v61  ;;  %v14562_v61 = vld [vmem:[#allocation12 + $0x568] ss:$16 sps:$4 sm:$0xff]  }
 0x657   :  { %11223 = vmatpush1.bf16.msra.mxu1 %v14511_v34  ;;  %11347 = vmatprep.subr.bf16.mxu0 %v14522_v56  ;;  %v14559_v34 = vld [vmem:[#allocation12 + $0xf60] ss:$16 sps:$4 sm:$0xff]   ;;  %v14570_v56 = vld [vmem:[#allocation12 + $0x58c] ss:$16 sps:$4 sm:$0xff]  }
 0x658   :  { %11224 = vmatprep.subr.bf16.mxu1 %v14519_v16  ;;  %v14567_v16 = vld [vmem:[#allocation12 + $0xf84] ss:$16 sps:$4 sm:$0xff]  }
 0x65a   :  { %11348 = vmatpush1.bf16.msra.mxu0 %v14520_v62  ;;  %v14568_v62 = vld [vmem:[#allocation12 + $0x588] ss:$16 sps:$4 sm:$0xff]  }
 0x65b   :  { %11225 = vmatpush1.bf16.msra.mxu1 %v14517_v32  ;;  %11349 = vmatprep.subr.bf16.mxu0 %v14528_v52  ;;  %v14565_v32 = vld [vmem:[#allocation12 + $0xf80] ss:$16 sps:$4 sm:$0xff]   ;;  %v14576_v52 = vld [vmem:[#allocation12 + $0x5ac] ss:$16 sps:$4 sm:$0xff]  }
 0x65c   :  { %v15660_v18 = vpop.f32.mrb[20].mxu0  ;;  %11226 = vmatprep.subr.bf16.mxu1 %v14525_v4  ;;  %v14573_v4 = vld [vmem:[#allocation12 + $0xfa4] ss:$16 sps:$4 sm:$0xff]  }
 0x65d   :  { %v15662_v57 = vpop.f32.mrb[16].mxu1  ;;  %v15664_v20 = vpop.f32.mrb[21].mxu0 }
 0x65e   :  { %v7813_v21 = vpop.f32.mrb[17].mxu1  ;;  %v11049_v22 = vpop.f32.mrb[22].mxu0  ;;  %11350 = vmatpush1.bf16.msra.mxu0 %v14526_v7  ;;  %v14574_v7 = vld [vmem:[#allocation12 + $0x5a8] ss:$16 sps:$4 sm:$0xff]  }
 0x65f   :  { %v13992_v6 = vadd.f32 %v7813_v21, %v1341_v36  ;;  %v7815_v1 = vpop.f32.mrb[18].mxu1  ;;  %11227 = vmatpush1.bf16.msra.mxu1 %v14523_v42  ;;  %v11050_v23 = vpop.f32.mrb[23].mxu0  ;;  %11351 = vmatprep.subr.bf16.mxu0 %v14534_v12  ;;  %v14571_v36 = vld [vmem:[#allocation12 + $0xfa0] ss:$16 sps:$4 sm:$0xff]   ;;  %v14582_v42 = vld [vmem:[#allocation12 + $0x5cc] ss:$16 sps:$4 sm:$0xff]   ;;  %v1337_v12 = vrot.slane %v15655_v40, %v1304_v25 }
 0x660   :  { %v7816_v44 = vpop.f32.mrb[19].mxu1  ;;  %11228 = vmatprep.subr.bf16.mxu1 %v14531_v19  ;;  %v14579_v19 = vld [vmem:[#allocation12 + $0xfc4] ss:$16 sps:$4 sm:$0xff]   ;;  %v14580_v21 = vld [vmem:[#allocation12 + $0x5c8] ss:$16 sps:$4 sm:$0xff]  }
 0x661   :  { %v7833_v27 = vmax.f32 %v13992_v6, 0.0  ;;  %v14577_v22 = vld [vmem:[#allocation12 + $0xfc0] ss:$16 sps:$4 sm:$0xff]   ;;  %v13991_v6 = vadd.f32 %v15662_v57, %v1337_v12  ;;  %v14585_v1 = vld [vmem:[#allocation12 + $0xfe4] ss:$16 sps:$4 sm:$0xff]  }
 0x662   :  { %11352 = vmatpush1.bf16.msra.mxu0 %v14532_v0  ;;  %v14588_v0 = vld [vmem:[#allocation12 + $0x5ec] ss:$16 sps:$4 sm:$0xff]   ;;  %v14586_v23 = vld [vmem:[#allocation12 + $0x5e8] ss:$16 sps:$4 sm:$0xff]  }
 0x663   :  { %v15666_v37 = vpack.c.bf16 %v7833_v27, %v7833_v27  ;;  %11229 = vmatpush1.bf16.msra.mxu1 %v14529_v35  ;;  %11353 = vmatprep.subr.bf16.mxu0 %v14540_v24  ;;  %v14583_v35 = vld [vmem:[#allocation12 + $0xfe0] ss:$16 sps:$4 sm:$0xff]   ;;  %v7832_v24 = vmax.f32 %v13991_v6, 0.0  ;;  %v14591_v25 = vld [vmem:[#allocation12 + $0x20c] ss:$16 sps:$4 sm:$0xff]  }
 0x664   :  { %11230 = vmatprep.subr.bf16.mxu1 %v14537_v17  ;;  %v14592_v40 = vld [vmem:[#allocation12 + $0x808] ss:$16 sps:$4 sm:$0xff]   ;;  %v14597_v57 = vld [vmem:[#allocation12 + $0x22c] ss:$16 sps:$4 sm:$0xff]  }
 0x665   :  { %11248 = vmatprep.mubr.bf16.mxu1 %v15666_v37  ;;  %v14589_v44 = vld [vmem:[#allocation12 + $0x208] ss:$16 sps:$4 sm:$0xff]   ;;  %v15673_v17 = vpack.c.bf16 %v7832_v24, %v7832_v24  ;;  %v14600_v27 = vld [vmem:[#allocation12 + $0x82c] ss:$16 sps:$4 sm:$0xff]  }
 0x666   :  { %11354 = vmatpush1.bf16.msra.mxu0 %v14538_v30  ;;  %v14598_v30 = vld [vmem:[#allocation12 + $0x828] ss:$16 sps:$4 sm:$0xff]   ;;  %v14648_v24 = vld [vmem:[#allocation12 + $0x92c] ss:$16 sps:$4 sm:$0xff]  }
 0x667   :  { %11231 = vmatpush1.bf16.msra.mxu1 %v14535_v33  ;;  %11355 = vmatprep.subr.bf16.mxu0 %v14546_v38  ;;  %v14595_v33 = vld [vmem:[#allocation12 + $0x228] ss:$16 sps:$4 sm:$0xff]   ;;  %v14606_v38 = vld [vmem:[#allocation12 + $0x84c] ss:$16 sps:$4 sm:$0xff]  }
 0x668   :  { %11232 = vmatprep.subr.bf16.mxu1 %v14543_v59  ;;  %v14603_v59 = vld [vmem:[#allocation12 + $0x24c] ss:$16 sps:$4 sm:$0xff]   ;;  %v14625_v12 = vld [vmem:[#allocation12 + $0x2c8] ss:$16 sps:$4 sm:$0xff]  }
 0x669   :  { %v14634_v6 = vld [vmem:[#allocation12 + $0x8e8] ss:$16 sps:$4 sm:$0xff]  }
 0x66a   :  { %11356 = vmatpush1.bf16.msra.mxu0 %v14544_v39  ;;  %v14604_v39 = vld [vmem:[#allocation12 + $0x848] ss:$16 sps:$4 sm:$0xff]  }
 0x66b   :  { %11233 = vmatpush1.bf16.msra.mxu1 %v14541_v43  ;;  %11357 = vmatprep.subr.bf16.mxu0 %v14552_v49  ;;  %v14601_v43 = vld [vmem:[#allocation12 + $0x248] ss:$16 sps:$4 sm:$0xff]   ;;  %v14609_v49 = vld [vmem:[#allocation12 + $0x26c] ss:$16 sps:$4 sm:$0xff]  }
 0x66c   :  { %11234 = vmatprep.subr.bf16.mxu1 %v14549_v41  ;;  %v14610_v41 = vld [vmem:[#allocation12 + $0x868] ss:$16 sps:$4 sm:$0xff]  }
 0x66e   :  { %11358 = vmatpush1.bf16.msra.mxu0 %v14550_v46  ;;  %v14607_v46 = vld [vmem:[#allocation12 + $0x268] ss:$16 sps:$4 sm:$0xff]  }
 0x66f   :  { %11235 = vmatpush1.bf16.msra.mxu1 %v14547_v50  ;;  %11359 = vmatprep.subr.bf16.mxu0 %v14558_v51  ;;  %v14615_v50 = vld [vmem:[#allocation12 + $0x28c] ss:$16 sps:$4 sm:$0xff]   ;;  %v14613_v51 = vld [vmem:[#allocation12 + $0x288] ss:$16 sps:$4 sm:$0xff]  }
 0x670   :  { %11236 = vmatprep.subr.bf16.mxu1 %v14555_v58  ;;  %v14624_v58 = vld [vmem:[#allocation12 + $0x8ac] ss:$16 sps:$4 sm:$0xff]  }
 0x672   :  { %11360 = vmatpush1.bf16.msra.mxu0 %v14556_v53  ;;  %v14621_v53 = vld [vmem:[#allocation12 + $0x2ac] ss:$16 sps:$4 sm:$0xff]  }
 0x673   :  { %11237 = vmatpush1.bf16.msra.mxu1 %v14553_v55  ;;  %11361 = vmatprep.subr.bf16.mxu0 %v14564_v54  ;;  %v14622_v55 = vld [vmem:[#allocation12 + $0x8a8] ss:$16 sps:$4 sm:$0xff]  }
 0x674   :  { %11238 = vmatprep.subr.bf16.mxu1 %v14561_v47  ;;  %v14619_v54 = vld [vmem:[#allocation12 + $0x2a8] ss:$16 sps:$4 sm:$0xff]   ;;  %v14630_v47 = vld [vmem:[#allocation12 + $0x8cc] ss:$16 sps:$4 sm:$0xff]  }
 0x676   :  { %11362 = vmatpush1.bf16.msra.mxu0 %v14562_v61 }
 0x677   :  { %11239 = vmatpush1.bf16.msra.mxu1 %v14559_v34  ;;  %11363 = vmatprep.subr.bf16.mxu0 %v14570_v56  ;;  %v14627_v34 = vld [vmem:[#allocation12 + $0x2cc] ss:$16 sps:$4 sm:$0xff]  }
 0x678   :  { %11240 = vmatprep.subr.bf16.mxu1 %v14567_v16 }
 0x67a   :  { %11364 = vmatpush1.bf16.msra.mxu0 %v14568_v62 }
 0x67b   :  { %11241 = vmatpush1.bf16.msra.mxu1 %v14565_v32  ;;  %11365 = vmatprep.subr.bf16.mxu0 %v14576_v52 }
 0x67c   :  { %11242 = vmatprep.subr.bf16.mxu1 %v14573_v4  ;;  %v14628_v4 = vld [vmem:[#allocation12 + $0x8c8] ss:$16 sps:$4 sm:$0xff]  }
 0x67e   :  { %11366 = vmatpush1.bf16.msra.mxu0 %v14574_v7 }
 0x67f   :  { %11243 = vmatpush1.bf16.msra.mxu1 %v14571_v36  ;;  %11367 = vmatprep.subr.bf16.mxu0 %v14582_v42 }
 0x680   :  { %11244 = vmatprep.subr.bf16.mxu1 %v14579_v19  ;;  %v14636_v19 = vld [vmem:[#allocation12 + $0x8ec] ss:$16 sps:$4 sm:$0xff]  }
 0x682   :  { %11368 = vmatpush1.bf16.msra.mxu0 %v14580_v21 }
 0x683   :  { %11245 = vmatpush1.bf16.msra.mxu1 %v14577_v22  ;;  %11369 = vmatprep.subr.bf16.mxu0 %v14588_v0  ;;  %v14633_v22 = vld [vmem:[#allocation12 + $0x2ec] ss:$16 sps:$4 sm:$0xff]  }
 0x684   :  { %11246 = vmatprep.subr.bf16.mxu1 %v14585_v1  ;;  %v14631_v1 = vld [vmem:[#allocation12 + $0x2e8] ss:$16 sps:$4 sm:$0xff]  }
 0x686   :  { %11370 = vmatpush1.bf16.msra.mxu0 %v14586_v23  ;;  %v14639_v23 = vld [vmem:[#allocation12 + $0x30c] ss:$16 sps:$4 sm:$0xff]  }
 0x687   :  { %11247 = vmatpush1.bf16.msra.mxu1 %v14583_v35  ;;  %11421 = vmatprep.subr.bf16.mxu0 %v14594_v63  ;;  %v14640_v35 = vld [vmem:[#allocation12 + $0x908] ss:$16 sps:$4 sm:$0xff]  }
 0x688   :  { %11298 = vmatprep.subr.bf16.mxu1 %v14591_v25  ;;  %v14637_v63 = vld [vmem:[#allocation12 + $0x308] ss:$16 sps:$4 sm:$0xff]  }
 0x689   :  { %11372 = vmatmul.mubr.bf16.vlgmr.msra.gmra.mrb[36].mxu0 %v15580_v15  ;;  %v14612_v15 = vld [vmem:[#allocation12 + $0x86c] ss:$16 sps:$4 sm:$0xff]   ;;  %v14646_v25 = vld [vmem:[#allocation12 + $0x928] ss:$16 sps:$4 sm:$0xff]  }
 0x68a   :  { %11249 = vmatmul.mubr.bf16.vlgmr.msra.gmra.mrb[32].mxu1 %v15673_v17  ;;  %11422 = vmatpush1.bf16.msra.mxu0 %v14592_v40  ;;  %v14654_v40 = vld [vmem:[#allocation12 + $0x94c] ss:$16 sps:$4 sm:$0xff]  }
 0x68b   :  { %11299 = vmatpush1.bf16.msra.mxu1 %v14589_v44  ;;  %11330 = vmatprep.mubr.bf16.mxu1 %v15582_v14  ;;  %v14618_v14 = vld [vmem:[#allocation12 + $0x88c] ss:$16 sps:$4 sm:$0xff]  }
 0x68c   :  { %11453 = vmatprep.mubr.bf16.mxu0 %v15585_v26  ;;  %11300 = vmatprep.subr.bf16.mxu1 %v14597_v57  ;;  %v14616_v26 = vld [vmem:[#allocation12 + $0x888] ss:$16 sps:$4 sm:$0xff]   ;;  %v14651_v44 = vld [vmem:[#allocation12 + $0x34c] ss:$16 sps:$4 sm:$0xff]  }
 0x68d   :  { %11423 = vmatprep.subr.bf16.mxu0 %v14600_v27  ;;  %v14652_v57 = vld [vmem:[#allocation12 + $0x948] ss:$16 sps:$4 sm:$0xff]  }
 0x68e   :  { %11424 = vmatpush1.bf16.msra.mxu0 %v14598_v30  ;;  %v14649_v27 = vld [vmem:[#allocation12 + $0x348] ss:$16 sps:$4 sm:$0xff]   ;;  %v14660_v30 = vld [vmem:[#allocation12 + $0x96c] ss:$16 sps:$4 sm:$0xff]  }
 0x68f   :  { %11301 = vmatpush1.bf16.msra.mxu1 %v14595_v33  ;;  %11425 = vmatprep.subr.bf16.mxu0 %v14606_v38  ;;  %v14657_v33 = vld [vmem:[#allocation12 + $0x36c] ss:$16 sps:$4 sm:$0xff]   ;;  %v14658_v38 = vld [vmem:[#allocation12 + $0x968] ss:$16 sps:$4 sm:$0xff]  }
 0x690   :  { %11302 = vmatprep.subr.bf16.mxu1 %v14603_v59  ;;  %v14655_v59 = vld [vmem:[#allocation12 + $0x368] ss:$16 sps:$4 sm:$0xff]  }
 0x692   :  { %11426 = vmatpush1.bf16.msra.mxu0 %v14604_v39  ;;  %v14666_v39 = vld [vmem:[#allocation12 + $0x98c] ss:$16 sps:$4 sm:$0xff]  }
 0x693   :  { %11303 = vmatpush1.bf16.msra.mxu1 %v14601_v43  ;;  %11427 = vmatprep.subr.bf16.mxu0 %v14612_v15  ;;  %v14663_v43 = vld [vmem:[#allocation12 + $0x38c] ss:$16 sps:$4 sm:$0xff]   ;;  %v14664_v15 = vld [vmem:[#allocation12 + $0x988] ss:$16 sps:$4 sm:$0xff]  }
 0x694   :  { %11304 = vmatprep.subr.bf16.mxu1 %v14609_v49  ;;  %v14661_v49 = vld [vmem:[#allocation12 + $0x388] ss:$16 sps:$4 sm:$0xff]  }
 0x696   :  { %11428 = vmatpush1.bf16.msra.mxu0 %v14610_v41  ;;  %v14672_v41 = vld [vmem:[#allocation12 + $0x9ac] ss:$16 sps:$4 sm:$0xff]  }
 0x697   :  { %11305 = vmatpush1.bf16.msra.mxu1 %v14607_v46  ;;  %11429 = vmatprep.subr.bf16.mxu0 %v14618_v14  ;;  %v14669_v46 = vld [vmem:[#allocation12 + $0x3ac] ss:$16 sps:$4 sm:$0xff]   ;;  %v14670_v14 = vld [vmem:[#allocation12 + $0x9a8] ss:$16 sps:$4 sm:$0xff]  }
 0x698   :  { %11306 = vmatprep.subr.bf16.mxu1 %v14615_v50  ;;  %v14667_v50 = vld [vmem:[#allocation12 + $0x3a8] ss:$16 sps:$4 sm:$0xff]  }
 0x69a   :  { %11430 = vmatpush1.bf16.msra.mxu0 %v14616_v26  ;;  %v14678_v26 = vld [vmem:[#allocation12 + $0x9cc] ss:$16 sps:$4 sm:$0xff]  }
 0x69b   :  { %11307 = vmatpush1.bf16.msra.mxu1 %v14613_v51  ;;  %11431 = vmatprep.subr.bf16.mxu0 %v14624_v58  ;;  %v14675_v51 = vld [vmem:[#allocation12 + $0x3cc] ss:$16 sps:$4 sm:$0xff]   ;;  %v14676_v58 = vld [vmem:[#allocation12 + $0x9c8] ss:$16 sps:$4 sm:$0xff]  }
 0x69c   :  { %v15679_v61 = vpop.f32.mrb[24].mxu0  ;;  %11308 = vmatprep.subr.bf16.mxu1 %v14621_v53  ;;  %v14673_v53 = vld [vmem:[#allocation12 + $0x3c8] ss:$16 sps:$4 sm:$0xff]  }
 0x69d   :  { %v11004_v56 = vpop.f32.mrb[20].mxu1  ;;  %v15681_v16 = vpop.f32.mrb[25].mxu0 }
 0x69e   :  { %v11005_v62 = vadd.f32 %v11004_v56, %v15643_v28  ;;  %v11006_v32 = vpop.f32.mrb[21].mxu1  ;;  %v11131_v52 = vpop.f32.mrb[26].mxu0  ;;  %11432 = vmatpush1.bf16.msra.mxu0 %v14622_v55  ;;  %v14684_v55 = vld [vmem:[#allocation12 + $0x9ec] ss:$16 sps:$4 sm:$0xff]  }
 0x69f   :  { %v11007_v7 = vadd.f32 %v11006_v32, %v15645_v31  ;;  %v11008_v36 = vpop.f32.mrb[22].mxu1  ;;  %11309 = vmatpush1.bf16.msra.mxu1 %v14619_v54  ;;  %v11132_v42 = vpop.f32.mrb[27].mxu0  ;;  %11433 = vmatprep.subr.bf16.mxu0 %v14630_v47  ;;  %v14642_v31 = vld [vmem:[#allocation12 + $0x90c] ss:$16 sps:$4 sm:$0xff]   ;;  %v14682_v47 = vld [vmem:[#allocation12 + $0x9e8] ss:$16 sps:$4 sm:$0xff]  }
 0x6a0   :  { %v11009_v21 = vpop.f32.mrb[23].mxu1  ;;  %11310 = vmatprep.subr.bf16.mxu1 %v14627_v34  ;;  %v15686_v0 = vadd.f32 %v15660_v18, %v11005_v62  ;;  %v14645_v18 = vld [vmem:[#allocation12 + $0x32c] ss:$16 sps:$4 sm:$0xff]   ;;  %v14679_v34 = vld [vmem:[#allocation12 + $0x3e8] ss:$16 sps:$4 sm:$0xff]  }
 0x6a1   :  { %v15689_v28 = vadd.f32 %v15664_v20, %v11007_v7  ;;  %v14643_v20 = vld [vmem:[#allocation12 + $0x328] ss:$16 sps:$4 sm:$0xff]   ;;  %v14681_v54 = vld [vmem:[#allocation12 + $0x3ec] ss:$16 sps:$4 sm:$0xff]  }
 0x6a2   :  { %11434 = vmatpush1.bf16.msra.mxu0 %v14628_v4  ;;  %v14690_v56 = vld [vmem:[#allocation12 + $0xc0c] ss:$16 sps:$4 sm:$0xff]   ;;  %v14688_v32 = vld [vmem:[#allocation12 + $0xc08] ss:$16 sps:$4 sm:$0xff]  }
 0x6a3   :  { %11311 = vmatpush1.bf16.msra.mxu1 %v14625_v12  ;;  %11435 = vmatprep.subr.bf16.mxu0 %v14636_v19  ;;  %v14687_v62 = vld [vmem:[#allocation12 + $0x60c] ss:$16 sps:$4 sm:$0xff]   ;;  %v14685_v52 = vld [vmem:[#allocation12 + $0x608] ss:$16 sps:$4 sm:$0xff]  }
 0x6a4   :  { %11312 = vmatprep.subr.bf16.mxu1 %v14633_v22  ;;  %v14693_v4 = vld [vmem:[#allocation12 + $0x62c] ss:$16 sps:$4 sm:$0xff]   ;;  %v14694_v36 = vld [vmem:[#allocation12 + $0xc28] ss:$16 sps:$4 sm:$0xff]  }
 0x6a5   :  { %v14696_v7 = vld [vmem:[#allocation12 + $0xc2c] ss:$16 sps:$4 sm:$0xff]   ;;  %v14691_v42 = vld [vmem:[#allocation12 + $0x628] ss:$16 sps:$4 sm:$0xff]  }
 0x6a6   :  { %11436 = vmatpush1.bf16.msra.mxu0 %v14634_v6  ;;  %v14702_v12 = vld [vmem:[#allocation12 + $0xc4c] ss:$16 sps:$4 sm:$0xff]   ;;  %v14700_v21 = vld [vmem:[#allocation12 + $0xc48] ss:$16 sps:$4 sm:$0xff]  }
 0x6a7   :  { %11313 = vmatpush1.bf16.msra.mxu1 %v14631_v1  ;;  %11437 = vmatprep.subr.bf16.mxu0 %v14642_v31  ;;  %v14699_v19 = vld [vmem:[#allocation12 + $0x64c] ss:$16 sps:$4 sm:$0xff]   ;;  %v14697_v22 = vld [vmem:[#allocation12 + $0x648] ss:$16 sps:$4 sm:$0xff]  }
 0x6a8   :  { %11314 = vmatprep.subr.bf16.mxu1 %v14639_v23  ;;  %v14706_v6 = vld [vmem:[#allocation12 + $0xc68] ss:$16 sps:$4 sm:$0xff]   ;;  %v14711_v31 = vld [vmem:[#allocation12 + $0x68c] ss:$16 sps:$4 sm:$0xff]  }
 0x6a9   :  { %v14703_v1 = vld [vmem:[#allocation12 + $0x668] ss:$16 sps:$4 sm:$0xff]  }
 0x6aa   :  { %11438 = vmatpush1.bf16.msra.mxu0 %v14640_v35  ;;  %v14709_v23 = vld [vmem:[#allocation12 + $0x688] ss:$16 sps:$4 sm:$0xff]   ;;  %v14720_v35 = vld [vmem:[#allocation12 + $0xcac] ss:$16 sps:$4 sm:$0xff]  }
 0x6ab   :  { %11315 = vmatpush1.bf16.msra.mxu1 %v14637_v63  ;;  %11439 = vmatprep.subr.bf16.mxu0 %v14648_v24  ;;  %v14717_v63 = vld [vmem:[#allocation12 + $0x6ac] ss:$16 sps:$4 sm:$0xff]   ;;  %v14718_v24 = vld [vmem:[#allocation12 + $0xca8] ss:$16 sps:$4 sm:$0xff]  }
 0x6ac   :  { %11316 = vmatprep.subr.bf16.mxu1 %v14645_v18  ;;  %v14715_v18 = vld [vmem:[#allocation12 + $0x6a8] ss:$16 sps:$4 sm:$0xff]  }
 0x6ae   :  { %11440 = vmatpush1.bf16.msra.mxu0 %v14646_v25  ;;  %v14726_v25 = vld [vmem:[#allocation12 + $0xccc] ss:$16 sps:$4 sm:$0xff]  }
 0x6af   :  { %11317 = vmatpush1.bf16.msra.mxu1 %v14643_v20  ;;  %11441 = vmatprep.subr.bf16.mxu0 %v14654_v40  ;;  %v14723_v40 = vld [vmem:[#allocation12 + $0x6cc] ss:$16 sps:$4 sm:$0xff]  }
 0x6b0   :  { %11318 = vmatprep.subr.bf16.mxu1 %v14651_v44 }
 0x6b2   :  { %11442 = vmatpush1.bf16.msra.mxu0 %v14652_v57 }
 0x6b3   :  { %11319 = vmatpush1.bf16.msra.mxu1 %v14649_v27  ;;  %11443 = vmatprep.subr.bf16.mxu0 %v14660_v30 }
 0x6b4   :  { %11320 = vmatprep.subr.bf16.mxu1 %v14657_v33 }
 0x6b6   :  { %11444 = vmatpush1.bf16.msra.mxu0 %v14658_v38  ;;  %v14724_v38 = vld [vmem:[#allocation12 + $0xcc8] ss:$16 sps:$4 sm:$0xff]  }
 0x6b7   :  { %11321 = vmatpush1.bf16.msra.mxu1 %v14655_v59  ;;  %11445 = vmatprep.subr.bf16.mxu0 %v14666_v39 }
 0x6b8   :  { %11322 = vmatprep.subr.bf16.mxu1 %v14663_v43 }
 0x6ba   :  { %11446 = vmatpush1.bf16.msra.mxu0 %v14664_v15  ;;  %v14721_v15 = vld [vmem:[#allocation12 + $0x6c8] ss:$16 sps:$4 sm:$0xff]  }
 0x6bb   :  { %11323 = vmatpush1.bf16.msra.mxu1 %v14661_v49  ;;  %11447 = vmatprep.subr.bf16.mxu0 %v14672_v41  ;;  %v14732_v49 = vld [vmem:[#allocation12 + $0xcec] ss:$16 sps:$4 sm:$0xff]  }
 0x6bc   :  { %11324 = vmatprep.subr.bf16.mxu1 %v14669_v46  ;;  %v14729_v46 = vld [vmem:[#allocation12 + $0x6ec] ss:$16 sps:$4 sm:$0xff]  }
 0x6be   :  { %11448 = vmatpush1.bf16.msra.mxu0 %v14670_v14 }
 0x6bf   :  { %11325 = vmatpush1.bf16.msra.mxu1 %v14667_v50  ;;  %11449 = vmatprep.subr.bf16.mxu0 %v14678_v26  ;;  %v14730_v50 = vld [vmem:[#allocation12 + $0xce8] ss:$16 sps:$4 sm:$0xff]  }
 0x6c0   :  { %11326 = vmatprep.subr.bf16.mxu1 %v14675_v51  ;;  %v14727_v26 = vld [vmem:[#allocation12 + $0x6e8] ss:$16 sps:$4 sm:$0xff]   ;;  %v14735_v51 = vld [vmem:[#allocation12 + $0x70c] ss:$16 sps:$4 sm:$0xff]  }
 0x6c2   :  { %11450 = vmatpush1.bf16.msra.mxu0 %v14676_v58  ;;  %v14736_v58 = vld [vmem:[#allocation12 + $0xd08] ss:$16 sps:$4 sm:$0xff]  }
 0x6c3   :  { %11327 = vmatpush1.bf16.msra.mxu1 %v14673_v53  ;;  %11451 = vmatprep.subr.bf16.mxu0 %v14684_v55  ;;  %v14733_v53 = vld [vmem:[#allocation12 + $0x708] ss:$16 sps:$4 sm:$0xff]   ;;  %v14744_v55 = vld [vmem:[#allocation12 + $0xd2c] ss:$16 sps:$4 sm:$0xff]  }
 0x6c4   :  { %11328 = vmatprep.subr.bf16.mxu1 %v14681_v54  ;;  %v14742_v54 = vld [vmem:[#allocation12 + $0xd28] ss:$16 sps:$4 sm:$0xff]  }
 0x6c6   :  { %11452 = vmatpush1.bf16.msra.mxu0 %v14682_v47  ;;  %v14750_v47 = vld [vmem:[#allocation12 + $0xd4c] ss:$16 sps:$4 sm:$0xff]  }
 0x6c7   :  { %11329 = vmatpush1.bf16.msra.mxu1 %v14679_v34  ;;  %11503 = vmatprep.subr.bf16.mxu0 %v14690_v56  ;;  %v14747_v34 = vld [vmem:[#allocation12 + $0x74c] ss:$16 sps:$4 sm:$0xff]   ;;  %v14748_v56 = vld [vmem:[#allocation12 + $0xd48] ss:$16 sps:$4 sm:$0xff]  }
 0x6c8   :  { %11380 = vmatprep.subr.bf16.mxu1 %v14687_v62  ;;  %v14745_v62 = vld [vmem:[#allocation12 + $0x748] ss:$16 sps:$4 sm:$0xff]  }
 0x6c9   :  { %11454 = vmatmul.mubr.bf16.vlgmr.msra.gmra.mrb[40].mxu0 %v15604_v10  ;;  %v14708_v10 = vld [vmem:[#allocation12 + $0xc6c] ss:$16 sps:$4 sm:$0xff]  }
 0x6ca   :  { %11331 = vmatmul.mubr.bf16.vlgmr.msra.gmra.mrb[36].mxu1 %v15606_v5  ;;  %11504 = vmatpush1.bf16.msra.mxu0 %v14688_v32  ;;  %v14705_v5 = vld [vmem:[#allocation12 + $0x66c] ss:$16 sps:$4 sm:$0xff]  }
 0x6cb   :  { %11381 = vmatpush1.bf16.msra.mxu1 %v14685_v52  ;;  %11412 = vmatprep.mubr.bf16.mxu1 %v15608_v11  ;;  %v14714_v11 = vld [vmem:[#allocation12 + $0xc8c] ss:$16 sps:$4 sm:$0xff]  }
 0x6cc   :  { %11535 = vmatprep.mubr.bf16.mxu0 %v15618_v60  ;;  %11382 = vmatprep.subr.bf16.mxu1 %v14693_v4  ;;  %v14712_v60 = vld [vmem:[#allocation12 + $0xc88] ss:$16 sps:$4 sm:$0xff]   ;;  %v14756_v32 = vld [vmem:[#allocation12 + $0xd6c] ss:$16 sps:$4 sm:$0xff]  }
 0x6cd   :  { %11505 = vmatprep.subr.bf16.mxu0 %v14696_v7  ;;  %v14753_v52 = vld [vmem:[#allocation12 + $0x76c] ss:$16 sps:$4 sm:$0xff]   ;;  %v14754_v4 = vld [vmem:[#allocation12 + $0xd68] ss:$16 sps:$4 sm:$0xff]  }
 0x6ce   :  { %11506 = vmatpush1.bf16.msra.mxu0 %v14694_v36  ;;  %v14751_v7 = vld [vmem:[#allocation12 + $0x768] ss:$16 sps:$4 sm:$0xff]   ;;  %v14762_v36 = vld [vmem:[#allocation12 + $0xd8c] ss:$16 sps:$4 sm:$0xff]  }
 0x6cf   :  { %11383 = vmatpush1.bf16.msra.mxu1 %v14691_v42  ;;  %11507 = vmatprep.subr.bf16.mxu0 %v14702_v12  ;;  %v14759_v42 = vld [vmem:[#allocation12 + $0x78c] ss:$16 sps:$4 sm:$0xff]   ;;  %v14760_v12 = vld [vmem:[#allocation12 + $0xd88] ss:$16 sps:$4 sm:$0xff]  }
 0x6d0   :  { %11384 = vmatprep.subr.bf16.mxu1 %v14699_v19  ;;  %v14757_v19 = vld [vmem:[#allocation12 + $0x788] ss:$16 sps:$4 sm:$0xff]  }
 0x6d2   :  { %11508 = vmatpush1.bf16.msra.mxu0 %v14700_v21  ;;  %v14768_v21 = vld [vmem:[#allocation12 + $0xdac] ss:$16 sps:$4 sm:$0xff]  }
 0x6d3   :  { %11385 = vmatpush1.bf16.msra.mxu1 %v14697_v22  ;;  %11509 = vmatprep.subr.bf16.mxu0 %v14708_v10  ;;  %v14765_v22 = vld [vmem:[#allocation12 + $0x7ac] ss:$16 sps:$4 sm:$0xff]   ;;  %v14766_v10 = vld [vmem:[#allocation12 + $0xda8] ss:$16 sps:$4 sm:$0xff]  }
 0x6d4   :  { %11386 = vmatprep.subr.bf16.mxu1 %v14705_v5  ;;  %v14763_v5 = vld [vmem:[#allocation12 + $0x7a8] ss:$16 sps:$4 sm:$0xff]  }
 0x6d6   :  { %11510 = vmatpush1.bf16.msra.mxu0 %v14706_v6  ;;  %v14774_v6 = vld [vmem:[#allocation12 + $0xdcc] ss:$16 sps:$4 sm:$0xff]  }
 0x6d7   :  { %11387 = vmatpush1.bf16.msra.mxu1 %v14703_v1  ;;  %11511 = vmatprep.subr.bf16.mxu0 %v14714_v11  ;;  %v14771_v1 = vld [vmem:[#allocation12 + $0x7cc] ss:$16 sps:$4 sm:$0xff]   ;;  %v14772_v11 = vld [vmem:[#allocation12 + $0xdc8] ss:$16 sps:$4 sm:$0xff]  }
 0x6d8   :  { %11388 = vmatprep.subr.bf16.mxu1 %v14711_v31  ;;  %v14769_v31 = vld [vmem:[#allocation12 + $0x7c8] ss:$16 sps:$4 sm:$0xff]  }
 0x6da   :  { %11512 = vmatpush1.bf16.msra.mxu0 %v14712_v60  ;;  %v14780_v60 = vld [vmem:[#allocation12 + $0xdec] ss:$16 sps:$4 sm:$0xff]  }
 0x6db   :  { %11389 = vmatpush1.bf16.msra.mxu1 %v14709_v23  ;;  %11513 = vmatprep.subr.bf16.mxu0 %v14720_v35  ;;  %v14777_v23 = vld [vmem:[#allocation12 + $0x7ec] ss:$16 sps:$4 sm:$0xff]   ;;  %v14778_v35 = vld [vmem:[#allocation12 + $0xde8] ss:$16 sps:$4 sm:$0xff]  }
 0x6dc   :  { %v15695_v20 = vpop.f32.mrb[28].mxu0  ;;  %11390 = vmatprep.subr.bf16.mxu1 %v14717_v63  ;;  %v14775_v63 = vld [vmem:[#allocation12 + $0x7e8] ss:$16 sps:$4 sm:$0xff]  }
 0x6dd   :  { %v11086_v44 = vpop.f32.mrb[24].mxu1  ;;  %v15697_v57 = vpop.f32.mrb[29].mxu0 }
 0x6de   :  { %v11087_v27 = vadd.f32 %v11086_v44, %v15686_v0  ;;  %v11088_v30 = vpop.f32.mrb[25].mxu1  ;;  %v11213_v33 = vpop.f32.mrb[30].mxu0  ;;  %11514 = vmatpush1.bf16.msra.mxu0 %v14718_v24  ;;  %v14807_v24 = vld [vmem:[#allocation15 + $0x4] ss:$8 sps:$4 sm:$0xff]   ;;  %v14786_v44 = vld [vmem:[#allocation12 + $0xa2c] ss:$16 sps:$4 sm:$0xff]  }
 0x6df   :  { %v11089_v59 = vadd.f32 %v11088_v30, %v15689_v28  ;;  %v11090_v39 = vpop.f32.mrb[26].mxu1  ;;  %11391 = vmatpush1.bf16.msra.mxu1 %v14715_v18  ;;  %v11214_v43 = vpop.f32.mrb[31].mxu0  ;;  %11515 = vmatprep.subr.bf16.mxu0 %v14726_v25  ;;  %v14738_v28 = vld [vmem:[#allocation12 + $0xd0c] ss:$16 sps:$4 sm:$0xff]   ;;  %v14784_v33 = vld [vmem:[#allocation12 + $0xa28] ss:$16 sps:$4 sm:$0xff]  }
 0x6e0   :  { %v11091_v41 = vpop.f32.mrb[27].mxu1  ;;  %11392 = vmatprep.subr.bf16.mxu1 %v14723_v40  ;;  %v15702_v14 = vadd.f32 %v15679_v61, %v11087_v27  ;;  %v14741_v61 = vld [vmem:[#allocation12 + $0x72c] ss:$16 sps:$4 sm:$0xff]   ;;  %v14781_v40 = vld [vmem:[#allocation12 + $0xa08] ss:$16 sps:$4 sm:$0xff]  }
 0x6e1   :  { %v15705_v0 = vadd.f32 %v15681_v16, %v11089_v59  ;;  %v14739_v16 = vld [vmem:[#allocation12 + $0x728] ss:$16 sps:$4 sm:$0xff]   ;;  %v14783_v18 = vld [vmem:[#allocation12 + $0xa0c] ss:$16 sps:$4 sm:$0xff]  }
 0x6e2   :  { %11516 = vmatpush1.bf16.msra.mxu0 %v14724_v38  ;;  %v14805_v25 = vld [vmem:[#allocation15] ss:$8 sps:$4 sm:$0xff]   ;;  %v14813_v27 = vld [vmem:[#allocation15 + $0x14] ss:$8 sps:$4 sm:$0xff]   ;;  %v14811_v30 = vld [vmem:[#allocation15 + $0x10] ss:$8 sps:$4 sm:$0xff]  }
 0x6e3   :  { %11393 = vmatpush1.bf16.msra.mxu1 %v14721_v15  ;;  %11517 = vmatprep.subr.bf16.mxu0 %v14732_v49  ;;  %v14819_v38 = vld [vmem:[#allocation15 + $0x24] ss:$8 sps:$4 sm:$0xff]   ;;  %v14789_v59 = vld [vmem:[#allocation12 + $0xa4c] ss:$16 sps:$4 sm:$0xff]   ;;  %v14825_v15 = vld [vmem:[#allocation15 + $0x34] ss:$8 sps:$4 sm:$0xff]  }
 0x6e4   :  { %11394 = vmatprep.subr.bf16.mxu1 %v14729_v46  ;;  %v14817_v39 = vld [vmem:[#allocation15 + $0x20] ss:$8 sps:$4 sm:$0xff]   ;;  %v14787_v43 = vld [vmem:[#allocation12 + $0xa48] ss:$16 sps:$4 sm:$0xff]  }
 0x6e5   :  { %v14790_v49 = vld [vmem:[#allocation12 + $0xa68] ss:$16 sps:$4 sm:$0xff]   ;;  %v14829_v46 = vld [vmem:[#allocation15 + $0x40] ss:$8 sps:$4 sm:$0xff]  }
 0x6e6   :  { %11518 = vmatpush1.bf16.msra.mxu0 %v14730_v50  ;;  %v14831_v41 = vld [vmem:[#allocation15 + $0x44] ss:$8 sps:$4 sm:$0xff]  }
 0x6e7   :  { %11395 = vmatpush1.bf16.msra.mxu1 %v14727_v26  ;;  %11519 = vmatprep.subr.bf16.mxu0 %v14738_v28  ;;  %v14793_v50 = vld [vmem:[#allocation12 + $0xa88] ss:$16 sps:$4 sm:$0xff]   ;;  %v14798_v28 = vld [vmem:[#allocation12 + $0xaac] ss:$16 sps:$4 sm:$0xff]  }
 0x6e8   :  { %11396 = vmatprep.subr.bf16.mxu1 %v14735_v51  ;;  %v14837_v26 = vld [vmem:[#allocation15 + $0x54] ss:$8 sps:$4 sm:$0xff]   ;;  %v14835_v51 = vld [vmem:[#allocation15 + $0x50] ss:$8 sps:$4 sm:$0xff]  }
 0x6ea   :  { %11520 = vmatpush1.bf16.msra.mxu0 %v14736_v58  ;;  %v14796_v58 = vld [vmem:[#allocation12 + $0xaa8] ss:$16 sps:$4 sm:$0xff]  }
 0x6eb   :  { %11397 = vmatpush1.bf16.msra.mxu1 %v14733_v53  ;;  %11521 = vmatprep.subr.bf16.mxu0 %v14744_v55  ;;  %v14843_v53 = vld [vmem:[#allocation15 + $0x64] ss:$8 sps:$4 sm:$0xff]  }
 0x6ec   :  { %11398 = vmatprep.subr.bf16.mxu1 %v14741_v61  ;;  %v14801_v61 = vld [vmem:[#allocation12 + $0xacc] ss:$16 sps:$4 sm:$0xff]  }
 0x6ee   :  { %11522 = vmatpush1.bf16.msra.mxu0 %v14742_v54 }
 0x6ef   :  { %11399 = vmatpush1.bf16.msra.mxu1 %v14739_v16  ;;  %11523 = vmatprep.subr.bf16.mxu0 %v14750_v47 }
 0x6f0   :  { %11400 = vmatprep.subr.bf16.mxu1 %v14747_v34 }
 0x6f2   :  { %11524 = vmatpush1.bf16.msra.mxu0 %v14748_v56 }
 0x6f3   :  { %11401 = vmatpush1.bf16.msra.mxu1 %v14745_v62  ;;  %11525 = vmatprep.subr.bf16.mxu0 %v14756_v32  ;;  %v14841_v62 = vld [vmem:[#allocation15 + $0x60] ss:$8 sps:$4 sm:$0xff]  }
 0x6f4   :  { %11402 = vmatprep.subr.bf16.mxu1 %v14753_v52 }
 0x6f6   :  { %11526 = vmatpush1.bf16.msra.mxu0 %v14754_v4 }
 0x6f7   :  { %11403 = vmatpush1.bf16.msra.mxu1 %v14751_v7  ;;  %11527 = vmatprep.subr.bf16.mxu0 %v14762_v36  ;;  %v14799_v7 = vld [vmem:[#allocation12 + $0xac8] ss:$16 sps:$4 sm:$0xff]  }
 0x6f8   :  { %11404 = vmatprep.subr.bf16.mxu1 %v14759_v42  ;;  %v14849_v36 = vld [vmem:[#allocation15 + $0x74] ss:$8 sps:$4 sm:$0xff]  }
 0x6fa   :  { %11528 = vmatpush1.bf16.msra.mxu0 %v14760_v12  ;;  %v14804_v12 = vld [vmem:[#allocation12 + $0xaec] ss:$16 sps:$4 sm:$0xff]  }
 0x6fb   :  { %11405 = vmatpush1.bf16.msra.mxu1 %v14757_v19  ;;  %11529 = vmatprep.subr.bf16.mxu0 %v14768_v21  ;;  %v14847_v21 = vld [vmem:[#allocation15 + $0x70] ss:$8 sps:$4 sm:$0xff]  }
 0x6fc   :  { %11406 = vmatprep.subr.bf16.mxu1 %v14765_v22  ;;  %v14802_v22 = vld [vmem:[#allocation12 + $0xae8] ss:$16 sps:$4 sm:$0xff]  }
 0x6fe   :  { %11530 = vmatpush1.bf16.msra.mxu0 %v14766_v10  ;;  %v14810_v10 = vld [vmem:[#allocation12 + $0xb0c] ss:$16 sps:$4 sm:$0xff]  }
 0x6ff   :  { %11407 = vmatpush1.bf16.msra.mxu1 %v14763_v5  ;;  %11531 = vmatprep.subr.bf16.mxu0 %v14774_v6  ;;  %v14853_v5 = vld [vmem:[#allocation15 + $0x80] ss:$8 sps:$4 sm:$0xff]   ;;  %v14808_v6 = vld [vmem:[#allocation12 + $0xb08] ss:$16 sps:$4 sm:$0xff]  }
 0x700   :  { %11408 = vmatprep.subr.bf16.mxu1 %v14771_v1  ;;  %v14861_v1 = vld [vmem:[#allocation15 + $0x94] ss:$8 sps:$4 sm:$0xff]  }
 0x702   :  { %11532 = vmatpush1.bf16.msra.mxu0 %v14772_v11  ;;  %v14859_v11 = vld [vmem:[#allocation15 + $0x90] ss:$8 sps:$4 sm:$0xff]  }
 0x703   :  { %11409 = vmatpush1.bf16.msra.mxu1 %v14769_v31  ;;  %11533 = vmatprep.subr.bf16.mxu0 %v14780_v60  ;;  %v14867_v31 = vld [vmem:[#allocation15 + $0xa4] ss:$8 sps:$4 sm:$0xff]   ;;  %v14822_v60 = vld [vmem:[#allocation12 + $0xb4c] ss:$16 sps:$4 sm:$0xff]  }
 0x704   :  { %11410 = vmatprep.subr.bf16.mxu1 %v14777_v23  ;;  %v14865_v23 = vld [vmem:[#allocation15 + $0xa0] ss:$8 sps:$4 sm:$0xff]  }
 0x706   :  { %11534 = vmatpush1.bf16.msra.mxu0 %v14778_v35  ;;  %v14820_v35 = vld [vmem:[#allocation12 + $0xb48] ss:$16 sps:$4 sm:$0xff]  }
 0x707   :  { %11411 = vmatpush1.bf16.msra.mxu1 %v14775_v63  ;;  %12030 = vmatprep.subr.bf16.mxu0 %v14807_v24  ;;  %v14873_v63 = vld [vmem:[#allocation15 + $0xb4] ss:$8 sps:$4 sm:$0xff]   ;;  %v14828_v24 = vld [vmem:[#allocation12 + $0xb6c] ss:$16 sps:$4 sm:$0xff]  }
 0x708   :  { %11462 = vmatprep.subr.bf16.mxu1 %v14783_v18  ;;  %v14871_v18 = vld [vmem:[#allocation15 + $0xb0] ss:$8 sps:$4 sm:$0xff]  }
 0x709   :  { %11536 = vmatmul.mubr.bf16.vlgmr.msra.gmra.mrb[44].mxu0 %v15633_v2  ;;  %v14792_v2 = vld [vmem:[#allocation12 + $0xa6c] ss:$16 sps:$4 sm:$0xff]  }
 0x70a   :  { %11413 = vmatmul.mubr.bf16.vlgmr.msra.gmra.mrb[40].mxu1 %v15635_v3  ;;  %12031 = vmatpush1.bf16.msra.mxu0 %v14805_v25  ;;  %v14823_v3 = vld [vmem:[#allocation15 + $0x30] ss:$8 sps:$4 sm:$0xff]   ;;  %v14826_v25 = vld [vmem:[#allocation12 + $0xb68] ss:$16 sps:$4 sm:$0xff]  }
 0x70b   :  { %11463 = vmatpush1.bf16.msra.mxu1 %v14781_v40  ;;  %11494 = vmatprep.mubr.bf16.mxu1 %v15637_v8  ;;  %v14795_v8 = vld [vmem:[#allocation12 + $0xa8c] ss:$16 sps:$4 sm:$0xff]   ;;  %v14879_v40 = vld [vmem:[#allocation15 + $0xc4] ss:$8 sps:$4 sm:$0xff]  }
 0x70c   :  { %11464 = vmatprep.subr.bf16.mxu1 %v14786_v44  ;;  %12032 = vmatprep.subr.bf16.mxu0 %v14813_v27  ;;  %v14834_v44 = vld [vmem:[#allocation12 + $0xb8c] ss:$16 sps:$4 sm:$0xff]  }
 0x70d   :  { %v14877_v27 = vld [vmem:[#allocation15 + $0xc0] ss:$8 sps:$4 sm:$0xff]  }
 0x70e   :  { %12033 = vmatpush1.bf16.msra.mxu0 %v14811_v30  ;;  %v14832_v30 = vld [vmem:[#allocation12 + $0xb88] ss:$16 sps:$4 sm:$0xff]  }
 0x70f   :  { %11465 = vmatpush1.bf16.msra.mxu1 %v14784_v33  ;;  %12034 = vmatprep.subr.bf16.mxu0 %v14819_v38  ;;  %v14885_v33 = vld [vmem:[#allocation15 + $0xd4] ss:$8 sps:$4 sm:$0xff]   ;;  %v14840_v38 = vld [vmem:[#allocation12 + $0xbac] ss:$16 sps:$4 sm:$0xff]  }
 0x710   :  { %11466 = vmatprep.subr.bf16.mxu1 %v14789_v59  ;;  %v14883_v59 = vld [vmem:[#allocation15 + $0xd0] ss:$8 sps:$4 sm:$0xff]  }
 0x712   :  { %12035 = vmatpush1.bf16.msra.mxu0 %v14817_v39  ;;  %v14838_v39 = vld [vmem:[#allocation12 + $0xba8] ss:$16 sps:$4 sm:$0xff]  }
 0x713   :  { %11467 = vmatpush1.bf16.msra.mxu1 %v14787_v43  ;;  %12036 = vmatprep.subr.bf16.mxu0 %v14825_v15  ;;  %v14891_v43 = vld [vmem:[#allocation15 + $0xe4] ss:$8 sps:$4 sm:$0xff]   ;;  %v14846_v15 = vld [vmem:[#allocation12 + $0xbcc] ss:$16 sps:$4 sm:$0xff]  }
 0x714   :  { %11468 = vmatprep.subr.bf16.mxu1 %v14792_v2  ;;  %v14889_v2 = vld [vmem:[#allocation15 + $0xe0] ss:$8 sps:$4 sm:$0xff]  }
 0x716   :  { %12037 = vmatpush1.bf16.msra.mxu0 %v14823_v3  ;;  %v14844_v3 = vld [vmem:[#allocation12 + $0xbc8] ss:$16 sps:$4 sm:$0xff]  }
 0x717   :  { %11469 = vmatpush1.bf16.msra.mxu1 %v14790_v49  ;;  %12038 = vmatprep.subr.bf16.mxu0 %v14831_v41  ;;  %v14897_v49 = vld [vmem:[#allocation15 + $0xf4] ss:$8 sps:$4 sm:$0xff]   ;;  %v14852_v41 = vld [vmem:[#allocation12 + $0xbec] ss:$16 sps:$4 sm:$0xff]  }
 0x718   :  { %11470 = vmatprep.subr.bf16.mxu1 %v14795_v8  ;;  %v14895_v8 = vld [vmem:[#allocation15 + $0xf0] ss:$8 sps:$4 sm:$0xff]  }
 0x71a   :  { %12039 = vmatpush1.bf16.msra.mxu0 %v14829_v46  ;;  %v14850_v46 = vld [vmem:[#allocation12 + $0xbe8] ss:$16 sps:$4 sm:$0xff]  }
 0x71b   :  { %11471 = vmatpush1.bf16.msra.mxu1 %v14793_v50  ;;  %12040 = vmatprep.subr.bf16.mxu0 %v14837_v26  ;;  %v14858_v50 = vld [vmem:[#allocation12 + $0xe0c] ss:$16 sps:$4 sm:$0xff]   ;;  %v14856_v26 = vld [vmem:[#allocation12 + $0xe08] ss:$16 sps:$4 sm:$0xff]  }
 0x71c   :  { %v15710_v55 = vpop.f32.mrb[32].mxu0  ;;  %11472 = vmatprep.subr.bf16.mxu1 %v14798_v28  ;;  %v14864_v28 = vld [vmem:[#allocation12 + $0xe2c] ss:$16 sps:$4 sm:$0xff]  }
 0x71d   :  { %v11168_v54 = vpop.f32.mrb[28].mxu1  ;;  %v15712_v16 = vpop.f32.mrb[33].mxu0 }
 0x71e   :  { %v11169_v47 = vadd.f32 %v11168_v54, %v15702_v14  ;;  %v11170_v34 = vpop.f32.mrb[29].mxu1  ;;  %v11295_v56 = vpop.f32.mrb[34].mxu0  ;;  %12041 = vmatpush1.bf16.msra.mxu0 %v14835_v51  ;;  %v14862_v51 = vld [vmem:[#allocation12 + $0xe28] ss:$16 sps:$4 sm:$0xff]  }
 0x71f   :  { %v11171_v32 = vadd.f32 %v11170_v34, %v15705_v0  ;;  %v11172_v52 = vpop.f32.mrb[30].mxu1  ;;  %11473 = vmatpush1.bf16.msra.mxu1 %v14796_v58  ;;  %v11296_v4 = vpop.f32.mrb[35].mxu0  ;;  %12042 = vmatprep.subr.bf16.mxu0 %v14843_v53  ;;  %v14855_v0 = vld [vmem:[#allocation15 + $0x84] ss:$8 sps:$4 sm:$0xff]   ;;  %v14870_v58 = vld [vmem:[#allocation12 + $0xe4c] ss:$16 sps:$4 sm:$0xff]  }
 0x720   :  { %v11173_v42 = vpop.f32.mrb[31].mxu1  ;;  %11474 = vmatprep.subr.bf16.mxu1 %v14801_v61  ;;  %v15717_v19 = vadd.f32 %v15695_v20, %v11169_v47  ;;  %v14816_v20 = vld [vmem:[#allocation12 + $0xb2c] ss:$16 sps:$4 sm:$0xff]   ;;  %v14868_v53 = vld [vmem:[#allocation12 + $0xe48] ss:$16 sps:$4 sm:$0xff]  }
 0x721   :  { %v15720_v14 = vadd.f32 %v15697_v57, %v11171_v32  ;;  %v14814_v57 = vld [vmem:[#allocation12 + $0xb28] ss:$16 sps:$4 sm:$0xff]   ;;  %v14876_v61 = vld [vmem:[#allocation12 + $0xe6c] ss:$16 sps:$4 sm:$0xff]  }
 0x722   :  { %12043 = vmatpush1.bf16.msra.mxu0 %v14841_v62  ;;  %v14874_v54 = vld [vmem:[#allocation12 + $0xe68] ss:$16 sps:$4 sm:$0xff]   ;;  %v14882_v47 = vld [vmem:[#allocation12 + $0xe8c] ss:$16 sps:$4 sm:$0xff]   ;;  %v15724_v62 = vld [vmem:[#allocation13] sm:$0xf] }
 0x723   :  { %11475 = vmatpush1.bf16.msra.mxu1 %v14799_v7  ;;  %12044 = vmatprep.subr.bf16.mxu0 %v14849_v36  ;;  %v14880_v34 = vld [vmem:[#allocation12 + $0xe88] ss:$16 sps:$4 sm:$0xff]   ;;  %v14888_v56 = vld [vmem:[#allocation12 + $0xeac] ss:$16 sps:$4 sm:$0xff]   ;;  %v11609_v7 = vrot.slane %v15724_v62, %v15479_v13 }
 0x724   :  { %11476 = vmatprep.subr.bf16.mxu1 %v14804_v12  ;;  %v14894_v52 = vld [vmem:[#allocation12 + $0xecc] ss:$16 sps:$4 sm:$0xff]  }
 0x726   :  { %12045 = vmatpush1.bf16.msra.mxu0 %v14847_v21 }
 0x727   :  { %11477 = vmatpush1.bf16.msra.mxu1 %v14802_v22  ;;  %12046 = vmatprep.subr.bf16.mxu0 %v14855_v0 }
 0x728   :  { %11478 = vmatprep.subr.bf16.mxu1 %v14810_v10 }
 0x72a   :  { %12047 = vmatpush1.bf16.msra.mxu0 %v14853_v5  ;;  %v14892_v5 = vld [vmem:[#allocation12 + $0xec8] ss:$16 sps:$4 sm:$0xff]  }
 0x72b   :  { %11479 = vmatpush1.bf16.msra.mxu1 %v14808_v6  ;;  %12048 = vmatprep.subr.bf16.mxu0 %v14861_v1 }
 0x72c   :  { %11480 = vmatprep.subr.bf16.mxu1 %v14816_v20  ;;  %v14900_v20 = vld [vmem:[#allocation12 + $0xeec] ss:$16 sps:$4 sm:$0xff]  }
 0x72e   :  { %12049 = vmatpush1.bf16.msra.mxu0 %v14859_v11 }
 0x72f   :  { %11481 = vmatpush1.bf16.msra.mxu1 %v14814_v57  ;;  %12050 = vmatprep.subr.bf16.mxu0 %v14867_v31 }
 0x730   :  { %11482 = vmatprep.subr.bf16.mxu1 %v14822_v60  ;;  %v14898_v60 = vld [vmem:[#allocation12 + $0xee8] ss:$16 sps:$4 sm:$0xff]  }
 0x732   :  { %12051 = vmatpush1.bf16.msra.mxu0 %v14865_v23  ;;  %v14903_v23 = vld [vmem:[#allocation12 + $0xf0c] ss:$16 sps:$4 sm:$0xff]  }
 0x733   :  { %11483 = vmatpush1.bf16.msra.mxu1 %v14820_v35  ;;  %12052 = vmatprep.subr.bf16.mxu0 %v14873_v63  ;;  %v14906_v63 = vld [vmem:[#allocation12 + $0xf2c] ss:$16 sps:$4 sm:$0xff]  }
 0x734   :  { %11484 = vmatprep.subr.bf16.mxu1 %v14828_v24  ;;  %v14904_v24 = vld [vmem:[#allocation12 + $0xf28] ss:$16 sps:$4 sm:$0xff]  }
 0x736   :  { %12053 = vmatpush1.bf16.msra.mxu0 %v14871_v18  ;;  %v14909_v18 = vld [vmem:[#allocation12 + $0xf4c] ss:$16 sps:$4 sm:$0xff]  }
 0x737   :  { %11485 = vmatpush1.bf16.msra.mxu1 %v14826_v25  ;;  %12054 = vmatprep.subr.bf16.mxu0 %v14879_v40  ;;  %v14907_v25 = vld [vmem:[#allocation12 + $0xf48] ss:$16 sps:$4 sm:$0xff]   ;;  %v14912_v40 = vld [vmem:[#allocation12 + $0xf6c] ss:$16 sps:$4 sm:$0xff]  }
 0x738   :  { %11486 = vmatprep.subr.bf16.mxu1 %v14834_v44  ;;  %v14910_v44 = vld [vmem:[#allocation12 + $0xf68] ss:$16 sps:$4 sm:$0xff]  }
 0x73a   :  { %12055 = vmatpush1.bf16.msra.mxu0 %v14877_v27  ;;  %v14915_v27 = vld [vmem:[#allocation12 + $0xf8c] ss:$16 sps:$4 sm:$0xff]  }
 0x73b   :  { %11487 = vmatpush1.bf16.msra.mxu1 %v14832_v30  ;;  %12056 = vmatprep.subr.bf16.mxu0 %v14885_v33  ;;  %v14913_v30 = vld [vmem:[#allocation12 + $0xf88] ss:$16 sps:$4 sm:$0xff]   ;;  %v14918_v33 = vld [vmem:[#allocation12 + $0xfac] ss:$16 sps:$4 sm:$0xff]  }
 0x73c   :  { %11488 = vmatprep.subr.bf16.mxu1 %v14840_v38  ;;  %v14916_v38 = vld [vmem:[#allocation12 + $0xfa8] ss:$16 sps:$4 sm:$0xff]  }
 0x73e   :  { %12057 = vmatpush1.bf16.msra.mxu0 %v14883_v59  ;;  %v14921_v59 = vld [vmem:[#allocation12 + $0xfcc] ss:$16 sps:$4 sm:$0xff]  }
 0x73f   :  { %11489 = vmatpush1.bf16.msra.mxu1 %v14838_v39  ;;  %12058 = vmatprep.subr.bf16.mxu0 %v14891_v43  ;;  %v14919_v39 = vld [vmem:[#allocation12 + $0xfc8] ss:$16 sps:$4 sm:$0xff]   ;;  %v14924_v43 = vld [vmem:[#allocation12 + $0xfec] ss:$16 sps:$4 sm:$0xff]  }
 0x740   :  { %11490 = vmatprep.subr.bf16.mxu1 %v14846_v15  ;;  %v14922_v15 = vld [vmem:[#allocation12 + $0xfe8] ss:$16 sps:$4 sm:$0xff]  }
 0x742   :  { %12059 = vmatpush1.bf16.msra.mxu0 %v14889_v2 }
 0x743   :  { %11491 = vmatpush1.bf16.msra.mxu1 %v14844_v3  ;;  %12060 = vmatprep.subr.bf16.mxu0 %v14897_v49 }
 0x744   :  { %11492 = vmatprep.subr.bf16.mxu1 %v14852_v41 }
 0x746   :  { %12061 = vmatpush1.bf16.msra.mxu0 %v14895_v8 }
 0x747   :  { %11493 = vmatpush1.bf16.msra.mxu1 %v14850_v46 }
 0x748   :  { %11544 = vmatprep.subr.bf16.mxu1 %v14858_v50 }
 0x74a   :  { %11495 = vmatmul.mubr.bf16.vlgmr.msra.gmra.mrb[44].mxu1 %v15650_v45  ;;  %v14886_v45 = vld [vmem:[#allocation12 + $0xea8] ss:$16 sps:$4 sm:$0xff]  }
 0x74b   :  { %11545 = vmatpush1.bf16.msra.mxu1 %v14856_v26  ;;  %11576 = vmatprep.mubr.bf16.mxu1 %v15666_v37  ;;  %v11605_v37 = vrot.slane %v15724_v62, %v15476_v9 }
 0x74c   :  { %11546 = vmatprep.subr.bf16.mxu1 %v14864_v28 }
 0x74f   :  { %11547 = vmatpush1.bf16.msra.mxu1 %v14862_v51 }
 0x750   :  { %11548 = vmatprep.subr.bf16.mxu1 %v14870_v58 }
 0x753   :  { %11549 = vmatpush1.bf16.msra.mxu1 %v14868_v53  ;;  %v14925_v53 = vld [vmem:[#allocation15 + $0x100] ss:$8 sps:$4 sm:$0xff]  }
 0x754   :  { %11550 = vmatprep.subr.bf16.mxu1 %v14876_v61  ;;  %v14927_v61 = vld [vmem:[#allocation15 + $0x104] ss:$8 sps:$4 sm:$0xff]  }
 0x755   :  { %12071 = vmatprep.subr.bf16.mxu0 %v14927_v61 }
 0x757   :  { %11551 = vmatpush1.bf16.msra.mxu1 %v14874_v54  ;;  %v14930_v54 = vld [vmem:[#allocation15 + $0x114] ss:$8 sps:$4 sm:$0xff]  }
 0x758   :  { %11552 = vmatprep.subr.bf16.mxu1 %v14882_v47  ;;  %v14928_v47 = vld [vmem:[#allocation15 + $0x110] ss:$8 sps:$4 sm:$0xff]  }
 0x75b   :  { %11553 = vmatpush1.bf16.msra.mxu1 %v14880_v34  ;;  %v14933_v34 = vld [vmem:[#allocation15 + $0x124] ss:$8 sps:$4 sm:$0xff]  }
 0x75c   :  { %v15728_v32 = vpop.f32.mrb[36].mxu0  ;;  %11554 = vmatprep.subr.bf16.mxu1 %v14888_v56  ;;  %v14936_v56 = vld [vmem:[#allocation15 + $0x134] ss:$8 sps:$4 sm:$0xff]  }
 0x75d   :  { %v11250_v4 = vpop.f32.mrb[32].mxu1  ;;  %v15732_v36 = vpop.f32.mrb[37].mxu0 }
 0x75e   :  { %v11251_v42 = vadd.f32 %v11250_v4, %v15717_v19  ;;  %v11252_v12 = vpop.f32.mrb[33].mxu1  ;;  %v11377_v21 = vpop.f32.mrb[38].mxu0  ;;  %v14945_v4 = vld [vmem:[#allocation15 + $0x164] ss:$8 sps:$4 sm:$0xff]  }
 0x75f   :  { %v11253_v22 = vadd.f32 %v11252_v12, %v15720_v14  ;;  %v11254_v0 = vpop.f32.mrb[34].mxu1  ;;  %11555 = vmatpush1.bf16.msra.mxu1 %v14886_v45  ;;  %v11378_v10 = vpop.f32.mrb[39].mxu0  ;;  %v14901_v14 = vld [vmem:[#allocation12 + $0xf08] ss:$16 sps:$4 sm:$0xff]   ;;  %v14949_v21 = vld [vmem:[#allocation15 + $0x180] ss:$8 sps:$4 sm:$0xff]  }
 0x760   :  { %v11622_v6 = vadd.f32 %v11605_v37, %v11251_v42  ;;  %v11255_v1 = vpop.f32.mrb[35].mxu1  ;;  %11556 = vmatprep.subr.bf16.mxu1 %v14894_v52  ;;  %v14939_v45 = vld [vmem:[#allocation15 + $0x144] ss:$8 sps:$4 sm:$0xff]   ;;  %v14937_v37 = vld [vmem:[#allocation15 + $0x140] ss:$8 sps:$4 sm:$0xff]  }
 0x761   :  { %v11623_v11 = vadd.f32 %v11609_v7, %v11253_v22  ;;  %v14940_v52 = vld [vmem:[#allocation15 + $0x150] ss:$8 sps:$4 sm:$0xff]   ;;  %v14943_v7 = vld [vmem:[#allocation15 + $0x160] ss:$8 sps:$4 sm:$0xff]   ;;  %v14951_v12 = vld [vmem:[#allocation15 + $0x184] ss:$8 sps:$4 sm:$0xff]  }
 0x762   :  { %v11626_v57 = vmax.f32 %v11622_v6, 0.0  ;;  %v14946_v42 = vld [vmem:[#allocation15 + $0x170] ss:$8 sps:$4 sm:$0xff]   ;;  %v14954_v22 = vld [vmem:[#allocation15 + $0x194] ss:$8 sps:$4 sm:$0xff]  }
 0x763   :  { %v11627_v31 = vmax.f32 %v11623_v11, 0.0  ;;  %11557 = vmatpush1.bf16.msra.mxu1 %v14892_v5  ;;  %v14952_v0 = vld [vmem:[#allocation15 + $0x190] ss:$8 sps:$4 sm:$0xff]   ;;  %v14957_v10 = vld [vmem:[#allocation15 + $0x1a4] ss:$8 sps:$4 sm:$0xff]  }
 0x764   :  { %11558 = vmatprep.subr.bf16.mxu1 %v14900_v20  ;;  %v11630_v35 = vpack.c.bf16 %v11626_v57, %v11626_v57  ;;  %v14955_v5 = vld [vmem:[#allocation15 + $0x1a0] ss:$8 sps:$4 sm:$0xff]   ;;  %v14960_v6 = vld [vmem:[#allocation15 + $0x1b4] ss:$8 sps:$4 sm:$0xff]   ;;  %v14958_v1 = vld [vmem:[#allocation15 + $0x1b0] ss:$8 sps:$4 sm:$0xff]  }
 0x765   :  { %v11631_v19 = vpack.c.bf16 %v11627_v31, %v11627_v31  ;;  %v14963_v20 = vld [vmem:[#allocation15 + $0x1c4] ss:$8 sps:$4 sm:$0xff]   ;;  %v14961_v11 = vld [vmem:[#allocation15 + $0x1c0] ss:$8 sps:$4 sm:$0xff]   ;;  %v14966_v57 = vld [vmem:[#allocation15 + $0x1d4] ss:$8 sps:$4 sm:$0xff]  }
 0x766   :  { %v14964_v31 = vld [vmem:[#allocation15 + $0x1d0] ss:$8 sps:$4 sm:$0xff]  }
 0x767   :  { %11559 = vmatpush1.bf16.msra.mxu1 %v14898_v60  ;;  %12062 = vmatprep.mubr.bf16.mxu0 %v11631_v19 }
 0x768   :  { %12063 = vmatmul.mubr.bf16.vlgmr.msra.gmra.mrb[48].mxu0 %v11630_v35  ;;  %11560 = vmatprep.subr.bf16.mxu1 %v14903_v23 }
 0x769   :  { %12072 = vmatpush1.bf16.msra.mxu0 %v14925_v53 }
 0x76a   :  { %12073 = vmatprep.subr.bf16.mxu0 %v14930_v54 }
 0x76b   :  { %11561 = vmatpush1.bf16.msra.mxu1 %v14901_v14 }
 0x76c   :  { %11562 = vmatprep.subr.bf16.mxu1 %v14906_v63 }
 0x76d   :  { %12074 = vmatpush1.bf16.msra.mxu0 %v14928_v47 }
 0x76e   :  { %12075 = vmatprep.subr.bf16.mxu0 %v14933_v34 }
 0x76f   :  { %11563 = vmatpush1.bf16.msra.mxu1 %v14904_v24 }
 0x770   :  { %11564 = vmatprep.subr.bf16.mxu1 %v14909_v18 }
 0x773   :  { %11565 = vmatpush1.bf16.msra.mxu1 %v14907_v25 }
 0x774   :  { %11566 = vmatprep.subr.bf16.mxu1 %v14912_v40  ;;  %v14969_v40 = vld [vmem:[#allocation15 + $0x1e4] ss:$8 sps:$4 sm:$0xff]  }
 0x777   :  { %11567 = vmatpush1.bf16.msra.mxu1 %v14910_v44 }
 0x778   :  { %11568 = vmatprep.subr.bf16.mxu1 %v14915_v27 }
 0x77b   :  { %11569 = vmatpush1.bf16.msra.mxu1 %v14913_v30  ;;  %v14967_v30 = vld [vmem:[#allocation15 + $0x1e0] ss:$8 sps:$4 sm:$0xff]  }
 0x77c   :  { %11570 = vmatprep.subr.bf16.mxu1 %v14918_v33 }
 0x77f   :  { %11571 = vmatpush1.bf16.msra.mxu1 %v14916_v38  ;;  %v14972_v38 = vld [vmem:[#allocation15 + $0x1f4] ss:$8 sps:$4 sm:$0xff]  }
 0x780   :  { %11572 = vmatprep.subr.bf16.mxu1 %v14921_v59  ;;  %v14970_v59 = vld [vmem:[#allocation15 + $0x1f0] ss:$8 sps:$4 sm:$0xff]  }
 0x783   :  { %11573 = vmatpush1.bf16.msra.mxu1 %v14919_v39  ;;  %v14973_v39 = vld [vmem:[%s15821_s8 + $0x40] sm:$0xff]  }
 0x784   :  { %11574 = vmatprep.subr.bf16.mxu1 %v14924_v43  ;;  %v14974_v43 = vld [vmem:[%s15821_s8] sm:$0xff]  }
 0x787   :  { %11575 = vmatpush1.bf16.msra.mxu1 %v14922_v15  ;;  %v14975_v15 = vld [vmem:[%s15821_s8 + $0x48] sm:$0xff]  }
 0x788   :  { %13953 = vmatprep.subr.bf16.mxu1 %v14973_v39 }
 0x78a   :  { %11577 = vmatmul.mubr.bf16.vlgmr.msra.gmra.mrb[48].mxu1 %v15673_v17 }
 0x78b   :  { %13954 = vmatpush3.bf16.msra.mxu1 %v14974_v43 }
 0x78c   :  { %13955 = vmatprep.subr.bf16.mxu1 %v14975_v15 }
 0x79c   :  { %v15737_v2 = vpop.f32.mrb[40].mxu0 }
 0x79d   :  { %v11332_v3 = vpop.f32.mrb[36].mxu1  ;;  %v15739_v49 = vpop.f32.mrb[41].mxu0 }
 0x79e   :  { %v11333_v41 = vadd.f32 %v11332_v3, %v15710_v55  ;;  %v11334_v8 = vpop.f32.mrb[37].mxu1  ;;  %v11459_v46 = vpop.f32.mrb[42].mxu0  ;;  %v14931_v55 = vld [vmem:[#allocation15 + $0x120] ss:$8 sps:$4 sm:$0xff]  }
 0x79f   :  { %v11335_v50 = vadd.f32 %v11334_v8, %v15712_v16  ;;  %v11336_v26 = vpop.f32.mrb[38].mxu1  ;;  %v11460_v28 = vpop.f32.mrb[43].mxu0  ;;  %12076 = vmatpush1.bf16.msra.mxu0 %v14931_v55  ;;  %v14934_v16 = vld [vmem:[#allocation15 + $0x130] ss:$8 sps:$4 sm:$0xff]   ;;  %v14977_v3 = vld [vmem:[%s15821_s8 + $0x50] sm:$0xff]   ;;  %v14980_v8 = vld [vmem:[%s15821_s8 + $0x18] sm:$0xff]   ;;  %v11613_v55 = vrot.slane %v15724_v62, %v15591_v29 }
 0x7a0   :  { %v11337_v51 = vpop.f32.mrb[39].mxu1  ;;  %v11374_v58 = vadd.f32 %v15728_v32, %v11333_v41  ;;  %12077 = vmatprep.subr.bf16.mxu0 %v14936_v56  ;;  %v14942_v32 = vld [vmem:[#allocation15 + $0x154] ss:$8 sps:$4 sm:$0xff]   ;;  %v14979_v41 = vld [vmem:[%s15821_s8 + $0x58] sm:$0xff]   ;;  %v14981_v46 = vld [vmem:[%s15821_s8 + $0x60] sm:$0xff]  }
 0x7a1   :  { %v11376_v17 = vadd.f32 %v15732_v36, %v11335_v50  ;;  %v14948_v36 = vld [vmem:[#allocation15 + $0x174] ss:$8 sps:$4 sm:$0xff]   ;;  %v14982_v50 = vld [vmem:[%s15821_s8 + $0x20] sm:$0xff]  }
 0x7a2   :  { %v14983_v26 = vld [vmem:[%s15821_s8 + $0x68] sm:$0xff]   ;;  %v14985_v29 = vld [vmem:[%s15821_s8 + $0x70] sm:$0xff]  }
 0x7a3   :  { %12078 = vmatpush1.bf16.msra.mxu0 %v14934_v16  ;;  %v14984_v28 = vld [vmem:[%s15821_s8 + $0x28] sm:$0xff]   ;;  %v11617_v16 = vrot.slane %v15724_v62, %v15566_v48  ;;  %v14986_v48 = vld [vmem:[%s15821_s8 + $0x30] sm:$0xff]   ;;  %v14987_v62 = vld [vmem:[%s15821_s8 + $0x78] sm:$0xff]  }
 0x7a4   :  { %12079 = vmatprep.subr.bf16.mxu0 %v14939_v45 }
 0x7a7   :  { %12080 = vmatpush1.bf16.msra.mxu0 %v14937_v37 }
 0x7a8   :  { %12081 = vmatprep.subr.bf16.mxu0 %v14942_v32 }
 0x7ab   :  { %12082 = vmatpush1.bf16.msra.mxu0 %v14940_v52 }
 0x7ac   :  { %12083 = vmatprep.subr.bf16.mxu0 %v14945_v4 }
 0x7af   :  { %12084 = vmatpush1.bf16.msra.mxu0 %v14943_v7 }
 0x7b0   :  { %12085 = vmatprep.subr.bf16.mxu0 %v14948_v36 }
 0x7b3   :  { %12086 = vmatpush1.bf16.msra.mxu0 %v14946_v42 }
 0x7b4   :  { %12087 = vmatprep.subr.bf16.mxu0 %v14951_v12 }
 0x7b7   :  { %12088 = vmatpush1.bf16.msra.mxu0 %v14949_v21 }
 0x7b8   :  { %12089 = vmatprep.subr.bf16.mxu0 %v14954_v22 }
 0x7bb   :  { %12090 = vmatpush1.bf16.msra.mxu0 %v14952_v0  ;;  %v14988_v0 = vld [vmem:[%s15821_s8 + $0x38] sm:$0xff]  }
 0x7bc   :  { %12091 = vmatprep.subr.bf16.mxu0 %v14957_v10  ;;  %v11698_v10 = vld [vmem:[#allocation16] sm:$0x3] }
 0x7bf   :  { %12092 = vmatpush1.bf16.msra.mxu0 %v14955_v5  ;;  %v11703_v5 = vrot.slane %v11698_v10, %v15476_v9 }
 0x7c0   :  { %12093 = vmatprep.subr.bf16.mxu0 %v14960_v6  ;;  %v11707_v6 = vrot.slane %v11698_v10, %v15479_v13 }
 0x7c3   :  { %12094 = vmatpush1.bf16.msra.mxu0 %v14958_v1 }
 0x7c4   :  { %12095 = vmatprep.subr.bf16.mxu0 %v14963_v20 }
 0x7c7   :  { %12096 = vmatpush1.bf16.msra.mxu0 %v14961_v11 }
 0x7c8   :  { %12097 = vmatprep.subr.bf16.mxu0 %v14966_v57 }
 0x7cb   :  { %12098 = vmatpush1.bf16.msra.mxu0 %v14964_v31 }
 0x7cc   :  { %12099 = vmatprep.subr.bf16.mxu0 %v14969_v40 }
 0x7cf   :  { %12100 = vmatpush1.bf16.msra.mxu0 %v14967_v30 }
 0x7d0   :  { %12101 = vmatprep.subr.bf16.mxu0 %v14972_v38 }
 0x7d3   :  { %12102 = vmatpush1.bf16.msra.mxu0 %v14970_v59 }
 0x7dc   :  { %v11537_v60 = vpop.f32.mrb[44].mxu0 }
 0x7dd   :  { %v11414_v23 = vpop.f32.mrb[40].mxu1  ;;  %v11539_v19 = vpop.f32.mrb[45].mxu0 }
 0x7de   :  { %v11415_v35 = vadd.f32 %v11414_v23, %v11374_v58  ;;  %v11416_v14 = vpop.f32.mrb[41].mxu1  ;;  %v11541_v63 = vpop.f32.mrb[46].mxu0 }
 0x7df   :  { %v11417_v24 = vadd.f32 %v11416_v14, %v11376_v17  ;;  %v11418_v18 = vpop.f32.mrb[42].mxu1  ;;  %v11542_v25 = vpop.f32.mrb[47].mxu0 }
 0x7e0   :  { %v11419_v44 = vpop.f32.mrb[43].mxu1  ;;  %v11456_v27 = vadd.f32 %v15737_v2, %v11415_v35  ;;  %v14976_v2 = vld [vmem:[%s15821_s8 + $0x8] sm:$0xff]  }
 0x7e1   :  { %v11458_v33 = vadd.f32 %v15739_v49, %v11417_v24  ;;  %13956 = vmatpush3.bf16.msra.mxu1 %v14976_v2  ;;  %v14978_v49 = vld [vmem:[%s15821_s8 + $0x10] sm:$0xff]   ;;  %s15246_s8 = smov [#allocation19]  }
 0x7e2   :  { %13957 = vmatprep.subr.bf16.mxu1 %v14977_v3  ;;  %v13924_v24 = vld [vmem:[#allocation18] ss:$0 sm:$0xff]  ;;  %s12299_s13 = sshll.u32 %s15246_s8, 4  ;;  %s12300_s13 = int_to_ptr.vmem [resolvable:$true] %s12299_s13 }
 0x7e3   :  { %s15197_s15 = scalar_lea.vmem %s12300_s13, 128  ;;  %p15202_p3 = scmp.lt.s32.totalorder %s12300_s13, %s12300_s13 }
 0x7e4   :  { %p15198_p2 = scmp.ne.s32.totalorder %s12300_s13, %s15197_s15  ;;  %p15203_p4 = scmp.lt.s32.totalorder %s15197_s15, %s15197_s15 }
 0x7e5   :  { %13958 = vmatpush3.bf16.msra.mxu1 %v14978_v49 }
 0x7e6   :  { %13959 = vmatprep.subr.bf16.mxu1 %v14979_v41  ;;  %p15204_p5 = por %p15203_p4, %p15202_p3 }
 0x7e8   :  { %p15205_p6 = pnand %p15204_p5, %p15198_p2 }
 0x7e9   :  { %13960 = vmatpush3.bf16.msra.mxu1 %v14980_v8 }
 0x7ea   :  { %13961 = vmatprep.subr.bf16.mxu1 %v14981_v46 }
 0x7ed   :  { %13962 = vmatpush3.bf16.msra.mxu1 %v14982_v50 }
 0x7ee   :  { %13963 = vmatprep.subr.bf16.mxu1 %v14983_v26 }
 0x7f1   :  { %13964 = vmatpush3.bf16.msra.mxu1 %v14984_v28 }
 0x7f2   :  { %13965 = vmatprep.subr.bf16.mxu1 %v14985_v29 }
 0x7f5   :  { %13966 = vmatpush3.bf16.msra.mxu1 %v14986_v48 }
 0x7f6   :  { %13967 = vmatprep.subr.bf16.mxu1 %v14987_v62 }
 0x7f9   :  { %13968 = vmatpush3.bf16.msra.mxu1 %v14988_v0 }
 0x81d   :  { %v11496_v51 = vpop.f32.mrb[44].mxu1 }
 0x81e   :  { %v11497_v58 = vadd.f32 %v11496_v51, %v11456_v27  ;;  %v11498_v53 = vpop.f32.mrb[45].mxu1 }
 0x81f   :  { %v11499_v61 = vadd.f32 %v11498_v53, %v11458_v33  ;;  %v11500_v17 = vpop.f32.mrb[46].mxu1 }
 0x820   :  { %v11501_v54 = vpop.f32.mrb[47].mxu1  ;;  %v11538_v47 = vadd.f32 %v11537_v60, %v11497_v58 }
 0x821   :  { %v11540_v34 = vadd.f32 %v11539_v19, %v11499_v61 }
 0x85d   :  { %v11578_v56 = vpop.f32.mrb[48].mxu1 }
 0x85e   :  { %v11579_v45 = vadd.f32 %v11578_v56, %v11538_v47  ;;  %v11580_v37 = vpop.f32.mrb[49].mxu1 }
 0x85f   :  { %v11581_v32 = vadd.f32 %v11580_v37, %v11540_v34  ;;  %v11582_v52 = vpop.f32.mrb[50].mxu1 }
 0x860   :  { %v11624_v4 = vadd.f32 %v11613_v55, %v11579_v45  ;;  %v11583_v7 = vpop.f32.mrb[51].mxu1 }
 0x861   :  { %v11625_v36 = vadd.f32 %v11617_v16, %v11581_v32 }
 0x862   :  { %v11628_v42 = vmax.f32 %v11624_v4, 0.0 }
 0x863   :  { %v11629_v12 = vmax.f32 %v11625_v36, 0.0 }
 0x864   :  { %v11632_v22 = vpack.c.bf16 %v11628_v42, %v11628_v42 }
 0x865   :  { %v11633_v21 = vpack.c.bf16 %v11629_v12, %v11629_v12 }
 0x867   :  { %12103 = vmatprep.mubr.bf16.mxu0 %v11633_v21 }
 0x868   :  { %12104 = vmatmul.mubr.bf16.vlgmr.msra.gmra.mrb[48].mxu0 %v11632_v22 }
 0x93b   :  { %v12105_v1 = vpop.f32.mrb[48].mxu0 }
 0x93c   :  { %v13993_v20 = vadd.f32 %v12105_v1, %v11703_v5  ;;  %v12107_v11 = vpop.f32.mrb[49].mxu0 }
 0x93d   :  { %v13994_v57 = vadd.f32 %v12107_v11, %v11707_v6  ;;  %v12109_v31 = vpop.f32.mrb[50].mxu0 }
 0x93e   :  { %v12112_v60 = vmax.f32 %v13993_v20, 0.0  ;;  %v12110_v23 = vpop.f32.mrb[51].mxu0 }
 0x93f   :  { %v12113_v19 = vmax.f32 %v13994_v57, 0.0 }
 0x940   :  { %v12114_v14 = vpack.c.bf16 %v12112_v60, %v12112_v60 }
 0x941   :  { %v12115_v35 = vpack.c.bf16 %v12113_v19, %v12113_v19 }
 0x943   :  { %12283 = vmatprep.mubr.bf16.mxu1 %v12115_v35 }
 0x944   :  { %12284 = vmatmul.mubr.bf16.vlgmr.msra.gmra.mrb[52].mxu1 %v12114_v14 }
 0xa17   :  { %v13969_v63 = vpop.f32.mrb[52].mxu1 }
 0xa18   :  { %v13970_v18 = vpop.f32.mrb[53].mxu1 }
 0xa19   :  { %v13971_v9 = vadd.f32 %v13970_v18, %v13969_v63  ;;  %v13972_v25 = vpop.f32.mrb[54].mxu1 }
 0xa1a   :  { %v13973_v13 = vpop.f32.mrb[55].mxu1 }
 0xa1b   :  { %v12286_v40 = vadd.f32 %v13971_v9, %v13924_v24 }
 0xa1d   :  { %12292 = vst.msk [vmem:[#allocation19] sm:$0xff] %vm12291_vm0, %v12286_v40 }
 0xa1e   :  { %15208 = shalt.err (!%p15205_p6)
}
 0xa1f   :  { %s15209_s0 = scalar_lea.hbm %s15823_s10, 128 }
 0xa20   :  { %p15210_p7 = scmp.ne.s32.totalorder %s15823_s10, %s15209_s0  ;;  %p15213_p8 = scmp.lt.u32.totalorder %s15209_s0, %s15823_s10 }
 0xa22   :  { %p15215_p9 = pnand %p15213_p8, %p15210_p7 }
 0xa24   :  { %15218 = shalt.err (!%p15215_p9)
}
 0xa25   :  { %12302 = dma.vmem_to_hbm [thread:$0]  %s12300_s13, 128, %s15823_s10, [#allocation6]  }
 0xa26   :  { %15229 = dma.done.wait [#allocation6], 128  }
 0xa27   :  { %15230 = vsyncadd [#allocation6], 4294967168 }
 0xa28   :  { %12306 = vsyncpa [#allocation5], 1 }
 0xa29   :  { %12307 = vsyncpa [#allocation8], 1 }
 0xa2a   :  { %12308 = vsyncpa [#allocation11], 1 }
 0xa2b   :  { %12309 = vsyncpa [#allocation14], 1 }
 0xa2c   :  { %12310 = vsyncpa [#allocation17], 1 }
 0xa2d   :  { %12311 = vsyncpa [#allocation6], 1 }

</bundles_post_ra>
